<compile_context>
chip_gen: v7x
topology: tpu7x:2x2x1
jax: 0.10.0
libtpu: 0.0.40
codegen_flags: <defaults>
</compile_context>

<pallas_src>
import math

import jax
import jax.numpy as jnp
from jax import lax
from jax.experimental import pallas as pl
from jax.experimental.pallas import tpu as pltpu

f32 = jnp.float32
bf16 = jnp.bfloat16


# ------------------------------------------------------------------ fused kernel
def _make_hlt_kernel(B, M, N, D, H, V, nhead, num_layers):
    BM = B * M
    NBM = N * BM
    hd = D // nhead
    scale = 1.0 / math.sqrt(hd)
    G4 = 4 * H          # per-direction fused gate width
    G8 = 8 * H

    def layer_norm(x, g, b):
        mu = jnp.mean(x, axis=-1, keepdims=True)
        var = jnp.mean(jnp.square(x - mu), axis=-1, keepdims=True)
        return (x - mu) * lax.rsqrt(var + 1e-5) * g + b

    def kernel(ids_ref, valid_ref,
               tab0_ref, wih_ref, bih_ref, whh_ref,
               pw_ref, pb_ref,
               posb_ref, bias_ref, pool_ref,
               g0_ref, be0_ref,
               wqkv_ref, bqkv_ref, wo_ref, bo_ref,
               g1_ref, be1_ref,
               w1_ref, bf1_ref, w2_ref, bf2_ref,
               g2_ref, be2_ref,
               wc_ref, bc_ref,
               out_ref,
               outf_ref, outb_ref, pref_ref, preb_ref):

        # -------- embedding folded into layer-0 W_ih: single one-hot matmul ----
        ids = ids_ref[...]                                         # (NBM, 1) int32
        iota = lax.broadcasted_iota(jnp.int32, (NBM, V), 1)
        onehot = (iota == ids).astype(bf16)                        # (NBM, V) bf16

        def precompute(l):
            # hoisted x @ W_ih (+ bias) for both directions of layer l, written
            # once into VMEM scratch so the serial recurrence only loads slabs.
            if l == 0:
                pre = jnp.dot(onehot, tab0_ref[...],
                              preferred_element_type=f32)          # bias folded in table
            else:
                w = wih_ref[l - 1]                                  # (2H, 8H) bf16
                pre = (jnp.dot(outf_ref[...].astype(bf16), w[0:H, :],
                               preferred_element_type=f32)
                       + jnp.dot(outb_ref[...].astype(bf16), w[H:2 * H, :],
                                 preferred_element_type=f32)
                       + bih_ref[l - 1])
            pref_ref[...] = pre[:, 0:G4]                            # fwd pre (NBM, 4H)
            preb_ref[...] = pre[:, G4:G8]                           # bwd pre (NBM, 4H)

        def cell(pre_ref, wh, h, c, t):
            m = valid_ref[pl.ds(t * BM, BM), :]                     # (BM, 1), 1 = valid
            # ONE gate-fused matmul per direction per step (f32 on critical path)
            gates = (pre_ref[pl.ds(t * BM, BM), :]
                     + jnp.dot(h, wh, preferred_element_type=f32))  # (BM, 4H)
            ig = jax.nn.sigmoid(gates[:, 0:H])                      # torch order i,f,g,o
            fg = jax.nn.sigmoid(gates[:, H:2 * H])
            gv = jnp.tanh(gates[:, 2 * H:3 * H])
            og = jax.nn.sigmoid(gates[:, 3 * H:4 * H])
            c_new = fg * c + ig * gv
            h_new = og * jnp.tanh(c_new)
            return (m * h_new + (1.0 - m) * h,
                    m * c_new + (1.0 - m) * c, m)

        f_last = b_last = None
        for l in range(num_layers):
            last = (l == num_layers - 1)
            precompute(l)
            whf = whh_ref[2 * l]                                    # (H, 4H) f32
            whb = whh_ref[2 * l + 1]
            hf = jnp.zeros((BM, H), f32)
            cf = jnp.zeros((BM, H), f32)
            hb = jnp.zeros((BM, H), f32)
            cb = jnp.zeros((BM, H), f32)
            blast = jnp.zeros((BM, H), f32)
            seen = jnp.zeros((BM, 1), f32)
            # fully unrolled time loop (N static): all slice starts static.
            for i in range(N):
                tf, tb = i, N - 1 - i
                hf, cf, mf = cell(pref_ref, whf, hf, cf, tf)
                hb, cb, mb = cell(preb_ref, whb, hb, cb, tb)
                if not last:                                        # next layer's input
                    outf_ref[pl.ds(tf * BM, BM), :] = hf * mf
                    outb_ref[pl.ds(tb * BM, BM), :] = hb * mb
                else:                                               # bwd hidden @ last valid t
                    first = mb * (1.0 - seen)
                    blast = blast + first * hb
                    seen = jnp.maximum(seen, mb)
            f_last, b_last = hf, blast

        # -------- tanh projection (split halves, no lane concat) ---------------
        pw = pw_ref[...]                                            # (2H, D) f32
        stmt = jnp.tanh(jnp.dot(f_last, pw[0:H, :], preferred_element_type=f32)
                        + jnp.dot(b_last, pw[H:2 * H, :], preferred_element_type=f32)
                        + pb_ref[...])                              # (BM, D)

        # -------- transformer encoder layer, flattened over B*M ----------------
        x0 = layer_norm(stmt + posb_ref[...], g0_ref[...], be0_ref[...])   # (BM, D)

        # fused QKV projection: one (BM, D) @ (D, 3D) bf16 matmul
        qkv = (jnp.dot(x0.astype(bf16), wqkv_ref[...], preferred_element_type=f32)
               + bqkv_ref[...])                                     # (BM, 3D)
        bias = bias_ref[...]                                        # (BM, BM) additive mask
        ctxs = []
        for hn in range(nhead):
            qh = qkv[:, hn * hd:(hn + 1) * hd]
            kh = qkv[:, D + hn * hd: D + (hn + 1) * hd]
            vh = qkv[:, 2 * D + hn * hd: 2 * D + (hn + 1) * hd]
            s = lax.dot_general(qh, kh, (((1,), (1,)), ((), ())),
                                preferred_element_type=f32) * scale + bias
            e = jnp.exp(s - jnp.max(s, axis=-1, keepdims=True))
            p = e / jnp.sum(e, axis=-1, keepdims=True)              # exact (parity)
            ctxs.append(jnp.dot(p, vh, preferred_element_type=f32))
        ctx = jnp.concatenate(ctxs, axis=1)                         # lane-pack heads (BM, D)
        attn = (jnp.dot(ctx.astype(bf16), wo_ref[...], preferred_element_type=f32)
                + bo_ref[...])                                      # single out-proj

        x1 = layer_norm(x0 + attn, g1_ref[...], be1_ref[...])
        hmid = jnp.maximum(
            jnp.dot(x1.astype(bf16), w1_ref[...], preferred_element_type=f32)
            + bf1_ref[...], 0.0)
        ffo = (jnp.dot(hmid.astype(bf16), w2_ref[...], preferred_element_type=f32)
               + bf2_ref[...])
        x2 = layer_norm(x1 + ffo, g2_ref[...], be2_ref[...])

        # -------- masked mean pool + classifier (single store) -----------------
        pooled = jnp.dot(pool_ref[...], x2, preferred_element_type=f32)    # (B, D)
        out_ref[...] = (jnp.dot(pooled, wc_ref[...], preferred_element_type=f32)
                        + bc_ref[...])                                     # (B, 2)

    return kernel


# ----------------------------------------------------------------------- wrapper
def hlt_forward(params, token_ids, token_mask, statement_mask, *, nhead=6):
    B, M, N = token_ids.shape
    V = params["emb_table0"].shape[0]
    D = params["pos_table"].shape[1]
    H = D // 2
    num_layers = params["lstm_whh"].shape[0] // 2
    BM = B * M
    NBM = N * BM

    # time-major token ids / validity (1.0 = real token); row index = t*BM + b*M + m
    ids_tm = jnp.transpose(token_ids.astype(jnp.int32).reshape(BM, N),
                           (1, 0)).reshape(NBM, 1)
    valid_tm = jnp.transpose((~token_mask).astype(jnp.float32).reshape(BM, N),
                             (1, 0)).reshape(NBM, 1)

    # positional table tiled over the flattened (B*M) statement axis
    posb = jnp.tile(params["pos_table"][:M], (B, 1))                       # (BM, D)

    # block-diagonal additive attention mask: query b*M+i may attend key b*M+j
    # iff same batch and statement_mask[b, j] (src_key_padding_mask semantics).
    keep = statement_mask.astype(jnp.float32)                              # (B, M)
    same = jnp.repeat(jnp.repeat(jnp.eye(B, dtype=jnp.float32), M, axis=0), M, axis=1)
    attn_bias = (1.0 - same * keep.reshape(1, BM)) * (-1e30)               # (BM, BM)

    # pooling selection matrix: literal reference pooling over statement_mask == False
    pool = (~statement_mask).astype(jnp.float32)                           # (B, M)
    cnt = jnp.maximum(jnp.sum(pool, axis=1, keepdims=True), 1.0)           # clamp(min=1)
    pool_sel = (jnp.repeat(jnp.eye(B, dtype=jnp.float32), M, axis=1)
                * jnp.tile(pool / cnt, (1, B)))                            # (B, BM)

    kernel = _make_hlt_kernel(B, M, N, D, H, V, nhead, num_layers)
    args = (ids_tm, valid_tm,
            params["emb_table0"], params["lstm_wih"], params["lstm_bih"],
            params["lstm_whh"],
            params["proj_w"], params["proj_b"],
            posb, attn_bias, pool_sel,
            params["ln0_g"], params["ln0_b"],
            params["wqkv"], params["bqkv"], params["wo"], params["bo"],
            params["ln1_g"], params["ln1_b"],
            params["w1"], params["b1"], params["w2"], params["b2"],
            params["ln2_g"], params["ln2_b"],
            params["wc"], params["bc"])
    return pl.pallas_call(
        kernel,
        out_shape=jax.ShapeDtypeStruct((B, 2), jnp.float32),
        scratch_shapes=[pltpu.VMEM((NBM, H), jnp.float32),        # layer-output fwd
                        pltpu.VMEM((NBM, H), jnp.float32),        # layer-output bwd
                        pltpu.VMEM((NBM, 4 * H), jnp.float32),    # hoisted pre fwd (gate-fused)
                        pltpu.VMEM((NBM, 4 * H), jnp.float32)],   # hoisted pre bwd (gate-fused)
    )(*args)


# -------------------------------------------------------------------- parameters
def init_params(key, vocab_size, d, num_layers, nhead, dff):
    assert d % 2 == 0 and d % nhead == 0
    H = d // 2
    keys = iter(jax.random.split(key, 64))

    def u(shape, fan_in):
        k = 1.0 / math.sqrt(fan_in)
        return jax.random.uniform(next(keys), shape, jnp.float32, -k, k)

    params = {}
    emb = jax.random.normal(next(keys), (vocab_size, d), jnp.float32) * 0.1
    emb = emb.at[0].set(0.0)                                       # padding_idx=0

    # raw per-(layer, direction) LSTM weights (x @ W form, torch gate order i,f,g,o),
    # combined b_ih + b_hh biases; U(-1/sqrt(H), 1/sqrt(H)) like torch.
    wih, bih, whh = [], [], []
    for l in range(num_layers):
        din = d if l == 0 else 2 * H
        for _ in range(2):                                         # fwd, bwd
            wih.append(u((din, 4 * H), H))
            bih.append(u((1, 4 * H), H))
            whh.append(u((H, 4 * H), H))

    # layer 0: embedding + bias folded into one fused (V, 8H) bf16 table
    params["emb_table0"] = jnp.concatenate(
        [emb @ wih[0] + bih[0], emb @ wih[1] + bih[1]], axis=1).astype(bf16)
    # layers >= 1: [fwd | bwd] W_ih lane-concatenated, bf16 operands, f32 bias
    rest_w, rest_b = [], []
    for l in range(1, num_layers):
        rest_w.append(jnp.concatenate([wih[2 * l], wih[2 * l + 1]], axis=1))
        rest_b.append(jnp.concatenate([bih[2 * l], bih[2 * l + 1]], axis=1))
    if not rest_w:                                                 # keep signature uniform
        rest_w = [jnp.zeros((2 * H, 8 * H), jnp.float32)]
        rest_b = [jnp.zeros((1, 8 * H), jnp.float32)]
    params["lstm_wih"] = jnp.stack(rest_w).astype(bf16)            # (L-1, 2H, 8H)
    params["lstm_bih"] = jnp.stack(rest_b)                         # (L-1, 1, 8H)
    # gate-fused recurrent weights, one (H, 4H) tile per (layer, direction)
    params["lstm_whh"] = jnp.stack(whh)                            # (2L, H, 4H) f32

    # TODO(synk): reference declares nn.Linear(2*embedding_dim, embedding_dim) for the
    # projection but feeds it an embedding_dim-wide tensor (shape mismatch in torch);
    # implemented as Linear(embedding_dim, embedding_dim).
    params["proj_w"] = u((d, d), d)                                # rows: [fwd H | bwd H]
    params["proj_b"] = u((1, d), d)

    params["pos_table"] = jax.random.normal(next(keys), (30, d), jnp.float32) * 0.1
    for name in ("ln0", "ln1", "ln2"):
        params[name + "_g"] = 1.0 + 0.05 * jax.random.normal(next(keys), (1, d), jnp.float32)
        params[name + "_b"] = 0.05 * jax.random.normal(next(keys), (1, d), jnp.float32)

    # fused attention projections: lanes = [Q(all heads) | K(all heads) | V(all heads)]
    params["wqkv"] = u((d, 3 * d), d).astype(bf16)
    params["bqkv"] = u((1, 3 * d), d)
    params["wo"] = u((d, d), d).astype(bf16)                       # rows head-major
    params["bo"] = u((1, d), d)

    params["w1"] = u((d, dff), d).astype(bf16)
    params["b1"] = u((1, dff), d)
    params["w2"] = u((dff, d), dff).astype(bf16)
    params["b2"] = u((1, d), dff)
    params["wc"] = u((d, 2), d)
    params["bc"] = u((1, 2), d)
    return params


# ------------------------------------------------------------------------- driver
if __name__ == "__main__":
    B, M, N = 2, 4, 8
    # TODO(synk): reference default d_model=128 is not divisible by nhead=6; use
    # embedding_dim=48 (divisible by 6) so multi-head attention is well defined.
    vocab_size, d, num_layers, nhead, dff = 50, 48, 2, 6, 512

    key = jax.random.PRNGKey(0)
    kp, kid, klen = jax.random.split(key, 3)
    params = init_params(kp, vocab_size, d, num_layers, nhead, dff)

    token_ids = jax.random.randint(kid, (B, M, N), 1, vocab_size)
    lengths = jax.random.randint(klen, (B, M), 3, N + 1)               # >= 1 valid token
    token_mask = jnp.arange(N)[None, None, :] >= lengths[:, :, None]   # True = padding
    token_ids = jnp.where(token_mask, 0, token_ids)
    statement_mask = jnp.array([[True, True, True, False],
                                [True, True, False, False]])

    fwd = jax.jit(hlt_forward)
    out = jax.block_until_ready(fwd(params, token_ids, token_mask, statement_mask))
    assert out.shape == (B, 2) and out.dtype == jnp.float32
    assert bool(jnp.all(jnp.isfinite(out)))
    print("KERNEL_OK")
</pallas_src>

<mosaic_0001>
module attributes {stable_mosaic.version = 11 : i64} {
  func.func @kernel(%arg0: memref<64x1xi32, #tpu.memory_space<vmem>>, %arg1: memref<64x1xf32, #tpu.memory_space<vmem>>, %arg2: memref<50x192xbf16, #tpu.memory_space<vmem>>, %arg3: memref<1x48x192xbf16, #tpu.memory_space<vmem>>, %arg4: memref<1x1x192xf32, #tpu.memory_space<vmem>>, %arg5: memref<4x24x96xf32, #tpu.memory_space<vmem>>, %arg6: memref<48x48xf32, #tpu.memory_space<vmem>>, %arg7: memref<1x48xf32, #tpu.memory_space<vmem>>, %arg8: memref<8x48xf32, #tpu.memory_space<vmem>>, %arg9: memref<8x8xf32, #tpu.memory_space<vmem>>, %arg10: memref<2x8xf32, #tpu.memory_space<vmem>>, %arg11: memref<1x48xf32, #tpu.memory_space<vmem>>, %arg12: memref<1x48xf32, #tpu.memory_space<vmem>>, %arg13: memref<48x144xbf16, #tpu.memory_space<vmem>>, %arg14: memref<1x144xf32, #tpu.memory_space<vmem>>, %arg15: memref<48x48xbf16, #tpu.memory_space<vmem>>, %arg16: memref<1x48xf32, #tpu.memory_space<vmem>>, %arg17: memref<1x48xf32, #tpu.memory_space<vmem>>, %arg18: memref<1x48xf32, #tpu.memory_space<vmem>>, %arg19: memref<48x512xbf16, #tpu.memory_space<vmem>>, %arg20: memref<1x512xf32, #tpu.memory_space<vmem>>, %arg21: memref<512x48xbf16, #tpu.memory_space<vmem>>, %arg22: memref<1x48xf32, #tpu.memory_space<vmem>>, %arg23: memref<1x48xf32, #tpu.memory_space<vmem>>, %arg24: memref<1x48xf32, #tpu.memory_space<vmem>>, %arg25: memref<48x2xf32, #tpu.memory_space<vmem>>, %arg26: memref<1x2xf32, #tpu.memory_space<vmem>>, %arg27: memref<2x2xf32, #tpu.memory_space<vmem>>, %arg28: memref<64x24xf32, #tpu.memory_space<vmem>>, %arg29: memref<64x24xf32, #tpu.memory_space<vmem>>, %arg30: memref<64x96xf32, #tpu.memory_space<vmem>>, %arg31: memref<64x96xf32, #tpu.memory_space<vmem>>) attributes {dimension_semantics = [], scalar_prefetch = 0 : i64, scratch_operands = 4 : i64, tpu.core_type = #tpu.core_type<tc>} {
    %c0 = arith.constant 0 : index
    %c0_0 = arith.constant 0 : index
    %0 = vector.load %arg0[%c0, %c0_0] : memref<64x1xi32, #tpu.memory_space<vmem>>, vector<64x1xi32>
    %1 = tpu.iota {dimensions = array<i32: 1>} : vector<64x50xi32>
    %2 = vector.broadcast %0 : vector<64x1xi32> to vector<64x50xi32>
    %3 = arith.cmpi eq, %1, %2 : vector<64x50xi32>
    %4 = arith.extui %3 : vector<64x50xi1> to vector<64x50xi32>
    %5 = arith.sitofp %4 : vector<64x50xi32> to vector<64x50xf32>
    %6 = arith.truncf %5 : vector<64x50xf32> to vector<64x50xbf16>
    %c0_1 = arith.constant 0 : index
    %c0_2 = arith.constant 0 : index
    %7 = vector.load %arg2[%c0_1, %c0_2] : memref<50x192xbf16, #tpu.memory_space<vmem>>, vector<50x192xbf16>
    %cst = arith.constant dense<0.000000e+00> : vector<64x192xf32>
    %8 = tpu.matmul %6, %7, %cst {dimension_numbers = #tpu.dot_dimension_numbers<[1], [0], [0], [1], [0, 0, 1, 1], [], []>} : vector<64x50xbf16>, vector<50x192xbf16>, vector<64x192xf32> -> vector<64x192xf32>
    %9 = vector.extract_strided_slice %8 {offsets = [0, 0], sizes = [64, 96], strides = [1, 1]} : vector<64x192xf32> to vector<64x96xf32>
    %c0_3 = arith.constant 0 : index
    %c0_4 = arith.constant 0 : index
    %10 = vector.load %arg30[%c0_3, %c0_4] : memref<64x96xf32, #tpu.memory_space<vmem>>, vector<64x96xf32>
    tpu.vector_store %arg30[%c0_3, %c0_4], %9 {strides = array<i32>} : memref<64x96xf32, #tpu.memory_space<vmem>>, vector<64x96xf32>,
    %11 = vector.extract_strided_slice %8 {offsets = [0, 96], sizes = [64, 96], strides = [1, 1]} : vector<64x192xf32> to vector<64x96xf32>
    %c0_5 = arith.constant 0 : index
    %c0_6 = arith.constant 0 : index
    %12 = vector.load %arg31[%c0_5, %c0_6] : memref<64x96xf32, #tpu.memory_space<vmem>>, vector<64x96xf32>
    tpu.vector_store %arg31[%c0_5, %c0_6], %11 {strides = array<i32>} : memref<64x96xf32, #tpu.memory_space<vmem>>, vector<64x96xf32>,
    %c0_7 = arith.constant 0 : index
    %c0_8 = arith.constant 0 : index
    %c0_9 = arith.constant 0 : index
    %13 = vector.load %arg5[%c0_7, %c0_8, %c0_9] : memref<4x24x96xf32, #tpu.memory_space<vmem>>, vector<1x24x96xf32>
    %14 = vector.shape_cast %13 : vector<1x24x96xf32> to vector<24x96xf32>
    %c1 = arith.constant 1 : index
    %c0_10 = arith.constant 0 : index
    %c0_11 = arith.constant 0 : index
    %15 = vector.load %arg5[%c1, %c0_10, %c0_11] : memref<4x24x96xf32, #tpu.memory_space<vmem>>, vector<1x24x96xf32>
    %16 = vector.shape_cast %15 : vector<1x24x96xf32> to vector<24x96xf32>
    %cst_12 = arith.constant 0.000000e+00 : f32
    %17 = vector.broadcast %cst_12 : f32 to vector<8x24xf32>
    %cst_13 = arith.constant 0.000000e+00 : f32
    %18 = vector.broadcast %cst_13 : f32 to vector<8x24xf32>
    %cst_14 = arith.constant 0.000000e+00 : f32
    %19 = vector.broadcast %cst_14 : f32 to vector<8x24xf32>
    %cst_15 = arith.constant 0.000000e+00 : f32
    %20 = vector.broadcast %cst_15 : f32 to vector<8x24xf32>
    %c0_16 = arith.constant 0 : index
    %c0_17 = arith.constant 0 : index
    %21 = vector.load %arg1[%c0_16, %c0_17] : memref<64x1xf32, #tpu.memory_space<vmem>>, vector<8x1xf32>
    %c0_18 = arith.constant 0 : index
    %c0_19 = arith.constant 0 : index
    %22 = vector.load %arg30[%c0_18, %c0_19] : memref<64x96xf32, #tpu.memory_space<vmem>>, vector<8x96xf32>
    %cst_20 = arith.constant dense<0.000000e+00> : vector<8x96xf32>
    %23 = tpu.matmul %17, %14, %cst_20 {dimension_numbers = #tpu.dot_dimension_numbers<[1], [0], [0], [1], [0, 0, 1, 1], [], []>} : vector<8x24xf32>, vector<24x96xf32>, vector<8x96xf32> -> vector<8x96xf32>
    %24 = arith.addf %22, %23 : vector<8x96xf32>
    %25 = vector.extract_strided_slice %24 {offsets = [0, 0], sizes = [8, 24], strides = [1, 1]} : vector<8x96xf32> to vector<8x24xf32>
    %26 = arith.negf %25 : vector<8x24xf32>
    %27 = math.exp %26 : vector<8x24xf32>
    %cst_21 = arith.constant 1.000000e+00 : f32
    %28 = vector.broadcast %cst_21 : f32 to vector<8x24xf32>
    %29 = arith.addf %28, %27 : vector<8x24xf32>
    %30 = arith.divf %28, %29 : vector<8x24xf32>
    %31 = vector.extract_strided_slice %24 {offsets = [0, 24], sizes = [8, 24], strides = [1, 1]} : vector<8x96xf32> to vector<8x24xf32>
    %32 = arith.negf %31 : vector<8x24xf32>
    %33 = math.exp %32 : vector<8x24xf32>
    %cst_22 = arith.constant 1.000000e+00 : f32
    %34 = vector.broadcast %cst_22 : f32 to vector<8x24xf32>
    %35 = arith.addf %34, %33 : vector<8x24xf32>
    %36 = arith.divf %34, %35 : vector<8x24xf32>
    %37 = vector.extract_strided_slice %24 {offsets = [0, 48], sizes = [8, 24], strides = [1, 1]} : vector<8x96xf32> to vector<8x24xf32>
    %38 = math.tanh %37 : vector<8x24xf32>
    %39 = vector.extract_strided_slice %24 {offsets = [0, 72], sizes = [8, 24], strides = [1, 1]} : vector<8x96xf32> to vector<8x24xf32>
    %40 = arith.negf %39 : vector<8x24xf32>
    %41 = math.exp %40 : vector<8x24xf32>
    %cst_23 = arith.constant 1.000000e+00 : f32
    %42 = vector.broadcast %cst_23 : f32 to vector<8x24xf32>
    %43 = arith.addf %42, %41 : vector<8x24xf32>
    %44 = arith.divf %42, %43 : vector<8x24xf32>
    %45 = arith.mulf %36, %18 : vector<8x24xf32>
    %46 = arith.mulf %30, %38 : vector<8x24xf32>
    %47 = arith.addf %45, %46 : vector<8x24xf32>
    %48 = math.tanh %47 : vector<8x24xf32>
    %49 = arith.mulf %44, %48 : vector<8x24xf32>
    %50 = vector.broadcast %21 : vector<8x1xf32> to vector<8x24xf32>
    %51 = arith.mulf %50, %49 : vector<8x24xf32>
    %cst_24 = arith.constant 1.000000e+00 : f32
    %52 = vector.broadcast %cst_24 : f32 to vector<8x1xf32>
    %53 = arith.subf %52, %21 : vector<8x1xf32>
    %54 = vector.broadcast %53 : vector<8x1xf32> to vector<8x24xf32>
    %55 = arith.mulf %54, %17 : vector<8x24xf32>
    %56 = arith.addf %51, %55 : vector<8x24xf32>
    %57 = vector.broadcast %21 : vector<8x1xf32> to vector<8x24xf32>
    %58 = arith.mulf %57, %47 : vector<8x24xf32>
    %cst_25 = arith.constant 1.000000e+00 : f32
    %59 = vector.broadcast %cst_25 : f32 to vector<8x1xf32>
    %60 = arith.subf %59, %21 : vector<8x1xf32>
    %61 = vector.broadcast %60 : vector<8x1xf32> to vector<8x24xf32>
    %62 = arith.mulf %61, %18 : vector<8x24xf32>
    %63 = arith.addf %58, %62 : vector<8x24xf32>
    %c56 = arith.constant 56 : index
    %c0_26 = arith.constant 0 : index
    %64 = vector.load %arg1[%c56, %c0_26] : memref<64x1xf32, #tpu.memory_space<vmem>>, vector<8x1xf32>
    %c56_27 = arith.constant 56 : index
    %c0_28 = arith.constant 0 : index
    %65 = vector.load %arg31[%c56_27, %c0_28] : memref<64x96xf32, #tpu.memory_space<vmem>>, vector<8x96xf32>
    %cst_29 = arith.constant dense<0.000000e+00> : vector<8x96xf32>
    %66 = tpu.matmul %19, %16, %cst_29 {dimension_numbers = #tpu.dot_dimension_numbers<[1], [0], [0], [1], [0, 0, 1, 1], [], []>} : vector<8x24xf32>, vector<24x96xf32>, vector<8x96xf32> -> vector<8x96xf32>
    %67 = arith.addf %65, %66 : vector<8x96xf32>
    %68 = vector.extract_strided_slice %67 {offsets = [0, 0], sizes = [8, 24], strides = [1, 1]} : vector<8x96xf32> to vector<8x24xf32>
    %69 = arith.negf %68 : vector<8x24xf32>
    %70 = math.exp %69 : vector<8x24xf32>
    %cst_30 = arith.constant 1.000000e+00 : f32
    %71 = vector.broadcast %cst_30 : f32 to vector<8x24xf32>
    %72 = arith.addf %71, %70 : vector<8x24xf32>
    %73 = arith.divf %71, %72 : vector<8x24xf32>
    %74 = vector.extract_strided_slice %67 {offsets = [0, 24], sizes = [8, 24], strides = [1, 1]} : vector<8x96xf32> to vector<8x24xf32>
    %75 = arith.negf %74 : vector<8x24xf32>
    %76 = math.exp %75 : vector<8x24xf32>
    %cst_31 = arith.constant 1.000000e+00 : f32
    %77 = vector.broadcast %cst_31 : f32 to vector<8x24xf32>
    %78 = arith.addf %77, %76 : vector<8x24xf32>
    %79 = arith.divf %77, %78 : vector<8x24xf32>
    %80 = vector.extract_strided_slice %67 {offsets = [0, 48], sizes = [8, 24], strides = [1, 1]} : vector<8x96xf32> to vector<8x24xf32>
    %81 = math.tanh %80 : vector<8x24xf32>
    %82 = vector.extract_strided_slice %67 {offsets = [0, 72], sizes = [8, 24], strides = [1, 1]} : vector<8x96xf32> to vector<8x24xf32>
    %83 = arith.negf %82 : vector<8x24xf32>
    %84 = math.exp %83 : vector<8x24xf32>
    %cst_32 = arith.constant 1.000000e+00 : f32
    %85 = vector.broadcast %cst_32 : f32 to vector<8x24xf32>
    %86 = arith.addf %85, %84 : vector<8x24xf32>
    %87 = arith.divf %85, %86 : vector<8x24xf32>
    %88 = arith.mulf %79, %20 : vector<8x24xf32>
    %89 = arith.mulf %73, %81 : vector<8x24xf32>
    %90 = arith.addf %88, %89 : vector<8x24xf32>
    %91 = math.tanh %90 : vector<8x24xf32>
    %92 = arith.mulf %87, %91 : vector<8x24xf32>
    %93 = vector.broadcast %64 : vector<8x1xf32> to vector<8x24xf32>
    %94 = arith.mulf %93, %92 : vector<8x24xf32>
    %cst_33 = arith.constant 1.000000e+00 : f32
    %95 = vector.broadcast %cst_33 : f32 to vector<8x1xf32>
    %96 = arith.subf %95, %64 : vector<8x1xf32>
    %97 = vector.broadcast %96 : vector<8x1xf32> to vector<8x24xf32>
    %98 = arith.mulf %97, %19 : vector<8x24xf32>
    %99 = arith.addf %94, %98 : vector<8x24xf32>
    %100 = vector.broadcast %64 : vector<8x1xf32> to vector<8x24xf32>
    %101 = arith.mulf %100, %90 : vector<8x24xf32>
    %cst_34 = arith.constant 1.000000e+00 : f32
    %102 = vector.broadcast %cst_34 : f32 to vector<8x1xf32>
    %103 = arith.subf %102, %64 : vector<8x1xf32>
    %104 = vector.broadcast %103 : vector<8x1xf32> to vector<8x24xf32>
    %105 = arith.mulf %104, %20 : vector<8x24xf32>
    %106 = arith.addf %101, %105 : vector<8x24xf32>
    %107 = vector.broadcast %21 : vector<8x1xf32> to vector<8x24xf32>
    %108 = arith.mulf %56, %107 : vector<8x24xf32>
    %c0_35 = arith.constant 0 : index
    %c0_36 = arith.constant 0 : index
    %109 = vector.load %arg28[%c0_35, %c0_36] : memref<64x24xf32, #tpu.memory_space<vmem>>, vector<8x24xf32>
    tpu.vector_store %arg28[%c0_35, %c0_36], %108 {strides = array<i32>} : memref<64x24xf32, #tpu.memory_space<vmem>>, vector<8x24xf32>,
    %110 = vector.broadcast %64 : vector<8x1xf32> to vector<8x24xf32>
    %111 = arith.mulf %99, %110 : vector<8x24xf32>
    %c56_37 = arith.constant 56 : index
    %c0_38 = arith.constant 0 : index
    %112 = vector.load %arg29[%c56_37, %c0_38] : memref<64x24xf32, #tpu.memory_space<vmem>>, vector<8x24xf32>
    tpu.vector_store %arg29[%c56_37, %c0_38], %111 {strides = array<i32>} : memref<64x24xf32, #tpu.memory_space<vmem>>, vector<8x24xf32>,
    %c8 = arith.constant 8 : index
    %c0_39 = arith.constant 0 : index
    %113 = vector.load %arg1[%c8, %c0_39] : memref<64x1xf32, #tpu.memory_space<vmem>>, vector<8x1xf32>
    %c8_40 = arith.constant 8 : index
    %c0_41 = arith.constant 0 : index
    %114 = vector.load %arg30[%c8_40, %c0_41] : memref<64x96xf32, #tpu.memory_space<vmem>>, vector<8x96xf32>
    %cst_42 = arith.constant dense<0.000000e+00> : vector<8x96xf32>
    %115 = tpu.matmul %56, %14, %cst_42 {dimension_numbers = #tpu.dot_dimension_numbers<[1], [0], [0], [1], [0, 0, 1, 1], [], []>} : vector<8x24xf32>, vector<24x96xf32>, vector<8x96xf32> -> vector<8x96xf32>
    %116 = arith.addf %114, %115 : vector<8x96xf32>
    %117 = vector.extract_strided_slice %116 {offsets = [0, 0], sizes = [8, 24], strides = [1, 1]} : vector<8x96xf32> to vector<8x24xf32>
    %118 = arith.negf %117 : vector<8x24xf32>
    %119 = math.exp %118 : vector<8x24xf32>
    %cst_43 = arith.constant 1.000000e+00 : f32
    %120 = vector.broadcast %cst_43 : f32 to vector<8x24xf32>
    %121 = arith.addf %120, %119 : vector<8x24xf32>
    %122 = arith.divf %120, %121 : vector<8x24xf32>
    %123 = vector.extract_strided_slice %116 {offsets = [0, 24], sizes = [8, 24], strides = [1, 1]} : vector<8x96xf32> to vector<8x24xf32>
    %124 = arith.negf %123 : vector<8x24xf32>
    %125 = math.exp %124 : vector<8x24xf32>
    %cst_44 = arith.constant 1.000000e+00 : f32
    %126 = vector.broadcast %cst_44 : f32 to vector<8x24xf32>
    %127 = arith.addf %126, %125 : vector<8x24xf32>
    %128 = arith.divf %126, %127 : vector<8x24xf32>
    %129 = vector.extract_strided_slice %116 {offsets = [0, 48], sizes = [8, 24], strides = [1, 1]} : vector<8x96xf32> to vector<8x24xf32>
    %130 = math.tanh %129 : vector<8x24xf32>
    %131 = vector.extract_strided_slice %116 {offsets = [0, 72], sizes = [8, 24], strides = [1, 1]} : vector<8x96xf32> to vector<8x24xf32>
    %132 = arith.negf %131 : vector<8x24xf32>
    %133 = math.exp %132 : vector<8x24xf32>
    %cst_45 = arith.constant 1.000000e+00 : f32
    %134 = vector.broadcast %cst_45 : f32 to vector<8x24xf32>
    %135 = arith.addf %134, %133 : vector<8x24xf32>
    %136 = arith.divf %134, %135 : vector<8x24xf32>
    %137 = arith.mulf %128, %63 : vector<8x24xf32>
    %138 = arith.mulf %122, %130 : vector<8x24xf32>
    %139 = arith.addf %137, %138 : vector<8x24xf32>
    %140 = math.tanh %139 : vector<8x24xf32>
    %141 = arith.mulf %136, %140 : vector<8x24xf32>
    %142 = vector.broadcast %113 : vector<8x1xf32> to vector<8x24xf32>
    %143 = arith.mulf %142, %141 : vector<8x24xf32>
    %cst_46 = arith.constant 1.000000e+00 : f32
    %144 = vector.broadcast %cst_46 : f32 to vector<8x1xf32>
    %145 = arith.subf %144, %113 : vector<8x1xf32>
    %146 = vector.broadcast %145 : vector<8x1xf32> to vector<8x24xf32>
    %147 = arith.mulf %146, %56 : vector<8x24xf32>
    %148 = arith.addf %143, %147 : vector<8x24xf32>
    %149 = vector.broadcast %113 : vector<8x1xf32> to vector<8x24xf32>
    %150 = arith.mulf %149, %139 : vector<8x24xf32>
    %cst_47 = arith.constant 1.000000e+00 : f32
    %151 = vector.broadcast %cst_47 : f32 to vector<8x1xf32>
    %152 = arith.subf %151, %113 : vector<8x1xf32>
    %153 = vector.broadcast %152 : vector<8x1xf32> to vector<8x24xf32>
    %154 = arith.mulf %153, %63 : vector<8x24xf32>
    %155 = arith.addf %150, %154 : vector<8x24xf32>
    %c48 = arith.constant 48 : index
    %c0_48 = arith.constant 0 : index
    %156 = vector.load %arg1[%c48, %c0_48] : memref<64x1xf32, #tpu.memory_space<vmem>>, vector<8x1xf32>
    %c48_49 = arith.constant 48 : index
    %c0_50 = arith.constant 0 : index
    %157 = vector.load %arg31[%c48_49, %c0_50] : memref<64x96xf32, #tpu.memory_space<vmem>>, vector<8x96xf32>
    %cst_51 = arith.constant dense<0.000000e+00> : vector<8x96xf32>
    %158 = tpu.matmul %99, %16, %cst_51 {dimension_numbers = #tpu.dot_dimension_numbers<[1], [0], [0], [1], [0, 0, 1, 1], [], []>} : vector<8x24xf32>, vector<24x96xf32>, vector<8x96xf32> -> vector<8x96xf32>
    %159 = arith.addf %157, %158 : vector<8x96xf32>
    %160 = vector.extract_strided_slice %159 {offsets = [0, 0], sizes = [8, 24], strides = [1, 1]} : vector<8x96xf32> to vector<8x24xf32>
    %161 = arith.negf %160 : vector<8x24xf32>
    %162 = math.exp %161 : vector<8x24xf32>
    %cst_52 = arith.constant 1.000000e+00 : f32
    %163 = vector.broadcast %cst_52 : f32 to vector<8x24xf32>
    %164 = arith.addf %163, %162 : vector<8x24xf32>
    %165 = arith.divf %163, %164 : vector<8x24xf32>
    %166 = vector.extract_strided_slice %159 {offsets = [0, 24], sizes = [8, 24], strides = [1, 1]} : vector<8x96xf32> to vector<8x24xf32>
    %167 = arith.negf %166 : vector<8x24xf32>
    %168 = math.exp %167 : vector<8x24xf32>
    %cst_53 = arith.constant 1.000000e+00 : f32
    %169 = vector.broadcast %cst_53 : f32 to vector<8x24xf32>
    %170 = arith.addf %169, %168 : vector<8x24xf32>
    %171 = arith.divf %169, %170 : vector<8x24xf32>
    %172 = vector.extract_strided_slice %159 {offsets = [0, 48], sizes = [8, 24], strides = [1, 1]} : vector<8x96xf32> to vector<8x24xf32>
    %173 = math.tanh %172 : vector<8x24xf32>
    %174 = vector.extract_strided_slice %159 {offsets = [0, 72], sizes = [8, 24], strides = [1, 1]} : vector<8x96xf32> to vector<8x24xf32>
    %175 = arith.negf %174 : vector<8x24xf32>
    %176 = math.exp %175 : vector<8x24xf32>
    %cst_54 = arith.constant 1.000000e+00 : f32
    %177 = vector.broadcast %cst_54 : f32 to vector<8x24xf32>
    %178 = arith.addf %177, %176 : vector<8x24xf32>
    %179 = arith.divf %177, %178 : vector<8x24xf32>
    %180 = arith.mulf %171, %106 : vector<8x24xf32>
    %181 = arith.mulf %165, %173 : vector<8x24xf32>
    %182 = arith.addf %180, %181 : vector<8x24xf32>
    %183 = math.tanh %182 : vector<8x24xf32>
    %184 = arith.mulf %179, %183 : vector<8x24xf32>
    %185 = vector.broadcast %156 : vector<8x1xf32> to vector<8x24xf32>
    %186 = arith.mulf %185, %184 : vector<8x24xf32>
    %cst_55 = arith.constant 1.000000e+00 : f32
    %187 = vector.broadcast %cst_55 : f32 to vector<8x1xf32>
    %188 = arith.subf %187, %156 : vector<8x1xf32>
    %189 = vector.broadcast %188 : vector<8x1xf32> to vector<8x24xf32>
    %190 = arith.mulf %189, %99 : vector<8x24xf32>
    %191 = arith.addf %186, %190 : vector<8x24xf32>
    %192 = vector.broadcast %156 : vector<8x1xf32> to vector<8x24xf32>
    %193 = arith.mulf %192, %182 : vector<8x24xf32>
    %cst_56 = arith.constant 1.000000e+00 : f32
    %194 = vector.broadcast %cst_56 : f32 to vector<8x1xf32>
    %195 = arith.subf %194, %156 : vector<8x1xf32>
    %196 = vector.broadcast %195 : vector<8x1xf32> to vector<8x24xf32>
    %197 = arith.mulf %196, %106 : vector<8x24xf32>
    %198 = arith.addf %193, %197 : vector<8x24xf32>
    %199 = vector.broadcast %113 : vector<8x1xf32> to vector<8x24xf32>
    %200 = arith.mulf %148, %199 : vector<8x24xf32>
    %c8_57 = arith.constant 8 : index
    %c0_58 = arith.constant 0 : index
    %201 = vector.load %arg28[%c8_57, %c0_58] : memref<64x24xf32, #tpu.memory_space<vmem>>, vector<8x24xf32>
    tpu.vector_store %arg28[%c8_57, %c0_58], %200 {strides = array<i32>} : memref<64x24xf32, #tpu.memory_space<vmem>>, vector<8x24xf32>,
    %202 = vector.broadcast %156 : vector<8x1xf32> to vector<8x24xf32>
    %203 = arith.mulf %191, %202 : vector<8x24xf32>
    %c48_59 = arith.constant 48 : index
    %c0_60 = arith.constant 0 : index
    %204 = vector.load %arg29[%c48_59, %c0_60] : memref<64x24xf32, #tpu.memory_space<vmem>>, vector<8x24xf32>
    tpu.vector_store %arg29[%c48_59, %c0_60], %203 {strides = array<i32>} : memref<64x24xf32, #tpu.memory_space<vmem>>, vector<8x24xf32>,
    %c16 = arith.constant 16 : index
    %c0_61 = arith.constant 0 : index
    %205 = vector.load %arg1[%c16, %c0_61] : memref<64x1xf32, #tpu.memory_space<vmem>>, vector<8x1xf32>
    %c16_62 = arith.constant 16 : index
    %c0_63 = arith.constant 0 : index
    %206 = vector.load %arg30[%c16_62, %c0_63] : memref<64x96xf32, #tpu.memory_space<vmem>>, vector<8x96xf32>
    %cst_64 = arith.constant dense<0.000000e+00> : vector<8x96xf32>
    %207 = tpu.matmul %148, %14, %cst_64 {dimension_numbers = #tpu.dot_dimension_numbers<[1], [0], [0], [1], [0, 0, 1, 1], [], []>} : vector<8x24xf32>, vector<24x96xf32>, vector<8x96xf32> -> vector<8x96xf32>
    %208 = arith.addf %206, %207 : vector<8x96xf32>
    %209 = vector.extract_strided_slice %208 {offsets = [0, 0], sizes = [8, 24], strides = [1, 1]} : vector<8x96xf32> to vector<8x24xf32>
    %210 = arith.negf %209 : vector<8x24xf32>
    %211 = math.exp %210 : vector<8x24xf32>
    %cst_65 = arith.constant 1.000000e+00 : f32
    %212 = vector.broadcast %cst_65 : f32 to vector<8x24xf32>
    %213 = arith.addf %212, %211 : vector<8x24xf32>
    %214 = arith.divf %212, %213 : vector<8x24xf32>
    %215 = vector.extract_strided_slice %208 {offsets = [0, 24], sizes = [8, 24], strides = [1, 1]} : vector<8x96xf32> to vector<8x24xf32>
    %216 = arith.negf %215 : vector<8x24xf32>
    %217 = math.exp %216 : vector<8x24xf32>
    %cst_66 = arith.constant 1.000000e+00 : f32
    %218 = vector.broadcast %cst_66 : f32 to vector<8x24xf32>
    %219 = arith.addf %218, %217 : vector<8x24xf32>
    %220 = arith.divf %218, %219 : vector<8x24xf32>
    %221 = vector.extract_strided_slice %208 {offsets = [0, 48], sizes = [8, 24], strides = [1, 1]} : vector<8x96xf32> to vector<8x24xf32>
    %222 = math.tanh %221 : vector<8x24xf32>
    %223 = vector.extract_strided_slice %208 {offsets = [0, 72], sizes = [8, 24], strides = [1, 1]} : vector<8x96xf32> to vector<8x24xf32>
    %224 = arith.negf %223 : vector<8x24xf32>
    %225 = math.exp %224 : vector<8x24xf32>
    %cst_67 = arith.constant 1.000000e+00 : f32
    %226 = vector.broadcast %cst_67 : f32 to vector<8x24xf32>
    %227 = arith.addf %226, %225 : vector<8x24xf32>
    %228 = arith.divf %226, %227 : vector<8x24xf32>
    %229 = arith.mulf %220, %155 : vector<8x24xf32>
    %230 = arith.mulf %214, %222 : vector<8x24xf32>
    %231 = arith.addf %229, %230 : vector<8x24xf32>
    %232 = math.tanh %231 : vector<8x24xf32>
    %233 = arith.mulf %228, %232 : vector<8x24xf32>
    %234 = vector.broadcast %205 : vector<8x1xf32> to vector<8x24xf32>
    %235 = arith.mulf %234, %233 : vector<8x24xf32>
    %cst_68 = arith.constant 1.000000e+00 : f32
    %236 = vector.broadcast %cst_68 : f32 to vector<8x1xf32>
    %237 = arith.subf %236, %205 : vector<8x1xf32>
    %238 = vector.broadcast %237 : vector<8x1xf32> to vector<8x24xf32>
    %239 = arith.mulf %238, %148 : vector<8x24xf32>
    %240 = arith.addf %235, %239 : vector<8x24xf32>
    %241 = vector.broadcast %205 : vector<8x1xf32> to vector<8x24xf32>
    %242 = arith.mulf %241, %231 : vector<8x24xf32>
    %cst_69 = arith.constant 1.000000e+00 : f32
    %243 = vector.broadcast %cst_69 : f32 to vector<8x1xf32>
    %244 = arith.subf %243, %205 : vector<8x1xf32>
    %245 = vector.broadcast %244 : vector<8x1xf32> to vector<8x24xf32>
    %246 = arith.mulf %245, %155 : vector<8x24xf32>
    %247 = arith.addf %242, %246 : vector<8x24xf32>
    %c40 = arith.constant 40 : index
    %c0_70 = arith.constant 0 : index
    %248 = vector.load %arg1[%c40, %c0_70] : memref<64x1xf32, #tpu.memory_space<vmem>>, vector<8x1xf32>
    %c40_71 = arith.constant 40 : index
    %c0_72 = arith.constant 0 : index
    %249 = vector.load %arg31[%c40_71, %c0_72] : memref<64x96xf32, #tpu.memory_space<vmem>>, vector<8x96xf32>
    %cst_73 = arith.constant dense<0.000000e+00> : vector<8x96xf32>
    %250 = tpu.matmul %191, %16, %cst_73 {dimension_numbers = #tpu.dot_dimension_numbers<[1], [0], [0], [1], [0, 0, 1, 1], [], []>} : vector<8x24xf32>, vector<24x96xf32>, vector<8x96xf32> -> vector<8x96xf32>
    %251 = arith.addf %249, %250 : vector<8x96xf32>
    %252 = vector.extract_strided_slice %251 {offsets = [0, 0], sizes = [8, 24], strides = [1, 1]} : vector<8x96xf32> to vector<8x24xf32>
    %253 = arith.negf %252 : vector<8x24xf32>
    %254 = math.exp %253 : vector<8x24xf32>
    %cst_74 = arith.constant 1.000000e+00 : f32
    %255 = vector.broadcast %cst_74 : f32 to vector<8x24xf32>
    %256 = arith.addf %255, %254 : vector<8x24xf32>
    %257 = arith.divf %255, %256 : vector<8x24xf32>
    %258 = vector.extract_strided_slice %251 {offsets = [0, 24], sizes = [8, 24], strides = [1, 1]} : vector<8x96xf32> to vector<8x24xf32>
    %259 = arith.negf %258 : vector<8x24xf32>
    %260 = math.exp %259 : vector<8x24xf32>
    %cst_75 = arith.constant 1.000000e+00 : f32
    %261 = vector.broadcast %cst_75 : f32 to vector<8x24xf32>
    %262 = arith.addf %261, %260 : vector<8x24xf32>
    %263 = arith.divf %261, %262 : vector<8x24xf32>
    %264 = vector.extract_strided_slice %251 {offsets = [0, 48], sizes = [8, 24], strides = [1, 1]} : vector<8x96xf32> to vector<8x24xf32>
    %265 = math.tanh %264 : vector<8x24xf32>
    %266 = vector.extract_strided_slice %251 {offsets = [0, 72], sizes = [8, 24], strides = [1, 1]} : vector<8x96xf32> to vector<8x24xf32>
    %267 = arith.negf %266 : vector<8x24xf32>
    %268 = math.exp %267 : vector<8x24xf32>
    %cst_76 = arith.constant 1.000000e+00 : f32
    %269 = vector.broadcast %cst_76 : f32 to vector<8x24xf32>
    %270 = arith.addf %269, %268 : vector<8x24xf32>
    %271 = arith.divf %269, %270 : vector<8x24xf32>
    %272 = arith.mulf %263, %198 : vector<8x24xf32>
    %273 = arith.mulf %257, %265 : vector<8x24xf32>
    %274 = arith.addf %272, %273 : vector<8x24xf32>
    %275 = math.tanh %274 : vector<8x24xf32>
    %276 = arith.mulf %271, %275 : vector<8x24xf32>
    %277 = vector.broadcast %248 : vector<8x1xf32> to vector<8x24xf32>
    %278 = arith.mulf %277, %276 : vector<8x24xf32>
    %cst_77 = arith.constant 1.000000e+00 : f32
    %279 = vector.broadcast %cst_77 : f32 to vector<8x1xf32>
    %280 = arith.subf %279, %248 : vector<8x1xf32>
    %281 = vector.broadcast %280 : vector<8x1xf32> to vector<8x24xf32>
    %282 = arith.mulf %281, %191 : vector<8x24xf32>
    %283 = arith.addf %278, %282 : vector<8x24xf32>
    %284 = vector.broadcast %248 : vector<8x1xf32> to vector<8x24xf32>
    %285 = arith.mulf %284, %274 : vector<8x24xf32>
    %cst_78 = arith.constant 1.000000e+00 : f32
    %286 = vector.broadcast %cst_78 : f32 to vector<8x1xf32>
    %287 = arith.subf %286, %248 : vector<8x1xf32>
    %288 = vector.broadcast %287 : vector<8x1xf32> to vector<8x24xf32>
    %289 = arith.mulf %288, %198 : vector<8x24xf32>
    %290 = arith.addf %285, %289 : vector<8x24xf32>
    %291 = vector.broadcast %205 : vector<8x1xf32> to vector<8x24xf32>
    %292 = arith.mulf %240, %291 : vector<8x24xf32>
    %c16_79 = arith.constant 16 : index
    %c0_80 = arith.constant 0 : index
    %293 = vector.load %arg28[%c16_79, %c0_80] : memref<64x24xf32, #tpu.memory_space<vmem>>, vector<8x24xf32>
    tpu.vector_store %arg28[%c16_79, %c0_80], %292 {strides = array<i32>} : memref<64x24xf32, #tpu.memory_space<vmem>>, vector<8x24xf32>,
    %294 = vector.broadcast %248 : vector<8x1xf32> to vector<8x24xf32>
    %295 = arith.mulf %283, %294 : vector<8x24xf32>
    %c40_81 = arith.constant 40 : index
    %c0_82 = arith.constant 0 : index
    %296 = vector.load %arg29[%c40_81, %c0_82] : memref<64x24xf32, #tpu.memory_space<vmem>>, vector<8x24xf32>
    tpu.vector_store %arg29[%c40_81, %c0_82], %295 {strides = array<i32>} : memref<64x24xf32, #tpu.memory_space<vmem>>, vector<8x24xf32>,
    %c24 = arith.constant 24 : index
    %c0_83 = arith.constant 0 : index
    %297 = vector.load %arg1[%c24, %c0_83] : memref<64x1xf32, #tpu.memory_space<vmem>>, vector<8x1xf32>
    %c24_84 = arith.constant 24 : index
    %c0_85 = arith.constant 0 : index
    %298 = vector.load %arg30[%c24_84, %c0_85] : memref<64x96xf32, #tpu.memory_space<vmem>>, vector<8x96xf32>
    %cst_86 = arith.constant dense<0.000000e+00> : vector<8x96xf32>
    %299 = tpu.matmul %240, %14, %cst_86 {dimension_numbers = #tpu.dot_dimension_numbers<[1], [0], [0], [1], [0, 0, 1, 1], [], []>} : vector<8x24xf32>, vector<24x96xf32>, vector<8x96xf32> -> vector<8x96xf32>
    %300 = arith.addf %298, %299 : vector<8x96xf32>
    %301 = vector.extract_strided_slice %300 {offsets = [0, 0], sizes = [8, 24], strides = [1, 1]} : vector<8x96xf32> to vector<8x24xf32>
    %302 = arith.negf %301 : vector<8x24xf32>
    %303 = math.exp %302 : vector<8x24xf32>
    %cst_87 = arith.constant 1.000000e+00 : f32
    %304 = vector.broadcast %cst_87 : f32 to vector<8x24xf32>
    %305 = arith.addf %304, %303 : vector<8x24xf32>
    %306 = arith.divf %304, %305 : vector<8x24xf32>
    %307 = vector.extract_strided_slice %300 {offsets = [0, 24], sizes = [8, 24], strides = [1, 1]} : vector<8x96xf32> to vector<8x24xf32>
    %308 = arith.negf %307 : vector<8x24xf32>
    %309 = math.exp %308 : vector<8x24xf32>
    %cst_88 = arith.constant 1.000000e+00 : f32
    %310 = vector.broadcast %cst_88 : f32 to vector<8x24xf32>
    %311 = arith.addf %310, %309 : vector<8x24xf32>
    %312 = arith.divf %310, %311 : vector<8x24xf32>
    %313 = vector.extract_strided_slice %300 {offsets = [0, 48], sizes = [8, 24], strides = [1, 1]} : vector<8x96xf32> to vector<8x24xf32>
    %314 = math.tanh %313 : vector<8x24xf32>
    %315 = vector.extract_strided_slice %300 {offsets = [0, 72], sizes = [8, 24], strides = [1, 1]} : vector<8x96xf32> to vector<8x24xf32>
    %316 = arith.negf %315 : vector<8x24xf32>
    %317 = math.exp %316 : vector<8x24xf32>
    %cst_89 = arith.constant 1.000000e+00 : f32
    %318 = vector.broadcast %cst_89 : f32 to vector<8x24xf32>
    %319 = arith.addf %318, %317 : vector<8x24xf32>
    %320 = arith.divf %318, %319 : vector<8x24xf32>
    %321 = arith.mulf %312, %247 : vector<8x24xf32>
    %322 = arith.mulf %306, %314 : vector<8x24xf32>
    %323 = arith.addf %321, %322 : vector<8x24xf32>
    %324 = math.tanh %323 : vector<8x24xf32>
    %325 = arith.mulf %320, %324 : vector<8x24xf32>
    %326 = vector.broadcast %297 : vector<8x1xf32> to vector<8x24xf32>
    %327 = arith.mulf %326, %325 : vector<8x24xf32>
    %cst_90 = arith.constant 1.000000e+00 : f32
    %328 = vector.broadcast %cst_90 : f32 to vector<8x1xf32>
    %329 = arith.subf %328, %297 : vector<8x1xf32>
    %330 = vector.broadcast %329 : vector<8x1xf32> to vector<8x24xf32>
    %331 = arith.mulf %330, %240 : vector<8x24xf32>
    %332 = arith.addf %327, %331 : vector<8x24xf32>
    %333 = vector.broadcast %297 : vector<8x1xf32> to vector<8x24xf32>
    %334 = arith.mulf %333, %323 : vector<8x24xf32>
    %cst_91 = arith.constant 1.000000e+00 : f32
    %335 = vector.broadcast %cst_91 : f32 to vector<8x1xf32>
    %336 = arith.subf %335, %297 : vector<8x1xf32>
    %337 = vector.broadcast %336 : vector<8x1xf32> to vector<8x24xf32>
    %338 = arith.mulf %337, %247 : vector<8x24xf32>
    %339 = arith.addf %334, %338 : vector<8x24xf32>
    %c32 = arith.constant 32 : index
    %c0_92 = arith.constant 0 : index
    %340 = vector.load %arg1[%c32, %c0_92] : memref<64x1xf32, #tpu.memory_space<vmem>>, vector<8x1xf32>
    %c32_93 = arith.constant 32 : index
    %c0_94 = arith.constant 0 : index
    %341 = vector.load %arg31[%c32_93, %c0_94] : memref<64x96xf32, #tpu.memory_space<vmem>>, vector<8x96xf32>
    %cst_95 = arith.constant dense<0.000000e+00> : vector<8x96xf32>
    %342 = tpu.matmul %283, %16, %cst_95 {dimension_numbers = #tpu.dot_dimension_numbers<[1], [0], [0], [1], [0, 0, 1, 1], [], []>} : vector<8x24xf32>, vector<24x96xf32>, vector<8x96xf32> -> vector<8x96xf32>
    %343 = arith.addf %341, %342 : vector<8x96xf32>
    %344 = vector.extract_strided_slice %343 {offsets = [0, 0], sizes = [8, 24], strides = [1, 1]} : vector<8x96xf32> to vector<8x24xf32>
    %345 = arith.negf %344 : vector<8x24xf32>
    %346 = math.exp %345 : vector<8x24xf32>
    %cst_96 = arith.constant 1.000000e+00 : f32
    %347 = vector.broadcast %cst_96 : f32 to vector<8x24xf32>
    %348 = arith.addf %347, %346 : vector<8x24xf32>
    %349 = arith.divf %347, %348 : vector<8x24xf32>
    %350 = vector.extract_strided_slice %343 {offsets = [0, 24], sizes = [8, 24], strides = [1, 1]} : vector<8x96xf32> to vector<8x24xf32>
    %351 = arith.negf %350 : vector<8x24xf32>
    %352 = math.exp %351 : vector<8x24xf32>
    %cst_97 = arith.constant 1.000000e+00 : f32
    %353 = vector.broadcast %cst_97 : f32 to vector<8x24xf32>
    %354 = arith.addf %353, %352 : vector<8x24xf32>
    %355 = arith.divf %353, %354 : vector<8x24xf32>
    %356 = vector.extract_strided_slice %343 {offsets = [0, 48], sizes = [8, 24], strides = [1, 1]} : vector<8x96xf32> to vector<8x24xf32>
    %357 = math.tanh %356 : vector<8x24xf32>
    %358 = vector.extract_strided_slice %343 {offsets = [0, 72], sizes = [8, 24], strides = [1, 1]} : vector<8x96xf32> to vector<8x24xf32>
    %359 = arith.negf %358 : vector<8x24xf32>
    %360 = math.exp %359 : vector<8x24xf32>
    %cst_98 = arith.constant 1.000000e+00 : f32
    %361 = vector.broadcast %cst_98 : f32 to vector<8x24xf32>
    %362 = arith.addf %361, %360 : vector<8x24xf32>
    %363 = arith.divf %361, %362 : vector<8x24xf32>
    %364 = arith.mulf %355, %290 : vector<8x24xf32>
    %365 = arith.mulf %349, %357 : vector<8x24xf32>
    %366 = arith.addf %364, %365 : vector<8x24xf32>
    %367 = math.tanh %366 : vector<8x24xf32>
    %368 = arith.mulf %363, %367 : vector<8x24xf32>
    %369 = vector.broadcast %340 : vector<8x1xf32> to vector<8x24xf32>
    %370 = arith.mulf %369, %368 : vector<8x24xf32>
    %cst_99 = arith.constant 1.000000e+00 : f32
    %371 = vector.broadcast %cst_99 : f32 to vector<8x1xf32>
    %372 = arith.subf %371, %340 : vector<8x1xf32>
    %373 = vector.broadcast %372 : vector<8x1xf32> to vector<8x24xf32>
    %374 = arith.mulf %373, %283 : vector<8x24xf32>
    %375 = arith.addf %370, %374 : vector<8x24xf32>
    %376 = vector.broadcast %340 : vector<8x1xf32> to vector<8x24xf32>
    %377 = arith.mulf %376, %366 : vector<8x24xf32>
    %cst_100 = arith.constant 1.000000e+00 : f32
    %378 = vector.broadcast %cst_100 : f32 to vector<8x1xf32>
    %379 = arith.subf %378, %340 : vector<8x1xf32>
    %380 = vector.broadcast %379 : vector<8x1xf32> to vector<8x24xf32>
    %381 = arith.mulf %380, %290 : vector<8x24xf32>
    %382 = arith.addf %377, %381 : vector<8x24xf32>
    %383 = vector.broadcast %297 : vector<8x1xf32> to vector<8x24xf32>
    %384 = arith.mulf %332, %383 : vector<8x24xf32>
    %c24_101 = arith.constant 24 : index
    %c0_102 = arith.constant 0 : index
    %385 = vector.load %arg28[%c24_101, %c0_102] : memref<64x24xf32, #tpu.memory_space<vmem>>, vector<8x24xf32>
    tpu.vector_store %arg28[%c24_101, %c0_102], %384 {strides = array<i32>} : memref<64x24xf32, #tpu.memory_space<vmem>>, vector<8x24xf32>,
    %386 = vector.broadcast %340 : vector<8x1xf32> to vector<8x24xf32>
    %387 = arith.mulf %375, %386 : vector<8x24xf32>
    %c32_103 = arith.constant 32 : index
    %c0_104 = arith.constant 0 : index
    %388 = vector.load %arg29[%c32_103, %c0_104] : memref<64x24xf32, #tpu.memory_space<vmem>>, vector<8x24xf32>
    tpu.vector_store %arg29[%c32_103, %c0_104], %387 {strides = array<i32>} : memref<64x24xf32, #tpu.memory_space<vmem>>, vector<8x24xf32>,
    %c32_105 = arith.constant 32 : index
    %c0_106 = arith.constant 0 : index
    %389 = vector.load %arg1[%c32_105, %c0_106] : memref<64x1xf32, #tpu.memory_space<vmem>>, vector<8x1xf32>
    %c32_107 = arith.constant 32 : index
    %c0_108 = arith.constant 0 : index
    %390 = vector.load %arg30[%c32_107, %c0_108] : memref<64x96xf32, #tpu.memory_space<vmem>>, vector<8x96xf32>
    %cst_109 = arith.constant dense<0.000000e+00> : vector<8x96xf32>
    %391 = tpu.matmul %332, %14, %cst_109 {dimension_numbers = #tpu.dot_dimension_numbers<[1], [0], [0], [1], [0, 0, 1, 1], [], []>} : vector<8x24xf32>, vector<24x96xf32>, vector<8x96xf32> -> vector<8x96xf32>
    %392 = arith.addf %390, %391 : vector<8x96xf32>
    %393 = vector.extract_strided_slice %392 {offsets = [0, 0], sizes = [8, 24], strides = [1, 1]} : vector<8x96xf32> to vector<8x24xf32>
    %394 = arith.negf %393 : vector<8x24xf32>
    %395 = math.exp %394 : vector<8x24xf32>
    %cst_110 = arith.constant 1.000000e+00 : f32
    %396 = vector.broadcast %cst_110 : f32 to vector<8x24xf32>
    %397 = arith.addf %396, %395 : vector<8x24xf32>
    %398 = arith.divf %396, %397 : vector<8x24xf32>
    %399 = vector.extract_strided_slice %392 {offsets = [0, 24], sizes = [8, 24], strides = [1, 1]} : vector<8x96xf32> to vector<8x24xf32>
    %400 = arith.negf %399 : vector<8x24xf32>
    %401 = math.exp %400 : vector<8x24xf32>
    %cst_111 = arith.constant 1.000000e+00 : f32
    %402 = vector.broadcast %cst_111 : f32 to vector<8x24xf32>
    %403 = arith.addf %402, %401 : vector<8x24xf32>
    %404 = arith.divf %402, %403 : vector<8x24xf32>
    %405 = vector.extract_strided_slice %392 {offsets = [0, 48], sizes = [8, 24], strides = [1, 1]} : vector<8x96xf32> to vector<8x24xf32>
    %406 = math.tanh %405 : vector<8x24xf32>
    %407 = vector.extract_strided_slice %392 {offsets = [0, 72], sizes = [8, 24], strides = [1, 1]} : vector<8x96xf32> to vector<8x24xf32>
    %408 = arith.negf %407 : vector<8x24xf32>
    %409 = math.exp %408 : vector<8x24xf32>
    %cst_112 = arith.constant 1.000000e+00 : f32
    %410 = vector.broadcast %cst_112 : f32 to vector<8x24xf32>
    %411 = arith.addf %410, %409 : vector<8x24xf32>
    %412 = arith.divf %410, %411 : vector<8x24xf32>
    %413 = arith.mulf %404, %339 : vector<8x24xf32>
    %414 = arith.mulf %398, %406 : vector<8x24xf32>
    %415 = arith.addf %413, %414 : vector<8x24xf32>
    %416 = math.tanh %415 : vector<8x24xf32>
    %417 = arith.mulf %412, %416 : vector<8x24xf32>
    %418 = vector.broadcast %389 : vector<8x1xf32> to vector<8x24xf32>
    %419 = arith.mulf %418, %417 : vector<8x24xf32>
    %cst_113 = arith.constant 1.000000e+00 : f32
    %420 = vector.broadcast %cst_113 : f32 to vector<8x1xf32>
    %421 = arith.subf %420, %389 : vector<8x1xf32>
    %422 = vector.broadcast %421 : vector<8x1xf32> to vector<8x24xf32>
    %423 = arith.mulf %422, %332 : vector<8x24xf32>
    %424 = arith.addf %419, %423 : vector<8x24xf32>
    %425 = vector.broadcast %389 : vector<8x1xf32> to vector<8x24xf32>
    %426 = arith.mulf %425, %415 : vector<8x24xf32>
    %cst_114 = arith.constant 1.000000e+00 : f32
    %427 = vector.broadcast %cst_114 : f32 to vector<8x1xf32>
    %428 = arith.subf %427, %389 : vector<8x1xf32>
    %429 = vector.broadcast %428 : vector<8x1xf32> to vector<8x24xf32>
    %430 = arith.mulf %429, %339 : vector<8x24xf32>
    %431 = arith.addf %426, %430 : vector<8x24xf32>
    %c24_115 = arith.constant 24 : index
    %c0_116 = arith.constant 0 : index
    %432 = vector.load %arg1[%c24_115, %c0_116] : memref<64x1xf32, #tpu.memory_space<vmem>>, vector<8x1xf32>
    %c24_117 = arith.constant 24 : index
    %c0_118 = arith.constant 0 : index
    %433 = vector.load %arg31[%c24_117, %c0_118] : memref<64x96xf32, #tpu.memory_space<vmem>>, vector<8x96xf32>
    %cst_119 = arith.constant dense<0.000000e+00> : vector<8x96xf32>
    %434 = tpu.matmul %375, %16, %cst_119 {dimension_numbers = #tpu.dot_dimension_numbers<[1], [0], [0], [1], [0, 0, 1, 1], [], []>} : vector<8x24xf32>, vector<24x96xf32>, vector<8x96xf32> -> vector<8x96xf32>
    %435 = arith.addf %433, %434 : vector<8x96xf32>
    %436 = vector.extract_strided_slice %435 {offsets = [0, 0], sizes = [8, 24], strides = [1, 1]} : vector<8x96xf32> to vector<8x24xf32>
    %437 = arith.negf %436 : vector<8x24xf32>
    %438 = math.exp %437 : vector<8x24xf32>
    %cst_120 = arith.constant 1.000000e+00 : f32
    %439 = vector.broadcast %cst_120 : f32 to vector<8x24xf32>
    %440 = arith.addf %439, %438 : vector<8x24xf32>
    %441 = arith.divf %439, %440 : vector<8x24xf32>
    %442 = vector.extract_strided_slice %435 {offsets = [0, 24], sizes = [8, 24], strides = [1, 1]} : vector<8x96xf32> to vector<8x24xf32>
    %443 = arith.negf %442 : vector<8x24xf32>
    %444 = math.exp %443 : vector<8x24xf32>
    %cst_121 = arith.constant 1.000000e+00 : f32
    %445 = vector.broadcast %cst_121 : f32 to vector<8x24xf32>
    %446 = arith.addf %445, %444 : vector<8x24xf32>
    %447 = arith.divf %445, %446 : vector<8x24xf32>
    %448 = vector.extract_strided_slice %435 {offsets = [0, 48], sizes = [8, 24], strides = [1, 1]} : vector<8x96xf32> to vector<8x24xf32>
    %449 = math.tanh %448 : vector<8x24xf32>
    %450 = vector.extract_strided_slice %435 {offsets = [0, 72], sizes = [8, 24], strides = [1, 1]} : vector<8x96xf32> to vector<8x24xf32>
    %451 = arith.negf %450 : vector<8x24xf32>
    %452 = math.exp %451 : vector<8x24xf32>
    %cst_122 = arith.constant 1.000000e+00 : f32
    %453 = vector.broadcast %cst_122 : f32 to vector<8x24xf32>
    %454 = arith.addf %453, %452 : vector<8x24xf32>
    %455 = arith.divf %453, %454 : vector<8x24xf32>
    %456 = arith.mulf %447, %382 : vector<8x24xf32>
    %457 = arith.mulf %441, %449 : vector<8x24xf32>
    %458 = arith.addf %456, %457 : vector<8x24xf32>
    %459 = math.tanh %458 : vector<8x24xf32>
    %460 = arith.mulf %455, %459 : vector<8x24xf32>
    %461 = vector.broadcast %432 : vector<8x1xf32> to vector<8x24xf32>
    %462 = arith.mulf %461, %460 : vector<8x24xf32>
    %cst_123 = arith.constant 1.000000e+00 : f32
    %463 = vector.broadcast %cst_123 : f32 to vector<8x1xf32>
    %464 = arith.subf %463, %432 : vector<8x1xf32>
    %465 = vector.broadcast %464 : vector<8x1xf32> to vector<8x24xf32>
    %466 = arith.mulf %465, %375 : vector<8x24xf32>
    %467 = arith.addf %462, %466 : vector<8x24xf32>
    %468 = vector.broadcast %432 : vector<8x1xf32> to vector<8x24xf32>
    %469 = arith.mulf %468, %458 : vector<8x24xf32>
    %cst_124 = arith.constant 1.000000e+00 : f32
    %470 = vector.broadcast %cst_124 : f32 to vector<8x1xf32>
    %471 = arith.subf %470, %432 : vector<8x1xf32>
    %472 = vector.broadcast %471 : vector<8x1xf32> to vector<8x24xf32>
    %473 = arith.mulf %472, %382 : vector<8x24xf32>
    %474 = arith.addf %469, %473 : vector<8x24xf32>
    %475 = vector.broadcast %389 : vector<8x1xf32> to vector<8x24xf32>
    %476 = arith.mulf %424, %475 : vector<8x24xf32>
    %c32_125 = arith.constant 32 : index
    %c0_126 = arith.constant 0 : index
    %477 = vector.load %arg28[%c32_125, %c0_126] : memref<64x24xf32, #tpu.memory_space<vmem>>, vector<8x24xf32>
    tpu.vector_store %arg28[%c32_125, %c0_126], %476 {strides = array<i32>} : memref<64x24xf32, #tpu.memory_space<vmem>>, vector<8x24xf32>,
    %478 = vector.broadcast %432 : vector<8x1xf32> to vector<8x24xf32>
    %479 = arith.mulf %467, %478 : vector<8x24xf32>
    %c24_127 = arith.constant 24 : index
    %c0_128 = arith.constant 0 : index
    %480 = vector.load %arg29[%c24_127, %c0_128] : memref<64x24xf32, #tpu.memory_space<vmem>>, vector<8x24xf32>
    tpu.vector_store %arg29[%c24_127, %c0_128], %479 {strides = array<i32>} : memref<64x24xf32, #tpu.memory_space<vmem>>, vector<8x24xf32>,
    %c40_129 = arith.constant 40 : index
    %c0_130 = arith.constant 0 : index
    %481 = vector.load %arg1[%c40_129, %c0_130] : memref<64x1xf32, #tpu.memory_space<vmem>>, vector<8x1xf32>
    %c40_131 = arith.constant 40 : index
    %c0_132 = arith.constant 0 : index
    %482 = vector.load %arg30[%c40_131, %c0_132] : memref<64x96xf32, #tpu.memory_space<vmem>>, vector<8x96xf32>
    %cst_133 = arith.constant dense<0.000000e+00> : vector<8x96xf32>
    %483 = tpu.matmul %424, %14, %cst_133 {dimension_numbers = #tpu.dot_dimension_numbers<[1], [0], [0], [1], [0, 0, 1, 1], [], []>} : vector<8x24xf32>, vector<24x96xf32>, vector<8x96xf32> -> vector<8x96xf32>
    %484 = arith.addf %482, %483 : vector<8x96xf32>
    %485 = vector.extract_strided_slice %484 {offsets = [0, 0], sizes = [8, 24], strides = [1, 1]} : vector<8x96xf32> to vector<8x24xf32>
    %486 = arith.negf %485 : vector<8x24xf32>
    %487 = math.exp %486 : vector<8x24xf32>
    %cst_134 = arith.constant 1.000000e+00 : f32
    %488 = vector.broadcast %cst_134 : f32 to vector<8x24xf32>
    %489 = arith.addf %488, %487 : vector<8x24xf32>
    %490 = arith.divf %488, %489 : vector<8x24xf32>
    %491 = vector.extract_strided_slice %484 {offsets = [0, 24], sizes = [8, 24], strides = [1, 1]} : vector<8x96xf32> to vector<8x24xf32>
    %492 = arith.negf %491 : vector<8x24xf32>
    %493 = math.exp %492 : vector<8x24xf32>
    %cst_135 = arith.constant 1.000000e+00 : f32
    %494 = vector.broadcast %cst_135 : f32 to vector<8x24xf32>
    %495 = arith.addf %494, %493 : vector<8x24xf32>
    %496 = arith.divf %494, %495 : vector<8x24xf32>
    %497 = vector.extract_strided_slice %484 {offsets = [0, 48], sizes = [8, 24], strides = [1, 1]} : vector<8x96xf32> to vector<8x24xf32>
    %498 = math.tanh %497 : vector<8x24xf32>
    %499 = vector.extract_strided_slice %484 {offsets = [0, 72], sizes = [8, 24], strides = [1, 1]} : vector<8x96xf32> to vector<8x24xf32>
    %500 = arith.negf %499 : vector<8x24xf32>
    %501 = math.exp %500 : vector<8x24xf32>
    %cst_136 = arith.constant 1.000000e+00 : f32
    %502 = vector.broadcast %cst_136 : f32 to vector<8x24xf32>
    %503 = arith.addf %502, %501 : vector<8x24xf32>
    %504 = arith.divf %502, %503 : vector<8x24xf32>
    %505 = arith.mulf %496, %431 : vector<8x24xf32>
    %506 = arith.mulf %490, %498 : vector<8x24xf32>
    %507 = arith.addf %505, %506 : vector<8x24xf32>
    %508 = math.tanh %507 : vector<8x24xf32>
    %509 = arith.mulf %504, %508 : vector<8x24xf32>
    %510 = vector.broadcast %481 : vector<8x1xf32> to vector<8x24xf32>
    %511 = arith.mulf %510, %509 : vector<8x24xf32>
    %cst_137 = arith.constant 1.000000e+00 : f32
    %512 = vector.broadcast %cst_137 : f32 to vector<8x1xf32>
    %513 = arith.subf %512, %481 : vector<8x1xf32>
    %514 = vector.broadcast %513 : vector<8x1xf32> to vector<8x24xf32>
    %515 = arith.mulf %514, %424 : vector<8x24xf32>
    %516 = arith.addf %511, %515 : vector<8x24xf32>
    %517 = vector.broadcast %481 : vector<8x1xf32> to vector<8x24xf32>
    %518 = arith.mulf %517, %507 : vector<8x24xf32>
    %cst_138 = arith.constant 1.000000e+00 : f32
    %519 = vector.broadcast %cst_138 : f32 to vector<8x1xf32>
    %520 = arith.subf %519, %481 : vector<8x1xf32>
    %521 = vector.broadcast %520 : vector<8x1xf32> to vector<8x24xf32>
    %522 = arith.mulf %521, %431 : vector<8x24xf32>
    %523 = arith.addf %518, %522 : vector<8x24xf32>
    %c16_139 = arith.constant 16 : index
    %c0_140 = arith.constant 0 : index
    %524 = vector.load %arg1[%c16_139, %c0_140] : memref<64x1xf32, #tpu.memory_space<vmem>>, vector<8x1xf32>
    %c16_141 = arith.constant 16 : index
    %c0_142 = arith.constant 0 : index
    %525 = vector.load %arg31[%c16_141, %c0_142] : memref<64x96xf32, #tpu.memory_space<vmem>>, vector<8x96xf32>
    %cst_143 = arith.constant dense<0.000000e+00> : vector<8x96xf32>
    %526 = tpu.matmul %467, %16, %cst_143 {dimension_numbers = #tpu.dot_dimension_numbers<[1], [0], [0], [1], [0, 0, 1, 1], [], []>} : vector<8x24xf32>, vector<24x96xf32>, vector<8x96xf32> -> vector<8x96xf32>
    %527 = arith.addf %525, %526 : vector<8x96xf32>
    %528 = vector.extract_strided_slice %527 {offsets = [0, 0], sizes = [8, 24], strides = [1, 1]} : vector<8x96xf32> to vector<8x24xf32>
    %529 = arith.negf %528 : vector<8x24xf32>
    %530 = math.exp %529 : vector<8x24xf32>
    %cst_144 = arith.constant 1.000000e+00 : f32
    %531 = vector.broadcast %cst_144 : f32 to vector<8x24xf32>
    %532 = arith.addf %531, %530 : vector<8x24xf32>
    %533 = arith.divf %531, %532 : vector<8x24xf32>
    %534 = vector.extract_strided_slice %527 {offsets = [0, 24], sizes = [8, 24], strides = [1, 1]} : vector<8x96xf32> to vector<8x24xf32>
    %535 = arith.negf %534 : vector<8x24xf32>
    %536 = math.exp %535 : vector<8x24xf32>
    %cst_145 = arith.constant 1.000000e+00 : f32
    %537 = vector.broadcast %cst_145 : f32 to vector<8x24xf32>
    %538 = arith.addf %537, %536 : vector<8x24xf32>
    %539 = arith.divf %537, %538 : vector<8x24xf32>
    %540 = vector.extract_strided_slice %527 {offsets = [0, 48], sizes = [8, 24], strides = [1, 1]} : vector<8x96xf32> to vector<8x24xf32>
    %541 = math.tanh %540 : vector<8x24xf32>
    %542 = vector.extract_strided_slice %527 {offsets = [0, 72], sizes = [8, 24], strides = [1, 1]} : vector<8x96xf32> to vector<8x24xf32>
    %543 = arith.negf %542 : vector<8x24xf32>
    %544 = math.exp %543 : vector<8x24xf32>
    %cst_146 = arith.constant 1.000000e+00 : f32
    %545 = vector.broadcast %cst_146 : f32 to vector<8x24xf32>
    %546 = arith.addf %545, %544 : vector<8x24xf32>
    %547 = arith.divf %545, %546 : vector<8x24xf32>
    %548 = arith.mulf %539, %474 : vector<8x24xf32>
    %549 = arith.mulf %533, %541 : vector<8x24xf32>
    %550 = arith.addf %548, %549 : vector<8x24xf32>
    %551 = math.tanh %550 : vector<8x24xf32>
    %552 = arith.mulf %547, %551 : vector<8x24xf32>
    %553 = vector.broadcast %524 : vector<8x1xf32> to vector<8x24xf32>
    %554 = arith.mulf %553, %552 : vector<8x24xf32>
    %cst_147 = arith.constant 1.000000e+00 : f32
    %555 = vector.broadcast %cst_147 : f32 to vector<8x1xf32>
    %556 = arith.subf %555, %524 : vector<8x1xf32>
    %557 = vector.broadcast %556 : vector<8x1xf32> to vector<8x24xf32>
    %558 = arith.mulf %557, %467 : vector<8x24xf32>
    %559 = arith.addf %554, %558 : vector<8x24xf32>
    %560 = vector.broadcast %524 : vector<8x1xf32> to vector<8x24xf32>
    %561 = arith.mulf %560, %550 : vector<8x24xf32>
    %cst_148 = arith.constant 1.000000e+00 : f32
    %562 = vector.broadcast %cst_148 : f32 to vector<8x1xf32>
    %563 = arith.subf %562, %524 : vector<8x1xf32>
    %564 = vector.broadcast %563 : vector<8x1xf32> to vector<8x24xf32>
    %565 = arith.mulf %564, %474 : vector<8x24xf32>
    %566 = arith.addf %561, %565 : vector<8x24xf32>
    %567 = vector.broadcast %481 : vector<8x1xf32> to vector<8x24xf32>
    %568 = arith.mulf %516, %567 : vector<8x24xf32>
    %c40_149 = arith.constant 40 : index
    %c0_150 = arith.constant 0 : index
    %569 = vector.load %arg28[%c40_149, %c0_150] : memref<64x24xf32, #tpu.memory_space<vmem>>, vector<8x24xf32>
    tpu.vector_store %arg28[%c40_149, %c0_150], %568 {strides = array<i32>} : memref<64x24xf32, #tpu.memory_space<vmem>>, vector<8x24xf32>,
    %570 = vector.broadcast %524 : vector<8x1xf32> to vector<8x24xf32>
    %571 = arith.mulf %559, %570 : vector<8x24xf32>
    %c16_151 = arith.constant 16 : index
    %c0_152 = arith.constant 0 : index
    %572 = vector.load %arg29[%c16_151, %c0_152] : memref<64x24xf32, #tpu.memory_space<vmem>>, vector<8x24xf32>
    tpu.vector_store %arg29[%c16_151, %c0_152], %571 {strides = array<i32>} : memref<64x24xf32, #tpu.memory_space<vmem>>, vector<8x24xf32>,
    %c48_153 = arith.constant 48 : index
    %c0_154 = arith.constant 0 : index
    %573 = vector.load %arg1[%c48_153, %c0_154] : memref<64x1xf32, #tpu.memory_space<vmem>>, vector<8x1xf32>
    %c48_155 = arith.constant 48 : index
    %c0_156 = arith.constant 0 : index
    %574 = vector.load %arg30[%c48_155, %c0_156] : memref<64x96xf32, #tpu.memory_space<vmem>>, vector<8x96xf32>
    %cst_157 = arith.constant dense<0.000000e+00> : vector<8x96xf32>
    %575 = tpu.matmul %516, %14, %cst_157 {dimension_numbers = #tpu.dot_dimension_numbers<[1], [0], [0], [1], [0, 0, 1, 1], [], []>} : vector<8x24xf32>, vector<24x96xf32>, vector<8x96xf32> -> vector<8x96xf32>
    %576 = arith.addf %574, %575 : vector<8x96xf32>
    %577 = vector.extract_strided_slice %576 {offsets = [0, 0], sizes = [8, 24], strides = [1, 1]} : vector<8x96xf32> to vector<8x24xf32>
    %578 = arith.negf %577 : vector<8x24xf32>
    %579 = math.exp %578 : vector<8x24xf32>
    %cst_158 = arith.constant 1.000000e+00 : f32
    %580 = vector.broadcast %cst_158 : f32 to vector<8x24xf32>
    %581 = arith.addf %580, %579 : vector<8x24xf32>
    %582 = arith.divf %580, %581 : vector<8x24xf32>
    %583 = vector.extract_strided_slice %576 {offsets = [0, 24], sizes = [8, 24], strides = [1, 1]} : vector<8x96xf32> to vector<8x24xf32>
    %584 = arith.negf %583 : vector<8x24xf32>
    %585 = math.exp %584 : vector<8x24xf32>
    %cst_159 = arith.constant 1.000000e+00 : f32
    %586 = vector.broadcast %cst_159 : f32 to vector<8x24xf32>
    %587 = arith.addf %586, %585 : vector<8x24xf32>
    %588 = arith.divf %586, %587 : vector<8x24xf32>
    %589 = vector.extract_strided_slice %576 {offsets = [0, 48], sizes = [8, 24], strides = [1, 1]} : vector<8x96xf32> to vector<8x24xf32>
    %590 = math.tanh %589 : vector<8x24xf32>
    %591 = vector.extract_strided_slice %576 {offsets = [0, 72], sizes = [8, 24], strides = [1, 1]} : vector<8x96xf32> to vector<8x24xf32>
    %592 = arith.negf %591 : vector<8x24xf32>
    %593 = math.exp %592 : vector<8x24xf32>
    %cst_160 = arith.constant 1.000000e+00 : f32
    %594 = vector.broadcast %cst_160 : f32 to vector<8x24xf32>
    %595 = arith.addf %594, %593 : vector<8x24xf32>
    %596 = arith.divf %594, %595 : vector<8x24xf32>
    %597 = arith.mulf %588, %523 : vector<8x24xf32>
    %598 = arith.mulf %582, %590 : vector<8x24xf32>
    %599 = arith.addf %597, %598 : vector<8x24xf32>
    %600 = math.tanh %599 : vector<8x24xf32>
    %601 = arith.mulf %596, %600 : vector<8x24xf32>
    %602 = vector.broadcast %573 : vector<8x1xf32> to vector<8x24xf32>
    %603 = arith.mulf %602, %601 : vector<8x24xf32>
    %cst_161 = arith.constant 1.000000e+00 : f32
    %604 = vector.broadcast %cst_161 : f32 to vector<8x1xf32>
    %605 = arith.subf %604, %573 : vector<8x1xf32>
    %606 = vector.broadcast %605 : vector<8x1xf32> to vector<8x24xf32>
    %607 = arith.mulf %606, %516 : vector<8x24xf32>
    %608 = arith.addf %603, %607 : vector<8x24xf32>
    %609 = vector.broadcast %573 : vector<8x1xf32> to vector<8x24xf32>
    %610 = arith.mulf %609, %599 : vector<8x24xf32>
    %cst_162 = arith.constant 1.000000e+00 : f32
    %611 = vector.broadcast %cst_162 : f32 to vector<8x1xf32>
    %612 = arith.subf %611, %573 : vector<8x1xf32>
    %613 = vector.broadcast %612 : vector<8x1xf32> to vector<8x24xf32>
    %614 = arith.mulf %613, %523 : vector<8x24xf32>
    %615 = arith.addf %610, %614 : vector<8x24xf32>
    %c8_163 = arith.constant 8 : index
    %c0_164 = arith.constant 0 : index
    %616 = vector.load %arg1[%c8_163, %c0_164] : memref<64x1xf32, #tpu.memory_space<vmem>>, vector<8x1xf32>
    %c8_165 = arith.constant 8 : index
    %c0_166 = arith.constant 0 : index
    %617 = vector.load %arg31[%c8_165, %c0_166] : memref<64x96xf32, #tpu.memory_space<vmem>>, vector<8x96xf32>
    %cst_167 = arith.constant dense<0.000000e+00> : vector<8x96xf32>
    %618 = tpu.matmul %559, %16, %cst_167 {dimension_numbers = #tpu.dot_dimension_numbers<[1], [0], [0], [1], [0, 0, 1, 1], [], []>} : vector<8x24xf32>, vector<24x96xf32>, vector<8x96xf32> -> vector<8x96xf32>
    %619 = arith.addf %617, %618 : vector<8x96xf32>
    %620 = vector.extract_strided_slice %619 {offsets = [0, 0], sizes = [8, 24], strides = [1, 1]} : vector<8x96xf32> to vector<8x24xf32>
    %621 = arith.negf %620 : vector<8x24xf32>
    %622 = math.exp %621 : vector<8x24xf32>
    %cst_168 = arith.constant 1.000000e+00 : f32
    %623 = vector.broadcast %cst_168 : f32 to vector<8x24xf32>
    %624 = arith.addf %623, %622 : vector<8x24xf32>
    %625 = arith.divf %623, %624 : vector<8x24xf32>
    %626 = vector.extract_strided_slice %619 {offsets = [0, 24], sizes = [8, 24], strides = [1, 1]} : vector<8x96xf32> to vector<8x24xf32>
    %627 = arith.negf %626 : vector<8x24xf32>
    %628 = math.exp %627 : vector<8x24xf32>
    %cst_169 = arith.constant 1.000000e+00 : f32
    %629 = vector.broadcast %cst_169 : f32 to vector<8x24xf32>
    %630 = arith.addf %629, %628 : vector<8x24xf32>
    %631 = arith.divf %629, %630 : vector<8x24xf32>
    %632 = vector.extract_strided_slice %619 {offsets = [0, 48], sizes = [8, 24], strides = [1, 1]} : vector<8x96xf32> to vector<8x24xf32>
    %633 = math.tanh %632 : vector<8x24xf32>
    %634 = vector.extract_strided_slice %619 {offsets = [0, 72], sizes = [8, 24], strides = [1, 1]} : vector<8x96xf32> to vector<8x24xf32>
    %635 = arith.negf %634 : vector<8x24xf32>
    %636 = math.exp %635 : vector<8x24xf32>
    %cst_170 = arith.constant 1.000000e+00 : f32
    %637 = vector.broadcast %cst_170 : f32 to vector<8x24xf32>
    %638 = arith.addf %637, %636 : vector<8x24xf32>
    %639 = arith.divf %637, %638 : vector<8x24xf32>
    %640 = arith.mulf %631, %566 : vector<8x24xf32>
    %641 = arith.mulf %625, %633 : vector<8x24xf32>
    %642 = arith.addf %640, %641 : vector<8x24xf32>
    %643 = math.tanh %642 : vector<8x24xf32>
    %644 = arith.mulf %639, %643 : vector<8x24xf32>
    %645 = vector.broadcast %616 : vector<8x1xf32> to vector<8x24xf32>
    %646 = arith.mulf %645, %644 : vector<8x24xf32>
    %cst_171 = arith.constant 1.000000e+00 : f32
    %647 = vector.broadcast %cst_171 : f32 to vector<8x1xf32>
    %648 = arith.subf %647, %616 : vector<8x1xf32>
    %649 = vector.broadcast %648 : vector<8x1xf32> to vector<8x24xf32>
    %650 = arith.mulf %649, %559 : vector<8x24xf32>
    %651 = arith.addf %646, %650 : vector<8x24xf32>
    %652 = vector.broadcast %616 : vector<8x1xf32> to vector<8x24xf32>
    %653 = arith.mulf %652, %642 : vector<8x24xf32>
    %cst_172 = arith.constant 1.000000e+00 : f32
    %654 = vector.broadcast %cst_172 : f32 to vector<8x1xf32>
    %655 = arith.subf %654, %616 : vector<8x1xf32>
    %656 = vector.broadcast %655 : vector<8x1xf32> to vector<8x24xf32>
    %657 = arith.mulf %656, %566 : vector<8x24xf32>
    %658 = arith.addf %653, %657 : vector<8x24xf32>
    %659 = vector.broadcast %573 : vector<8x1xf32> to vector<8x24xf32>
    %660 = arith.mulf %608, %659 : vector<8x24xf32>
    %c48_173 = arith.constant 48 : index
    %c0_174 = arith.constant 0 : index
    %661 = vector.load %arg28[%c48_173, %c0_174] : memref<64x24xf32, #tpu.memory_space<vmem>>, vector<8x24xf32>
    tpu.vector_store %arg28[%c48_173, %c0_174], %660 {strides = array<i32>} : memref<64x24xf32, #tpu.memory_space<vmem>>, vector<8x24xf32>,
    %662 = vector.broadcast %616 : vector<8x1xf32> to vector<8x24xf32>
    %663 = arith.mulf %651, %662 : vector<8x24xf32>
    %c8_175 = arith.constant 8 : index
    %c0_176 = arith.constant 0 : index
    %664 = vector.load %arg29[%c8_175, %c0_176] : memref<64x24xf32, #tpu.memory_space<vmem>>, vector<8x24xf32>
    tpu.vector_store %arg29[%c8_175, %c0_176], %663 {strides = array<i32>} : memref<64x24xf32, #tpu.memory_space<vmem>>, vector<8x24xf32>,
    %c56_177 = arith.constant 56 : index
    %c0_178 = arith.constant 0 : index
    %665 = vector.load %arg1[%c56_177, %c0_178] : memref<64x1xf32, #tpu.memory_space<vmem>>, vector<8x1xf32>
    %c56_179 = arith.constant 56 : index
    %c0_180 = arith.constant 0 : index
    %666 = vector.load %arg30[%c56_179, %c0_180] : memref<64x96xf32, #tpu.memory_space<vmem>>, vector<8x96xf32>
    %cst_181 = arith.constant dense<0.000000e+00> : vector<8x96xf32>
    %667 = tpu.matmul %608, %14, %cst_181 {dimension_numbers = #tpu.dot_dimension_numbers<[1], [0], [0], [1], [0, 0, 1, 1], [], []>} : vector<8x24xf32>, vector<24x96xf32>, vector<8x96xf32> -> vector<8x96xf32>
    %668 = arith.addf %666, %667 : vector<8x96xf32>
    %669 = vector.extract_strided_slice %668 {offsets = [0, 0], sizes = [8, 24], strides = [1, 1]} : vector<8x96xf32> to vector<8x24xf32>
    %670 = arith.negf %669 : vector<8x24xf32>
    %671 = math.exp %670 : vector<8x24xf32>
    %cst_182 = arith.constant 1.000000e+00 : f32
    %672 = vector.broadcast %cst_182 : f32 to vector<8x24xf32>
    %673 = arith.addf %672, %671 : vector<8x24xf32>
    %674 = arith.divf %672, %673 : vector<8x24xf32>
    %675 = vector.extract_strided_slice %668 {offsets = [0, 24], sizes = [8, 24], strides = [1, 1]} : vector<8x96xf32> to vector<8x24xf32>
    %676 = arith.negf %675 : vector<8x24xf32>
    %677 = math.exp %676 : vector<8x24xf32>
    %cst_183 = arith.constant 1.000000e+00 : f32
    %678 = vector.broadcast %cst_183 : f32 to vector<8x24xf32>
    %679 = arith.addf %678, %677 : vector<8x24xf32>
    %680 = arith.divf %678, %679 : vector<8x24xf32>
    %681 = vector.extract_strided_slice %668 {offsets = [0, 48], sizes = [8, 24], strides = [1, 1]} : vector<8x96xf32> to vector<8x24xf32>
    %682 = math.tanh %681 : vector<8x24xf32>
    %683 = vector.extract_strided_slice %668 {offsets = [0, 72], sizes = [8, 24], strides = [1, 1]} : vector<8x96xf32> to vector<8x24xf32>
    %684 = arith.negf %683 : vector<8x24xf32>
    %685 = math.exp %684 : vector<8x24xf32>
    %cst_184 = arith.constant 1.000000e+00 : f32
    %686 = vector.broadcast %cst_184 : f32 to vector<8x24xf32>
    %687 = arith.addf %686, %685 : vector<8x24xf32>
    %688 = arith.divf %686, %687 : vector<8x24xf32>
    %689 = arith.mulf %680, %615 : vector<8x24xf32>
    %690 = arith.mulf %674, %682 : vector<8x24xf32>
    %691 = arith.addf %689, %690 : vector<8x24xf32>
    %692 = math.tanh %691 : vector<8x24xf32>
    %693 = arith.mulf %688, %692 : vector<8x24xf32>
    %694 = vector.broadcast %665 : vector<8x1xf32> to vector<8x24xf32>
    %695 = arith.mulf %694, %693 : vector<8x24xf32>
    %cst_185 = arith.constant 1.000000e+00 : f32
    %696 = vector.broadcast %cst_185 : f32 to vector<8x1xf32>
    %697 = arith.subf %696, %665 : vector<8x1xf32>
    %698 = vector.broadcast %697 : vector<8x1xf32> to vector<8x24xf32>
    %699 = arith.mulf %698, %608 : vector<8x24xf32>
    %700 = arith.addf %695, %699 : vector<8x24xf32>
    %c0_186 = arith.constant 0 : index
    %c0_187 = arith.constant 0 : index
    %701 = vector.load %arg1[%c0_186, %c0_187] : memref<64x1xf32, #tpu.memory_space<vmem>>, vector<8x1xf32>
    %c0_188 = arith.constant 0 : index
    %c0_189 = arith.constant 0 : index
    %702 = vector.load %arg31[%c0_188, %c0_189] : memref<64x96xf32, #tpu.memory_space<vmem>>, vector<8x96xf32>
    %cst_190 = arith.constant dense<0.000000e+00> : vector<8x96xf32>
    %703 = tpu.matmul %651, %16, %cst_190 {dimension_numbers = #tpu.dot_dimension_numbers<[1], [0], [0], [1], [0, 0, 1, 1], [], []>} : vector<8x24xf32>, vector<24x96xf32>, vector<8x96xf32> -> vector<8x96xf32>
    %704 = arith.addf %702, %703 : vector<8x96xf32>
    %705 = vector.extract_strided_slice %704 {offsets = [0, 0], sizes = [8, 24], strides = [1, 1]} : vector<8x96xf32> to vector<8x24xf32>
    %706 = arith.negf %705 : vector<8x24xf32>
    %707 = math.exp %706 : vector<8x24xf32>
    %cst_191 = arith.constant 1.000000e+00 : f32
    %708 = vector.broadcast %cst_191 : f32 to vector<8x24xf32>
    %709 = arith.addf %708, %707 : vector<8x24xf32>
    %710 = arith.divf %708, %709 : vector<8x24xf32>
    %711 = vector.extract_strided_slice %704 {offsets = [0, 24], sizes = [8, 24], strides = [1, 1]} : vector<8x96xf32> to vector<8x24xf32>
    %712 = arith.negf %711 : vector<8x24xf32>
    %713 = math.exp %712 : vector<8x24xf32>
    %cst_192 = arith.constant 1.000000e+00 : f32
    %714 = vector.broadcast %cst_192 : f32 to vector<8x24xf32>
    %715 = arith.addf %714, %713 : vector<8x24xf32>
    %716 = arith.divf %714, %715 : vector<8x24xf32>
    %717 = vector.extract_strided_slice %704 {offsets = [0, 48], sizes = [8, 24], strides = [1, 1]} : vector<8x96xf32> to vector<8x24xf32>
    %718 = math.tanh %717 : vector<8x24xf32>
    %719 = vector.extract_strided_slice %704 {offsets = [0, 72], sizes = [8, 24], strides = [1, 1]} : vector<8x96xf32> to vector<8x24xf32>
    %720 = arith.negf %719 : vector<8x24xf32>
    %721 = math.exp %720 : vector<8x24xf32>
    %cst_193 = arith.constant 1.000000e+00 : f32
    %722 = vector.broadcast %cst_193 : f32 to vector<8x24xf32>
    %723 = arith.addf %722, %721 : vector<8x24xf32>
    %724 = arith.divf %722, %723 : vector<8x24xf32>
    %725 = arith.mulf %716, %658 : vector<8x24xf32>
    %726 = arith.mulf %710, %718 : vector<8x24xf32>
    %727 = arith.addf %725, %726 : vector<8x24xf32>
    %728 = math.tanh %727 : vector<8x24xf32>
    %729 = arith.mulf %724, %728 : vector<8x24xf32>
    %730 = vector.broadcast %701 : vector<8x1xf32> to vector<8x24xf32>
    %731 = arith.mulf %730, %729 : vector<8x24xf32>
    %cst_194 = arith.constant 1.000000e+00 : f32
    %732 = vector.broadcast %cst_194 : f32 to vector<8x1xf32>
    %733 = arith.subf %732, %701 : vector<8x1xf32>
    %734 = vector.broadcast %733 : vector<8x1xf32> to vector<8x24xf32>
    %735 = arith.mulf %734, %651 : vector<8x24xf32>
    %736 = arith.addf %731, %735 : vector<8x24xf32>
    %737 = vector.broadcast %665 : vector<8x1xf32> to vector<8x24xf32>
    %738 = arith.mulf %700, %737 : vector<8x24xf32>
    %c56_195 = arith.constant 56 : index
    %c0_196 = arith.constant 0 : index
    %739 = vector.load %arg28[%c56_195, %c0_196] : memref<64x24xf32, #tpu.memory_space<vmem>>, vector<8x24xf32>
    tpu.vector_store %arg28[%c56_195, %c0_196], %738 {strides = array<i32>} : memref<64x24xf32, #tpu.memory_space<vmem>>, vector<8x24xf32>,
    %740 = vector.broadcast %701 : vector<8x1xf32> to vector<8x24xf32>
    %741 = arith.mulf %736, %740 : vector<8x24xf32>
    %c0_197 = arith.constant 0 : index
    %c0_198 = arith.constant 0 : index
    %742 = vector.load %arg29[%c0_197, %c0_198] : memref<64x24xf32, #tpu.memory_space<vmem>>, vector<8x24xf32>
    tpu.vector_store %arg29[%c0_197, %c0_198], %741 {strides = array<i32>} : memref<64x24xf32, #tpu.memory_space<vmem>>, vector<8x24xf32>,
    %c0_199 = arith.constant 0 : index
    %c0_200 = arith.constant 0 : index
    %c0_201 = arith.constant 0 : index
    %743 = vector.load %arg3[%c0_199, %c0_200, %c0_201] : memref<1x48x192xbf16, #tpu.memory_space<vmem>>, vector<1x48x192xbf16>
    %744 = vector.shape_cast %743 : vector<1x48x192xbf16> to vector<48x192xbf16>
    %c0_202 = arith.constant 0 : index
    %c0_203 = arith.constant 0 : index
    %745 = vector.load %arg28[%c0_202, %c0_203] : memref<64x24xf32, #tpu.memory_space<vmem>>, vector<64x24xf32>
    %746 = arith.truncf %745 : vector<64x24xf32> to vector<64x24xbf16>
    %747 = vector.extract_strided_slice %744 {offsets = [0, 0], sizes = [24, 192], strides = [1, 1]} : vector<48x192xbf16> to vector<24x192xbf16>
    %cst_204 = arith.constant dense<0.000000e+00> : vector<64x192xf32>
    %748 = tpu.matmul %746, %747, %cst_204 {dimension_numbers = #tpu.dot_dimension_numbers<[1], [0], [0], [1], [0, 0, 1, 1], [], []>} : vector<64x24xbf16>, vector<24x192xbf16>, vector<64x192xf32> -> vector<64x192xf32>
    %c0_205 = arith.constant 0 : index
    %c0_206 = arith.constant 0 : index
    %749 = vector.load %arg29[%c0_205, %c0_206] : memref<64x24xf32, #tpu.memory_space<vmem>>, vector<64x24xf32>
    %750 = arith.truncf %749 : vector<64x24xf32> to vector<64x24xbf16>
    %751 = vector.extract_strided_slice %744 {offsets = [24, 0], sizes = [24, 192], strides = [1, 1]} : vector<48x192xbf16> to vector<24x192xbf16>
    %cst_207 = arith.constant dense<0.000000e+00> : vector<64x192xf32>
    %752 = tpu.matmul %750, %751, %cst_207 {dimension_numbers = #tpu.dot_dimension_numbers<[1], [0], [0], [1], [0, 0, 1, 1], [], []>} : vector<64x24xbf16>, vector<24x192xbf16>, vector<64x192xf32> -> vector<64x192xf32>
    %753 = arith.addf %748, %752 : vector<64x192xf32>
    %c0_208 = arith.constant 0 : index
    %c0_209 = arith.constant 0 : index
    %c0_210 = arith.constant 0 : index
    %754 = vector.load %arg4[%c0_208, %c0_209, %c0_210] : memref<1x1x192xf32, #tpu.memory_space<vmem>>, vector<1x1x192xf32>
    %755 = vector.shape_cast %754 : vector<1x1x192xf32> to vector<1x192xf32>
    %756 = vector.broadcast %755 : vector<1x192xf32> to vector<64x192xf32>
    %757 = arith.addf %753, %756 : vector<64x192xf32>
    %758 = vector.extract_strided_slice %757 {offsets = [0, 0], sizes = [64, 96], strides = [1, 1]} : vector<64x192xf32> to vector<64x96xf32>
    %c0_211 = arith.constant 0 : index
    %c0_212 = arith.constant 0 : index
    %759 = vector.load %arg30[%c0_211, %c0_212] : memref<64x96xf32, #tpu.memory_space<vmem>>, vector<64x96xf32>
    tpu.vector_store %arg30[%c0_211, %c0_212], %758 {strides = array<i32>} : memref<64x96xf32, #tpu.memory_space<vmem>>, vector<64x96xf32>,
    %760 = vector.extract_strided_slice %757 {offsets = [0, 96], sizes = [64, 96], strides = [1, 1]} : vector<64x192xf32> to vector<64x96xf32>
    %c0_213 = arith.constant 0 : index
    %c0_214 = arith.constant 0 : index
    %761 = vector.load %arg31[%c0_213, %c0_214] : memref<64x96xf32, #tpu.memory_space<vmem>>, vector<64x96xf32>
    tpu.vector_store %arg31[%c0_213, %c0_214], %760 {strides = array<i32>} : memref<64x96xf32, #tpu.memory_space<vmem>>, vector<64x96xf32>,
    %c2 = arith.constant 2 : index
    %c0_215 = arith.constant 0 : index
    %c0_216 = arith.constant 0 : index
    %762 = vector.load %arg5[%c2, %c0_215, %c0_216] : memref<4x24x96xf32, #tpu.memory_space<vmem>>, vector<1x24x96xf32>
    %763 = vector.shape_cast %762 : vector<1x24x96xf32> to vector<24x96xf32>
    %c3 = arith.constant 3 : index
    %c0_217 = arith.constant 0 : index
    %c0_218 = arith.constant 0 : index
    %764 = vector.load %arg5[%c3, %c0_217, %c0_218] : memref<4x24x96xf32, #tpu.memory_space<vmem>>, vector<1x24x96xf32>
    %765 = vector.shape_cast %764 : vector<1x24x96xf32> to vector<24x96xf32>
    %cst_219 = arith.constant 0.000000e+00 : f32
    %766 = vector.broadcast %cst_219 : f32 to vector<8x24xf32>
    %cst_220 = arith.constant 0.000000e+00 : f32
    %767 = vector.broadcast %cst_220 : f32 to vector<8x24xf32>
    %cst_221 = arith.constant 0.000000e+00 : f32
    %768 = vector.broadcast %cst_221 : f32 to vector<8x24xf32>
    %cst_222 = arith.constant 0.000000e+00 : f32
    %769 = vector.broadcast %cst_222 : f32 to vector<8x24xf32>
    %cst_223 = arith.constant 0.000000e+00 : f32
    %770 = vector.broadcast %cst_223 : f32 to vector<8x24xf32>
    %cst_224 = arith.constant 0.000000e+00 : f32
    %771 = vector.broadcast %cst_224 : f32 to vector<8x1xf32>
    %c0_225 = arith.constant 0 : index
    %c0_226 = arith.constant 0 : index
    %772 = vector.load %arg1[%c0_225, %c0_226] : memref<64x1xf32, #tpu.memory_space<vmem>>, vector<8x1xf32>
    %c0_227 = arith.constant 0 : index
    %c0_228 = arith.constant 0 : index
    %773 = vector.load %arg30[%c0_227, %c0_228] : memref<64x96xf32, #tpu.memory_space<vmem>>, vector<8x96xf32>
    %cst_229 = arith.constant dense<0.000000e+00> : vector<8x96xf32>
    %774 = tpu.matmul %766, %763, %cst_229 {dimension_numbers = #tpu.dot_dimension_numbers<[1], [0], [0], [1], [0, 0, 1, 1], [], []>} : vector<8x24xf32>, vector<24x96xf32>, vector<8x96xf32> -> vector<8x96xf32>
    %775 = arith.addf %773, %774 : vector<8x96xf32>
    %776 = vector.extract_strided_slice %775 {offsets = [0, 0], sizes = [8, 24], strides = [1, 1]} : vector<8x96xf32> to vector<8x24xf32>
    %777 = arith.negf %776 : vector<8x24xf32>
    %778 = math.exp %777 : vector<8x24xf32>
    %cst_230 = arith.constant 1.000000e+00 : f32
    %779 = vector.broadcast %cst_230 : f32 to vector<8x24xf32>
    %780 = arith.addf %779, %778 : vector<8x24xf32>
    %781 = arith.divf %779, %780 : vector<8x24xf32>
    %782 = vector.extract_strided_slice %775 {offsets = [0, 24], sizes = [8, 24], strides = [1, 1]} : vector<8x96xf32> to vector<8x24xf32>
    %783 = arith.negf %782 : vector<8x24xf32>
    %784 = math.exp %783 : vector<8x24xf32>
    %cst_231 = arith.constant 1.000000e+00 : f32
    %785 = vector.broadcast %cst_231 : f32 to vector<8x24xf32>
    %786 = arith.addf %785, %784 : vector<8x24xf32>
    %787 = arith.divf %785, %786 : vector<8x24xf32>
    %788 = vector.extract_strided_slice %775 {offsets = [0, 48], sizes = [8, 24], strides = [1, 1]} : vector<8x96xf32> to vector<8x24xf32>
    %789 = math.tanh %788 : vector<8x24xf32>
    %790 = vector.extract_strided_slice %775 {offsets = [0, 72], sizes = [8, 24], strides = [1, 1]} : vector<8x96xf32> to vector<8x24xf32>
    %791 = arith.negf %790 : vector<8x24xf32>
    %792 = math.exp %791 : vector<8x24xf32>
    %cst_232 = arith.constant 1.000000e+00 : f32
    %793 = vector.broadcast %cst_232 : f32 to vector<8x24xf32>
    %794 = arith.addf %793, %792 : vector<8x24xf32>
    %795 = arith.divf %793, %794 : vector<8x24xf32>
    %796 = arith.mulf %787, %767 : vector<8x24xf32>
    %797 = arith.mulf %781, %789 : vector<8x24xf32>
    %798 = arith.addf %796, %797 : vector<8x24xf32>
    %799 = math.tanh %798 : vector<8x24xf32>
    %800 = arith.mulf %795, %799 : vector<8x24xf32>
    %801 = vector.broadcast %772 : vector<8x1xf32> to vector<8x24xf32>
    %802 = arith.mulf %801, %800 : vector<8x24xf32>
    %cst_233 = arith.constant 1.000000e+00 : f32
    %803 = vector.broadcast %cst_233 : f32 to vector<8x1xf32>
    %804 = arith.subf %803, %772 : vector<8x1xf32>
    %805 = vector.broadcast %804 : vector<8x1xf32> to vector<8x24xf32>
    %806 = arith.mulf %805, %766 : vector<8x24xf32>
    %807 = arith.addf %802, %806 : vector<8x24xf32>
    %808 = vector.broadcast %772 : vector<8x1xf32> to vector<8x24xf32>
    %809 = arith.mulf %808, %798 : vector<8x24xf32>
    %cst_234 = arith.constant 1.000000e+00 : f32
    %810 = vector.broadcast %cst_234 : f32 to vector<8x1xf32>
    %811 = arith.subf %810, %772 : vector<8x1xf32>
    %812 = vector.broadcast %811 : vector<8x1xf32> to vector<8x24xf32>
    %813 = arith.mulf %812, %767 : vector<8x24xf32>
    %814 = arith.addf %809, %813 : vector<8x24xf32>
    %c56_235 = arith.constant 56 : index
    %c0_236 = arith.constant 0 : index
    %815 = vector.load %arg1[%c56_235, %c0_236] : memref<64x1xf32, #tpu.memory_space<vmem>>, vector<8x1xf32>
    %c56_237 = arith.constant 56 : index
    %c0_238 = arith.constant 0 : index
    %816 = vector.load %arg31[%c56_237, %c0_238] : memref<64x96xf32, #tpu.memory_space<vmem>>, vector<8x96xf32>
    %cst_239 = arith.constant dense<0.000000e+00> : vector<8x96xf32>
    %817 = tpu.matmul %768, %765, %cst_239 {dimension_numbers = #tpu.dot_dimension_numbers<[1], [0], [0], [1], [0, 0, 1, 1], [], []>} : vector<8x24xf32>, vector<24x96xf32>, vector<8x96xf32> -> vector<8x96xf32>
    %818 = arith.addf %816, %817 : vector<8x96xf32>
    %819 = vector.extract_strided_slice %818 {offsets = [0, 0], sizes = [8, 24], strides = [1, 1]} : vector<8x96xf32> to vector<8x24xf32>
    %820 = arith.negf %819 : vector<8x24xf32>
    %821 = math.exp %820 : vector<8x24xf32>
    %cst_240 = arith.constant 1.000000e+00 : f32
    %822 = vector.broadcast %cst_240 : f32 to vector<8x24xf32>
    %823 = arith.addf %822, %821 : vector<8x24xf32>
    %824 = arith.divf %822, %823 : vector<8x24xf32>
    %825 = vector.extract_strided_slice %818 {offsets = [0, 24], sizes = [8, 24], strides = [1, 1]} : vector<8x96xf32> to vector<8x24xf32>
    %826 = arith.negf %825 : vector<8x24xf32>
    %827 = math.exp %826 : vector<8x24xf32>
    %cst_241 = arith.constant 1.000000e+00 : f32
    %828 = vector.broadcast %cst_241 : f32 to vector<8x24xf32>
    %829 = arith.addf %828, %827 : vector<8x24xf32>
    %830 = arith.divf %828, %829 : vector<8x24xf32>
    %831 = vector.extract_strided_slice %818 {offsets = [0, 48], sizes = [8, 24], strides = [1, 1]} : vector<8x96xf32> to vector<8x24xf32>
    %832 = math.tanh %831 : vector<8x24xf32>
    %833 = vector.extract_strided_slice %818 {offsets = [0, 72], sizes = [8, 24], strides = [1, 1]} : vector<8x96xf32> to vector<8x24xf32>
    %834 = arith.negf %833 : vector<8x24xf32>
    %835 = math.exp %834 : vector<8x24xf32>
    %cst_242 = arith.constant 1.000000e+00 : f32
    %836 = vector.broadcast %cst_242 : f32 to vector<8x24xf32>
    %837 = arith.addf %836, %835 : vector<8x24xf32>
    %838 = arith.divf %836, %837 : vector<8x24xf32>
    %839 = arith.mulf %830, %769 : vector<8x24xf32>
    %840 = arith.mulf %824, %832 : vector<8x24xf32>
    %841 = arith.addf %839, %840 : vector<8x24xf32>
    %842 = math.tanh %841 : vector<8x24xf32>
    %843 = arith.mulf %838, %842 : vector<8x24xf32>
    %844 = vector.broadcast %815 : vector<8x1xf32> to vector<8x24xf32>
    %845 = arith.mulf %844, %843 : vector<8x24xf32>
    %cst_243 = arith.constant 1.000000e+00 : f32
    %846 = vector.broadcast %cst_243 : f32 to vector<8x1xf32>
    %847 = arith.subf %846, %815 : vector<8x1xf32>
    %848 = vector.broadcast %847 : vector<8x1xf32> to vector<8x24xf32>
    %849 = arith.mulf %848, %768 : vector<8x24xf32>
    %850 = arith.addf %845, %849 : vector<8x24xf32>
    %851 = vector.broadcast %815 : vector<8x1xf32> to vector<8x24xf32>
    %852 = arith.mulf %851, %841 : vector<8x24xf32>
    %cst_244 = arith.constant 1.000000e+00 : f32
    %853 = vector.broadcast %cst_244 : f32 to vector<8x1xf32>
    %854 = arith.subf %853, %815 : vector<8x1xf32>
    %855 = vector.broadcast %854 : vector<8x1xf32> to vector<8x24xf32>
    %856 = arith.mulf %855, %769 : vector<8x24xf32>
    %857 = arith.addf %852, %856 : vector<8x24xf32>
    %cst_245 = arith.constant 1.000000e+00 : f32
    %858 = vector.broadcast %cst_245 : f32 to vector<8x1xf32>
    %859 = arith.subf %858, %771 : vector<8x1xf32>
    %860 = arith.mulf %815, %859 : vector<8x1xf32>
    %861 = vector.broadcast %860 : vector<8x1xf32> to vector<8x24xf32>
    %862 = arith.mulf %861, %850 : vector<8x24xf32>
    %863 = arith.addf %770, %862 : vector<8x24xf32>
    %864 = arith.maximumf %771, %815 : vector<8x1xf32>
    %c8_246 = arith.constant 8 : index
    %c0_247 = arith.constant 0 : index
    %865 = vector.load %arg1[%c8_246, %c0_247] : memref<64x1xf32, #tpu.memory_space<vmem>>, vector<8x1xf32>
    %c8_248 = arith.constant 8 : index
    %c0_249 = arith.constant 0 : index
    %866 = vector.load %arg30[%c8_248, %c0_249] : memref<64x96xf32, #tpu.memory_space<vmem>>, vector<8x96xf32>
    %cst_250 = arith.constant dense<0.000000e+00> : vector<8x96xf32>
    %867 = tpu.matmul %807, %763, %cst_250 {dimension_numbers = #tpu.dot_dimension_numbers<[1], [0], [0], [1], [0, 0, 1, 1], [], []>} : vector<8x24xf32>, vector<24x96xf32>, vector<8x96xf32> -> vector<8x96xf32>
    %868 = arith.addf %866, %867 : vector<8x96xf32>
    %869 = vector.extract_strided_slice %868 {offsets = [0, 0], sizes = [8, 24], strides = [1, 1]} : vector<8x96xf32> to vector<8x24xf32>
    %870 = arith.negf %869 : vector<8x24xf32>
    %871 = math.exp %870 : vector<8x24xf32>
    %cst_251 = arith.constant 1.000000e+00 : f32
    %872 = vector.broadcast %cst_251 : f32 to vector<8x24xf32>
    %873 = arith.addf %872, %871 : vector<8x24xf32>
    %874 = arith.divf %872, %873 : vector<8x24xf32>
    %875 = vector.extract_strided_slice %868 {offsets = [0, 24], sizes = [8, 24], strides = [1, 1]} : vector<8x96xf32> to vector<8x24xf32>
    %876 = arith.negf %875 : vector<8x24xf32>
    %877 = math.exp %876 : vector<8x24xf32>
    %cst_252 = arith.constant 1.000000e+00 : f32
    %878 = vector.broadcast %cst_252 : f32 to vector<8x24xf32>
    %879 = arith.addf %878, %877 : vector<8x24xf32>
    %880 = arith.divf %878, %879 : vector<8x24xf32>
    %881 = vector.extract_strided_slice %868 {offsets = [0, 48], sizes = [8, 24], strides = [1, 1]} : vector<8x96xf32> to vector<8x24xf32>
    %882 = math.tanh %881 : vector<8x24xf32>
    %883 = vector.extract_strided_slice %868 {offsets = [0, 72], sizes = [8, 24], strides = [1, 1]} : vector<8x96xf32> to vector<8x24xf32>
    %884 = arith.negf %883 : vector<8x24xf32>
    %885 = math.exp %884 : vector<8x24xf32>
    %cst_253 = arith.constant 1.000000e+00 : f32
    %886 = vector.broadcast %cst_253 : f32 to vector<8x24xf32>
    %887 = arith.addf %886, %885 : vector<8x24xf32>
    %888 = arith.divf %886, %887 : vector<8x24xf32>
    %889 = arith.mulf %880, %814 : vector<8x24xf32>
    %890 = arith.mulf %874, %882 : vector<8x24xf32>
    %891 = arith.addf %889, %890 : vector<8x24xf32>
    %892 = math.tanh %891 : vector<8x24xf32>
    %893 = arith.mulf %888, %892 : vector<8x24xf32>
    %894 = vector.broadcast %865 : vector<8x1xf32> to vector<8x24xf32>
    %895 = arith.mulf %894, %893 : vector<8x24xf32>
    %cst_254 = arith.constant 1.000000e+00 : f32
    %896 = vector.broadcast %cst_254 : f32 to vector<8x1xf32>
    %897 = arith.subf %896, %865 : vector<8x1xf32>
    %898 = vector.broadcast %897 : vector<8x1xf32> to vector<8x24xf32>
    %899 = arith.mulf %898, %807 : vector<8x24xf32>
    %900 = arith.addf %895, %899 : vector<8x24xf32>
    %901 = vector.broadcast %865 : vector<8x1xf32> to vector<8x24xf32>
    %902 = arith.mulf %901, %891 : vector<8x24xf32>
    %cst_255 = arith.constant 1.000000e+00 : f32
    %903 = vector.broadcast %cst_255 : f32 to vector<8x1xf32>
    %904 = arith.subf %903, %865 : vector<8x1xf32>
    %905 = vector.broadcast %904 : vector<8x1xf32> to vector<8x24xf32>
    %906 = arith.mulf %905, %814 : vector<8x24xf32>
    %907 = arith.addf %902, %906 : vector<8x24xf32>
    %c48_256 = arith.constant 48 : index
    %c0_257 = arith.constant 0 : index
    %908 = vector.load %arg1[%c48_256, %c0_257] : memref<64x1xf32, #tpu.memory_space<vmem>>, vector<8x1xf32>
    %c48_258 = arith.constant 48 : index
    %c0_259 = arith.constant 0 : index
    %909 = vector.load %arg31[%c48_258, %c0_259] : memref<64x96xf32, #tpu.memory_space<vmem>>, vector<8x96xf32>
    %cst_260 = arith.constant dense<0.000000e+00> : vector<8x96xf32>
    %910 = tpu.matmul %850, %765, %cst_260 {dimension_numbers = #tpu.dot_dimension_numbers<[1], [0], [0], [1], [0, 0, 1, 1], [], []>} : vector<8x24xf32>, vector<24x96xf32>, vector<8x96xf32> -> vector<8x96xf32>
    %911 = arith.addf %909, %910 : vector<8x96xf32>
    %912 = vector.extract_strided_slice %911 {offsets = [0, 0], sizes = [8, 24], strides = [1, 1]} : vector<8x96xf32> to vector<8x24xf32>
    %913 = arith.negf %912 : vector<8x24xf32>
    %914 = math.exp %913 : vector<8x24xf32>
    %cst_261 = arith.constant 1.000000e+00 : f32
    %915 = vector.broadcast %cst_261 : f32 to vector<8x24xf32>
    %916 = arith.addf %915, %914 : vector<8x24xf32>
    %917 = arith.divf %915, %916 : vector<8x24xf32>
    %918 = vector.extract_strided_slice %911 {offsets = [0, 24], sizes = [8, 24], strides = [1, 1]} : vector<8x96xf32> to vector<8x24xf32>
    %919 = arith.negf %918 : vector<8x24xf32>
    %920 = math.exp %919 : vector<8x24xf32>
    %cst_262 = arith.constant 1.000000e+00 : f32
    %921 = vector.broadcast %cst_262 : f32 to vector<8x24xf32>
    %922 = arith.addf %921, %920 : vector<8x24xf32>
    %923 = arith.divf %921, %922 : vector<8x24xf32>
    %924 = vector.extract_strided_slice %911 {offsets = [0, 48], sizes = [8, 24], strides = [1, 1]} : vector<8x96xf32> to vector<8x24xf32>
    %925 = math.tanh %924 : vector<8x24xf32>
    %926 = vector.extract_strided_slice %911 {offsets = [0, 72], sizes = [8, 24], strides = [1, 1]} : vector<8x96xf32> to vector<8x24xf32>
    %927 = arith.negf %926 : vector<8x24xf32>
    %928 = math.exp %927 : vector<8x24xf32>
    %cst_263 = arith.constant 1.000000e+00 : f32
    %929 = vector.broadcast %cst_263 : f32 to vector<8x24xf32>
    %930 = arith.addf %929, %928 : vector<8x24xf32>
    %931 = arith.divf %929, %930 : vector<8x24xf32>
    %932 = arith.mulf %923, %857 : vector<8x24xf32>
    %933 = arith.mulf %917, %925 : vector<8x24xf32>
    %934 = arith.addf %932, %933 : vector<8x24xf32>
    %935 = math.tanh %934 : vector<8x24xf32>
    %936 = arith.mulf %931, %935 : vector<8x24xf32>
    %937 = vector.broadcast %908 : vector<8x1xf32> to vector<8x24xf32>
    %938 = arith.mulf %937, %936 : vector<8x24xf32>
    %cst_264 = arith.constant 1.000000e+00 : f32
    %939 = vector.broadcast %cst_264 : f32 to vector<8x1xf32>
    %940 = arith.subf %939, %908 : vector<8x1xf32>
    %941 = vector.broadcast %940 : vector<8x1xf32> to vector<8x24xf32>
    %942 = arith.mulf %941, %850 : vector<8x24xf32>
    %943 = arith.addf %938, %942 : vector<8x24xf32>
    %944 = vector.broadcast %908 : vector<8x1xf32> to vector<8x24xf32>
    %945 = arith.mulf %944, %934 : vector<8x24xf32>
    %cst_265 = arith.constant 1.000000e+00 : f32
    %946 = vector.broadcast %cst_265 : f32 to vector<8x1xf32>
    %947 = arith.subf %946, %908 : vector<8x1xf32>
    %948 = vector.broadcast %947 : vector<8x1xf32> to vector<8x24xf32>
    %949 = arith.mulf %948, %857 : vector<8x24xf32>
    %950 = arith.addf %945, %949 : vector<8x24xf32>
    %cst_266 = arith.constant 1.000000e+00 : f32
    %951 = vector.broadcast %cst_266 : f32 to vector<8x1xf32>
    %952 = arith.subf %951, %864 : vector<8x1xf32>
    %953 = arith.mulf %908, %952 : vector<8x1xf32>
    %954 = vector.broadcast %953 : vector<8x1xf32> to vector<8x24xf32>
    %955 = arith.mulf %954, %943 : vector<8x24xf32>
    %956 = arith.addf %863, %955 : vector<8x24xf32>
    %957 = arith.maximumf %864, %908 : vector<8x1xf32>
    %c16_267 = arith.constant 16 : index
    %c0_268 = arith.constant 0 : index
    %958 = vector.load %arg1[%c16_267, %c0_268] : memref<64x1xf32, #tpu.memory_space<vmem>>, vector<8x1xf32>
    %c16_269 = arith.constant 16 : index
    %c0_270 = arith.constant 0 : index
    %959 = vector.load %arg30[%c16_269, %c0_270] : memref<64x96xf32, #tpu.memory_space<vmem>>, vector<8x96xf32>
    %cst_271 = arith.constant dense<0.000000e+00> : vector<8x96xf32>
    %960 = tpu.matmul %900, %763, %cst_271 {dimension_numbers = #tpu.dot_dimension_numbers<[1], [0], [0], [1], [0, 0, 1, 1], [], []>} : vector<8x24xf32>, vector<24x96xf32>, vector<8x96xf32> -> vector<8x96xf32>
    %961 = arith.addf %959, %960 : vector<8x96xf32>
    %962 = vector.extract_strided_slice %961 {offsets = [0, 0], sizes = [8, 24], strides = [1, 1]} : vector<8x96xf32> to vector<8x24xf32>
    %963 = arith.negf %962 : vector<8x24xf32>
    %964 = math.exp %963 : vector<8x24xf32>
    %cst_272 = arith.constant 1.000000e+00 : f32
    %965 = vector.broadcast %cst_272 : f32 to vector<8x24xf32>
    %966 = arith.addf %965, %964 : vector<8x24xf32>
    %967 = arith.divf %965, %966 : vector<8x24xf32>
    %968 = vector.extract_strided_slice %961 {offsets = [0, 24], sizes = [8, 24], strides = [1, 1]} : vector<8x96xf32> to vector<8x24xf32>
    %969 = arith.negf %968 : vector<8x24xf32>
    %970 = math.exp %969 : vector<8x24xf32>
    %cst_273 = arith.constant 1.000000e+00 : f32
    %971 = vector.broadcast %cst_273 : f32 to vector<8x24xf32>
    %972 = arith.addf %971, %970 : vector<8x24xf32>
    %973 = arith.divf %971, %972 : vector<8x24xf32>
    %974 = vector.extract_strided_slice %961 {offsets = [0, 48], sizes = [8, 24], strides = [1, 1]} : vector<8x96xf32> to vector<8x24xf32>
    %975 = math.tanh %974 : vector<8x24xf32>
    %976 = vector.extract_strided_slice %961 {offsets = [0, 72], sizes = [8, 24], strides = [1, 1]} : vector<8x96xf32> to vector<8x24xf32>
    %977 = arith.negf %976 : vector<8x24xf32>
    %978 = math.exp %977 : vector<8x24xf32>
    %cst_274 = arith.constant 1.000000e+00 : f32
    %979 = vector.broadcast %cst_274 : f32 to vector<8x24xf32>
    %980 = arith.addf %979, %978 : vector<8x24xf32>
    %981 = arith.divf %979, %980 : vector<8x24xf32>
    %982 = arith.mulf %973, %907 : vector<8x24xf32>
    %983 = arith.mulf %967, %975 : vector<8x24xf32>
    %984 = arith.addf %982, %983 : vector<8x24xf32>
    %985 = math.tanh %984 : vector<8x24xf32>
    %986 = arith.mulf %981, %985 : vector<8x24xf32>
    %987 = vector.broadcast %958 : vector<8x1xf32> to vector<8x24xf32>
    %988 = arith.mulf %987, %986 : vector<8x24xf32>
    %cst_275 = arith.constant 1.000000e+00 : f32
    %989 = vector.broadcast %cst_275 : f32 to vector<8x1xf32>
    %990 = arith.subf %989, %958 : vector<8x1xf32>
    %991 = vector.broadcast %990 : vector<8x1xf32> to vector<8x24xf32>
    %992 = arith.mulf %991, %900 : vector<8x24xf32>
    %993 = arith.addf %988, %992 : vector<8x24xf32>
    %994 = vector.broadcast %958 : vector<8x1xf32> to vector<8x24xf32>
    %995 = arith.mulf %994, %984 : vector<8x24xf32>
    %cst_276 = arith.constant 1.000000e+00 : f32
    %996 = vector.broadcast %cst_276 : f32 to vector<8x1xf32>
    %997 = arith.subf %996, %958 : vector<8x1xf32>
    %998 = vector.broadcast %997 : vector<8x1xf32> to vector<8x24xf32>
    %999 = arith.mulf %998, %907 : vector<8x24xf32>
    %1000 = arith.addf %995, %999 : vector<8x24xf32>
    %c40_277 = arith.constant 40 : index
    %c0_278 = arith.constant 0 : index
    %1001 = vector.load %arg1[%c40_277, %c0_278] : memref<64x1xf32, #tpu.memory_space<vmem>>, vector<8x1xf32>
    %c40_279 = arith.constant 40 : index
    %c0_280 = arith.constant 0 : index
    %1002 = vector.load %arg31[%c40_279, %c0_280] : memref<64x96xf32, #tpu.memory_space<vmem>>, vector<8x96xf32>
    %cst_281 = arith.constant dense<0.000000e+00> : vector<8x96xf32>
    %1003 = tpu.matmul %943, %765, %cst_281 {dimension_numbers = #tpu.dot_dimension_numbers<[1], [0], [0], [1], [0, 0, 1, 1], [], []>} : vector<8x24xf32>, vector<24x96xf32>, vector<8x96xf32> -> vector<8x96xf32>
    %1004 = arith.addf %1002, %1003 : vector<8x96xf32>
    %1005 = vector.extract_strided_slice %1004 {offsets = [0, 0], sizes = [8, 24], strides = [1, 1]} : vector<8x96xf32> to vector<8x24xf32>
    %1006 = arith.negf %1005 : vector<8x24xf32>
    %1007 = math.exp %1006 : vector<8x24xf32>
    %cst_282 = arith.constant 1.000000e+00 : f32
    %1008 = vector.broadcast %cst_282 : f32 to vector<8x24xf32>
    %1009 = arith.addf %1008, %1007 : vector<8x24xf32>
    %1010 = arith.divf %1008, %1009 : vector<8x24xf32>
    %1011 = vector.extract_strided_slice %1004 {offsets = [0, 24], sizes = [8, 24], strides = [1, 1]} : vector<8x96xf32> to vector<8x24xf32>
    %1012 = arith.negf %1011 : vector<8x24xf32>
    %1013 = math.exp %1012 : vector<8x24xf32>
    %cst_283 = arith.constant 1.000000e+00 : f32
    %1014 = vector.broadcast %cst_283 : f32 to vector<8x24xf32>
    %1015 = arith.addf %1014, %1013 : vector<8x24xf32>
    %1016 = arith.divf %1014, %1015 : vector<8x24xf32>
    %1017 = vector.extract_strided_slice %1004 {offsets = [0, 48], sizes = [8, 24], strides = [1, 1]} : vector<8x96xf32> to vector<8x24xf32>
    %1018 = math.tanh %1017 : vector<8x24xf32>
    %1019 = vector.extract_strided_slice %1004 {offsets = [0, 72], sizes = [8, 24], strides = [1, 1]} : vector<8x96xf32> to vector<8x24xf32>
    %1020 = arith.negf %1019 : vector<8x24xf32>
    %1021 = math.exp %1020 : vector<8x24xf32>
    %cst_284 = arith.constant 1.000000e+00 : f32
    %1022 = vector.broadcast %cst_284 : f32 to vector<8x24xf32>
    %1023 = arith.addf %1022, %1021 : vector<8x24xf32>
    %1024 = arith.divf %1022, %1023 : vector<8x24xf32>
    %1025 = arith.mulf %1016, %950 : vector<8x24xf32>
    %1026 = arith.mulf %1010, %1018 : vector<8x24xf32>
    %1027 = arith.addf %1025, %1026 : vector<8x24xf32>
    %1028 = math.tanh %1027 : vector<8x24xf32>
    %1029 = arith.mulf %1024, %1028 : vector<8x24xf32>
    %1030 = vector.broadcast %1001 : vector<8x1xf32> to vector<8x24xf32>
    %1031 = arith.mulf %1030, %1029 : vector<8x24xf32>
    %cst_285 = arith.constant 1.000000e+00 : f32
    %1032 = vector.broadcast %cst_285 : f32 to vector<8x1xf32>
    %1033 = arith.subf %1032, %1001 : vector<8x1xf32>
    %1034 = vector.broadcast %1033 : vector<8x1xf32> to vector<8x24xf32>
    %1035 = arith.mulf %1034, %943 : vector<8x24xf32>
    %1036 = arith.addf %1031, %1035 : vector<8x24xf32>
    %1037 = vector.broadcast %1001 : vector<8x1xf32> to vector<8x24xf32>
    %1038 = arith.mulf %1037, %1027 : vector<8x24xf32>
    %cst_286 = arith.constant 1.000000e+00 : f32
    %1039 = vector.broadcast %cst_286 : f32 to vector<8x1xf32>
    %1040 = arith.subf %1039, %1001 : vector<8x1xf32>
    %1041 = vector.broadcast %1040 : vector<8x1xf32> to vector<8x24xf32>
    %1042 = arith.mulf %1041, %950 : vector<8x24xf32>
    %1043 = arith.addf %1038, %1042 : vector<8x24xf32>
    %cst_287 = arith.constant 1.000000e+00 : f32
    %1044 = vector.broadcast %cst_287 : f32 to vector<8x1xf32>
    %1045 = arith.subf %1044, %957 : vector<8x1xf32>
    %1046 = arith.mulf %1001, %1045 : vector<8x1xf32>
    %1047 = vector.broadcast %1046 : vector<8x1xf32> to vector<8x24xf32>
    %1048 = arith.mulf %1047, %1036 : vector<8x24xf32>
    %1049 = arith.addf %956, %1048 : vector<8x24xf32>
    %1050 = arith.maximumf %957, %1001 : vector<8x1xf32>
    %c24_288 = arith.constant 24 : index
    %c0_289 = arith.constant 0 : index
    %1051 = vector.load %arg1[%c24_288, %c0_289] : memref<64x1xf32, #tpu.memory_space<vmem>>, vector<8x1xf32>
    %c24_290 = arith.constant 24 : index
    %c0_291 = arith.constant 0 : index
    %1052 = vector.load %arg30[%c24_290, %c0_291] : memref<64x96xf32, #tpu.memory_space<vmem>>, vector<8x96xf32>
    %cst_292 = arith.constant dense<0.000000e+00> : vector<8x96xf32>
    %1053 = tpu.matmul %993, %763, %cst_292 {dimension_numbers = #tpu.dot_dimension_numbers<[1], [0], [0], [1], [0, 0, 1, 1], [], []>} : vector<8x24xf32>, vector<24x96xf32>, vector<8x96xf32> -> vector<8x96xf32>
    %1054 = arith.addf %1052, %1053 : vector<8x96xf32>
    %1055 = vector.extract_strided_slice %1054 {offsets = [0, 0], sizes = [8, 24], strides = [1, 1]} : vector<8x96xf32> to vector<8x24xf32>
    %1056 = arith.negf %1055 : vector<8x24xf32>
    %1057 = math.exp %1056 : vector<8x24xf32>
    %cst_293 = arith.constant 1.000000e+00 : f32
    %1058 = vector.broadcast %cst_293 : f32 to vector<8x24xf32>
    %1059 = arith.addf %1058, %1057 : vector<8x24xf32>
    %1060 = arith.divf %1058, %1059 : vector<8x24xf32>
    %1061 = vector.extract_strided_slice %1054 {offsets = [0, 24], sizes = [8, 24], strides = [1, 1]} : vector<8x96xf32> to vector<8x24xf32>
    %1062 = arith.negf %1061 : vector<8x24xf32>
    %1063 = math.exp %1062 : vector<8x24xf32>
    %cst_294 = arith.constant 1.000000e+00 : f32
    %1064 = vector.broadcast %cst_294 : f32 to vector<8x24xf32>
    %1065 = arith.addf %1064, %1063 : vector<8x24xf32>
    %1066 = arith.divf %1064, %1065 : vector<8x24xf32>
    %1067 = vector.extract_strided_slice %1054 {offsets = [0, 48], sizes = [8, 24], strides = [1, 1]} : vector<8x96xf32> to vector<8x24xf32>
    %1068 = math.tanh %1067 : vector<8x24xf32>
    %1069 = vector.extract_strided_slice %1054 {offsets = [0, 72], sizes = [8, 24], strides = [1, 1]} : vector<8x96xf32> to vector<8x24xf32>
    %1070 = arith.negf %1069 : vector<8x24xf32>
    %1071 = math.exp %1070 : vector<8x24xf32>
    %cst_295 = arith.constant 1.000000e+00 : f32
    %1072 = vector.broadcast %cst_295 : f32 to vector<8x24xf32>
    %1073 = arith.addf %1072, %1071 : vector<8x24xf32>
    %1074 = arith.divf %1072, %1073 : vector<8x24xf32>
    %1075 = arith.mulf %1066, %1000 : vector<8x24xf32>
    %1076 = arith.mulf %1060, %1068 : vector<8x24xf32>
    %1077 = arith.addf %1075, %1076 : vector<8x24xf32>
    %1078 = math.tanh %1077 : vector<8x24xf32>
    %1079 = arith.mulf %1074, %1078 : vector<8x24xf32>
    %1080 = vector.broadcast %1051 : vector<8x1xf32> to vector<8x24xf32>
    %1081 = arith.mulf %1080, %1079 : vector<8x24xf32>
    %cst_296 = arith.constant 1.000000e+00 : f32
    %1082 = vector.broadcast %cst_296 : f32 to vector<8x1xf32>
    %1083 = arith.subf %1082, %1051 : vector<8x1xf32>
    %1084 = vector.broadcast %1083 : vector<8x1xf32> to vector<8x24xf32>
    %1085 = arith.mulf %1084, %993 : vector<8x24xf32>
    %1086 = arith.addf %1081, %1085 : vector<8x24xf32>
    %1087 = vector.broadcast %1051 : vector<8x1xf32> to vector<8x24xf32>
    %1088 = arith.mulf %1087, %1077 : vector<8x24xf32>
    %cst_297 = arith.constant 1.000000e+00 : f32
    %1089 = vector.broadcast %cst_297 : f32 to vector<8x1xf32>
    %1090 = arith.subf %1089, %1051 : vector<8x1xf32>
    %1091 = vector.broadcast %1090 : vector<8x1xf32> to vector<8x24xf32>
    %1092 = arith.mulf %1091, %1000 : vector<8x24xf32>
    %1093 = arith.addf %1088, %1092 : vector<8x24xf32>
    %c32_298 = arith.constant 32 : index
    %c0_299 = arith.constant 0 : index
    %1094 = vector.load %arg1[%c32_298, %c0_299] : memref<64x1xf32, #tpu.memory_space<vmem>>, vector<8x1xf32>
    %c32_300 = arith.constant 32 : index
    %c0_301 = arith.constant 0 : index
    %1095 = vector.load %arg31[%c32_300, %c0_301] : memref<64x96xf32, #tpu.memory_space<vmem>>, vector<8x96xf32>
    %cst_302 = arith.constant dense<0.000000e+00> : vector<8x96xf32>
    %1096 = tpu.matmul %1036, %765, %cst_302 {dimension_numbers = #tpu.dot_dimension_numbers<[1], [0], [0], [1], [0, 0, 1, 1], [], []>} : vector<8x24xf32>, vector<24x96xf32>, vector<8x96xf32> -> vector<8x96xf32>
    %1097 = arith.addf %1095, %1096 : vector<8x96xf32>
    %1098 = vector.extract_strided_slice %1097 {offsets = [0, 0], sizes = [8, 24], strides = [1, 1]} : vector<8x96xf32> to vector<8x24xf32>
    %1099 = arith.negf %1098 : vector<8x24xf32>
    %1100 = math.exp %1099 : vector<8x24xf32>
    %cst_303 = arith.constant 1.000000e+00 : f32
    %1101 = vector.broadcast %cst_303 : f32 to vector<8x24xf32>
    %1102 = arith.addf %1101, %1100 : vector<8x24xf32>
    %1103 = arith.divf %1101, %1102 : vector<8x24xf32>
    %1104 = vector.extract_strided_slice %1097 {offsets = [0, 24], sizes = [8, 24], strides = [1, 1]} : vector<8x96xf32> to vector<8x24xf32>
    %1105 = arith.negf %1104 : vector<8x24xf32>
    %1106 = math.exp %1105 : vector<8x24xf32>
    %cst_304 = arith.constant 1.000000e+00 : f32
    %1107 = vector.broadcast %cst_304 : f32 to vector<8x24xf32>
    %1108 = arith.addf %1107, %1106 : vector<8x24xf32>
    %1109 = arith.divf %1107, %1108 : vector<8x24xf32>
    %1110 = vector.extract_strided_slice %1097 {offsets = [0, 48], sizes = [8, 24], strides = [1, 1]} : vector<8x96xf32> to vector<8x24xf32>
    %1111 = math.tanh %1110 : vector<8x24xf32>
    %1112 = vector.extract_strided_slice %1097 {offsets = [0, 72], sizes = [8, 24], strides = [1, 1]} : vector<8x96xf32> to vector<8x24xf32>
    %1113 = arith.negf %1112 : vector<8x24xf32>
    %1114 = math.exp %1113 : vector<8x24xf32>
    %cst_305 = arith.constant 1.000000e+00 : f32
    %1115 = vector.broadcast %cst_305 : f32 to vector<8x24xf32>
    %1116 = arith.addf %1115, %1114 : vector<8x24xf32>
    %1117 = arith.divf %1115, %1116 : vector<8x24xf32>
    %1118 = arith.mulf %1109, %1043 : vector<8x24xf32>
    %1119 = arith.mulf %1103, %1111 : vector<8x24xf32>
    %1120 = arith.addf %1118, %1119 : vector<8x24xf32>
    %1121 = math.tanh %1120 : vector<8x24xf32>
    %1122 = arith.mulf %1117, %1121 : vector<8x24xf32>
    %1123 = vector.broadcast %1094 : vector<8x1xf32> to vector<8x24xf32>
    %1124 = arith.mulf %1123, %1122 : vector<8x24xf32>
    %cst_306 = arith.constant 1.000000e+00 : f32
    %1125 = vector.broadcast %cst_306 : f32 to vector<8x1xf32>
    %1126 = arith.subf %1125, %1094 : vector<8x1xf32>
    %1127 = vector.broadcast %1126 : vector<8x1xf32> to vector<8x24xf32>
    %1128 = arith.mulf %1127, %1036 : vector<8x24xf32>
    %1129 = arith.addf %1124, %1128 : vector<8x24xf32>
    %1130 = vector.broadcast %1094 : vector<8x1xf32> to vector<8x24xf32>
    %1131 = arith.mulf %1130, %1120 : vector<8x24xf32>
    %cst_307 = arith.constant 1.000000e+00 : f32
    %1132 = vector.broadcast %cst_307 : f32 to vector<8x1xf32>
    %1133 = arith.subf %1132, %1094 : vector<8x1xf32>
    %1134 = vector.broadcast %1133 : vector<8x1xf32> to vector<8x24xf32>
    %1135 = arith.mulf %1134, %1043 : vector<8x24xf32>
    %1136 = arith.addf %1131, %1135 : vector<8x24xf32>
    %cst_308 = arith.constant 1.000000e+00 : f32
    %1137 = vector.broadcast %cst_308 : f32 to vector<8x1xf32>
    %1138 = arith.subf %1137, %1050 : vector<8x1xf32>
    %1139 = arith.mulf %1094, %1138 : vector<8x1xf32>
    %1140 = vector.broadcast %1139 : vector<8x1xf32> to vector<8x24xf32>
    %1141 = arith.mulf %1140, %1129 : vector<8x24xf32>
    %1142 = arith.addf %1049, %1141 : vector<8x24xf32>
    %1143 = arith.maximumf %1050, %1094 : vector<8x1xf32>
    %c32_309 = arith.constant 32 : index
    %c0_310 = arith.constant 0 : index
    %1144 = vector.load %arg1[%c32_309, %c0_310] : memref<64x1xf32, #tpu.memory_space<vmem>>, vector<8x1xf32>
    %c32_311 = arith.constant 32 : index
    %c0_312 = arith.constant 0 : index
    %1145 = vector.load %arg30[%c32_311, %c0_312] : memref<64x96xf32, #tpu.memory_space<vmem>>, vector<8x96xf32>
    %cst_313 = arith.constant dense<0.000000e+00> : vector<8x96xf32>
    %1146 = tpu.matmul %1086, %763, %cst_313 {dimension_numbers = #tpu.dot_dimension_numbers<[1], [0], [0], [1], [0, 0, 1, 1], [], []>} : vector<8x24xf32>, vector<24x96xf32>, vector<8x96xf32> -> vector<8x96xf32>
    %1147 = arith.addf %1145, %1146 : vector<8x96xf32>
    %1148 = vector.extract_strided_slice %1147 {offsets = [0, 0], sizes = [8, 24], strides = [1, 1]} : vector<8x96xf32> to vector<8x24xf32>
    %1149 = arith.negf %1148 : vector<8x24xf32>
    %1150 = math.exp %1149 : vector<8x24xf32>
    %cst_314 = arith.constant 1.000000e+00 : f32
    %1151 = vector.broadcast %cst_314 : f32 to vector<8x24xf32>
    %1152 = arith.addf %1151, %1150 : vector<8x24xf32>
    %1153 = arith.divf %1151, %1152 : vector<8x24xf32>
    %1154 = vector.extract_strided_slice %1147 {offsets = [0, 24], sizes = [8, 24], strides = [1, 1]} : vector<8x96xf32> to vector<8x24xf32>
    %1155 = arith.negf %1154 : vector<8x24xf32>
    %1156 = math.exp %1155 : vector<8x24xf32>
    %cst_315 = arith.constant 1.000000e+00 : f32
    %1157 = vector.broadcast %cst_315 : f32 to vector<8x24xf32>
    %1158 = arith.addf %1157, %1156 : vector<8x24xf32>
    %1159 = arith.divf %1157, %1158 : vector<8x24xf32>
    %1160 = vector.extract_strided_slice %1147 {offsets = [0, 48], sizes = [8, 24], strides = [1, 1]} : vector<8x96xf32> to vector<8x24xf32>
    %1161 = math.tanh %1160 : vector<8x24xf32>
    %1162 = vector.extract_strided_slice %1147 {offsets = [0, 72], sizes = [8, 24], strides = [1, 1]} : vector<8x96xf32> to vector<8x24xf32>
    %1163 = arith.negf %1162 : vector<8x24xf32>
    %1164 = math.exp %1163 : vector<8x24xf32>
    %cst_316 = arith.constant 1.000000e+00 : f32
    %1165 = vector.broadcast %cst_316 : f32 to vector<8x24xf32>
    %1166 = arith.addf %1165, %1164 : vector<8x24xf32>
    %1167 = arith.divf %1165, %1166 : vector<8x24xf32>
    %1168 = arith.mulf %1159, %1093 : vector<8x24xf32>
    %1169 = arith.mulf %1153, %1161 : vector<8x24xf32>
    %1170 = arith.addf %1168, %1169 : vector<8x24xf32>
    %1171 = math.tanh %1170 : vector<8x24xf32>
    %1172 = arith.mulf %1167, %1171 : vector<8x24xf32>
    %1173 = vector.broadcast %1144 : vector<8x1xf32> to vector<8x24xf32>
    %1174 = arith.mulf %1173, %1172 : vector<8x24xf32>
    %cst_317 = arith.constant 1.000000e+00 : f32
    %1175 = vector.broadcast %cst_317 : f32 to vector<8x1xf32>
    %1176 = arith.subf %1175, %1144 : vector<8x1xf32>
    %1177 = vector.broadcast %1176 : vector<8x1xf32> to vector<8x24xf32>
    %1178 = arith.mulf %1177, %1086 : vector<8x24xf32>
    %1179 = arith.addf %1174, %1178 : vector<8x24xf32>
    %1180 = vector.broadcast %1144 : vector<8x1xf32> to vector<8x24xf32>
    %1181 = arith.mulf %1180, %1170 : vector<8x24xf32>
    %cst_318 = arith.constant 1.000000e+00 : f32
    %1182 = vector.broadcast %cst_318 : f32 to vector<8x1xf32>
    %1183 = arith.subf %1182, %1144 : vector<8x1xf32>
    %1184 = vector.broadcast %1183 : vector<8x1xf32> to vector<8x24xf32>
    %1185 = arith.mulf %1184, %1093 : vector<8x24xf32>
    %1186 = arith.addf %1181, %1185 : vector<8x24xf32>
    %c24_319 = arith.constant 24 : index
    %c0_320 = arith.constant 0 : index
    %1187 = vector.load %arg1[%c24_319, %c0_320] : memref<64x1xf32, #tpu.memory_space<vmem>>, vector<8x1xf32>
    %c24_321 = arith.constant 24 : index
    %c0_322 = arith.constant 0 : index
    %1188 = vector.load %arg31[%c24_321, %c0_322] : memref<64x96xf32, #tpu.memory_space<vmem>>, vector<8x96xf32>
    %cst_323 = arith.constant dense<0.000000e+00> : vector<8x96xf32>
    %1189 = tpu.matmul %1129, %765, %cst_323 {dimension_numbers = #tpu.dot_dimension_numbers<[1], [0], [0], [1], [0, 0, 1, 1], [], []>} : vector<8x24xf32>, vector<24x96xf32>, vector<8x96xf32> -> vector<8x96xf32>
    %1190 = arith.addf %1188, %1189 : vector<8x96xf32>
    %1191 = vector.extract_strided_slice %1190 {offsets = [0, 0], sizes = [8, 24], strides = [1, 1]} : vector<8x96xf32> to vector<8x24xf32>
    %1192 = arith.negf %1191 : vector<8x24xf32>
    %1193 = math.exp %1192 : vector<8x24xf32>
    %cst_324 = arith.constant 1.000000e+00 : f32
    %1194 = vector.broadcast %cst_324 : f32 to vector<8x24xf32>
    %1195 = arith.addf %1194, %1193 : vector<8x24xf32>
    %1196 = arith.divf %1194, %1195 : vector<8x24xf32>
    %1197 = vector.extract_strided_slice %1190 {offsets = [0, 24], sizes = [8, 24], strides = [1, 1]} : vector<8x96xf32> to vector<8x24xf32>
    %1198 = arith.negf %1197 : vector<8x24xf32>
    %1199 = math.exp %1198 : vector<8x24xf32>
    %cst_325 = arith.constant 1.000000e+00 : f32
    %1200 = vector.broadcast %cst_325 : f32 to vector<8x24xf32>
    %1201 = arith.addf %1200, %1199 : vector<8x24xf32>
    %1202 = arith.divf %1200, %1201 : vector<8x24xf32>
    %1203 = vector.extract_strided_slice %1190 {offsets = [0, 48], sizes = [8, 24], strides = [1, 1]} : vector<8x96xf32> to vector<8x24xf32>
    %1204 = math.tanh %1203 : vector<8x24xf32>
    %1205 = vector.extract_strided_slice %1190 {offsets = [0, 72], sizes = [8, 24], strides = [1, 1]} : vector<8x96xf32> to vector<8x24xf32>
    %1206 = arith.negf %1205 : vector<8x24xf32>
    %1207 = math.exp %1206 : vector<8x24xf32>
    %cst_326 = arith.constant 1.000000e+00 : f32
    %1208 = vector.broadcast %cst_326 : f32 to vector<8x24xf32>
    %1209 = arith.addf %1208, %1207 : vector<8x24xf32>
    %1210 = arith.divf %1208, %1209 : vector<8x24xf32>
    %1211 = arith.mulf %1202, %1136 : vector<8x24xf32>
    %1212 = arith.mulf %1196, %1204 : vector<8x24xf32>
    %1213 = arith.addf %1211, %1212 : vector<8x24xf32>
    %1214 = math.tanh %1213 : vector<8x24xf32>
    %1215 = arith.mulf %1210, %1214 : vector<8x24xf32>
    %1216 = vector.broadcast %1187 : vector<8x1xf32> to vector<8x24xf32>
    %1217 = arith.mulf %1216, %1215 : vector<8x24xf32>
    %cst_327 = arith.constant 1.000000e+00 : f32
    %1218 = vector.broadcast %cst_327 : f32 to vector<8x1xf32>
    %1219 = arith.subf %1218, %1187 : vector<8x1xf32>
    %1220 = vector.broadcast %1219 : vector<8x1xf32> to vector<8x24xf32>
    %1221 = arith.mulf %1220, %1129 : vector<8x24xf32>
    %1222 = arith.addf %1217, %1221 : vector<8x24xf32>
    %1223 = vector.broadcast %1187 : vector<8x1xf32> to vector<8x24xf32>
    %1224 = arith.mulf %1223, %1213 : vector<8x24xf32>
    %cst_328 = arith.constant 1.000000e+00 : f32
    %1225 = vector.broadcast %cst_328 : f32 to vector<8x1xf32>
    %1226 = arith.subf %1225, %1187 : vector<8x1xf32>
    %1227 = vector.broadcast %1226 : vector<8x1xf32> to vector<8x24xf32>
    %1228 = arith.mulf %1227, %1136 : vector<8x24xf32>
    %1229 = arith.addf %1224, %1228 : vector<8x24xf32>
    %cst_329 = arith.constant 1.000000e+00 : f32
    %1230 = vector.broadcast %cst_329 : f32 to vector<8x1xf32>
    %1231 = arith.subf %1230, %1143 : vector<8x1xf32>
    %1232 = arith.mulf %1187, %1231 : vector<8x1xf32>
    %1233 = vector.broadcast %1232 : vector<8x1xf32> to vector<8x24xf32>
    %1234 = arith.mulf %1233, %1222 : vector<8x24xf32>
    %1235 = arith.addf %1142, %1234 : vector<8x24xf32>
    %1236 = arith.maximumf %1143, %1187 : vector<8x1xf32>
    %c40_330 = arith.constant 40 : index
    %c0_331 = arith.constant 0 : index
    %1237 = vector.load %arg1[%c40_330, %c0_331] : memref<64x1xf32, #tpu.memory_space<vmem>>, vector<8x1xf32>
    %c40_332 = arith.constant 40 : index
    %c0_333 = arith.constant 0 : index
    %1238 = vector.load %arg30[%c40_332, %c0_333] : memref<64x96xf32, #tpu.memory_space<vmem>>, vector<8x96xf32>
    %cst_334 = arith.constant dense<0.000000e+00> : vector<8x96xf32>
    %1239 = tpu.matmul %1179, %763, %cst_334 {dimension_numbers = #tpu.dot_dimension_numbers<[1], [0], [0], [1], [0, 0, 1, 1], [], []>} : vector<8x24xf32>, vector<24x96xf32>, vector<8x96xf32> -> vector<8x96xf32>
    %1240 = arith.addf %1238, %1239 : vector<8x96xf32>
    %1241 = vector.extract_strided_slice %1240 {offsets = [0, 0], sizes = [8, 24], strides = [1, 1]} : vector<8x96xf32> to vector<8x24xf32>
    %1242 = arith.negf %1241 : vector<8x24xf32>
    %1243 = math.exp %1242 : vector<8x24xf32>
    %cst_335 = arith.constant 1.000000e+00 : f32
    %1244 = vector.broadcast %cst_335 : f32 to vector<8x24xf32>
    %1245 = arith.addf %1244, %1243 : vector<8x24xf32>
    %1246 = arith.divf %1244, %1245 : vector<8x24xf32>
    %1247 = vector.extract_strided_slice %1240 {offsets = [0, 24], sizes = [8, 24], strides = [1, 1]} : vector<8x96xf32> to vector<8x24xf32>
    %1248 = arith.negf %1247 : vector<8x24xf32>
    %1249 = math.exp %1248 : vector<8x24xf32>
    %cst_336 = arith.constant 1.000000e+00 : f32
    %1250 = vector.broadcast %cst_336 : f32 to vector<8x24xf32>
    %1251 = arith.addf %1250, %1249 : vector<8x24xf32>
    %1252 = arith.divf %1250, %1251 : vector<8x24xf32>
    %1253 = vector.extract_strided_slice %1240 {offsets = [0, 48], sizes = [8, 24], strides = [1, 1]} : vector<8x96xf32> to vector<8x24xf32>
    %1254 = math.tanh %1253 : vector<8x24xf32>
    %1255 = vector.extract_strided_slice %1240 {offsets = [0, 72], sizes = [8, 24], strides = [1, 1]} : vector<8x96xf32> to vector<8x24xf32>
    %1256 = arith.negf %1255 : vector<8x24xf32>
    %1257 = math.exp %1256 : vector<8x24xf32>
    %cst_337 = arith.constant 1.000000e+00 : f32
    %1258 = vector.broadcast %cst_337 : f32 to vector<8x24xf32>
    %1259 = arith.addf %1258, %1257 : vector<8x24xf32>
    %1260 = arith.divf %1258, %1259 : vector<8x24xf32>
    %1261 = arith.mulf %1252, %1186 : vector<8x24xf32>
    %1262 = arith.mulf %1246, %1254 : vector<8x24xf32>
    %1263 = arith.addf %1261, %1262 : vector<8x24xf32>
    %1264 = math.tanh %1263 : vector<8x24xf32>
    %1265 = arith.mulf %1260, %1264 : vector<8x24xf32>
    %1266 = vector.broadcast %1237 : vector<8x1xf32> to vector<8x24xf32>
    %1267 = arith.mulf %1266, %1265 : vector<8x24xf32>
    %cst_338 = arith.constant 1.000000e+00 : f32
    %1268 = vector.broadcast %cst_338 : f32 to vector<8x1xf32>
    %1269 = arith.subf %1268, %1237 : vector<8x1xf32>
    %1270 = vector.broadcast %1269 : vector<8x1xf32> to vector<8x24xf32>
    %1271 = arith.mulf %1270, %1179 : vector<8x24xf32>
    %1272 = arith.addf %1267, %1271 : vector<8x24xf32>
    %1273 = vector.broadcast %1237 : vector<8x1xf32> to vector<8x24xf32>
    %1274 = arith.mulf %1273, %1263 : vector<8x24xf32>
    %cst_339 = arith.constant 1.000000e+00 : f32
    %1275 = vector.broadcast %cst_339 : f32 to vector<8x1xf32>
    %1276 = arith.subf %1275, %1237 : vector<8x1xf32>
    %1277 = vector.broadcast %1276 : vector<8x1xf32> to vector<8x24xf32>
    %1278 = arith.mulf %1277, %1186 : vector<8x24xf32>
    %1279 = arith.addf %1274, %1278 : vector<8x24xf32>
    %c16_340 = arith.constant 16 : index
    %c0_341 = arith.constant 0 : index
    %1280 = vector.load %arg1[%c16_340, %c0_341] : memref<64x1xf32, #tpu.memory_space<vmem>>, vector<8x1xf32>
    %c16_342 = arith.constant 16 : index
    %c0_343 = arith.constant 0 : index
    %1281 = vector.load %arg31[%c16_342, %c0_343] : memref<64x96xf32, #tpu.memory_space<vmem>>, vector<8x96xf32>
    %cst_344 = arith.constant dense<0.000000e+00> : vector<8x96xf32>
    %1282 = tpu.matmul %1222, %765, %cst_344 {dimension_numbers = #tpu.dot_dimension_numbers<[1], [0], [0], [1], [0, 0, 1, 1], [], []>} : vector<8x24xf32>, vector<24x96xf32>, vector<8x96xf32> -> vector<8x96xf32>
    %1283 = arith.addf %1281, %1282 : vector<8x96xf32>
    %1284 = vector.extract_strided_slice %1283 {offsets = [0, 0], sizes = [8, 24], strides = [1, 1]} : vector<8x96xf32> to vector<8x24xf32>
    %1285 = arith.negf %1284 : vector<8x24xf32>
    %1286 = math.exp %1285 : vector<8x24xf32>
    %cst_345 = arith.constant 1.000000e+00 : f32
    %1287 = vector.broadcast %cst_345 : f32 to vector<8x24xf32>
    %1288 = arith.addf %1287, %1286 : vector<8x24xf32>
    %1289 = arith.divf %1287, %1288 : vector<8x24xf32>
    %1290 = vector.extract_strided_slice %1283 {offsets = [0, 24], sizes = [8, 24], strides = [1, 1]} : vector<8x96xf32> to vector<8x24xf32>
    %1291 = arith.negf %1290 : vector<8x24xf32>
    %1292 = math.exp %1291 : vector<8x24xf32>
    %cst_346 = arith.constant 1.000000e+00 : f32
    %1293 = vector.broadcast %cst_346 : f32 to vector<8x24xf32>
    %1294 = arith.addf %1293, %1292 : vector<8x24xf32>
    %1295 = arith.divf %1293, %1294 : vector<8x24xf32>
    %1296 = vector.extract_strided_slice %1283 {offsets = [0, 48], sizes = [8, 24], strides = [1, 1]} : vector<8x96xf32> to vector<8x24xf32>
    %1297 = math.tanh %1296 : vector<8x24xf32>
    %1298 = vector.extract_strided_slice %1283 {offsets = [0, 72], sizes = [8, 24], strides = [1, 1]} : vector<8x96xf32> to vector<8x24xf32>
    %1299 = arith.negf %1298 : vector<8x24xf32>
    %1300 = math.exp %1299 : vector<8x24xf32>
    %cst_347 = arith.constant 1.000000e+00 : f32
    %1301 = vector.broadcast %cst_347 : f32 to vector<8x24xf32>
    %1302 = arith.addf %1301, %1300 : vector<8x24xf32>
    %1303 = arith.divf %1301, %1302 : vector<8x24xf32>
    %1304 = arith.mulf %1295, %1229 : vector<8x24xf32>
    %1305 = arith.mulf %1289, %1297 : vector<8x24xf32>
    %1306 = arith.addf %1304, %1305 : vector<8x24xf32>
    %1307 = math.tanh %1306 : vector<8x24xf32>
    %1308 = arith.mulf %1303, %1307 : vector<8x24xf32>
    %1309 = vector.broadcast %1280 : vector<8x1xf32> to vector<8x24xf32>
    %1310 = arith.mulf %1309, %1308 : vector<8x24xf32>
    %cst_348 = arith.constant 1.000000e+00 : f32
    %1311 = vector.broadcast %cst_348 : f32 to vector<8x1xf32>
    %1312 = arith.subf %1311, %1280 : vector<8x1xf32>
    %1313 = vector.broadcast %1312 : vector<8x1xf32> to vector<8x24xf32>
    %1314 = arith.mulf %1313, %1222 : vector<8x24xf32>
    %1315 = arith.addf %1310, %1314 : vector<8x24xf32>
    %1316 = vector.broadcast %1280 : vector<8x1xf32> to vector<8x24xf32>
    %1317 = arith.mulf %1316, %1306 : vector<8x24xf32>
    %cst_349 = arith.constant 1.000000e+00 : f32
    %1318 = vector.broadcast %cst_349 : f32 to vector<8x1xf32>
    %1319 = arith.subf %1318, %1280 : vector<8x1xf32>
    %1320 = vector.broadcast %1319 : vector<8x1xf32> to vector<8x24xf32>
    %1321 = arith.mulf %1320, %1229 : vector<8x24xf32>
    %1322 = arith.addf %1317, %1321 : vector<8x24xf32>
    %cst_350 = arith.constant 1.000000e+00 : f32
    %1323 = vector.broadcast %cst_350 : f32 to vector<8x1xf32>
    %1324 = arith.subf %1323, %1236 : vector<8x1xf32>
    %1325 = arith.mulf %1280, %1324 : vector<8x1xf32>
    %1326 = vector.broadcast %1325 : vector<8x1xf32> to vector<8x24xf32>
    %1327 = arith.mulf %1326, %1315 : vector<8x24xf32>
    %1328 = arith.addf %1235, %1327 : vector<8x24xf32>
    %1329 = arith.maximumf %1236, %1280 : vector<8x1xf32>
    %c48_351 = arith.constant 48 : index
    %c0_352 = arith.constant 0 : index
    %1330 = vector.load %arg1[%c48_351, %c0_352] : memref<64x1xf32, #tpu.memory_space<vmem>>, vector<8x1xf32>
    %c48_353 = arith.constant 48 : index
    %c0_354 = arith.constant 0 : index
    %1331 = vector.load %arg30[%c48_353, %c0_354] : memref<64x96xf32, #tpu.memory_space<vmem>>, vector<8x96xf32>
    %cst_355 = arith.constant dense<0.000000e+00> : vector<8x96xf32>
    %1332 = tpu.matmul %1272, %763, %cst_355 {dimension_numbers = #tpu.dot_dimension_numbers<[1], [0], [0], [1], [0, 0, 1, 1], [], []>} : vector<8x24xf32>, vector<24x96xf32>, vector<8x96xf32> -> vector<8x96xf32>
    %1333 = arith.addf %1331, %1332 : vector<8x96xf32>
    %1334 = vector.extract_strided_slice %1333 {offsets = [0, 0], sizes = [8, 24], strides = [1, 1]} : vector<8x96xf32> to vector<8x24xf32>
    %1335 = arith.negf %1334 : vector<8x24xf32>
    %1336 = math.exp %1335 : vector<8x24xf32>
    %cst_356 = arith.constant 1.000000e+00 : f32
    %1337 = vector.broadcast %cst_356 : f32 to vector<8x24xf32>
    %1338 = arith.addf %1337, %1336 : vector<8x24xf32>
    %1339 = arith.divf %1337, %1338 : vector<8x24xf32>
    %1340 = vector.extract_strided_slice %1333 {offsets = [0, 24], sizes = [8, 24], strides = [1, 1]} : vector<8x96xf32> to vector<8x24xf32>
    %1341 = arith.negf %1340 : vector<8x24xf32>
    %1342 = math.exp %1341 : vector<8x24xf32>
    %cst_357 = arith.constant 1.000000e+00 : f32
    %1343 = vector.broadcast %cst_357 : f32 to vector<8x24xf32>
    %1344 = arith.addf %1343, %1342 : vector<8x24xf32>
    %1345 = arith.divf %1343, %1344 : vector<8x24xf32>
    %1346 = vector.extract_strided_slice %1333 {offsets = [0, 48], sizes = [8, 24], strides = [1, 1]} : vector<8x96xf32> to vector<8x24xf32>
    %1347 = math.tanh %1346 : vector<8x24xf32>
    %1348 = vector.extract_strided_slice %1333 {offsets = [0, 72], sizes = [8, 24], strides = [1, 1]} : vector<8x96xf32> to vector<8x24xf32>
    %1349 = arith.negf %1348 : vector<8x24xf32>
    %1350 = math.exp %1349 : vector<8x24xf32>
    %cst_358 = arith.constant 1.000000e+00 : f32
    %1351 = vector.broadcast %cst_358 : f32 to vector<8x24xf32>
    %1352 = arith.addf %1351, %1350 : vector<8x24xf32>
    %1353 = arith.divf %1351, %1352 : vector<8x24xf32>
    %1354 = arith.mulf %1345, %1279 : vector<8x24xf32>
    %1355 = arith.mulf %1339, %1347 : vector<8x24xf32>
    %1356 = arith.addf %1354, %1355 : vector<8x24xf32>
    %1357 = math.tanh %1356 : vector<8x24xf32>
    %1358 = arith.mulf %1353, %1357 : vector<8x24xf32>
    %1359 = vector.broadcast %1330 : vector<8x1xf32> to vector<8x24xf32>
    %1360 = arith.mulf %1359, %1358 : vector<8x24xf32>
    %cst_359 = arith.constant 1.000000e+00 : f32
    %1361 = vector.broadcast %cst_359 : f32 to vector<8x1xf32>
    %1362 = arith.subf %1361, %1330 : vector<8x1xf32>
    %1363 = vector.broadcast %1362 : vector<8x1xf32> to vector<8x24xf32>
    %1364 = arith.mulf %1363, %1272 : vector<8x24xf32>
    %1365 = arith.addf %1360, %1364 : vector<8x24xf32>
    %1366 = vector.broadcast %1330 : vector<8x1xf32> to vector<8x24xf32>
    %1367 = arith.mulf %1366, %1356 : vector<8x24xf32>
    %cst_360 = arith.constant 1.000000e+00 : f32
    %1368 = vector.broadcast %cst_360 : f32 to vector<8x1xf32>
    %1369 = arith.subf %1368, %1330 : vector<8x1xf32>
    %1370 = vector.broadcast %1369 : vector<8x1xf32> to vector<8x24xf32>
    %1371 = arith.mulf %1370, %1279 : vector<8x24xf32>
    %1372 = arith.addf %1367, %1371 : vector<8x24xf32>
    %c8_361 = arith.constant 8 : index
    %c0_362 = arith.constant 0 : index
    %1373 = vector.load %arg1[%c8_361, %c0_362] : memref<64x1xf32, #tpu.memory_space<vmem>>, vector<8x1xf32>
    %c8_363 = arith.constant 8 : index
    %c0_364 = arith.constant 0 : index
    %1374 = vector.load %arg31[%c8_363, %c0_364] : memref<64x96xf32, #tpu.memory_space<vmem>>, vector<8x96xf32>
    %cst_365 = arith.constant dense<0.000000e+00> : vector<8x96xf32>
    %1375 = tpu.matmul %1315, %765, %cst_365 {dimension_numbers = #tpu.dot_dimension_numbers<[1], [0], [0], [1], [0, 0, 1, 1], [], []>} : vector<8x24xf32>, vector<24x96xf32>, vector<8x96xf32> -> vector<8x96xf32>
    %1376 = arith.addf %1374, %1375 : vector<8x96xf32>
    %1377 = vector.extract_strided_slice %1376 {offsets = [0, 0], sizes = [8, 24], strides = [1, 1]} : vector<8x96xf32> to vector<8x24xf32>
    %1378 = arith.negf %1377 : vector<8x24xf32>
    %1379 = math.exp %1378 : vector<8x24xf32>
    %cst_366 = arith.constant 1.000000e+00 : f32
    %1380 = vector.broadcast %cst_366 : f32 to vector<8x24xf32>
    %1381 = arith.addf %1380, %1379 : vector<8x24xf32>
    %1382 = arith.divf %1380, %1381 : vector<8x24xf32>
    %1383 = vector.extract_strided_slice %1376 {offsets = [0, 24], sizes = [8, 24], strides = [1, 1]} : vector<8x96xf32> to vector<8x24xf32>
    %1384 = arith.negf %1383 : vector<8x24xf32>
    %1385 = math.exp %1384 : vector<8x24xf32>
    %cst_367 = arith.constant 1.000000e+00 : f32
    %1386 = vector.broadcast %cst_367 : f32 to vector<8x24xf32>
    %1387 = arith.addf %1386, %1385 : vector<8x24xf32>
    %1388 = arith.divf %1386, %1387 : vector<8x24xf32>
    %1389 = vector.extract_strided_slice %1376 {offsets = [0, 48], sizes = [8, 24], strides = [1, 1]} : vector<8x96xf32> to vector<8x24xf32>
    %1390 = math.tanh %1389 : vector<8x24xf32>
    %1391 = vector.extract_strided_slice %1376 {offsets = [0, 72], sizes = [8, 24], strides = [1, 1]} : vector<8x96xf32> to vector<8x24xf32>
    %1392 = arith.negf %1391 : vector<8x24xf32>
    %1393 = math.exp %1392 : vector<8x24xf32>
    %cst_368 = arith.constant 1.000000e+00 : f32
    %1394 = vector.broadcast %cst_368 : f32 to vector<8x24xf32>
    %1395 = arith.addf %1394, %1393 : vector<8x24xf32>
    %1396 = arith.divf %1394, %1395 : vector<8x24xf32>
    %1397 = arith.mulf %1388, %1322 : vector<8x24xf32>
    %1398 = arith.mulf %1382, %1390 : vector<8x24xf32>
    %1399 = arith.addf %1397, %1398 : vector<8x24xf32>
    %1400 = math.tanh %1399 : vector<8x24xf32>
    %1401 = arith.mulf %1396, %1400 : vector<8x24xf32>
    %1402 = vector.broadcast %1373 : vector<8x1xf32> to vector<8x24xf32>
    %1403 = arith.mulf %1402, %1401 : vector<8x24xf32>
    %cst_369 = arith.constant 1.000000e+00 : f32
    %1404 = vector.broadcast %cst_369 : f32 to vector<8x1xf32>
    %1405 = arith.subf %1404, %1373 : vector<8x1xf32>
    %1406 = vector.broadcast %1405 : vector<8x1xf32> to vector<8x24xf32>
    %1407 = arith.mulf %1406, %1315 : vector<8x24xf32>
    %1408 = arith.addf %1403, %1407 : vector<8x24xf32>
    %1409 = vector.broadcast %1373 : vector<8x1xf32> to vector<8x24xf32>
    %1410 = arith.mulf %1409, %1399 : vector<8x24xf32>
    %cst_370 = arith.constant 1.000000e+00 : f32
    %1411 = vector.broadcast %cst_370 : f32 to vector<8x1xf32>
    %1412 = arith.subf %1411, %1373 : vector<8x1xf32>
    %1413 = vector.broadcast %1412 : vector<8x1xf32> to vector<8x24xf32>
    %1414 = arith.mulf %1413, %1322 : vector<8x24xf32>
    %1415 = arith.addf %1410, %1414 : vector<8x24xf32>
    %cst_371 = arith.constant 1.000000e+00 : f32
    %1416 = vector.broadcast %cst_371 : f32 to vector<8x1xf32>
    %1417 = arith.subf %1416, %1329 : vector<8x1xf32>
    %1418 = arith.mulf %1373, %1417 : vector<8x1xf32>
    %1419 = vector.broadcast %1418 : vector<8x1xf32> to vector<8x24xf32>
    %1420 = arith.mulf %1419, %1408 : vector<8x24xf32>
    %1421 = arith.addf %1328, %1420 : vector<8x24xf32>
    %1422 = arith.maximumf %1329, %1373 : vector<8x1xf32>
    %c56_372 = arith.constant 56 : index
    %c0_373 = arith.constant 0 : index
    %1423 = vector.load %arg1[%c56_372, %c0_373] : memref<64x1xf32, #tpu.memory_space<vmem>>, vector<8x1xf32>
    %c56_374 = arith.constant 56 : index
    %c0_375 = arith.constant 0 : index
    %1424 = vector.load %arg30[%c56_374, %c0_375] : memref<64x96xf32, #tpu.memory_space<vmem>>, vector<8x96xf32>
    %cst_376 = arith.constant dense<0.000000e+00> : vector<8x96xf32>
    %1425 = tpu.matmul %1365, %763, %cst_376 {dimension_numbers = #tpu.dot_dimension_numbers<[1], [0], [0], [1], [0, 0, 1, 1], [], []>} : vector<8x24xf32>, vector<24x96xf32>, vector<8x96xf32> -> vector<8x96xf32>
    %1426 = arith.addf %1424, %1425 : vector<8x96xf32>
    %1427 = vector.extract_strided_slice %1426 {offsets = [0, 0], sizes = [8, 24], strides = [1, 1]} : vector<8x96xf32> to vector<8x24xf32>
    %1428 = arith.negf %1427 : vector<8x24xf32>
    %1429 = math.exp %1428 : vector<8x24xf32>
    %cst_377 = arith.constant 1.000000e+00 : f32
    %1430 = vector.broadcast %cst_377 : f32 to vector<8x24xf32>
    %1431 = arith.addf %1430, %1429 : vector<8x24xf32>
    %1432 = arith.divf %1430, %1431 : vector<8x24xf32>
    %1433 = vector.extract_strided_slice %1426 {offsets = [0, 24], sizes = [8, 24], strides = [1, 1]} : vector<8x96xf32> to vector<8x24xf32>
    %1434 = arith.negf %1433 : vector<8x24xf32>
    %1435 = math.exp %1434 : vector<8x24xf32>
    %cst_378 = arith.constant 1.000000e+00 : f32
    %1436 = vector.broadcast %cst_378 : f32 to vector<8x24xf32>
    %1437 = arith.addf %1436, %1435 : vector<8x24xf32>
    %1438 = arith.divf %1436, %1437 : vector<8x24xf32>
    %1439 = vector.extract_strided_slice %1426 {offsets = [0, 48], sizes = [8, 24], strides = [1, 1]} : vector<8x96xf32> to vector<8x24xf32>
    %1440 = math.tanh %1439 : vector<8x24xf32>
    %1441 = vector.extract_strided_slice %1426 {offsets = [0, 72], sizes = [8, 24], strides = [1, 1]} : vector<8x96xf32> to vector<8x24xf32>
    %1442 = arith.negf %1441 : vector<8x24xf32>
    %1443 = math.exp %1442 : vector<8x24xf32>
    %cst_379 = arith.constant 1.000000e+00 : f32
    %1444 = vector.broadcast %cst_379 : f32 to vector<8x24xf32>
    %1445 = arith.addf %1444, %1443 : vector<8x24xf32>
    %1446 = arith.divf %1444, %1445 : vector<8x24xf32>
    %1447 = arith.mulf %1438, %1372 : vector<8x24xf32>
    %1448 = arith.mulf %1432, %1440 : vector<8x24xf32>
    %1449 = arith.addf %1447, %1448 : vector<8x24xf32>
    %1450 = math.tanh %1449 : vector<8x24xf32>
    %1451 = arith.mulf %1446, %1450 : vector<8x24xf32>
    %1452 = vector.broadcast %1423 : vector<8x1xf32> to vector<8x24xf32>
    %1453 = arith.mulf %1452, %1451 : vector<8x24xf32>
    %cst_380 = arith.constant 1.000000e+00 : f32
    %1454 = vector.broadcast %cst_380 : f32 to vector<8x1xf32>
    %1455 = arith.subf %1454, %1423 : vector<8x1xf32>
    %1456 = vector.broadcast %1455 : vector<8x1xf32> to vector<8x24xf32>
    %1457 = arith.mulf %1456, %1365 : vector<8x24xf32>
    %1458 = arith.addf %1453, %1457 : vector<8x24xf32>
    %c0_381 = arith.constant 0 : index
    %c0_382 = arith.constant 0 : index
    %1459 = vector.load %arg1[%c0_381, %c0_382] : memref<64x1xf32, #tpu.memory_space<vmem>>, vector<8x1xf32>
    %c0_383 = arith.constant 0 : index
    %c0_384 = arith.constant 0 : index
    %1460 = vector.load %arg31[%c0_383, %c0_384] : memref<64x96xf32, #tpu.memory_space<vmem>>, vector<8x96xf32>
    %cst_385 = arith.constant dense<0.000000e+00> : vector<8x96xf32>
    %1461 = tpu.matmul %1408, %765, %cst_385 {dimension_numbers = #tpu.dot_dimension_numbers<[1], [0], [0], [1], [0, 0, 1, 1], [], []>} : vector<8x24xf32>, vector<24x96xf32>, vector<8x96xf32> -> vector<8x96xf32>
    %1462 = arith.addf %1460, %1461 : vector<8x96xf32>
    %1463 = vector.extract_strided_slice %1462 {offsets = [0, 0], sizes = [8, 24], strides = [1, 1]} : vector<8x96xf32> to vector<8x24xf32>
    %1464 = arith.negf %1463 : vector<8x24xf32>
    %1465 = math.exp %1464 : vector<8x24xf32>
    %cst_386 = arith.constant 1.000000e+00 : f32
    %1466 = vector.broadcast %cst_386 : f32 to vector<8x24xf32>
    %1467 = arith.addf %1466, %1465 : vector<8x24xf32>
    %1468 = arith.divf %1466, %1467 : vector<8x24xf32>
    %1469 = vector.extract_strided_slice %1462 {offsets = [0, 24], sizes = [8, 24], strides = [1, 1]} : vector<8x96xf32> to vector<8x24xf32>
    %1470 = arith.negf %1469 : vector<8x24xf32>
    %1471 = math.exp %1470 : vector<8x24xf32>
    %cst_387 = arith.constant 1.000000e+00 : f32
    %1472 = vector.broadcast %cst_387 : f32 to vector<8x24xf32>
    %1473 = arith.addf %1472, %1471 : vector<8x24xf32>
    %1474 = arith.divf %1472, %1473 : vector<8x24xf32>
    %1475 = vector.extract_strided_slice %1462 {offsets = [0, 48], sizes = [8, 24], strides = [1, 1]} : vector<8x96xf32> to vector<8x24xf32>
    %1476 = math.tanh %1475 : vector<8x24xf32>
    %1477 = vector.extract_strided_slice %1462 {offsets = [0, 72], sizes = [8, 24], strides = [1, 1]} : vector<8x96xf32> to vector<8x24xf32>
    %1478 = arith.negf %1477 : vector<8x24xf32>
    %1479 = math.exp %1478 : vector<8x24xf32>
    %cst_388 = arith.constant 1.000000e+00 : f32
    %1480 = vector.broadcast %cst_388 : f32 to vector<8x24xf32>
    %1481 = arith.addf %1480, %1479 : vector<8x24xf32>
    %1482 = arith.divf %1480, %1481 : vector<8x24xf32>
    %1483 = arith.mulf %1474, %1415 : vector<8x24xf32>
    %1484 = arith.mulf %1468, %1476 : vector<8x24xf32>
    %1485 = arith.addf %1483, %1484 : vector<8x24xf32>
    %1486 = math.tanh %1485 : vector<8x24xf32>
    %1487 = arith.mulf %1482, %1486 : vector<8x24xf32>
    %1488 = vector.broadcast %1459 : vector<8x1xf32> to vector<8x24xf32>
    %1489 = arith.mulf %1488, %1487 : vector<8x24xf32>
    %cst_389 = arith.constant 1.000000e+00 : f32
    %1490 = vector.broadcast %cst_389 : f32 to vector<8x1xf32>
    %1491 = arith.subf %1490, %1459 : vector<8x1xf32>
    %1492 = vector.broadcast %1491 : vector<8x1xf32> to vector<8x24xf32>
    %1493 = arith.mulf %1492, %1408 : vector<8x24xf32>
    %1494 = arith.addf %1489, %1493 : vector<8x24xf32>
    %cst_390 = arith.constant 1.000000e+00 : f32
    %1495 = vector.broadcast %cst_390 : f32 to vector<8x1xf32>
    %1496 = arith.subf %1495, %1422 : vector<8x1xf32>
    %1497 = arith.mulf %1459, %1496 : vector<8x1xf32>
    %1498 = vector.broadcast %1497 : vector<8x1xf32> to vector<8x24xf32>
    %1499 = arith.mulf %1498, %1494 : vector<8x24xf32>
    %1500 = arith.addf %1421, %1499 : vector<8x24xf32>
    %c0_391 = arith.constant 0 : index
    %c0_392 = arith.constant 0 : index
    %1501 = vector.load %arg6[%c0_391, %c0_392] : memref<48x48xf32, #tpu.memory_space<vmem>>, vector<48x48xf32>
    %1502 = vector.extract_strided_slice %1501 {offsets = [0, 0], sizes = [24, 48], strides = [1, 1]} : vector<48x48xf32> to vector<24x48xf32>
    %cst_393 = arith.constant dense<0.000000e+00> : vector<8x48xf32>
    %1503 = tpu.matmul %1458, %1502, %cst_393 {dimension_numbers = #tpu.dot_dimension_numbers<[1], [0], [0], [1], [0, 0, 1, 1], [], []>} : vector<8x24xf32>, vector<24x48xf32>, vector<8x48xf32> -> vector<8x48xf32>
    %1504 = vector.extract_strided_slice %1501 {offsets = [24, 0], sizes = [24, 48], strides = [1, 1]} : vector<48x48xf32> to vector<24x48xf32>
    %cst_394 = arith.constant dense<0.000000e+00> : vector<8x48xf32>
    %1505 = tpu.matmul %1500, %1504, %cst_394 {dimension_numbers = #tpu.dot_dimension_numbers<[1], [0], [0], [1], [0, 0, 1, 1], [], []>} : vector<8x24xf32>, vector<24x48xf32>, vector<8x48xf32> -> vector<8x48xf32>
    %1506 = arith.addf %1503, %1505 : vector<8x48xf32>
    %c0_395 = arith.constant 0 : index
    %c0_396 = arith.constant 0 : index
    %1507 = vector.load %arg7[%c0_395, %c0_396] : memref<1x48xf32, #tpu.memory_space<vmem>>, vector<1x48xf32>
    %1508 = vector.broadcast %1507 : vector<1x48xf32> to vector<8x48xf32>
    %1509 = arith.addf %1506, %1508 : vector<8x48xf32>
    %1510 = math.tanh %1509 : vector<8x48xf32>
    %c0_397 = arith.constant 0 : index
    %c0_398 = arith.constant 0 : index
    %1511 = vector.load %arg8[%c0_397, %c0_398] : memref<8x48xf32, #tpu.memory_space<vmem>>, vector<8x48xf32>
    %1512 = arith.addf %1510, %1511 : vector<8x48xf32>
    %c0_399 = arith.constant 0 : index
    %c0_400 = arith.constant 0 : index
    %1513 = vector.load %arg11[%c0_399, %c0_400] : memref<1x48xf32, #tpu.memory_space<vmem>>, vector<1x48xf32>
    %c0_401 = arith.constant 0 : index
    %c0_402 = arith.constant 0 : index
    %1514 = vector.load %arg12[%c0_401, %c0_402] : memref<1x48xf32, #tpu.memory_space<vmem>>, vector<1x48xf32>
    %cst_403 = arith.constant dense<0.000000e+00> : vector<8xf32>
    %1515 = vector.multi_reduction <add>, %1512, %cst_403 [1] : vector<8x48xf32> to vector<8xf32>
    %1516 = vector.shape_cast %1515 : vector<8xf32> to vector<8x1xf32>
    %cst_404 = arith.constant 4.800000e+01 : f32
    %1517 = vector.broadcast %cst_404 : f32 to vector<8x1xf32>
    %1518 = arith.divf %1516, %1517 : vector<8x1xf32>
    %1519 = vector.broadcast %1518 : vector<8x1xf32> to vector<8x48xf32>
    %1520 = arith.subf %1512, %1519 : vector<8x48xf32>
    %1521 = arith.mulf %1520, %1520 : vector<8x48xf32>
    %cst_405 = arith.constant dense<0.000000e+00> : vector<8xf32>
    %1522 = vector.multi_reduction <add>, %1521, %cst_405 [1] : vector<8x48xf32> to vector<8xf32>
    %1523 = vector.shape_cast %1522 : vector<8xf32> to vector<8x1xf32>
    %cst_406 = arith.constant 4.800000e+01 : f32
    %1524 = vector.broadcast %cst_406 : f32 to vector<8x1xf32>
    %1525 = arith.divf %1523, %1524 : vector<8x1xf32>
    %1526 = vector.broadcast %1518 : vector<8x1xf32> to vector<8x48xf32>
    %1527 = arith.subf %1512, %1526 : vector<8x48xf32>
    %cst_407 = arith.constant 9.99999974E-6 : f32
    %1528 = vector.broadcast %cst_407 : f32 to vector<8x1xf32>
    %1529 = arith.addf %1525, %1528 : vector<8x1xf32>
    %1530 = math.rsqrt %1529 : vector<8x1xf32>
    %1531 = vector.broadcast %1530 : vector<8x1xf32> to vector<8x48xf32>
    %1532 = arith.mulf %1527, %1531 : vector<8x48xf32>
    %1533 = vector.broadcast %1513 : vector<1x48xf32> to vector<8x48xf32>
    %1534 = arith.mulf %1532, %1533 : vector<8x48xf32>
    %1535 = vector.broadcast %1514 : vector<1x48xf32> to vector<8x48xf32>
    %1536 = arith.addf %1534, %1535 : vector<8x48xf32>
    %1537 = arith.truncf %1536 : vector<8x48xf32> to vector<8x48xbf16>
    %c0_408 = arith.constant 0 : index
    %c0_409 = arith.constant 0 : index
    %1538 = vector.load %arg13[%c0_408, %c0_409] : memref<48x144xbf16, #tpu.memory_space<vmem>>, vector<48x144xbf16>
    %cst_410 = arith.constant dense<0.000000e+00> : vector<8x144xf32>
    %1539 = tpu.matmul %1537, %1538, %cst_410 {dimension_numbers = #tpu.dot_dimension_numbers<[1], [0], [0], [1], [0, 0, 1, 1], [], []>} : vector<8x48xbf16>, vector<48x144xbf16>, vector<8x144xf32> -> vector<8x144xf32>
    %c0_411 = arith.constant 0 : index
    %c0_412 = arith.constant 0 : index
    %1540 = vector.load %arg14[%c0_411, %c0_412] : memref<1x144xf32, #tpu.memory_space<vmem>>, vector<1x144xf32>
    %1541 = vector.broadcast %1540 : vector<1x144xf32> to vector<8x144xf32>
    %1542 = arith.addf %1539, %1541 : vector<8x144xf32>
    %c0_413 = arith.constant 0 : index
    %c0_414 = arith.constant 0 : index
    %1543 = vector.load %arg9[%c0_413, %c0_414] : memref<8x8xf32, #tpu.memory_space<vmem>>, vector<8x8xf32>
    %1544 = vector.extract_strided_slice %1542 {offsets = [0, 0], sizes = [8, 8], strides = [1, 1]} : vector<8x144xf32> to vector<8x8xf32>
    %1545 = vector.extract_strided_slice %1542 {offsets = [0, 48], sizes = [8, 8], strides = [1, 1]} : vector<8x144xf32> to vector<8x8xf32>
    %1546 = vector.extract_strided_slice %1542 {offsets = [0, 96], sizes = [8, 8], strides = [1, 1]} : vector<8x144xf32> to vector<8x8xf32>
    %cst_415 = arith.constant dense<0.000000e+00> : vector<8x8xf32>
    %1547 = tpu.matmul %1544, %1545, %cst_415 {dimension_numbers = #tpu.dot_dimension_numbers<[1], [1], [0], [0], [0, 0, 1, 0], [], []>} : vector<8x8xf32>, vector<8x8xf32>, vector<8x8xf32> -> vector<8x8xf32>
    %cst_416 = arith.constant 0.353553385 : f32
    %1548 = vector.broadcast %cst_416 : f32 to vector<8x8xf32>
    %1549 = arith.mulf %1547, %1548 : vector<8x8xf32>
    %1550 = arith.addf %1549, %1543 : vector<8x8xf32>
    %cst_417 = arith.constant dense<0xFF800000> : vector<8xf32>
    %1551 = vector.multi_reduction <maximumf>, %1550, %cst_417 [1] : vector<8x8xf32> to vector<8xf32>
    %1552 = vector.shape_cast %1551 : vector<8xf32> to vector<8x1xf32>
    %1553 = vector.broadcast %1552 : vector<8x1xf32> to vector<8x8xf32>
    %1554 = arith.subf %1550, %1553 : vector<8x8xf32>
    %1555 = math.exp %1554 : vector<8x8xf32>
    %cst_418 = arith.constant dense<0.000000e+00> : vector<8xf32>
    %1556 = vector.multi_reduction <add>, %1555, %cst_418 [1] : vector<8x8xf32> to vector<8xf32>
    %1557 = vector.shape_cast %1556 : vector<8xf32> to vector<8x1xf32>
    %1558 = vector.broadcast %1557 : vector<8x1xf32> to vector<8x8xf32>
    %1559 = arith.divf %1555, %1558 : vector<8x8xf32>
    %cst_419 = arith.constant dense<0.000000e+00> : vector<8x8xf32>
    %1560 = tpu.matmul %1559, %1546, %cst_419 {dimension_numbers = #tpu.dot_dimension_numbers<[1], [0], [0], [1], [0, 0, 1, 1], [], []>} : vector<8x8xf32>, vector<8x8xf32>, vector<8x8xf32> -> vector<8x8xf32>
    %1561 = vector.extract_strided_slice %1542 {offsets = [0, 8], sizes = [8, 8], strides = [1, 1]} : vector<8x144xf32> to vector<8x8xf32>
    %1562 = vector.extract_strided_slice %1542 {offsets = [0, 56], sizes = [8, 8], strides = [1, 1]} : vector<8x144xf32> to vector<8x8xf32>
    %1563 = vector.extract_strided_slice %1542 {offsets = [0, 104], sizes = [8, 8], strides = [1, 1]} : vector<8x144xf32> to vector<8x8xf32>
    %cst_420 = arith.constant dense<0.000000e+00> : vector<8x8xf32>
    %1564 = tpu.matmul %1561, %1562, %cst_420 {dimension_numbers = #tpu.dot_dimension_numbers<[1], [1], [0], [0], [0, 0, 1, 0], [], []>} : vector<8x8xf32>, vector<8x8xf32>, vector<8x8xf32> -> vector<8x8xf32>
    %cst_421 = arith.constant 0.353553385 : f32
    %1565 = vector.broadcast %cst_421 : f32 to vector<8x8xf32>
    %1566 = arith.mulf %1564, %1565 : vector<8x8xf32>
    %1567 = arith.addf %1566, %1543 : vector<8x8xf32>
    %cst_422 = arith.constant dense<0xFF800000> : vector<8xf32>
    %1568 = vector.multi_reduction <maximumf>, %1567, %cst_422 [1] : vector<8x8xf32> to vector<8xf32>
    %1569 = vector.shape_cast %1568 : vector<8xf32> to vector<8x1xf32>
    %1570 = vector.broadcast %1569 : vector<8x1xf32> to vector<8x8xf32>
    %1571 = arith.subf %1567, %1570 : vector<8x8xf32>
    %1572 = math.exp %1571 : vector<8x8xf32>
    %cst_423 = arith.constant dense<0.000000e+00> : vector<8xf32>
    %1573 = vector.multi_reduction <add>, %1572, %cst_423 [1] : vector<8x8xf32> to vector<8xf32>
    %1574 = vector.shape_cast %1573 : vector<8xf32> to vector<8x1xf32>
    %1575 = vector.broadcast %1574 : vector<8x1xf32> to vector<8x8xf32>
    %1576 = arith.divf %1572, %1575 : vector<8x8xf32>
    %cst_424 = arith.constant dense<0.000000e+00> : vector<8x8xf32>
    %1577 = tpu.matmul %1576, %1563, %cst_424 {dimension_numbers = #tpu.dot_dimension_numbers<[1], [0], [0], [1], [0, 0, 1, 1], [], []>} : vector<8x8xf32>, vector<8x8xf32>, vector<8x8xf32> -> vector<8x8xf32>
    %1578 = vector.extract_strided_slice %1542 {offsets = [0, 16], sizes = [8, 8], strides = [1, 1]} : vector<8x144xf32> to vector<8x8xf32>
    %1579 = vector.extract_strided_slice %1542 {offsets = [0, 64], sizes = [8, 8], strides = [1, 1]} : vector<8x144xf32> to vector<8x8xf32>
    %1580 = vector.extract_strided_slice %1542 {offsets = [0, 112], sizes = [8, 8], strides = [1, 1]} : vector<8x144xf32> to vector<8x8xf32>
    %cst_425 = arith.constant dense<0.000000e+00> : vector<8x8xf32>
    %1581 = tpu.matmul %1578, %1579, %cst_425 {dimension_numbers = #tpu.dot_dimension_numbers<[1], [1], [0], [0], [0, 0, 1, 0], [], []>} : vector<8x8xf32>, vector<8x8xf32>, vector<8x8xf32> -> vector<8x8xf32>
    %cst_426 = arith.constant 0.353553385 : f32
    %1582 = vector.broadcast %cst_426 : f32 to vector<8x8xf32>
    %1583 = arith.mulf %1581, %1582 : vector<8x8xf32>
    %1584 = arith.addf %1583, %1543 : vector<8x8xf32>
    %cst_427 = arith.constant dense<0xFF800000> : vector<8xf32>
    %1585 = vector.multi_reduction <maximumf>, %1584, %cst_427 [1] : vector<8x8xf32> to vector<8xf32>
    %1586 = vector.shape_cast %1585 : vector<8xf32> to vector<8x1xf32>
    %1587 = vector.broadcast %1586 : vector<8x1xf32> to vector<8x8xf32>
    %1588 = arith.subf %1584, %1587 : vector<8x8xf32>
    %1589 = math.exp %1588 : vector<8x8xf32>
    %cst_428 = arith.constant dense<0.000000e+00> : vector<8xf32>
    %1590 = vector.multi_reduction <add>, %1589, %cst_428 [1] : vector<8x8xf32> to vector<8xf32>
    %1591 = vector.shape_cast %1590 : vector<8xf32> to vector<8x1xf32>
    %1592 = vector.broadcast %1591 : vector<8x1xf32> to vector<8x8xf32>
    %1593 = arith.divf %1589, %1592 : vector<8x8xf32>
    %cst_429 = arith.constant dense<0.000000e+00> : vector<8x8xf32>
    %1594 = tpu.matmul %1593, %1580, %cst_429 {dimension_numbers = #tpu.dot_dimension_numbers<[1], [0], [0], [1], [0, 0, 1, 1], [], []>} : vector<8x8xf32>, vector<8x8xf32>, vector<8x8xf32> -> vector<8x8xf32>
    %1595 = vector.extract_strided_slice %1542 {offsets = [0, 24], sizes = [8, 8], strides = [1, 1]} : vector<8x144xf32> to vector<8x8xf32>
    %1596 = vector.extract_strided_slice %1542 {offsets = [0, 72], sizes = [8, 8], strides = [1, 1]} : vector<8x144xf32> to vector<8x8xf32>
    %1597 = vector.extract_strided_slice %1542 {offsets = [0, 120], sizes = [8, 8], strides = [1, 1]} : vector<8x144xf32> to vector<8x8xf32>
    %cst_430 = arith.constant dense<0.000000e+00> : vector<8x8xf32>
    %1598 = tpu.matmul %1595, %1596, %cst_430 {dimension_numbers = #tpu.dot_dimension_numbers<[1], [1], [0], [0], [0, 0, 1, 0], [], []>} : vector<8x8xf32>, vector<8x8xf32>, vector<8x8xf32> -> vector<8x8xf32>
    %cst_431 = arith.constant 0.353553385 : f32
    %1599 = vector.broadcast %cst_431 : f32 to vector<8x8xf32>
    %1600 = arith.mulf %1598, %1599 : vector<8x8xf32>
    %1601 = arith.addf %1600, %1543 : vector<8x8xf32>
    %cst_432 = arith.constant dense<0xFF800000> : vector<8xf32>
    %1602 = vector.multi_reduction <maximumf>, %1601, %cst_432 [1] : vector<8x8xf32> to vector<8xf32>
    %1603 = vector.shape_cast %1602 : vector<8xf32> to vector<8x1xf32>
    %1604 = vector.broadcast %1603 : vector<8x1xf32> to vector<8x8xf32>
    %1605 = arith.subf %1601, %1604 : vector<8x8xf32>
    %1606 = math.exp %1605 : vector<8x8xf32>
    %cst_433 = arith.constant dense<0.000000e+00> : vector<8xf32>
    %1607 = vector.multi_reduction <add>, %1606, %cst_433 [1] : vector<8x8xf32> to vector<8xf32>
    %1608 = vector.shape_cast %1607 : vector<8xf32> to vector<8x1xf32>
    %1609 = vector.broadcast %1608 : vector<8x1xf32> to vector<8x8xf32>
    %1610 = arith.divf %1606, %1609 : vector<8x8xf32>
    %cst_434 = arith.constant dense<0.000000e+00> : vector<8x8xf32>
    %1611 = tpu.matmul %1610, %1597, %cst_434 {dimension_numbers = #tpu.dot_dimension_numbers<[1], [0], [0], [1], [0, 0, 1, 1], [], []>} : vector<8x8xf32>, vector<8x8xf32>, vector<8x8xf32> -> vector<8x8xf32>
    %1612 = vector.extract_strided_slice %1542 {offsets = [0, 32], sizes = [8, 8], strides = [1, 1]} : vector<8x144xf32> to vector<8x8xf32>
    %1613 = vector.extract_strided_slice %1542 {offsets = [0, 80], sizes = [8, 8], strides = [1, 1]} : vector<8x144xf32> to vector<8x8xf32>
    %1614 = vector.extract_strided_slice %1542 {offsets = [0, 128], sizes = [8, 8], strides = [1, 1]} : vector<8x144xf32> to vector<8x8xf32>
    %cst_435 = arith.constant dense<0.000000e+00> : vector<8x8xf32>
    %1615 = tpu.matmul %1612, %1613, %cst_435 {dimension_numbers = #tpu.dot_dimension_numbers<[1], [1], [0], [0], [0, 0, 1, 0], [], []>} : vector<8x8xf32>, vector<8x8xf32>, vector<8x8xf32> -> vector<8x8xf32>
    %cst_436 = arith.constant 0.353553385 : f32
    %1616 = vector.broadcast %cst_436 : f32 to vector<8x8xf32>
    %1617 = arith.mulf %1615, %1616 : vector<8x8xf32>
    %1618 = arith.addf %1617, %1543 : vector<8x8xf32>
    %cst_437 = arith.constant dense<0xFF800000> : vector<8xf32>
    %1619 = vector.multi_reduction <maximumf>, %1618, %cst_437 [1] : vector<8x8xf32> to vector<8xf32>
    %1620 = vector.shape_cast %1619 : vector<8xf32> to vector<8x1xf32>
    %1621 = vector.broadcast %1620 : vector<8x1xf32> to vector<8x8xf32>
    %1622 = arith.subf %1618, %1621 : vector<8x8xf32>
    %1623 = math.exp %1622 : vector<8x8xf32>
    %cst_438 = arith.constant dense<0.000000e+00> : vector<8xf32>
    %1624 = vector.multi_reduction <add>, %1623, %cst_438 [1] : vector<8x8xf32> to vector<8xf32>
    %1625 = vector.shape_cast %1624 : vector<8xf32> to vector<8x1xf32>
    %1626 = vector.broadcast %1625 : vector<8x1xf32> to vector<8x8xf32>
    %1627 = arith.divf %1623, %1626 : vector<8x8xf32>
    %cst_439 = arith.constant dense<0.000000e+00> : vector<8x8xf32>
    %1628 = tpu.matmul %1627, %1614, %cst_439 {dimension_numbers = #tpu.dot_dimension_numbers<[1], [0], [0], [1], [0, 0, 1, 1], [], []>} : vector<8x8xf32>, vector<8x8xf32>, vector<8x8xf32> -> vector<8x8xf32>
    %1629 = vector.extract_strided_slice %1542 {offsets = [0, 40], sizes = [8, 8], strides = [1, 1]} : vector<8x144xf32> to vector<8x8xf32>
    %1630 = vector.extract_strided_slice %1542 {offsets = [0, 88], sizes = [8, 8], strides = [1, 1]} : vector<8x144xf32> to vector<8x8xf32>
    %1631 = vector.extract_strided_slice %1542 {offsets = [0, 136], sizes = [8, 8], strides = [1, 1]} : vector<8x144xf32> to vector<8x8xf32>
    %cst_440 = arith.constant dense<0.000000e+00> : vector<8x8xf32>
    %1632 = tpu.matmul %1629, %1630, %cst_440 {dimension_numbers = #tpu.dot_dimension_numbers<[1], [1], [0], [0], [0, 0, 1, 0], [], []>} : vector<8x8xf32>, vector<8x8xf32>, vector<8x8xf32> -> vector<8x8xf32>
    %cst_441 = arith.constant 0.353553385 : f32
    %1633 = vector.broadcast %cst_441 : f32 to vector<8x8xf32>
    %1634 = arith.mulf %1632, %1633 : vector<8x8xf32>
    %1635 = arith.addf %1634, %1543 : vector<8x8xf32>
    %cst_442 = arith.constant dense<0xFF800000> : vector<8xf32>
    %1636 = vector.multi_reduction <maximumf>, %1635, %cst_442 [1] : vector<8x8xf32> to vector<8xf32>
    %1637 = vector.shape_cast %1636 : vector<8xf32> to vector<8x1xf32>
    %1638 = vector.broadcast %1637 : vector<8x1xf32> to vector<8x8xf32>
    %1639 = arith.subf %1635, %1638 : vector<8x8xf32>
    %1640 = math.exp %1639 : vector<8x8xf32>
    %cst_443 = arith.constant dense<0.000000e+00> : vector<8xf32>
    %1641 = vector.multi_reduction <add>, %1640, %cst_443 [1] : vector<8x8xf32> to vector<8xf32>
    %1642 = vector.shape_cast %1641 : vector<8xf32> to vector<8x1xf32>
    %1643 = vector.broadcast %1642 : vector<8x1xf32> to vector<8x8xf32>
    %1644 = arith.divf %1640, %1643 : vector<8x8xf32>
    %cst_444 = arith.constant dense<0.000000e+00> : vector<8x8xf32>
    %1645 = tpu.matmul %1644, %1631, %cst_444 {dimension_numbers = #tpu.dot_dimension_numbers<[1], [0], [0], [1], [0, 0, 1, 1], [], []>} : vector<8x8xf32>, vector<8x8xf32>, vector<8x8xf32> -> vector<8x8xf32>
    %1646 = tpu.concatenate %1560, %1577, %1594, %1611, %1628, %1645 in 1 : vector<8x8xf32>, vector<8x8xf32>, vector<8x8xf32>, vector<8x8xf32>, vector<8x8xf32>, vector<8x8xf32> -> vector<8x48xf32>
    %1647 = arith.truncf %1646 : vector<8x48xf32> to vector<8x48xbf16>
    %c0_445 = arith.constant 0 : index
    %c0_446 = arith.constant 0 : index
    %1648 = vector.load %arg15[%c0_445, %c0_446] : memref<48x48xbf16, #tpu.memory_space<vmem>>, vector<48x48xbf16>
    %cst_447 = arith.constant dense<0.000000e+00> : vector<8x48xf32>
    %1649 = tpu.matmul %1647, %1648, %cst_447 {dimension_numbers = #tpu.dot_dimension_numbers<[1], [0], [0], [1], [0, 0, 1, 1], [], []>} : vector<8x48xbf16>, vector<48x48xbf16>, vector<8x48xf32> -> vector<8x48xf32>
    %c0_448 = arith.constant 0 : index
    %c0_449 = arith.constant 0 : index
    %1650 = vector.load %arg16[%c0_448, %c0_449] : memref<1x48xf32, #tpu.memory_space<vmem>>, vector<1x48xf32>
    %1651 = vector.broadcast %1650 : vector<1x48xf32> to vector<8x48xf32>
    %1652 = arith.addf %1649, %1651 : vector<8x48xf32>
    %1653 = arith.addf %1536, %1652 : vector<8x48xf32>
    %c0_450 = arith.constant 0 : index
    %c0_451 = arith.constant 0 : index
    %1654 = vector.load %arg17[%c0_450, %c0_451] : memref<1x48xf32, #tpu.memory_space<vmem>>, vector<1x48xf32>
    %c0_452 = arith.constant 0 : index
    %c0_453 = arith.constant 0 : index
    %1655 = vector.load %arg18[%c0_452, %c0_453] : memref<1x48xf32, #tpu.memory_space<vmem>>, vector<1x48xf32>
    %cst_454 = arith.constant dense<0.000000e+00> : vector<8xf32>
    %1656 = vector.multi_reduction <add>, %1653, %cst_454 [1] : vector<8x48xf32> to vector<8xf32>
    %1657 = vector.shape_cast %1656 : vector<8xf32> to vector<8x1xf32>
    %cst_455 = arith.constant 4.800000e+01 : f32
    %1658 = vector.broadcast %cst_455 : f32 to vector<8x1xf32>
    %1659 = arith.divf %1657, %1658 : vector<8x1xf32>
    %1660 = vector.broadcast %1659 : vector<8x1xf32> to vector<8x48xf32>
    %1661 = arith.subf %1653, %1660 : vector<8x48xf32>
    %1662 = arith.mulf %1661, %1661 : vector<8x48xf32>
    %cst_456 = arith.constant dense<0.000000e+00> : vector<8xf32>
    %1663 = vector.multi_reduction <add>, %1662, %cst_456 [1] : vector<8x48xf32> to vector<8xf32>
    %1664 = vector.shape_cast %1663 : vector<8xf32> to vector<8x1xf32>
    %cst_457 = arith.constant 4.800000e+01 : f32
    %1665 = vector.broadcast %cst_457 : f32 to vector<8x1xf32>
    %1666 = arith.divf %1664, %1665 : vector<8x1xf32>
    %1667 = vector.broadcast %1659 : vector<8x1xf32> to vector<8x48xf32>
    %1668 = arith.subf %1653, %1667 : vector<8x48xf32>
    %cst_458 = arith.constant 9.99999974E-6 : f32
    %1669 = vector.broadcast %cst_458 : f32 to vector<8x1xf32>
    %1670 = arith.addf %1666, %1669 : vector<8x1xf32>
    %1671 = math.rsqrt %1670 : vector<8x1xf32>
    %1672 = vector.broadcast %1671 : vector<8x1xf32> to vector<8x48xf32>
    %1673 = arith.mulf %1668, %1672 : vector<8x48xf32>
    %1674 = vector.broadcast %1654 : vector<1x48xf32> to vector<8x48xf32>
    %1675 = arith.mulf %1673, %1674 : vector<8x48xf32>
    %1676 = vector.broadcast %1655 : vector<1x48xf32> to vector<8x48xf32>
    %1677 = arith.addf %1675, %1676 : vector<8x48xf32>
    %1678 = arith.truncf %1677 : vector<8x48xf32> to vector<8x48xbf16>
    %c0_459 = arith.constant 0 : index
    %c0_460 = arith.constant 0 : index
    %1679 = vector.load %arg19[%c0_459, %c0_460] : memref<48x512xbf16, #tpu.memory_space<vmem>>, vector<48x512xbf16>
    %cst_461 = arith.constant dense<0.000000e+00> : vector<8x512xf32>
    %1680 = tpu.matmul %1678, %1679, %cst_461 {dimension_numbers = #tpu.dot_dimension_numbers<[1], [0], [0], [1], [0, 0, 1, 1], [], []>} : vector<8x48xbf16>, vector<48x512xbf16>, vector<8x512xf32> -> vector<8x512xf32>
    %c0_462 = arith.constant 0 : index
    %c0_463 = arith.constant 0 : index
    %1681 = vector.load %arg20[%c0_462, %c0_463] : memref<1x512xf32, #tpu.memory_space<vmem>>, vector<1x512xf32>
    %1682 = vector.broadcast %1681 : vector<1x512xf32> to vector<8x512xf32>
    %1683 = arith.addf %1680, %1682 : vector<8x512xf32>
    %cst_464 = arith.constant 0.000000e+00 : f32
    %1684 = vector.broadcast %cst_464 : f32 to vector<8x512xf32>
    %1685 = arith.maximumf %1683, %1684 : vector<8x512xf32>
    %1686 = arith.truncf %1685 : vector<8x512xf32> to vector<8x512xbf16>
    %c0_465 = arith.constant 0 : index
    %c0_466 = arith.constant 0 : index
    %1687 = vector.load %arg21[%c0_465, %c0_466] : memref<512x48xbf16, #tpu.memory_space<vmem>>, vector<512x48xbf16>
    %cst_467 = arith.constant dense<0.000000e+00> : vector<8x48xf32>
    %1688 = tpu.matmul %1686, %1687, %cst_467 {dimension_numbers = #tpu.dot_dimension_numbers<[1], [0], [0], [1], [0, 0, 1, 1], [], []>} : vector<8x512xbf16>, vector<512x48xbf16>, vector<8x48xf32> -> vector<8x48xf32>
    %c0_468 = arith.constant 0 : index
    %c0_469 = arith.constant 0 : index
    %1689 = vector.load %arg22[%c0_468, %c0_469] : memref<1x48xf32, #tpu.memory_space<vmem>>, vector<1x48xf32>
    %1690 = vector.broadcast %1689 : vector<1x48xf32> to vector<8x48xf32>
    %1691 = arith.addf %1688, %1690 : vector<8x48xf32>
    %1692 = arith.addf %1677, %1691 : vector<8x48xf32>
    %c0_470 = arith.constant 0 : index
    %c0_471 = arith.constant 0 : index
    %1693 = vector.load %arg23[%c0_470, %c0_471] : memref<1x48xf32, #tpu.memory_space<vmem>>, vector<1x48xf32>
    %c0_472 = arith.constant 0 : index
    %c0_473 = arith.constant 0 : index
    %1694 = vector.load %arg24[%c0_472, %c0_473] : memref<1x48xf32, #tpu.memory_space<vmem>>, vector<1x48xf32>
    %cst_474 = arith.constant dense<0.000000e+00> : vector<8xf32>
    %1695 = vector.multi_reduction <add>, %1692, %cst_474 [1] : vector<8x48xf32> to vector<8xf32>
    %1696 = vector.shape_cast %1695 : vector<8xf32> to vector<8x1xf32>
    %cst_475 = arith.constant 4.800000e+01 : f32
    %1697 = vector.broadcast %cst_475 : f32 to vector<8x1xf32>
    %1698 = arith.divf %1696, %1697 : vector<8x1xf32>
    %1699 = vector.broadcast %1698 : vector<8x1xf32> to vector<8x48xf32>
    %1700 = arith.subf %1692, %1699 : vector<8x48xf32>
    %1701 = arith.mulf %1700, %1700 : vector<8x48xf32>
    %cst_476 = arith.constant dense<0.000000e+00> : vector<8xf32>
    %1702 = vector.multi_reduction <add>, %1701, %cst_476 [1] : vector<8x48xf32> to vector<8xf32>
    %1703 = vector.shape_cast %1702 : vector<8xf32> to vector<8x1xf32>
    %cst_477 = arith.constant 4.800000e+01 : f32
    %1704 = vector.broadcast %cst_477 : f32 to vector<8x1xf32>
    %1705 = arith.divf %1703, %1704 : vector<8x1xf32>
    %1706 = vector.broadcast %1698 : vector<8x1xf32> to vector<8x48xf32>
    %1707 = arith.subf %1692, %1706 : vector<8x48xf32>
    %cst_478 = arith.constant 9.99999974E-6 : f32
    %1708 = vector.broadcast %cst_478 : f32 to vector<8x1xf32>
    %1709 = arith.addf %1705, %1708 : vector<8x1xf32>
    %1710 = math.rsqrt %1709 : vector<8x1xf32>
    %1711 = vector.broadcast %1710 : vector<8x1xf32> to vector<8x48xf32>
    %1712 = arith.mulf %1707, %1711 : vector<8x48xf32>
    %1713 = vector.broadcast %1693 : vector<1x48xf32> to vector<8x48xf32>
    %1714 = arith.mulf %1712, %1713 : vector<8x48xf32>
    %1715 = vector.broadcast %1694 : vector<1x48xf32> to vector<8x48xf32>
    %1716 = arith.addf %1714, %1715 : vector<8x48xf32>
    %c0_479 = arith.constant 0 : index
    %c0_480 = arith.constant 0 : index
    %1717 = vector.load %arg10[%c0_479, %c0_480] : memref<2x8xf32, #tpu.memory_space<vmem>>, vector<2x8xf32>
    %cst_481 = arith.constant dense<0.000000e+00> : vector<2x48xf32>
    %1718 = tpu.matmul %1717, %1716, %cst_481 {dimension_numbers = #tpu.dot_dimension_numbers<[1], [0], [0], [1], [0, 0, 1, 1], [], []>} : vector<2x8xf32>, vector<8x48xf32>, vector<2x48xf32> -> vector<2x48xf32>
    %c0_482 = arith.constant 0 : index
    %c0_483 = arith.constant 0 : index
    %1719 = vector.load %arg25[%c0_482, %c0_483] : memref<48x2xf32, #tpu.memory_space<vmem>>, vector<48x2xf32>
    %cst_484 = arith.constant dense<0.000000e+00> : vector<2x2xf32>
    %1720 = tpu.matmul %1718, %1719, %cst_484 {dimension_numbers = #tpu.dot_dimension_numbers<[1], [0], [0], [1], [0, 0, 1, 1], [], []>} : vector<2x48xf32>, vector<48x2xf32>, vector<2x2xf32> -> vector<2x2xf32>
    %c0_485 = arith.constant 0 : index
    %c0_486 = arith.constant 0 : index
    %1721 = vector.load %arg26[%c0_485, %c0_486] : memref<1x2xf32, #tpu.memory_space<vmem>>, vector<1x2xf32>
    %1722 = vector.broadcast %1721 : vector<1x2xf32> to vector<2x2xf32>
    %1723 = arith.addf %1720, %1722 : vector<2x2xf32>
    %c0_487 = arith.constant 0 : index
    %c0_488 = arith.constant 0 : index
    %1724 = vector.load %arg27[%c0_487, %c0_488] : memref<2x2xf32, #tpu.memory_space<vmem>>, vector<2x2xf32>
    tpu.vector_store %arg27[%c0_487, %c0_488], %1723 {strides = array<i32>} : memref<2x2xf32, #tpu.memory_space<vmem>>, vector<2x2xf32>,
    return
  }
}

</mosaic_0001>

<bundles_post_ra>
// kernel: hlt_forward.1
= control target key start
LH: loop header
LB: loop body
LE: loop exit
PB: predicated region body
PF: predicated region fallthrough
CT: control target
= control target key end

     0   :  { %s10164_s0 = inlined_call_operand.vmem [shape: s32[64,1], index: 0, kind: input, shape index: {}]   ;;  %s10165_s1 = inlined_call_operand.vmem [shape: f32[64,1], index: 1, kind: input, shape index: {}]   ;;  %s10166_s2 = inlined_call_operand.vmem [shape: bf16[50,192], index: 2, kind: input, shape index: {}]   ;;  %s10167_s3 = inlined_call_operand.vmem [shape: bf16[1,48,192], index: 3, kind: input, shape index: {}]   ;;  %s10168_s4 = inlined_call_operand.vmem [shape: f32[1,1,192], index: 4, kind: input, shape index: {}]   ;;  %s10169_s5 = inlined_call_operand.vmem [shape: f32[4,24,96], index: 5, kind: input, shape index: {}]   ;;  %s10170_s6 = inlined_call_operand.vmem [shape: f32[48,48], index: 6, kind: input, shape index: {}]   ;;  %s10171_s7 = inlined_call_operand.vmem [shape: f32[1,48], index: 7, kind: input, shape index: {}]   ;;  %s10172_s8 = inlined_call_operand.vmem [shape: f32[8,48], index: 8, kind: input, shape index: {}]   ;;  %s10173_s9 = inlined_call_operand.vmem [shape: f32[8,8], index: 9, kind: input, shape index: {}]   ;;  %s10174_s10 = inlined_call_operand.vmem [shape: f32[2,8], index: 10, kind: input, shape index: {}]   ;;  %s10175_s11 = inlined_call_operand.vmem [shape: f32[1,48], index: 11, kind: input, shape index: {}]   ;;  %s10176_s12 = inlined_call_operand.vmem [shape: f32[1,48], index: 12, kind: input, shape index: {}]   ;;  %s10177_s13 = inlined_call_operand.vmem [shape: bf16[48,144], index: 13, kind: input, shape index: {}]   ;;  %s10178_s14 = inlined_call_operand.vmem [shape: f32[1,144], index: 14, kind: input, shape index: {}]   ;;  %s10179_s15 = inlined_call_operand.vmem [shape: bf16[48,48], index: 15, kind: input, shape index: {}]   ;;  %s10180_s16 = inlined_call_operand.vmem [shape: f32[1,48], index: 16, kind: input, shape index: {}]   ;;  %s10181_s17 = inlined_call_operand.vmem [shape: f32[1,48], index: 17, kind: input, shape index: {}]   ;;  %s10182_s18 = inlined_call_operand.vmem [shape: f32[1,48], index: 18, kind: input, shape index: {}]   ;;  %s10183_s19 = inlined_call_operand.vmem [shape: bf16[48,512], index: 19, kind: input, shape index: {}]   ;;  %s10184_s20 = inlined_call_operand.vmem [shape: f32[1,512], index: 20, kind: input, shape index: {}]   ;;  %s10185_s21 = inlined_call_operand.vmem [shape: bf16[512,48], index: 21, kind: input, shape index: {}]   ;;  %s10186_s22 = inlined_call_operand.vmem [shape: f32[1,48], index: 22, kind: input, shape index: {}]   ;;  %s10187_s23 = inlined_call_operand.vmem [shape: f32[1,48], index: 23, kind: input, shape index: {}]   ;;  %s10188_s24 = inlined_call_operand.vmem [shape: f32[1,48], index: 24, kind: input, shape index: {}]   ;;  %s10189_s25 = inlined_call_operand.vmem [shape: f32[48,2], index: 25, kind: input, shape index: {}]   ;;  %s10190_s26 = inlined_call_operand.vmem [shape: f32[1,2], index: 26, kind: input, shape index: {}]   ;;  %s10191_s27 = inlined_call_operand.hbm [shape: f32[2,2], index: 27, kind: output, shape index: {}]  }
   0x1   :  { %10198 = sst [smem:[#allocation9_spill]] %s10164_s0 }
   0x2   :  { %10199 = sst [smem:[#allocation10_spill]] %s10165_s1 }
   0x3   :  { %10200 = sst [smem:[#allocation11_spill]] %s10166_s2 }
   0x4   :  { %10201 = sst [smem:[#allocation12_spill]] %s10167_s3 }
   0x5   :  { %10202 = sst [smem:[#allocation13_spill]] %s10168_s4 }
   0x6   :  { %10203 = sst [smem:[#allocation14_spill]] %s10169_s5 }
   0x7   :  { %10204 = sst [smem:[#allocation15_spill]] %s10170_s6 }
   0x8   :  { %10205 = sst [smem:[#allocation16_spill]] %s10171_s7 }
   0x9   :  { %10206 = sst [smem:[#allocation17_spill]] %s10172_s8 }
   0xa   :  { %10207 = sst [smem:[#allocation18_spill]] %s10173_s9 }
   0xb   :  { %10208 = sst [smem:[#allocation19_spill]] %s10174_s10 }
   0xc   :  { %10209 = sst [smem:[#allocation20_spill]] %s10175_s11 }
   0xd   :  { %s10210_s8 = sld [smem:[#allocation9_spill]]  ;;  %v8104_v2 = vmov 0   ;;  %s10211_s6 = sld [smem:[#allocation11_spill]]  ;;  %v8105_v21 = vmov 0.0|0.0   ;;  %vm205_vm0 = vcmask 1040384   ;;  %v8106_v22 = vmov 0.0  }
   0xe   :  { %7700 = vset.pattern.permute.xlu1 %v8104_v2  ;;  %7699 = vset.pattern.permute.xlu0 %v8104_v2  ;;  %s10212_s0 = sld [smem:[#allocation14_spill]]  ;;  %vm8107_vm1 = vmmov 0  }
   0xf   :  { %244 = vmatprep.mubr.bf16.mxu0 %v8104_v2  ;;  %7552 = vmatprep.subr.bf16.mxu1 %v8105_v21 }
  0x10   :  { %7162 = vmatprep.mubr.msk.f32.mxu1 %vm8107_vm1, %v8106_v22 }
  0x13   :  { %v90_v0 = vld [vmem:[%s10210_s8 + $0x10] sm:$0xff]  ;;  %v88_v1 = vld [vmem:[%s10210_s8] sm:$0xff]  ;;  %v91_v3 = vld [vmem:[%s10210_s8 + $0x18] sm:$0xff] }
  0x14   :  { %105 = vperm.xlu1 %7700, %v90_v0   ;;  %99 = vperm.xlu0 %7699, %v88_v1   ;;  %v89_v4 = vld [vmem:[%s10210_s8 + $0x8] sm:$0xff]  ;;  %v7704_v7 = vld [vmem:[%s10211_s6 + $0x14] ss:$8 sps:$4 sm:$0xff]   ;;  %v92_v9 = vld [vmem:[%s10210_s8 + $0x20] sm:$0xff] }
  0x15   :  { %v7701_v5 = vld [vmem:[%s10211_s6 + $0x4] ss:$8 sps:$4 sm:$0xff]   ;;  %v7703_v6 = vld [vmem:[%s10211_s6] ss:$8 sps:$4 sm:$0xff]   ;;  %v7706_v10 = vld [vmem:[%s10211_s6 + $0x10] ss:$8 sps:$4 sm:$0xff]  }
  0x16   :  { %v93_v8 = vld [vmem:[%s10210_s8 + $0x28] sm:$0xff]  ;;  %212 = vmatprep.subr.bf16.mxu0 %v7701_v5  ;;  %v156_v12 = vld [vmem:[%s10211_s6 + $0x30] sm:$0x11]  ;;  %v95_v13 = vld [vmem:[%s10210_s8 + $0x38] sm:$0xff] }
  0x17   :  { %v7707_v11 = vld [vmem:[%s10211_s6 + $0x24] ss:$8 sps:$4 sm:$0xff]   ;;  %213 = vmatpush1.bf16.msra.mxu0 %v7703_v6  ;;  %v94_v14 = vld [vmem:[%s10210_s8 + $0x30] sm:$0xff]  ;;  %v7709_v15 = vld [vmem:[%s10211_s6 + $0x20] ss:$8 sps:$4 sm:$0xff]   ;;  %v6757_v19 = vcombine.high %v156_v12, %v156_v12  ;;  %v6756_v20 = vcombine.low %v156_v12, %v156_v12 }
  0x18   :  { %108 = vperm.xlu1 %7700, %v91_v3   ;;  %102 = vperm.xlu0 %7699, %v89_v4   ;;  %v367_v16 = vld [vmem:[%s10212_s0] sm:$0xff]  ;;  %v368_v17 = vld [vmem:[%s10212_s0 + $0x8] sm:$0xff]  ;;  %v8326_v24 = vld [vmem:[%s10212_s0 + $0x10] sm:$0xff] }
  0x19   :  { %214 = vmatprep.subr.bf16.mxu0 %v7704_v7  ;;  %v8318_v18 = vpack.c.bf16 %v368_v17, %v367_v16  ;;  %v207_v23 = vsel %vm205_vm0, %v6756_v20, 0  ;;  %v6763_v25 = vld [vmem:[%s10212_s0 + $0x18] sm:$0xff]  ;;  %v6764_v26 = vld [vmem:[%s10212_s0 + $0x20] sm:$0xff]  ;;  %v8347_v28 = vld [vmem:[%s10212_s0 + $0x28] sm:$0xff] }
  0x1a   :  { %v8342_v27 = vpack.c.bf16 %v6764_v26, %v6763_v25 }
  0x1b   :  { %215 = vmatpush1.bf16.msra.mxu0 %v7706_v10  ;;  %7554 = vmatpush3.bf16.msra.mxu1 %v8318_v18 }
  0x1c   :  { %114 = vperm.xlu1 %7700, %v93_v8   ;;  %111 = vperm.xlu0 %7699, %v92_v9  }
  0x1d   :  { %216 = vmatprep.subr.bf16.mxu0 %v7707_v11  ;;  %7160 = vmatprep.subr.mxu1 %v8106_v22 }
  0x1f   :  { %217 = vmatpush1.bf16.msra.mxu0 %v7709_v15  ;;  %7161 = vmatpush3.msra.mxu1 %v8326_v24 }
  0x20   :  { %120 = vperm.xlu1 %7700, %v95_v13   ;;  %117 = vperm.xlu0 %7699, %v94_v14  }
  0x21   :  { %6758 = vmatprep.subr.msk.bf16.mxu0 %vm205_vm0, %v6757_v19  ;;  %7163 = vmatmul.mubr.f32.vlgmr.msra.gmra.mrb[0].mxu1 %v8106_v22 }
  0x22   :  { %7555 = vmatprep.subr.bf16.mxu1 %v8105_v21  ;;  %7171 = vmatprep.mubr.msk.f32.mxu1 %vm8107_vm1, %v8106_v22 }
  0x23   :  { %219 = vmatpush1.bf16.msra.mxu0 %v207_v23  ;;  %7557 = vmatpush3.bf16.msra.mxu1 %v8342_v27 }
  0x24   :  { %7573 = vmatprep.subr.bf16.mxu0 %v8105_v21  ;;  %7169 = vmatprep.subr.mxu1 %v8106_v22 }
  0x25   :  { %32 = vsyncpa [#allocation7], 0  ;;  %v96_v29 = vlaneseq  ;;  %vm192_vm4 = vcmask 408576   ;;  %vm285_vm11 = vcmask 785408   ;;  %s8108_s30 = smov 32   ;;  %s8109_s9 = smov 80  }
  0x26   :  { %vm342_vm12 = vcmask 261120   ;;  %s8110_s5 = smov 24   ;;  %s10213_s29 = sld [smem:[#allocation10_spill]]  ;;  %vm376_vm13 = vcmask 195584   ;;  %vm2417_vm14 = vcmask 1043456   ;;  %vm4750_vm15 = vcmask 392192  }
  0x27   :  { %7170 = vmatpush3.msra.mxu1 %v8347_v28  ;;  %v97_v30 = vand.u32 127, %v96_v29  ;;  %s8111_s1 = smov 48   ;;  %s8112_s11 = smov 56   ;;  %vm4876_vm0 = vcmask 64512  }
  0x28   :  { %7172 = vmatmul.mubr.f32.vlgmr.msra.gmra.mrb[2].mxu1 %v8106_v22  ;;  %7558 = vmatprep.subr.bf16.mxu1 %v8105_v21  ;;  %s10214_s8 = sld [smem:[#allocation12_spill]]  ;;  %s10215_s3 = sld [smem:[#allocation13_spill]] }
  0x29   :  { %7560 = vmatpush3.bf16.msra.mxu1 %v8318_v18  ;;  %7180 = vmatprep.mubr.msk.f32.mxu1 %vm8107_vm1, %v8106_v22  ;;  %s10217_s28 = sld [smem:[#allocation16_spill]]  ;;  %s8114_s6 = smov 120  }
  0x2a   :  { %7178 = vmatprep.subr.mxu1 %v8106_v22  ;;  %s8117_s2 = smov 96   ;;  %s10220_s7 = sld [smem:[#allocation18_spill]] }
  0x2b   :  { %s8120_s4 = smov 40  }
  0x2c   :  { %v374_v23 = vld [vmem:[%s10213_s29] sm:$0xff] }
  0x2d   :  { %7179 = vmatpush3.msra.mxu1 %v8326_v24 }
  0x2e   :  { %7561 = vmatprep.subr.bf16.mxu1 %v8105_v21 }
  0x93   :  { %v100_v31 = vpop.permute.xlu0 %99  ;;  %v106_v32 = vpop.permute.xlu1 %105 }
  0x94   :  { %vm122_vm2 = vcmp.eq.s32.totalorder %v97_v30, %v100_v31  ;;  %vm124_vm5 = vcmp.eq.s32.totalorder %v97_v30, %v106_v32 }
  0x95   :  { %v6742_v34 = vsel %vm122_vm2, 1.0, %v8106_v22  ;;  %v6744_v38 = vsel %vm124_vm5, 1.0, %v8106_v22  ;;  %vm5894_vm2 = vcmask 130048  }
  0x97   :  { %v103_v33 = vpop.permute.xlu0 %102  ;;  %v109_v37 = vpop.permute.xlu1 %108 }
  0x98   :  { %vm123_vm3 = vcmp.eq.s32.totalorder %v97_v30, %v103_v33  ;;  %vm125_vm6 = vcmp.eq.s32.totalorder %v97_v30, %v109_v37  ;;  %v491_v37 = vld [vmem:[%s10213_s29 + $0x38] sm:$0xff] }
  0x99   :  { %v6743_v35 = vsel %vm123_vm3, 1.0, %v8106_v22  ;;  %v6745_v39 = vsel %vm125_vm6, 1.0, %v8106_v22  ;;  %vm5898_vm3 = vcmask 326656  }
  0x9a   :  { %v146_v36 = vpack.c.bf16 %v6743_v35, %v6742_v34  ;;  %v147_v42 = vpack.c.bf16 %v6745_v39, %v6744_v38  ;;  %v594_v39 = vsub.f32 1.0, %v491_v37 }
  0x9b   :  { %v115_v40 = vpop.permute.xlu1 %114  ;;  %v112_v41 = vpop.permute.xlu0 %111 }
  0x9c   :  { %6759 = vmatmul.mubr.msk.bf16.vlgmr.msra.gmra.mrb[0].mxu0 %vm192_vm4, %v146_v36  ;;  %vm127_vm7 = vcmp.eq.s32.totalorder %v97_v30, %v115_v40  ;;  %vm126_vm8 = vcmp.eq.s32.totalorder %v97_v30, %v112_v41 }
  0x9d   :  { %254 = vmatprep.mubr.bf16.mxu0 %v8104_v2  ;;  %7575 = vmatpush3.bf16.msra.mxu0 %v8342_v27  ;;  %v6747_v43 = vsel %vm127_vm7, 1.0, %v8106_v22  ;;  %v6746_v44 = vsel %vm126_vm8, 1.0, %v8106_v22 }
  0x9e   :  { %7223 = vmatprep.subr.mxu0 %v8106_v22  ;;  %v148_v47 = vpack.c.bf16 %v6747_v43, %v6746_v44  ;;  %v481_v43 = vsub.f32 1.0, %v374_v23 }
  0x9f   :  { %v121_v45 = vpop.permute.xlu1 %120  ;;  %v118_v46 = vpop.permute.xlu0 %117 }
  0xa0   :  { %vm129_vm9 = vcmp.eq.s32.totalorder %v97_v30, %v121_v45  ;;  %vm128_vm10 = vcmp.eq.s32.totalorder %v97_v30, %v118_v46 }
  0xa1   :  { %7224 = vmatpush3.msra.mxu0 %v8347_v28  ;;  %v6749_v48 = vsel %vm129_vm9, 1.0, %v8106_v22  ;;  %v6748_v49 = vsel %vm128_vm10, 1.0, %v8106_v22 }
  0xa2   :  { %7579 = vmatprep.subr.bf16.mxu0 %v8105_v21  ;;  %v149_v50 = vpack.c.bf16 %v6749_v48, %v6748_v49 }
  0xa4   :  { %6760 = vmatmul.mubr.msk.bf16.gmra.mrb[4].mxu0 %vm192_vm4, %v147_v42 }
  0xa5   :  { %264 = vmatprep.mubr.bf16.mxu0 %v8104_v2 }
  0xac   :  { %6761 = vmatmul.mubr.msk.bf16.gmra.mrb[8].mxu0 %vm192_vm4, %v148_v47 }
  0xad   :  { %274 = vmatprep.mubr.bf16.mxu0 %v8104_v2 }
  0xb4   :  { %6762 = vmatmul.mubr.msk.bf16.gmra.mrb[12].mxu0 %vm192_vm4, %v149_v50 }
  0xb5   :  { %7225 = vmatprep.mubr.msk.f32.mxu0 %vm8107_vm1, %v8106_v22 }
  0xf4   :  { %v446_v51 = vpop.f32.mrb[0].mxu1 }
  0xf5   :  { %v7164_v52 = vpop.f32.mrb[1].mxu1 }
  0xfb   :  { %v559_v4 = vpop.f32.mrb[2].mxu1 }
  0xfc   :  { %v7173_v5 = vpop.f32.mrb[3].mxu1 }
 0x16f   :  { %v8382_v53 = vpop.f32.mrb[0].mxu0 }
 0x170   :  { %286 = vst.msk [vmem:[#allocation4] sm:$0xff] %vm285_vm11, %v8382_v53  ;;  %v8386_v54 = vpop.f32.mrb[1].mxu0 }
 0x171   :  { %v8388_v55 = vpop.f32.mrb[2].mxu0 }
 0x172   :  { %287 = vst.msk [vmem:[#allocation4 + $0x8] sm:$0xff] %vm285_vm11, %v8388_v55  ;;  %v8392_v56 = vpop.f32.mrb[3].mxu0 }
 0x177   :  { %v8394_v57 = vpop.f32.mrb[4].mxu0  ;;  %v375_v61 = vld [vmem:[#allocation4] sm:$0xff] }
 0x178   :  { %288 = vst.msk [vmem:[#allocation4 + $0x10] sm:$0xff] %vm285_vm11, %v8394_v57  ;;  %v8398_v58 = vpop.f32.mrb[5].mxu0  ;;  %v450_v62 = vadd.f32 %v446_v51, %v375_v61 }
 0x179   :  { %v8400_v59 = vpop.f32.mrb[6].mxu0 }
 0x17a   :  { %289 = vst.msk [vmem:[#allocation4 + $0x18] sm:$0xff] %vm285_vm11, %v8400_v59  ;;  %v8404_v60 = vpop.f32.mrb[7].mxu0  ;;  %7784 = vtanh.f32 %v450_v62  ;;  %v6766_v11 = vmul.f32 -1.442695, %v450_v62 }
 0x17c   :  { %7786 = vpow2.f32 %v6766_v11 }
 0x17f   :  { %v8406_v63 = vpop.f32.mrb[8].mxu0 }
 0x180   :  { %290 = vst.msk [vmem:[#allocation4 + $0x20] sm:$0xff] %vm285_vm11, %v8406_v63  ;;  %v8410_v0 = vpop.f32.mrb[9].mxu0 }
 0x181   :  { %v8412_v1 = vpop.f32.mrb[10].mxu0 }
 0x182   :  { %291 = vst.msk [vmem:[#allocation4 + $0x28] sm:$0xff] %vm285_vm11, %v8412_v1  ;;  %v8416_v3 = vpop.f32.mrb[11].mxu0 }
 0x184   :  { %v7785_v10 = vpop.eup %7784 }
 0x186   :  { %v7787_v12 = vpop.eup %7786 }
 0x187   :  { %v8418_v6 = vpop.f32.mrb[12].mxu0  ;;  %v454_v13 = vadd.f32 1.0, %v7787_v12 }
 0x188   :  { %292 = vst.msk [vmem:[#allocation4 + $0x30] sm:$0xff] %vm285_vm11, %v8418_v6  ;;  %v8422_v7 = vpop.f32.mrb[13].mxu0 }
 0x189   :  { %v280_v8 = vpop.f32.mrb[14].mxu0  ;;  %7788 = vrcp.f32 %v454_v13 }
 0x18a   :  { %293 = vst.msk [vmem:[#allocation4 + $0x38] sm:$0xff] %vm285_vm11, %v280_v8  ;;  %338 = vrot.lane.b32.xlu0 %v280_v8, %s8108_s30  ;;  %v282_v9 = vpop.f32.mrb[15].mxu0 }
 0x18b   :  { %340 = vrot.lane.b32.xlu1 %v282_v9, %s8108_s30 }
 0x18e   :  { %460 = vrot.lane.b32.xlu0 %v7785_v10, %s8109_s9 }
 0x193   :  { %v7789_v17 = vpop.eup %7788 }
 0x194   :  { %v458_v32 = vmul.f32 0.0, %v7789_v17 }
 0x1fc   :  { %v339_v14 = vpop.permute.xlu0 %338 }
 0x1fd   :  { %v341_v15 = vpop.permute.xlu1 %340 }
 0x1fe   :  { %v350_v16 = vsel %vm342_vm12, %v339_v14, %v341_v15 }
 0x1ff   :  { %366 = vst.msk [vmem:[#allocation5 + $0x38] sm:$0xff] %vm285_vm11, %v350_v16 }
 0x200   :  { %v461_v19 = vpop.permute.xlu0 %460 }
 0x201   :  { %v463_v20 = vmul.f32 %v7789_v17, %v461_v19  ;;  %v617_v19 = vld [vmem:[#allocation4 + $0x8] sm:$0xff] }
 0x203   :  { %465 = vrot.lane.b32.xlu0 %v463_v20, %s8110_s5 }
 0x206   :  { %v492_v25 = vld [vmem:[#allocation5 + $0x38] sm:$0xff] }
 0x207   :  { %v563_v26 = vadd.f32 %v559_v4, %v492_v25  ;;  %477 = vperm.xlu0 %7699, %v374_v23  }
 0x209   :  { %7790 = vtanh.f32 %v563_v26  ;;  %v6767_v31 = vmul.f32 -1.442695, %v563_v26 }
 0x20b   :  { %7792 = vpow2.f32 %v6767_v31 }
 0x213   :  { %v7791_v30 = vpop.eup %7790 }
 0x214   :  { %573 = vrot.lane.b32.xlu1 %v7791_v30, %s8109_s9 }
 0x215   :  { %v7793_v33 = vpop.eup %7792 }
 0x216   :  { %v567_v36 = vadd.f32 1.0, %v7793_v33 }
 0x275   :  { %v466_v34 = vpop.permute.xlu0 %465 }
 0x276   :  { %v468_v35 = vadd.f32 %v466_v34, %v458_v32 }
 0x278   :  { %7794 = vtanh.f32 %v468_v35 }
 0x279   :  { %7796 = vrcp.f32 %v567_v36 }
 0x282   :  { %v7795_v38 = vpop.eup %7794 }
 0x283   :  { %471 = vrot.lane.b32.xlu0 %v7795_v38, %s8111_s1  ;;  %v7797_v40 = vpop.eup %7796 }
 0x284   :  { %v571_v44 = vmul.f32 0.0, %v7797_v40 }
 0x286   :  { %v574_v41 = vpop.permute.xlu1 %573  ;;  %v8443_v47 = vpop.permute.xlu0 %477 }
 0x287   :  { %v576_v42 = vmul.f32 %v7797_v40, %v574_v41  ;;  %597 = vperm.xlu0 %7699, %v594_v39   ;;  %v489_v61 = vmul.f32 %v8443_v47, %v468_v35  ;;  %v8490_v41 = vld [vmem:[%s10213_s29 + $0x8] sm:$0xff] }
 0x289   :  { %578 = vrot.lane.b32.xlu1 %v576_v42, %s8110_s5 }
 0x28d   :  { %484 = vperm.xlu1 %7700, %v481_v43  }
 0x291   :  { %590 = vperm.xlu1 %7700, %v491_v37  }
 0x2f5   :  { %v472_v48 = vpop.permute.xlu0 %471 }
 0x2f6   :  { %v474_v50 = vmul.f32 %v7789_v17, %v472_v48 }
 0x2f8   :  { %v480_v52 = vmul.f32 %v8443_v47, %v474_v50  ;;  %v724_v50 = vsub.f32 1.0, %v8490_v41 }
 0x2fb   :  { %v579_v45 = vpop.permute.xlu1 %578 }
 0x2fc   :  { %v8440_v46 = vadd.f32 %v579_v45, %v571_v44 }
 0x2fe   :  { %7798 = vtanh.f32 %v8440_v46 }
 0x306   :  { %v598_v9 = vpop.permute.xlu0 %597 }
 0x307   :  { %v8458_v12 = vmul.f32 0.0, %v598_v9 }
 0x308   :  { %v7799_v49 = vpop.eup %7798 }
 0x309   :  { %584 = vrot.lane.b32.xlu1 %v7799_v49, %s8111_s1 }
 0x30c   :  { %v485_v51 = vpop.permute.xlu1 %484 }
 0x30d   :  { %v487_v62 = vmul.f32 0.0, %v485_v51 }
 0x30f   :  { %v8448_v4 = vadd.f32 %v487_v62, %v480_v52  ;;  %v8450_v5 = vadd.f32 %v489_v61, %v487_v62  ;;  %v8504_v62 = vld [vmem:[%s10213_s29 + $0x30] sm:$0xff] }
 0x310   :  { %v8456_v8 = vpop.permute.xlu1 %590 }
 0x311   :  { %619 = vrot.lane.b32.xlu0 %v8448_v4, %s8112_s11 }
 0x315   :  { %334 = vrot.lane.b32.xlu0 %v8418_v6, %s8108_s30 }
 0x37b   :  { %v585_v10 = vpop.permute.xlu1 %584 }
 0x37c   :  { %v587_v11 = vmul.f32 %v7797_v40, %v585_v10  ;;  %v843_v10 = vsub.f32 1.0, %v8504_v62 }
 0x37e   :  { %v593_v13 = vmul.f32 %v8456_v8, %v587_v11  ;;  %v602_v11 = vmul.f32 %v8456_v8, %v8440_v46 }
 0x380   :  { %v8462_v14 = vadd.f32 %v8458_v12, %v593_v13  ;;  %v8514_v13 = vadd.f32 %v602_v11, %v8458_v12 }
 0x382   :  { %738 = vrot.lane.b32.xlu1 %v8462_v14, %s8112_s11 }
 0x383   :  { %v620_v15 = vpop.permute.xlu0 %619 }
 0x384   :  { %7181 = vmatmul.mubr.msk.f32.vlgmr.msra.gmra.mrb[4].mxu1 %vm376_vm13, %v620_v15 }
 0x385   :  { %7563 = vmatpush3.bf16.msra.mxu1 %v8342_v27  ;;  %7189 = vmatprep.mubr.msk.f32.mxu1 %vm8107_vm1, %v8106_v22 }
 0x386   :  { %336 = vrot.lane.b32.xlu1 %v8422_v7, %s8108_s30  ;;  %7187 = vmatprep.subr.mxu1 %v8106_v22 }
 0x387   :  { %v335_v16 = vpop.permute.xlu0 %334 }
 0x389   :  { %7188 = vmatpush3.msra.mxu1 %v8347_v28 }
 0x38a   :  { %7564 = vmatprep.subr.bf16.mxu1 %v8105_v21 }
 0x3f4   :  { %v739_v6 = vpop.permute.xlu1 %738 }
 0x3f5   :  { %7190 = vmatmul.mubr.msk.f32.vlgmr.msra.gmra.mrb[6].mxu1 %vm376_vm13, %v739_v6 }
 0x3f6   :  { %7566 = vmatpush3.bf16.msra.mxu1 %v8318_v18  ;;  %7198 = vmatprep.mubr.msk.f32.mxu1 %vm8107_vm1, %v8106_v22 }
 0x3f7   :  { %7196 = vmatprep.subr.mxu1 %v8106_v22 }
 0x3f8   :  { %v337_v17 = vpop.permute.xlu1 %336 }
 0x3f9   :  { %v349_v7 = vsel %vm342_vm12, %v335_v16, %v337_v17 }
 0x3fa   :  { %365 = vst.msk [vmem:[#allocation5 + $0x30] sm:$0xff] %vm285_vm11, %v349_v7  ;;  %7197 = vmatpush3.msra.mxu1 %v8326_v24 }
 0x3fb   :  { %7567 = vmatprep.subr.bf16.mxu1 %v8105_v21 }
 0x401   :  { %v736_v32 = vld [vmem:[#allocation5 + $0x30] sm:$0xff] }
 0x457   :  { %v689_v20 = vpop.f32.mrb[4].mxu1 }
 0x458   :  { %v693_v23 = vadd.f32 %v689_v20, %v617_v19  ;;  %v7182_v25 = vpop.f32.mrb[5].mxu1 }
 0x45a   :  { %7800 = vtanh.f32 %v693_v23  ;;  %v6769_v30 = vmul.f32 -1.442695, %v693_v23 }
 0x45c   :  { %7802 = vpow2.f32 %v6769_v30 }
 0x464   :  { %v7801_v26 = vpop.eup %7800 }
 0x465   :  { %703 = vrot.lane.b32.xlu0 %v7801_v26, %s8109_s9 }
 0x466   :  { %v7803_v31 = vpop.eup %7802 }
 0x467   :  { %v697_v34 = vadd.f32 1.0, %v7803_v31 }
 0x4c8   :  { %v808_v33 = vpop.f32.mrb[6].mxu1 }
 0x4c9   :  { %v812_v35 = vadd.f32 %v808_v33, %v736_v32  ;;  %v7191_v36 = vpop.f32.mrb[7].mxu1 }
 0x4cb   :  { %7804 = vtanh.f32 %v812_v35  ;;  %v6771_v42 = vmul.f32 -1.442695, %v812_v35 }
 0x4cc   :  { %7806 = vrcp.f32 %v697_v34 }
 0x4cd   :  { %7808 = vpow2.f32 %v6771_v42 }
 0x4d5   :  { %v7805_v37 = vpop.eup %7804 }
 0x4d6   :  { %822 = vrot.lane.b32.xlu1 %v7805_v37, %s8109_s9  ;;  %v7807_v38 = vpop.eup %7806 }
 0x4d7   :  { %v704_v39 = vpop.permute.xlu0 %703  ;;  %v7809_v43 = vpop.eup %7808  ;;  %v701_v51 = vmul.f32 %v7807_v38, %v8450_v5 }
 0x4d8   :  { %v706_v40 = vmul.f32 %v7807_v38, %v704_v39  ;;  %v816_v44 = vadd.f32 1.0, %v7809_v43  ;;  %v867_v39 = vld [vmem:[#allocation4 + $0x10] sm:$0xff] }
 0x4da   :  { %708 = vrot.lane.b32.xlu0 %v706_v40, %s8110_s5  ;;  %7810 = vrcp.f32 %v816_v44 }
 0x4de   :  { %720 = vperm.xlu0 %7699, %v8490_v41  }
 0x4e4   :  { %v7811_v45 = vpop.eup %7810 }
 0x4e5   :  { %v820_v15 = vmul.f32 %v7811_v45, %v8514_v13 }
 0x548   :  { %v823_v48 = vpop.permute.xlu1 %822 }
 0x549   :  { %v825_v49 = vmul.f32 %v7811_v45, %v823_v48 }
 0x54b   :  { %827 = vrot.lane.b32.xlu1 %v825_v49, %s8110_s5 }
 0x54c   :  { %v709_v52 = vpop.permute.xlu0 %708 }
 0x54d   :  { %v8496_v61 = vadd.f32 %v709_v52, %v701_v51 }
 0x54f   :  { %7812 = vtanh.f32 %v8496_v61  ;;  %727 = vperm.xlu1 %7700, %v724_v50  }
 0x553   :  { %839 = vperm.xlu1 %7700, %v8504_v62  }
 0x559   :  { %v7813_v9 = vpop.eup %7812 }
 0x55a   :  { %714 = vrot.lane.b32.xlu0 %v7813_v9, %s8111_s1 }
 0x55d   :  { %v8520_v17 = vpop.permute.xlu0 %720 }
 0x55e   :  { %846 = vperm.xlu0 %7699, %v843_v10  }
 0x5bd   :  { %v828_v6 = vpop.permute.xlu1 %827 }
 0x5be   :  { %v8517_v16 = vadd.f32 %v828_v6, %v820_v15 }
 0x5c0   :  { %7814 = vtanh.f32 %v8517_v16 }
 0x5ca   :  { %v7815_v7 = vpop.eup %7814 }
 0x5cb   :  { %833 = vrot.lane.b32.xlu1 %v7815_v7, %s8111_s1 }
 0x5cc   :  { %v715_v19 = vpop.permute.xlu0 %714 }
 0x5cd   :  { %v717_v20 = vmul.f32 %v7807_v38, %v715_v19  ;;  %v8568_v19 = vld [vmem:[%s10213_s29 + $0x28] sm:$0xff] }
 0x5ce   :  { %v8523_v23 = vpop.permute.xlu1 %727 }
 0x5cf   :  { %v723_v46 = vmul.f32 %v8520_v17, %v717_v20  ;;  %v730_v12 = vmul.f32 %v8523_v23, %v8448_v4 }
 0x5d1   :  { %v8528_v25 = vadd.f32 %v730_v12, %v723_v46  ;;  %v1093_v46 = vsub.f32 1.0, %v8568_v19  ;;  %v8577_v12 = vld [vmem:[%s10213_s29 + $0x10] sm:$0xff] }
 0x5d2   :  { %v8534_v26 = vpop.permute.xlu1 %839 }
 0x5d3   :  { %869 = vrot.lane.b32.xlu0 %v8528_v25, %s8112_s11 }
 0x5d7   :  { %330 = vrot.lane.b32.xlu0 %v8412_v1, %s8108_s30 }
 0x5dd   :  { %v8536_v30 = vpop.permute.xlu0 %846 }
 0x5de   :  { %v849_v33 = vmul.f32 %v8536_v30, %v8462_v14 }
 0x63d   :  { %v834_v31 = vpop.permute.xlu1 %833 }
 0x63e   :  { %v836_v32 = vmul.f32 %v7811_v45, %v834_v31 }
 0x640   :  { %v842_v34 = vmul.f32 %v8534_v26, %v836_v32 }
 0x642   :  { %v8541_v35 = vadd.f32 %v849_v33, %v842_v34  ;;  %v733_v34 = vmul.f32 %v8523_v23, %v8450_v5  ;;  %v851_v23 = vmul.f32 %v8534_v26, %v8517_v16 }
 0x644   :  { %988 = vrot.lane.b32.xlu1 %v8541_v35, %s8112_s11 }
 0x645   :  { %v870_v36 = vpop.permute.xlu0 %869 }
 0x646   :  { %7199 = vmatmul.mubr.msk.f32.vlgmr.msra.gmra.mrb[8].mxu1 %vm376_vm13, %v870_v36  ;;  %v732_v36 = vmul.f32 %v8520_v17, %v8496_v61  ;;  %v852_v61 = vmul.f32 %v8536_v30, %v8514_v13 }
 0x647   :  { %7569 = vmatpush3.bf16.msra.mxu1 %v8342_v27  ;;  %7207 = vmatprep.mubr.msk.f32.mxu1 %vm8107_vm1, %v8106_v22 }
 0x648   :  { %332 = vrot.lane.b32.xlu1 %v8416_v3, %s8108_s30  ;;  %7205 = vmatprep.subr.mxu1 %v8106_v22 }
 0x649   :  { %v331_v37 = vpop.permute.xlu0 %330 }
 0x64b   :  { %7206 = vmatpush3.msra.mxu1 %v8347_v28 }
 0x64c   :  { %7570 = vmatprep.subr.bf16.mxu1 %v8105_v21 }
 0x6b6   :  { %v989_v1 = vpop.permute.xlu1 %988 }
 0x6b7   :  { %7208 = vmatmul.mubr.msk.f32.vlgmr.msra.gmra.mrb[10].mxu1 %vm376_vm13, %v989_v1 }
 0x6b8   :  { %7572 = vmatpush3.bf16.msra.mxu1 %v8318_v18  ;;  %7216 = vmatprep.mubr.msk.f32.mxu1 %vm8107_vm1, %v8106_v22 }
 0x6b9   :  { %7214 = vmatprep.subr.mxu1 %v8106_v22 }
 0x6ba   :  { %v333_v38 = vpop.permute.xlu1 %332 }
 0x6bb   :  { %v348_v3 = vsel %vm342_vm12, %v331_v37, %v333_v38  ;;  %v8584_v38 = vadd.f32 %v733_v34, %v732_v36 }
 0x6bc   :  { %364 = vst.msk [vmem:[#allocation5 + $0x28] sm:$0xff] %vm285_vm11, %v348_v3  ;;  %7215 = vmatpush3.msra.mxu1 %v8326_v24 }
 0x6bd   :  { %7576 = vmatprep.subr.bf16.mxu1 %v8105_v21 }
 0x6c3   :  { %v986_v49 = vld [vmem:[#allocation5 + $0x28] sm:$0xff] }
 0x719   :  { %v939_v40 = vpop.f32.mrb[8].mxu1 }
 0x71a   :  { %v943_v42 = vadd.f32 %v939_v40, %v867_v39  ;;  %v7200_v43 = vpop.f32.mrb[9].mxu1 }
 0x71b   :  { %v8597_v43 = vadd.f32 %v852_v61, %v851_v23  ;;  %v1117_v23 = vld [vmem:[#allocation4 + $0x18] sm:$0xff] }
 0x71c   :  { %7816 = vtanh.f32 %v943_v42  ;;  %v6773_v45 = vmul.f32 -1.442695, %v943_v42 }
 0x71e   :  { %7818 = vpow2.f32 %v6773_v45 }
 0x726   :  { %v7817_v44 = vpop.eup %7816 }
 0x727   :  { %953 = vrot.lane.b32.xlu1 %v7817_v44, %s8109_s9 }
 0x728   :  { %v7819_v48 = vpop.eup %7818 }
 0x729   :  { %v947_v52 = vadd.f32 1.0, %v7819_v48 }
 0x78a   :  { %v1058_v51 = vpop.f32.mrb[10].mxu1 }
 0x78b   :  { %v1062_v9 = vadd.f32 %v1058_v51, %v986_v49  ;;  %v7209_v11 = vpop.f32.mrb[11].mxu1  ;;  %v974_v51 = vsub.f32 1.0, %v8577_v12 }
 0x78d   :  { %7820 = vtanh.f32 %v1062_v9  ;;  %v6775_v31 = vmul.f32 -1.442695, %v1062_v9 }
 0x78e   :  { %7822 = vrcp.f32 %v947_v52 }
 0x78f   :  { %7824 = vpow2.f32 %v6775_v31 }
 0x797   :  { %v7821_v15 = vpop.eup %7820 }
 0x798   :  { %1072 = vrot.lane.b32.xlu0 %v7821_v15, %s8109_s9  ;;  %v7823_v6 = vpop.eup %7822 }
 0x799   :  { %v954_v7 = vpop.permute.xlu1 %953  ;;  %v7825_v32 = vpop.eup %7824  ;;  %v951_v39 = vmul.f32 %v7823_v6, %v8584_v38 }
 0x79a   :  { %v956_v20 = vmul.f32 %v7823_v6, %v954_v7  ;;  %v1066_v33 = vadd.f32 1.0, %v7825_v32 }
 0x79c   :  { %958 = vrot.lane.b32.xlu1 %v956_v20, %s8110_s5  ;;  %7826 = vrcp.f32 %v1066_v33 }
 0x7a0   :  { %1096 = vperm.xlu1 %7700, %v1093_v46  }
 0x7a4   :  { %970 = vperm.xlu1 %7700, %v8577_v12  }
 0x7a6   :  { %v7827_v1 = vpop.eup %7826 }
 0x7a7   :  { %v1070_v44 = vmul.f32 %v7827_v1, %v8597_v43 }
 0x80a   :  { %v1073_v37 = vpop.permute.xlu0 %1072 }
 0x80b   :  { %v1075_v3 = vmul.f32 %v7827_v1, %v1073_v37 }
 0x80d   :  { %1077 = vrot.lane.b32.xlu0 %v1075_v3, %s8110_s5 }
 0x80e   :  { %v959_v40 = vpop.permute.xlu1 %958 }
 0x80f   :  { %v8588_v42 = vadd.f32 %v959_v40, %v951_v39 }
 0x811   :  { %7828 = vtanh.f32 %v8588_v42  ;;  %1089 = vperm.xlu0 %7699, %v8568_v19  }
 0x81b   :  { %v7829_v5 = vpop.eup %7828 }
 0x81c   :  { %964 = vrot.lane.b32.xlu1 %v7829_v5, %s8111_s1 }
 0x81f   :  { %v8609_v16 = vpop.permute.xlu1 %1096 }
 0x820   :  { %v1099_v9 = vmul.f32 %v8609_v16, %v8541_v35 }
 0x823   :  { %v8616_v7 = vpop.permute.xlu1 %970 }
 0x87f   :  { %v1078_v45 = vpop.permute.xlu0 %1077 }
 0x880   :  { %v8600_v48 = vadd.f32 %v1078_v45, %v1070_v44 }
 0x882   :  { %7830 = vtanh.f32 %v8600_v48 }
 0x88c   :  { %v7831_v49 = vpop.eup %7830 }
 0x88d   :  { %1083 = vrot.lane.b32.xlu0 %v7831_v49, %s8111_s1 }
 0x88e   :  { %v965_v20 = vpop.permute.xlu1 %964 }
 0x88f   :  { %v967_v31 = vmul.f32 %v7823_v6, %v965_v20 }
 0x890   :  { %v8607_v13 = vpop.permute.xlu0 %1089 }
 0x891   :  { %977 = vperm.xlu0 %7699, %v974_v51   ;;  %v973_v33 = vmul.f32 %v8616_v7, %v967_v31 }
 0x8ff   :  { %v1084_v30 = vpop.permute.xlu0 %1083 }
 0x900   :  { %v1086_v52 = vmul.f32 %v7827_v1, %v1084_v30 }
 0x902   :  { %v1092_v11 = vmul.f32 %v8607_v13, %v1086_v52 }
 0x904   :  { %v8614_v15 = vadd.f32 %v1099_v9, %v1092_v11 }
 0x906   :  { %1238 = vrot.lane.b32.xlu0 %v8614_v15, %s8112_s11 }
 0x90a   :  { %326 = vrot.lane.b32.xlu0 %v8406_v63, %s8108_s30 }
 0x910   :  { %v8622_v32 = vpop.permute.xlu0 %977 }
 0x911   :  { %v980_v34 = vmul.f32 %v8622_v32, %v8528_v25 }
 0x913   :  { %v8627_v36 = vadd.f32 %v980_v34, %v973_v33 }
 0x915   :  { %1119 = vrot.lane.b32.xlu1 %v8627_v36, %s8112_s11 }
 0x919   :  { %328 = vrot.lane.b32.xlu1 %v8410_v0, %s8108_s30 }
 0x978   :  { %v1239_v1 = vpop.permute.xlu0 %1238 }
 0x979   :  { %7226 = vmatmul.mubr.msk.f32.vlgmr.msra.gmra.mrb[16].mxu0 %vm376_vm13, %v1239_v1 }
 0x97a   :  { %7581 = vmatpush3.bf16.msra.mxu0 %v8342_v27  ;;  %7243 = vmatprep.mubr.msk.f32.mxu0 %vm8107_vm1, %v8106_v22 }
 0x97b   :  { %7241 = vmatprep.subr.mxu0 %v8106_v22 }
 0x97c   :  { %v327_v0 = vpop.permute.xlu0 %326 }
 0x97e   :  { %7242 = vmatpush3.msra.mxu0 %v8347_v28 }
 0x97f   :  { %7585 = vmatprep.subr.bf16.mxu0 %v8105_v21 }
 0x987   :  { %v1120_v63 = vpop.permute.xlu1 %1119 }
 0x988   :  { %7217 = vmatmul.mubr.msk.f32.vlgmr.msra.gmra.mrb[12].mxu1 %vm376_vm13, %v1120_v63  ;;  %v8655_v63 = vld [vmem:[%s10213_s29 + $0x20] sm:$0xff] }
 0x989   :  { %7578 = vmatpush3.bf16.msra.mxu1 %v8318_v18  ;;  %7234 = vmatprep.mubr.msk.f32.mxu1 %vm8107_vm1, %v8106_v22 }
 0x98a   :  { %7232 = vmatprep.subr.mxu1 %v8106_v22 }
 0x98b   :  { %v329_v6 = vpop.permute.xlu1 %328 }
 0x98c   :  { %v347_v37 = vsel %vm342_vm12, %v327_v0, %v329_v6 }
 0x98d   :  { %363 = vst.msk [vmem:[#allocation5 + $0x20] sm:$0xff] %vm285_vm11, %v347_v37  ;;  %7233 = vmatpush3.msra.mxu1 %v8326_v24 }
 0x98e   :  { %7582 = vmatprep.subr.bf16.mxu1 %v8105_v21 }
 0x994   :  { %v1236_v3 = vld [vmem:[#allocation5 + $0x20] sm:$0xff] }
 0xa4c   :  { %v1308_v39 = vpop.f32.mrb[16].mxu0 }
 0xa4d   :  { %v1312_v40 = vadd.f32 %v1308_v39, %v1236_v3  ;;  %v7227_v5 = vpop.f32.mrb[17].mxu0  ;;  %v1343_v3 = vsub.f32 1.0, %v8655_v63  ;;  %v8665_v39 = vld [vmem:[%s10213_s29 + $0x18] sm:$0xff] }
 0xa4e   :  { %v1102_v5 = vmul.f32 %v8609_v16, %v8597_v43  ;;  %v1224_v43 = vsub.f32 1.0, %v8665_v39 }
 0xa4f   :  { %7832 = vtanh.f32 %v1312_v40  ;;  %v6779_v52 = vmul.f32 -1.442695, %v1312_v40  ;;  %v1101_v40 = vmul.f32 %v8607_v13, %v8600_v48 }
 0xa59   :  { %v7833_v61 = vpop.eup %7832 }
 0xa5a   :  { %1322 = vrot.lane.b32.xlu0 %v7833_v61, %s8109_s9  ;;  %v8672_v61 = vadd.f32 %v1102_v5, %v1101_v40 }
 0xa5b   :  { %v1189_v44 = vpop.f32.mrb[12].mxu1 }
 0xa5c   :  { %v1193_v45 = vadd.f32 %v1189_v44, %v1117_v23  ;;  %v7218_v49 = vpop.f32.mrb[13].mxu1 }
 0xa5d   :  { %v983_v49 = vmul.f32 %v8622_v32, %v8584_v38 }
 0xa5e   :  { %7834 = vtanh.f32 %v1193_v45  ;;  %v6777_v9 = vmul.f32 -1.442695, %v1193_v45 }
 0xa5f   :  { %7836 = vpow2.f32 %v6779_v52 }
 0xa60   :  { %7838 = vpow2.f32 %v6777_v9 }
 0xa68   :  { %v7835_v30 = vpop.eup %7834 }
 0xa69   :  { %1203 = vrot.lane.b32.xlu1 %v7835_v30, %s8109_s9  ;;  %v7837_v24 = vpop.eup %7836  ;;  %v982_v30 = vmul.f32 %v8616_v7, %v8588_v42 }
 0xa6a   :  { %v1316_v11 = vadd.f32 1.0, %v7837_v24  ;;  %v7839_v20 = vpop.eup %7838 }
 0xa6b   :  { %v1197_v1 = vadd.f32 1.0, %v7839_v20  ;;  %v8682_v48 = vadd.f32 %v983_v49, %v982_v30 }
 0xa6c   :  { %7840 = vrcp.f32 %v1316_v11 }
 0xa6d   :  { %7842 = vrcp.f32 %v1197_v1 }
 0xa76   :  { %v7841_v31 = vpop.eup %7840 }
 0xa77   :  { %v7843_v0 = vpop.eup %7842  ;;  %v1320_v23 = vmul.f32 %v7841_v31, %v8672_v61 }
 0xa78   :  { %v1201_v16 = vmul.f32 %v7843_v0, %v8682_v48 }
 0xacc   :  { %v1323_v33 = vpop.permute.xlu0 %1322 }
 0xacd   :  { %v1325_v34 = vmul.f32 %v7841_v31, %v1323_v33 }
 0xacf   :  { %1327 = vrot.lane.b32.xlu0 %v1325_v34, %s8110_s5 }
 0xad3   :  { %1339 = vperm.xlu0 %7699, %v8655_v63  }
 0xadb   :  { %v1204_v6 = vpop.permute.xlu1 %1203 }
 0xadc   :  { %v1206_v37 = vmul.f32 %v7843_v0, %v1204_v6 }
 0xade   :  { %1208 = vrot.lane.b32.xlu1 %v1206_v37, %s8110_s5 }
 0xae2   :  { %1346 = vperm.xlu1 %7700, %v1343_v3  }
 0xae6   :  { %1220 = vperm.xlu1 %7700, %v8665_v39  }
 0xb41   :  { %v1328_v44 = vpop.permute.xlu0 %1327 }
 0xb42   :  { %v8675_v45 = vadd.f32 %v1328_v44, %v1320_v23 }
 0xb44   :  { %7844 = vtanh.f32 %v8675_v45 }
 0xb4e   :  { %v7845_v52 = vpop.eup %7844 }
 0xb4f   :  { %1333 = vrot.lane.b32.xlu0 %v7845_v52, %s8111_s1 }
 0xb50   :  { %v1209_v24 = vpop.permute.xlu1 %1208 }
 0xb51   :  { %v8687_v9 = vadd.f32 %v1209_v24, %v1201_v16 }
 0xb52   :  { %v8693_v42 = vpop.permute.xlu0 %1339 }
 0xb53   :  { %1227 = vperm.xlu0 %7699, %v1224_v43   ;;  %7846 = vtanh.f32 %v8687_v9 }
 0xb5d   :  { %v7847_v38 = vpop.eup %7846 }
 0xb5e   :  { %1214 = vrot.lane.b32.xlu1 %v7847_v38, %s8111_s1 }
 0xb61   :  { %v8695_v32 = vpop.permute.xlu1 %1346 }
 0xb62   :  { %v1349_v33 = vmul.f32 %v8695_v32, %v8614_v15 }
 0xb65   :  { %v8706_v6 = vpop.permute.xlu1 %1220 }
 0xbc1   :  { %v1334_v11 = vpop.permute.xlu0 %1333 }
 0xbc2   :  { %v1336_v20 = vmul.f32 %v7841_v31, %v1334_v11 }
 0xbc4   :  { %v1342_v34 = vmul.f32 %v8693_v42, %v1336_v20  ;;  %v1367_v20 = vld [vmem:[#allocation4 + $0x20] sm:$0xff] }
 0xbc6   :  { %v8700_v1 = vadd.f32 %v1349_v33, %v1342_v34 }
 0xbc8   :  { %1488 = vrot.lane.b32.xlu0 %v8700_v1, %s8112_s11 }
 0xbcc   :  { %322 = vrot.lane.b32.xlu0 %v8400_v59, %s8108_s30 }
 0xbd0   :  { %v1215_v37 = vpop.permute.xlu1 %1214 }
 0xbd1   :  { %v1217_v40 = vmul.f32 %v7843_v0, %v1215_v37 }
 0xbd2   :  { %v8708_v5 = vpop.permute.xlu0 %1227 }
 0xbd3   :  { %v1230_v31 = vmul.f32 %v8708_v5, %v8627_v36  ;;  %v1223_v23 = vmul.f32 %v8706_v6, %v1217_v40 }
 0xbd5   :  { %v8713_v44 = vadd.f32 %v1230_v31, %v1223_v23 }
 0xbd7   :  { %1369 = vrot.lane.b32.xlu1 %v8713_v44, %s8112_s11 }
 0xbdb   :  { %324 = vrot.lane.b32.xlu1 %v8404_v60, %s8108_s30 }
 0xc3a   :  { %v1489_v59 = vpop.permute.xlu0 %1488 }
 0xc3b   :  { %7244 = vmatmul.mubr.msk.f32.vlgmr.msra.gmra.mrb[18].mxu0 %vm376_vm13, %v1489_v59 }
 0xc3c   :  { %7587 = vmatpush3.bf16.msra.mxu0 %v8342_v27  ;;  %7261 = vmatprep.mubr.msk.f32.mxu0 %vm8107_vm1, %v8106_v22 }
 0xc3d   :  { %7259 = vmatprep.subr.mxu0 %v8106_v22 }
 0xc3e   :  { %v323_v60 = vpop.permute.xlu0 %322 }
 0xc40   :  { %7260 = vmatpush3.msra.mxu0 %v8347_v28  ;;  %v8736_v28 = vld [vmem:[%s10212_s0 + $0x10] sm:$0xff] }
 0xc41   :  { %7591 = vmatprep.subr.bf16.mxu0 %v8105_v21 }
 0xc49   :  { %v1370_v0 = vpop.permute.xlu1 %1369 }
 0xc4a   :  { %7235 = vmatmul.mubr.msk.f32.vlgmr.msra.gmra.mrb[14].mxu1 %vm376_vm13, %v1370_v0 }
 0xc4b   :  { %7584 = vmatpush3.bf16.msra.mxu1 %v8318_v18  ;;  %7252 = vmatprep.mubr.msk.f32.mxu1 %vm8107_vm1, %v8106_v22 }
 0xc4c   :  { %7250 = vmatprep.subr.mxu1 %v8106_v22 }
 0xc4d   :  { %v325_v49 = vpop.permute.xlu1 %324 }
 0xc4e   :  { %v346_v30 = vsel %vm342_vm12, %v323_v60, %v325_v49 }
 0xc4f   :  { %362 = vst.msk [vmem:[#allocation5 + $0x18] sm:$0xff] %vm285_vm11, %v346_v30  ;;  %7251 = vmatpush3.msra.mxu1 %v8736_v28 }
 0xc50   :  { %7588 = vmatprep.subr.bf16.mxu1 %v8105_v21 }
 0xc56   :  { %v1486_v52 = vld [vmem:[#allocation5 + $0x18] sm:$0xff] }
 0xd0e   :  { %v1558_v16 = vpop.f32.mrb[18].mxu0 }
 0xd0f   :  { %v1562_v24 = vadd.f32 %v1558_v16, %v1486_v52  ;;  %v7245_v38 = vpop.f32.mrb[19].mxu0 }
 0xd11   :  { %7848 = vtanh.f32 %v1562_v24  ;;  %v6783_v31 = vmul.f32 -1.442695, %v1562_v24  ;;  %v1352_v24 = vmul.f32 %v8695_v32, %v8672_v61 }
 0xd1b   :  { %v7849_v11 = vpop.eup %7848 }
 0xd1c   :  { %1572 = vrot.lane.b32.xlu0 %v7849_v11, %s8109_s9 }
 0xd1d   :  { %v1439_v33 = vpop.f32.mrb[14].mxu1 }
 0xd1e   :  { %v1443_v34 = vadd.f32 %v1439_v33, %v1367_v20  ;;  %v7236_v37 = vpop.f32.mrb[15].mxu1  ;;  %v1351_v33 = vmul.f32 %v8693_v42, %v8675_v45 }
 0xd20   :  { %7850 = vtanh.f32 %v1443_v34  ;;  %v6781_v59 = vmul.f32 -1.442695, %v1443_v34  ;;  %v8752_v34 = vadd.f32 %v1352_v24, %v1351_v33 }
 0xd21   :  { %7852 = vpow2.f32 %v6783_v31 }
 0xd22   :  { %7854 = vpow2.f32 %v6781_v59 }
 0xd2a   :  { %v7851_v40 = vpop.eup %7850 }
 0xd2b   :  { %1453 = vrot.lane.b32.xlu1 %v7851_v40, %s8109_s9  ;;  %v7853_v23 = vpop.eup %7852 }
 0xd2c   :  { %v1566_v0 = vadd.f32 1.0, %v7853_v23  ;;  %v7855_v60 = vpop.eup %7854 }
 0xd2d   :  { %v1447_v16 = vadd.f32 1.0, %v7855_v60 }
 0xd2e   :  { %7856 = vrcp.f32 %v1566_v0 }
 0xd2f   :  { %7858 = vrcp.f32 %v1447_v16 }
 0xd38   :  { %v7857_v49 = vpop.eup %7856 }
 0xd39   :  { %v7859_v38 = vpop.eup %7858  ;;  %v1570_v37 = vmul.f32 %v7857_v49, %v8752_v34 }
 0xd8e   :  { %v1573_v30 = vpop.permute.xlu0 %1572 }
 0xd8f   :  { %v1575_v52 = vmul.f32 %v7857_v49, %v1573_v30 }
 0xd91   :  { %1577 = vrot.lane.b32.xlu0 %v1575_v52, %s8110_s5 }
 0xd95   :  { %1589 = vperm.xlu0 %7699, %v8665_v39   ;;  %v1233_v39 = vmul.f32 %v8708_v5, %v8682_v48 }
 0xd9d   :  { %v1454_v11 = vpop.permute.xlu1 %1453 }
 0xd9e   :  { %v1456_v20 = vmul.f32 %v7859_v38, %v1454_v11 }
 0xda0   :  { %1458 = vrot.lane.b32.xlu1 %v1456_v20, %s8110_s5 }
 0xda4   :  { %1596 = vperm.xlu1 %7700, %v1224_v43   ;;  %v1232_v43 = vmul.f32 %v8706_v6, %v8687_v9 }
 0xda6   :  { %v8762_v61 = vadd.f32 %v1233_v39, %v1232_v43 }
 0xda8   :  { %1470 = vperm.xlu1 %7700, %v8655_v63   ;;  %v1451_v45 = vmul.f32 %v7859_v38, %v8762_v61 }
 0xe03   :  { %v1578_v40 = vpop.permute.xlu0 %1577 }
 0xe04   :  { %v8755_v31 = vadd.f32 %v1578_v40, %v1570_v37 }
 0xe06   :  { %7860 = vtanh.f32 %v8755_v31 }
 0xe10   :  { %v7861_v23 = vpop.eup %7860 }
 0xe11   :  { %1583 = vrot.lane.b32.xlu0 %v7861_v23, %s8111_s1 }
 0xe12   :  { %v1459_v32 = vpop.permute.xlu1 %1458 }
 0xe13   :  { %v8766_v59 = vadd.f32 %v1459_v32, %v1451_v45 }
 0xe14   :  { %v8772_v48 = vpop.permute.xlu0 %1589 }
 0xe15   :  { %1477 = vperm.xlu0 %7699, %v1343_v3   ;;  %7862 = vtanh.f32 %v8766_v59 }
 0xe1f   :  { %v7863_v0 = vpop.eup %7862 }
 0xe20   :  { %1464 = vrot.lane.b32.xlu1 %v7863_v0, %s8111_s1 }
 0xe23   :  { %v8774_v9 = vpop.permute.xlu1 %1596 }
 0xe24   :  { %v1599_v30 = vmul.f32 %v8774_v9, %v8700_v1 }
 0xe27   :  { %v8785_v63 = vpop.permute.xlu1 %1470 }
 0xe83   :  { %v1584_v5 = vpop.permute.xlu0 %1583 }
 0xe84   :  { %v1586_v60 = vmul.f32 %v7857_v49, %v1584_v5  ;;  %v1617_v5 = vld [vmem:[#allocation4 + $0x28] sm:$0xff] }
 0xe86   :  { %v1592_v52 = vmul.f32 %v8772_v48, %v1586_v60 }
 0xe88   :  { %v8779_v16 = vadd.f32 %v1599_v30, %v1592_v52 }
 0xe8a   :  { %1738 = vrot.lane.b32.xlu0 %v8779_v16, %s8112_s11 }
 0xe8e   :  { %318 = vrot.lane.b32.xlu0 %v8394_v57, %s8108_s30 }
 0xe92   :  { %v1465_v3 = vpop.permute.xlu1 %1464 }
 0xe93   :  { %v1467_v11 = vmul.f32 %v7859_v38, %v1465_v3  ;;  %v8806_v38 = vld [vmem:[%s10212_s0 + $0x28] sm:$0xff] }
 0xe94   :  { %v8787_v20 = vpop.permute.xlu0 %1477 }
 0xe95   :  { %v1480_v49 = vmul.f32 %v8787_v20, %v8713_v44  ;;  %v1473_v24 = vmul.f32 %v8785_v63, %v1467_v11 }
 0xe97   :  { %v8792_v33 = vadd.f32 %v1480_v49, %v1473_v24 }
 0xe99   :  { %1619 = vrot.lane.b32.xlu1 %v8792_v33, %s8112_s11 }
 0xe9d   :  { %320 = vrot.lane.b32.xlu1 %v8398_v58, %s8108_s30 }
 0xefc   :  { %v1739_v57 = vpop.permute.xlu0 %1738 }
 0xefd   :  { %7262 = vmatmul.mubr.msk.f32.vlgmr.msra.gmra.mrb[20].mxu0 %vm376_vm13, %v1739_v57 }
 0xefe   :  { %7593 = vmatpush3.bf16.msra.mxu0 %v8342_v27  ;;  %7279 = vmatprep.mubr.msk.f32.mxu0 %vm8107_vm1, %v8106_v22 }
 0xeff   :  { %7277 = vmatprep.subr.mxu0 %v8106_v22 }
 0xf00   :  { %v319_v37 = vpop.permute.xlu0 %318 }
 0xf02   :  { %7278 = vmatpush3.msra.mxu0 %v8806_v38 }
 0xf03   :  { %7597 = vmatprep.subr.bf16.mxu0 %v8105_v21 }
 0xf0b   :  { %v1620_v58 = vpop.permute.xlu1 %1619 }
 0xf0c   :  { %7253 = vmatmul.mubr.msk.f32.vlgmr.msra.gmra.mrb[16].mxu1 %vm376_vm13, %v1620_v58 }
 0xf0d   :  { %7590 = vmatpush3.bf16.msra.mxu1 %v8318_v18  ;;  %7270 = vmatprep.mubr.msk.f32.mxu1 %vm8107_vm1, %v8106_v22 }
 0xf0e   :  { %7268 = vmatprep.subr.mxu1 %v8106_v22 }
 0xf0f   :  { %v321_v40 = vpop.permute.xlu1 %320 }
 0xf10   :  { %v345_v39 = vsel %vm342_vm12, %v319_v37, %v321_v40 }
 0xf11   :  { %361 = vst.msk [vmem:[#allocation5 + $0x10] sm:$0xff] %vm285_vm11, %v345_v39  ;;  %7269 = vmatpush3.msra.mxu1 %v8736_v28 }
 0xf12   :  { %7594 = vmatprep.subr.bf16.mxu1 %v8105_v21 }
 0xf18   :  { %v1736_v43 = vld [vmem:[#allocation5 + $0x10] sm:$0xff] }
 0xfd0   :  { %v1808_v23 = vpop.f32.mrb[20].mxu0 }
 0xfd1   :  { %v1812_v45 = vadd.f32 %v1808_v23, %v1736_v43  ;;  %v7263_v32 = vpop.f32.mrb[21].mxu0 }
 0xfd3   :  { %7864 = vtanh.f32 %v1812_v45  ;;  %v6787_v11 = vmul.f32 -1.442695, %v1812_v45  ;;  %v1602_v45 = vmul.f32 %v8774_v9, %v8752_v34 }
 0xfdd   :  { %v7865_v0 = vpop.eup %7864 }
 0xfde   :  { %1822 = vrot.lane.b32.xlu0 %v7865_v0, %s8109_s9 }
 0xfdf   :  { %v1689_v60 = vpop.f32.mrb[16].mxu1 }
 0xfe0   :  { %v1693_v30 = vadd.f32 %v1689_v60, %v1617_v5  ;;  %v7254_v52 = vpop.f32.mrb[17].mxu1  ;;  %v1601_v5 = vmul.f32 %v8772_v48, %v8755_v31 }
 0xfe2   :  { %7866 = vtanh.f32 %v1693_v30  ;;  %v6785_v24 = vmul.f32 -1.442695, %v1693_v30  ;;  %v8831_v60 = vadd.f32 %v1602_v45, %v1601_v5 }
 0xfe3   :  { %7868 = vpow2.f32 %v6787_v11 }
 0xfe4   :  { %7870 = vpow2.f32 %v6785_v24 }
 0xfec   :  { %v7867_v3 = vpop.eup %7866 }
 0xfed   :  { %1703 = vrot.lane.b32.xlu1 %v7867_v3, %s8109_s9  ;;  %v7869_v49 = vpop.eup %7868 }
 0xfee   :  { %v1816_v57 = vadd.f32 1.0, %v7869_v49  ;;  %v7871_v58 = vpop.eup %7870 }
 0xfef   :  { %v1697_v43 = vadd.f32 1.0, %v7871_v58 }
 0xff0   :  { %7872 = vrcp.f32 %v1816_v57 }
 0xff1   :  { %7874 = vrcp.f32 %v1697_v43 }
 0xffa   :  { %v7873_v37 = vpop.eup %7872 }
 0xffb   :  { %v7875_v23 = vpop.eup %7874  ;;  %v1820_v30 = vmul.f32 %v7873_v37, %v8831_v60 }
0x1050   :  { %v1823_v40 = vpop.permute.xlu0 %1822 }
0x1051   :  { %v1825_v39 = vmul.f32 %v7873_v37, %v1823_v40 }
0x1053   :  { %1827 = vrot.lane.b32.xlu0 %v1825_v39, %s8110_s5 }
0x1057   :  { %1839 = vperm.xlu0 %7699, %v8577_v12   ;;  %v1483_v12 = vmul.f32 %v8787_v20, %v8762_v61 }
0x105f   :  { %v1704_v32 = vpop.permute.xlu1 %1703 }
0x1060   :  { %v1706_v0 = vmul.f32 %v7875_v23, %v1704_v32 }
0x1062   :  { %1708 = vrot.lane.b32.xlu1 %v1706_v0, %s8110_s5 }
0x1066   :  { %1846 = vperm.xlu1 %7700, %v974_v51   ;;  %v1482_v51 = vmul.f32 %v8785_v63, %v8766_v59 }
0x1068   :  { %v8841_v34 = vadd.f32 %v1483_v12, %v1482_v51 }
0x106a   :  { %1720 = vperm.xlu1 %7700, %v8568_v19   ;;  %v1701_v31 = vmul.f32 %v7875_v23, %v8841_v34 }
0x10c5   :  { %v1828_v52 = vpop.permute.xlu0 %1827 }
0x10c6   :  { %v8834_v3 = vadd.f32 %v1828_v52, %v1820_v30 }
0x10c8   :  { %7876 = vtanh.f32 %v8834_v3 }
0x10d2   :  { %v7877_v11 = vpop.eup %7876 }
0x10d3   :  { %1833 = vrot.lane.b32.xlu0 %v7877_v11, %s8111_s1 }
0x10d4   :  { %v1709_v9 = vpop.permute.xlu1 %1708 }
0x10d5   :  { %v8845_v49 = vadd.f32 %v1709_v9, %v1701_v31 }
0x10d6   :  { %v8851_v61 = vpop.permute.xlu0 %1839 }
0x10d7   :  { %1727 = vperm.xlu0 %7699, %v1093_v46   ;;  %7878 = vtanh.f32 %v8845_v49 }
0x10e1   :  { %v7879_v24 = vpop.eup %7878 }
0x10e2   :  { %1714 = vrot.lane.b32.xlu1 %v7879_v24, %s8111_s1 }
0x10e5   :  { %v8853_v59 = vpop.permute.xlu1 %1846 }
0x10e6   :  { %v1849_v58 = vmul.f32 %v8853_v59, %v8779_v16 }
0x10e9   :  { %v8864_v19 = vpop.permute.xlu1 %1720 }
0x1145   :  { %v1834_v20 = vpop.permute.xlu0 %1833 }
0x1146   :  { %v1836_v57 = vmul.f32 %v7873_v37, %v1834_v20 }
0x1148   :  { %v1842_v40 = vmul.f32 %v8851_v61, %v1836_v57 }
0x114a   :  { %v8858_v39 = vadd.f32 %v1849_v58, %v1842_v40 }
0x114c   :  { %1988 = vrot.lane.b32.xlu0 %v8858_v39, %s8112_s11 }
0x1150   :  { %314 = vrot.lane.b32.xlu0 %v8388_v55, %s8108_s30 }
0x1154   :  { %v1715_v46 = vpop.permute.xlu1 %1714 }
0x1155   :  { %v1717_v43 = vmul.f32 %v7875_v23, %v1715_v46 }
0x1156   :  { %v8866_v32 = vpop.permute.xlu0 %1727 }
0x1157   :  { %v1730_v37 = vmul.f32 %v8866_v32, %v8792_v33  ;;  %v1723_v0 = vmul.f32 %v8864_v19, %v1717_v43 }
0x1159   :  { %v8871_v45 = vadd.f32 %v1730_v37, %v1723_v0 }
0x115b   :  { %1869 = vrot.lane.b32.xlu1 %v8871_v45, %s8112_s11 }
0x115f   :  { %316 = vrot.lane.b32.xlu1 %v8392_v56, %s8108_s30 }
0x11be   :  { %v1989_v55 = vpop.permute.xlu0 %1988 }
0x11bf   :  { %7280 = vmatmul.mubr.msk.f32.vlgmr.msra.gmra.mrb[22].mxu0 %vm376_vm13, %v1989_v55 }
0x11c0   :  { %7599 = vmatpush3.bf16.msra.mxu0 %v8342_v27  ;;  %7297 = vmatprep.mubr.msk.f32.mxu0 %vm8107_vm1, %v8106_v22 }
0x11c1   :  { %7295 = vmatprep.subr.mxu0 %v8106_v22 }
0x11c2   :  { %v315_v27 = vpop.permute.xlu0 %314 }
0x11c4   :  { %7296 = vmatpush3.msra.mxu0 %v8806_v38 }
0x11c5   :  { %7600 = vmatprep.subr.bf16.mxu0 %v8105_v21 }
0x11cd   :  { %v1870_v23 = vpop.permute.xlu1 %1869 }
0x11ce   :  { %7271 = vmatmul.mubr.msk.f32.vlgmr.msra.gmra.mrb[18].mxu1 %vm376_vm13, %v1870_v23 }
0x11cf   :  { %7596 = vmatpush3.bf16.msra.mxu1 %v8318_v18  ;;  %7288 = vmatprep.mubr.msk.f32.mxu1 %vm8107_vm1, %v8106_v22  ;;  %v1867_v18 = vld [vmem:[#allocation4 + $0x30] sm:$0xff] }
0x11d0   :  { %7286 = vmatprep.subr.mxu1 %v8106_v22 }
0x11d1   :  { %v317_v56 = vpop.permute.xlu1 %316 }
0x11d2   :  { %v344_v5 = vsel %vm342_vm12, %v315_v27, %v317_v56  ;;  %v1852_v56 = vmul.f32 %v8853_v59, %v8831_v60 }
0x11d3   :  { %360 = vst.msk [vmem:[#allocation5 + $0x8] sm:$0xff] %vm285_vm11, %v344_v5  ;;  %7287 = vmatpush3.msra.mxu1 %v8736_v28  ;;  %v1851_v5 = vmul.f32 %v8851_v61, %v8834_v3 }
0x11da   :  { %v1986_v38 = vld [vmem:[#allocation5 + $0x8] sm:$0xff] }
0x1292   :  { %v2058_v30 = vpop.f32.mrb[22].mxu0 }
0x1293   :  { %v2062_v52 = vadd.f32 %v2058_v30, %v1986_v38  ;;  %v7281_v12 = vpop.f32.mrb[23].mxu0  ;;  %v8904_v38 = vadd.f32 %v1852_v56, %v1851_v5 }
0x1295   :  { %7880 = vtanh.f32 %v2062_v52  ;;  %v6791_v20 = vmul.f32 -1.442695, %v2062_v52 }
0x129f   :  { %v7881_v51 = vpop.eup %7880 }
0x12a0   :  { %2072 = vrot.lane.b32.xlu0 %v7881_v51, %s8109_s9 }
0x12a1   :  { %v1939_v11 = vpop.f32.mrb[18].mxu1 }
0x12a2   :  { %v1943_v31 = vadd.f32 %v1939_v11, %v1867_v18  ;;  %v7272_v9 = vpop.f32.mrb[19].mxu1 }
0x12a4   :  { %7882 = vtanh.f32 %v1943_v31  ;;  %v6789_v28 = vmul.f32 -1.442695, %v1943_v31 }
0x12a5   :  { %7884 = vpow2.f32 %v6791_v20 }
0x12a6   :  { %7886 = vpow2.f32 %v6789_v28 }
0x12ae   :  { %v7883_v24 = vpop.eup %7882 }
0x12af   :  { %1953 = vrot.lane.b32.xlu1 %v7883_v24, %s8109_s9  ;;  %v7885_v57 = vpop.eup %7884 }
0x12b0   :  { %v2066_v58 = vadd.f32 1.0, %v7885_v57  ;;  %v7887_v40 = vpop.eup %7886 }
0x12b1   :  { %v1947_v0 = vadd.f32 1.0, %v7887_v40 }
0x12b2   :  { %7888 = vrcp.f32 %v2066_v58 }
0x12b3   :  { %7890 = vrcp.f32 %v1947_v0 }
0x12bc   :  { %v7889_v46 = vpop.eup %7888 }
0x12bd   :  { %v7891_v55 = vpop.eup %7890  ;;  %v2070_v30 = vmul.f32 %v7889_v46, %v8904_v38 }
0x1312   :  { %v2073_v43 = vpop.permute.xlu0 %2072 }
0x1313   :  { %v2075_v37 = vmul.f32 %v7889_v46, %v2073_v43 }
0x1315   :  { %2077 = vrot.lane.b32.xlu0 %v2075_v37, %s8110_s5 }
0x1319   :  { %2089 = vperm.xlu0 %7699, %v8490_v41   ;;  %v1733_v41 = vmul.f32 %v8866_v32, %v8841_v34 }
0x1321   :  { %v1954_v23 = vpop.permute.xlu1 %1953 }
0x1322   :  { %v1956_v27 = vmul.f32 %v7891_v55, %v1954_v23 }
0x1324   :  { %1958 = vrot.lane.b32.xlu1 %v1956_v27, %s8110_s5 }
0x1328   :  { %2096 = vperm.xlu1 %7700, %v724_v50   ;;  %v1732_v50 = vmul.f32 %v8864_v19, %v8845_v49 }
0x132a   :  { %v8914_v60 = vadd.f32 %v1733_v41, %v1732_v50 }
0x132c   :  { %1970 = vperm.xlu1 %7700, %v8504_v62   ;;  %v1951_v3 = vmul.f32 %v7891_v55, %v8914_v60 }
0x1387   :  { %v2078_v52 = vpop.permute.xlu0 %2077 }
0x1388   :  { %v8907_v12 = vadd.f32 %v2078_v52, %v2070_v30  ;;  %v2117_v30 = vld [vmem:[#allocation4 + $0x38] sm:$0xff] }
0x138a   :  { %7892 = vtanh.f32 %v8907_v12 }
0x1394   :  { %v7893_v51 = vpop.eup %7892 }
0x1395   :  { %2083 = vrot.lane.b32.xlu0 %v7893_v51, %s8111_s1 }
0x1396   :  { %v1959_v59 = vpop.permute.xlu1 %1958 }
0x1397   :  { %v8918_v18 = vadd.f32 %v1959_v59, %v1951_v3 }
0x1398   :  { %v8924_v34 = vpop.permute.xlu0 %2089 }
0x1399   :  { %1977 = vperm.xlu0 %7699, %v843_v10   ;;  %7894 = vtanh.f32 %v8918_v18 }
0x13a3   :  { %v7895_v11 = vpop.eup %7894 }
0x13a4   :  { %1964 = vrot.lane.b32.xlu1 %v7895_v11, %s8111_s1 }
0x13a7   :  { %v8926_v49 = vpop.permute.xlu1 %2096 }
0x13a8   :  { %v2099_v9 = vmul.f32 %v8926_v49, %v8858_v39 }
0x13ab   :  { %v8937_v62 = vpop.permute.xlu1 %1970 }
0x1407   :  { %v2084_v32 = vpop.permute.xlu0 %2083 }
0x1408   :  { %v2086_v31 = vmul.f32 %v7889_v46, %v2084_v32 }
0x140a   :  { %v2092_v24 = vmul.f32 %v8924_v34, %v2086_v31 }
0x140c   :  { %v8931_v20 = vadd.f32 %v2099_v9, %v2092_v24 }
0x140e   :  { %2235 = vrot.lane.b32.xlu0 %v8931_v20, %s8112_s11 }
0x1412   :  { %310 = vrot.lane.b32.xlu0 %v8382_v53, %s8108_s30 }
0x1416   :  { %v1965_v10 = vpop.permute.xlu1 %1964 }
0x1417   :  { %v1967_v57 = vmul.f32 %v7891_v55, %v1965_v10 }
0x1418   :  { %v1978_v28 = vpop.permute.xlu0 %1977 }
0x1419   :  { %v1980_v58 = vmul.f32 %v1978_v28, %v8871_v45  ;;  %v1973_v40 = vmul.f32 %v8937_v62, %v1967_v57 }
0x141b   :  { %v8941_v46 = vadd.f32 %v1980_v58, %v1973_v40  ;;  %v8960_v58 = vld [vmem:[%s10213_s29] sm:$0xff] }
0x141d   :  { %2119 = vrot.lane.b32.xlu1 %v8941_v46, %s8112_s11 }
0x1421   :  { %312 = vrot.lane.b32.xlu1 %v8386_v54, %s8108_s30 }
0x1480   :  { %v2236_v43 = vpop.permute.xlu0 %2235 }
0x1481   :  { %7298 = vmatmul.mubr.msk.f32.vlgmr.msra.gmra.mrb[24].mxu0 %vm376_vm13, %v2236_v43 }
0x1482   :  { %7306 = vmatprep.mubr.msk.f32.mxu0 %vm8107_vm1, %v8106_v22 }
0x1484   :  { %v311_v37 = vpop.permute.xlu0 %310 }
0x148f   :  { %v2120_v53 = vpop.permute.xlu1 %2119 }
0x1490   :  { %7289 = vmatmul.mubr.msk.f32.vlgmr.msra.gmra.mrb[20].mxu1 %vm376_vm13, %v2120_v53 }
0x1491   :  { %2456 = vmatprep.mubr.bf16.mxu1 %v8104_v2 }
0x1493   :  { %v313_v0 = vpop.permute.xlu1 %312 }
0x1494   :  { %v343_v55 = vsel %vm342_vm12, %v311_v37, %v313_v0  ;;  %v2340_v37 = vsub.f32 1.0, %v8960_v58  ;;  %v8973_v0 = vld [vmem:[%s10213_s29 + $0x38] sm:$0xff] }
0x1495   :  { %359 = vst.msk [vmem:[#allocation5] sm:$0xff] %vm285_vm11, %v343_v55  ;;  %v2102_v55 = vmul.f32 %v8926_v49, %v8904_v38 }
0x149c   :  { %v2233_v23 = vld [vmem:[#allocation5] sm:$0xff] }
0x1554   :  { %v2305_v27 = vpop.f32.mrb[24].mxu0 }
0x1555   :  { %v2309_v54 = vadd.f32 %v2305_v27, %v2233_v23  ;;  %v7299_v56 = vpop.f32.mrb[25].mxu0  ;;  %v2101_v23 = vmul.f32 %v8924_v34, %v8907_v12 }
0x1557   :  { %7896 = vtanh.f32 %v2309_v54  ;;  %v6795_v3 = vmul.f32 -1.442695, %v2309_v54  ;;  %v2103_v27 = vadd.f32 %v2102_v55, %v2101_v23 }
0x1561   :  { %v7897_v5 = vpop.eup %7896 }
0x1562   :  { %2319 = vrot.lane.b32.xlu0 %v7897_v5, %s8109_s9 }
0x1563   :  { %v2189_v52 = vpop.f32.mrb[20].mxu1 }
0x1564   :  { %v2193_v41 = vadd.f32 %v2189_v52, %v2117_v30  ;;  %v7290_v50 = vpop.f32.mrb[21].mxu1  ;;  %v1983_v30 = vmul.f32 %v1978_v28, %v8914_v60  ;;  %v1982_v52 = vmul.f32 %v8937_v62, %v8918_v18  ;;  %v2110_v60 = vmul.f32 %v8931_v20, %v8924_v34 }
0x1565   :  { %v1610_v18 = vmul.f32 %v8779_v16, %v8772_v48  ;;  %v1110_v28 = vmul.f32 %v8614_v15, %v8607_v13  ;;  %v604_v34 = vmul.f32 %v8448_v4, %v8443_v47  ;;  %v1104_v48 = vmul.f32 %v8627_v36, %v8616_v7  ;;  %v7712_v47 = vld [vmem:[%s10214_s8 + $0x18] ss:$8 sps:$4 sm:$0xff]   ;;  %v7714_v4 = vld [vmem:[%s10214_s8 + $0x1c] ss:$8 sps:$4 sm:$0xff]   ;;  %v2365_v36 = vld [vmem:[%s10214_s8 + $0x28] sm:$0xff] }
0x1566   :  { %7898 = vtanh.f32 %v2193_v41  ;;  %v6793_v11 = vmul.f32 -1.442695, %v2193_v41  ;;  %v1984_v50 = vadd.f32 %v1983_v30, %v1982_v52  ;;  %v1604_v13 = vmul.f32 %v8792_v33, %v8785_v63  ;;  %2424 = vmatprep.subr.bf16.mxu1 %v7714_v4  ;;  %v6817_v52 = vld [vmem:[%s10212_s0 + $0x48] sm:$0xff] }
0x1567   :  { %7900 = vpow2.f32 %v6795_v3  ;;  %2425 = vmatpush1.bf16.msra.mxu1 %v7712_v47  ;;  %v6799_v63 = vcombine.high %v2365_v36, %v2365_v36  ;;  %v6798_v33 = vcombine.low %v2365_v36, %v2365_v36 }
0x1568   :  { %7902 = vpow2.f32 %v6793_v11 }
0x1569   :  { %6800 = vmatprep.subr.msk.bf16.mxu1 %vm2417_vm14, %v6799_v63 }
0x1570   :  { %v7899_v51 = vpop.eup %7898 }
0x1571   :  { %2203 = vrot.lane.b32.xlu1 %v7899_v51, %s8109_s9  ;;  %v7901_v59 = vpop.eup %7900  ;;  %v2224_v51 = vsub.f32 1.0, %v8973_v0 }
0x1572   :  { %v2313_v32 = vadd.f32 1.0, %v7901_v59  ;;  %v7903_v31 = vpop.eup %7902  ;;  %v610_v59 = vmul.f32 %v8462_v14, %v8456_v8  ;;  %v2104_v8 = vmul.f32 %v8941_v46, %v8937_v62 }
0x1573   :  { %v2197_v57 = vadd.f32 1.0, %v7903_v31 }
0x1574   :  { %7904 = vrcp.f32 %v2313_v32  ;;  %v2419_v32 = vsel %vm2417_vm14, %v6798_v33, 0 }
0x1575   :  { %7906 = vrcp.f32 %v2197_v57  ;;  %2427 = vmatpush1.bf16.msra.mxu1 %v2419_v32 }
0x157e   :  { %v7905_v9 = vpop.eup %7904 }
0x157f   :  { %v8963_v40 = vpop.eup %7906  ;;  %v2317_v54 = vmul.f32 %v7905_v9, %v2103_v27 }
0x1580   :  { %v2201_v38 = vmul.f32 %v8963_v40, %v1984_v50 }
0x15d4   :  { %v2320_v24 = vpop.permute.xlu0 %2319 }
0x15d5   :  { %v2322_v10 = vmul.f32 %v7905_v9, %v2320_v24 }
0x15d7   :  { %2324 = vrot.lane.b32.xlu0 %v2322_v10, %s8110_s5  ;;  %v1860_v10 = vmul.f32 %v8858_v39, %v8851_v61  ;;  %v854_v39 = vmul.f32 %v8528_v25, %v8520_v17  ;;  %v1854_v17 = vmul.f32 %v8871_v45, %v8864_v19 }
0x15db   :  { %2336 = vperm.xlu0 %7699, %v8960_v58  }
0x15e3   :  { %v2204_v43 = vpop.permute.xlu1 %2203 }
0x15e4   :  { %v2206_v53 = vmul.f32 %v8963_v40, %v2204_v43 }
0x15e6   :  { %2208 = vrot.lane.b32.xlu1 %v2206_v53, %s8110_s5  ;;  %v860_v53 = vmul.f32 %v8541_v35, %v8534_v26  ;;  %v1354_v26 = vmul.f32 %v8713_v44, %v8706_v6  ;;  %v6814_v6 = vld [vmem:[%s10212_s0 + $0x30] sm:$0xff]  ;;  %v6815_v44 = vld [vmem:[%s10212_s0 + $0x38] sm:$0xff] }
0x15e7   :  { %v9061_v19 = vpack.c.bf16 %v6815_v44, %v6814_v6 }
0x15e9   :  { %7602 = vmatpush3.bf16.msra.mxu0 %v9061_v19 }
0x15ea   :  { %2343 = vperm.xlu1 %7700, %v2340_v37   ;;  %7304 = vmatprep.subr.mxu0 %v8106_v22 }
0x15ee   :  { %2220 = vperm.xlu1 %7700, %v8973_v0  }
0x1649   :  { %v2325_v56 = vpop.permute.xlu0 %2324 }
0x164a   :  { %v2327_v5 = vadd.f32 %v2325_v56, %v2317_v54 }
0x164c   :  { %7908 = vtanh.f32 %v2327_v5  ;;  %v9070_v5 = vld [vmem:[%s10212_s0 + $0x40] sm:$0xff] }
0x164d   :  { %7305 = vmatpush3.msra.mxu0 %v9070_v5 }
0x164e   :  { %7307 = vmatmul.mubr.f32.vlgmr.msra.gmra.mrb[26].mxu0 %v8106_v22  ;;  %7603 = vmatprep.subr.bf16.mxu0 %v8105_v21 }
0x164f   :  { %7315 = vmatprep.mubr.msk.f32.mxu0 %vm8107_vm1, %v8106_v22 }
0x1656   :  { %v7909_v41 = vpop.eup %7908 }
0x1657   :  { %2330 = vrot.lane.b32.xlu0 %v7909_v41, %s8111_s1  ;;  %v6818_v41 = vld [vmem:[%s10212_s0 + $0x50] sm:$0xff] }
0x1658   :  { %v2209_v49 = vpop.permute.xlu1 %2208  ;;  %v9084_v50 = vpack.c.bf16 %v6818_v41, %v6817_v52 }
0x1659   :  { %v2211_v12 = vadd.f32 %v2209_v49, %v2201_v38  ;;  %v9091_v38 = vld [vmem:[%s10212_s0 + $0x58] sm:$0xff] }
0x165a   :  { %v2337_v14 = vpop.permute.xlu0 %2336  ;;  %7605 = vmatpush3.bf16.msra.mxu0 %v9084_v50 }
0x165b   :  { %2227 = vperm.xlu0 %7699, %v2224_v51   ;;  %7910 = vtanh.f32 %v2211_v12  ;;  %7313 = vmatprep.subr.mxu0 %v8106_v22 }
0x165e   :  { %7314 = vmatpush3.msra.mxu0 %v9091_v38 }
0x165f   :  { %2112 = vrot.lane.b32.xlu0 %v2110_v60, %s8112_s11  ;;  %7316 = vmatmul.mubr.f32.vlgmr.msra.gmra.mrb[28].mxu0 %v8106_v22  ;;  %v2362_v60 = vld [vmem:[%s10214_s8 + $0x10] sm:$0xff] }
0x1660   :  { %7606 = vmatprep.subr.bf16.mxu0 %v8105_v21  ;;  %7324 = vmatprep.mubr.msk.f32.mxu0 %vm8107_vm1, %v8106_v22 }
0x1661   :  { %7608 = vmatpush3.bf16.msra.mxu0 %v9061_v19 }
0x1662   :  { %7322 = vmatprep.subr.mxu0 %v8106_v22 }
0x1663   :  { %1612 = vrot.lane.b32.xlu0 %v1610_v18, %s8112_s11 }
0x1665   :  { %v7911_v3 = vpop.eup %7910  ;;  %7323 = vmatpush3.msra.mxu0 %v9070_v5 }
0x1666   :  { %2214 = vrot.lane.b32.xlu1 %v7911_v3, %s8111_s1  ;;  %7609 = vmatprep.subr.bf16.mxu0 %v8105_v21 }
0x1667   :  { %1112 = vrot.lane.b32.xlu0 %v1110_v28, %s8112_s11 }
0x1669   :  { %v2344_v15 = vpop.permute.xlu1 %2343 }
0x166a   :  { %v2346_v62 = vmul.f32 %v2344_v15, %v8931_v20  ;;  %v1360_v20 = vmul.f32 %v8700_v1, %v8693_v42 }
0x166b   :  { %612 = vrot.lane.b32.xlu0 %v610_v59, %s8112_s11  ;;  %v7717_v59 = vld [vmem:[%s10214_s8] ss:$8 sps:$4 sm:$0xff]  }
0x166d   :  { %v2221_v57 = vpop.permute.xlu1 %2220 }
0x166f   :  { %606 = vrot.lane.b32.xlu0 %v604_v34, %s8112_s11 }
0x1673   :  { %1106 = vrot.lane.b32.xlu0 %v1104_v48, %s8112_s11  ;;  %v6808_v48 = vcombine.high %v2362_v60, %v2362_v60 }
0x1677   :  { %1606 = vrot.lane.b32.xlu0 %v1604_v13, %s8112_s11  ;;  %v6807_v13 = vcombine.low %v2362_v60, %v2362_v60 }
0x167b   :  { %2106 = vrot.lane.b32.xlu0 %v2104_v8, %s8112_s11 }
0x16c9   :  { %v2331_v7 = vpop.permute.xlu0 %2330 }
0x16ca   :  { %v2333_v16 = vmul.f32 %v7905_v9, %v2331_v7  ;;  %v7719_v9 = vld [vmem:[%s10214_s8 + $0x4] ss:$8 sps:$4 sm:$0xff]   ;;  %s10218_s8 = sld [smem:[#allocation17_spill]] }
0x16cb   :  { %2530 = vmatprep.subr.bf16.mxu1 %v7719_v9 }
0x16cc   :  { %v2339_v11 = vmul.f32 %v2337_v14, %v2333_v16 }
0x16ce   :  { %v2347_v31 = vadd.f32 %v2346_v62, %v2339_v11 }
0x16d0   :  { %v2354_v24 = vmul.f32 %v2347_v31, %v2337_v14  ;;  %v2525_v14 = vsel %vm2417_vm14, %v6807_v13, 0 }
0x16d2   :  { %2356 = vrot.lane.b32.xlu1 %v2354_v24, %s8112_s11 }
0x16d6   :  { %1862 = vrot.lane.b32.xlu1 %v1860_v10, %s8112_s11 }
0x16d8   :  { %v2215_v55 = vpop.permute.xlu1 %2214 }
0x16d9   :  { %v2217_v61 = vmul.f32 %v8963_v40, %v2215_v55 }
0x16da   :  { %v2228_v43 = vpop.permute.xlu0 %2227  ;;  %1362 = vrot.lane.b32.xlu1 %v1360_v20, %s8112_s11 }
0x16db   :  { %v2223_v42 = vmul.f32 %v2221_v57, %v2217_v61  ;;  %v2230_v1 = vmul.f32 %v2228_v43, %v8941_v46 }
0x16dd   :  { %v2231_v40 = vadd.f32 %v2230_v1, %v2223_v42 }
0x16de   :  { %v2113_v23 = vpop.permute.xlu0 %2112  ;;  %862 = vrot.lane.b32.xlu1 %v860_v53, %s8112_s11 }
0x16df   :  { %2115 = vst.msk [vmem:[#allocation3 + $0x8] sm:$0xff] %vm376_vm13, %v2113_v23  ;;  %v2348_v54 = vmul.f32 %v2231_v40, %v2221_v57 }
0x16e2   :  { %v1613_v27 = vpop.permute.xlu0 %1612  ;;  %856 = vrot.lane.b32.xlu1 %v854_v39, %s8112_s11 }
0x16e3   :  { %1615 = vst.msk [vmem:[#allocation3 + $0x18] sm:$0xff] %vm376_vm13, %v1613_v27 }
0x16e6   :  { %v1113_v35 = vpop.permute.xlu0 %1112  ;;  %1356 = vrot.lane.b32.xlu1 %v1354_v26, %s8112_s11  ;;  %v2379_v3 = vld [vmem:[#allocation3 + $0x8] sm:$0xff] }
0x16e7   :  { %1115 = vst.msk [vmem:[#allocation3 + $0x28] sm:$0xff] %vm376_vm13, %v1113_v35  ;;  %v9141_v35 = vshrl.u32 %v96_v29, 7 }
0x16e9   :  { %v9144_v40 = vsub.s32 0, %v9141_v35 }
0x16ea   :  { %1856 = vrot.lane.b32.xlu1 %v1854_v17, %s8112_s11  ;;  %v613_v25 = vpop.permute.xlu0 %612  ;;  %v2381_v15 = vld [vmem:[#allocation3 + $0x18] sm:$0xff]  ;;  %v2603_v17 = vld [vmem:[%s10215_s3] sm:$0x3]  ;;  %s8118_s3 = smov 88  }
0x16eb   :  { %615 = vst.msk [vmem:[#allocation3 + $0x38] sm:$0xff] %vm376_vm13, %v613_v25  ;;  %v9150_v25 = vsub.s32 1, %v9141_v35 }
0x16ee   :  { %2350 = vrot.lane.b32.xlu1 %v2348_v54, %s8112_s11  ;;  %v607_v46 = vpop.permute.xlu0 %606  ;;  %v2383_v33 = vld [vmem:[#allocation3 + $0x28] sm:$0xff]  ;;  %v2608_v54 = vrot.slane %v2603_v17, %v9144_v40 }
0x16ef   :  { %609 = vst.msk [vmem:[#allocation2] sm:$0xff] %vm376_vm13, %v607_v46  ;;  %v2612_v46 = vrot.slane %v2603_v17, %v9150_v25 }
0x16f2   :  { %v1107_v45 = vpop.permute.xlu0 %1106  ;;  %v2385_v31 = vld [vmem:[#allocation3 + $0x38] sm:$0xff] }
0x16f3   :  { %1109 = vst.msk [vmem:[#allocation2 + $0x10] sm:$0xff] %vm376_vm13, %v1107_v45 }
0x16f6   :  { %v1607_v56 = vpop.permute.xlu0 %1606  ;;  %v2366_v9 = vld [vmem:[#allocation2] sm:$0xff] }
0x16f7   :  { %1609 = vst.msk [vmem:[#allocation2 + $0x20] sm:$0xff] %vm376_vm13, %v1607_v56 }
0x16fa   :  { %v2107_v30 = vpop.permute.xlu0 %2106  ;;  %v2368_v43 = vld [vmem:[#allocation2 + $0x10] sm:$0xff] }
0x16fb   :  { %2109 = vst.msk [vmem:[#allocation2 + $0x30] sm:$0xff] %vm376_vm13, %v2107_v30 }
0x16fe   :  { %v2370_v23 = vld [vmem:[#allocation2 + $0x20] sm:$0xff] }
0x1702   :  { %v2372_v27 = vld [vmem:[#allocation2 + $0x30] sm:$0xff] }
0x1721   :  { %v2787_v1 = vpop.f32.mrb[26].mxu0 }
0x1722   :  { %v7308_v26 = vpop.f32.mrb[27].mxu0 }
0x1744   :  { %v2357_v49 = vpop.permute.xlu1 %2356 }
0x1745   :  { %2359 = vst.msk [vmem:[#allocation3] sm:$0xff] %vm376_vm13, %v2357_v49 }
0x1748   :  { %v1863_v12 = vpop.permute.xlu1 %1862 }
0x1749   :  { %1865 = vst.msk [vmem:[#allocation3 + $0x10] sm:$0xff] %vm376_vm13, %v1863_v12 }
0x174c   :  { %v1363_v18 = vpop.permute.xlu1 %1362  ;;  %v2378_v28 = vld [vmem:[#allocation3] sm:$0xff] }
0x174d   :  { %1365 = vst.msk [vmem:[#allocation3 + $0x20] sm:$0xff] %vm376_vm13, %v1363_v18  ;;  %v2386_v34 = vpack.c.bf16 %v2379_v3, %v2378_v28 }
0x174f   :  { %6801 = vmatmul.mubr.msk.bf16.vlgmr.msra.gmra.mrb[24].mxu1 %vm376_vm13, %v2386_v34 }
0x1750   :  { %v863_v8 = vpop.permute.xlu1 %862  ;;  %2466 = vmatprep.mubr.bf16.mxu1 %v8104_v2  ;;  %2531 = vmatpush1.bf16.msra.mxu1 %v7717_v59  ;;  %v2380_v47 = vld [vmem:[#allocation3 + $0x10] sm:$0xff] }
0x1751   :  { %865 = vst.msk [vmem:[#allocation3 + $0x30] sm:$0xff] %vm376_vm13, %v863_v8  ;;  %6809 = vmatprep.subr.msk.bf16.mxu1 %vm2417_vm14, %v6808_v48  ;;  %v2387_v7 = vpack.c.bf16 %v2381_v15, %v2380_v47 }
0x1754   :  { %v857_v4 = vpop.permute.xlu1 %856  ;;  %2533 = vmatpush1.bf16.msra.mxu1 %v2525_v14  ;;  %v2382_v16 = vld [vmem:[#allocation3 + $0x20] sm:$0xff] }
0x1755   :  { %859 = vst.msk [vmem:[#allocation2 + $0x8] sm:$0xff] %vm376_vm13, %v857_v4  ;;  %7633 = vmatprep.subr.bf16.mxu1 %v8105_v21  ;;  %v2388_v62 = vpack.c.bf16 %v2383_v33, %v2382_v16 }
0x1757   :  { %6802 = vmatmul.mubr.msk.bf16.gmra.mrb[28].mxu1 %vm376_vm13, %v2387_v7 }
0x1758   :  { %v1357_v36 = vpop.permute.xlu1 %1356  ;;  %2476 = vmatprep.mubr.bf16.mxu1 %v8104_v2  ;;  %v2384_v32 = vld [vmem:[#allocation3 + $0x30] sm:$0xff] }
0x1759   :  { %1359 = vst.msk [vmem:[#allocation2 + $0x18] sm:$0xff] %vm376_vm13, %v1357_v36  ;;  %v2389_v24 = vpack.c.bf16 %v2385_v31, %v2384_v32 }
0x175c   :  { %v1857_v63 = vpop.permute.xlu1 %1856  ;;  %v2367_v10 = vld [vmem:[#allocation2 + $0x8] sm:$0xff] }
0x175d   :  { %1859 = vst.msk [vmem:[#allocation2 + $0x28] sm:$0xff] %vm376_vm13, %v1857_v63  ;;  %v2374_v20 = vpack.c.bf16 %v2367_v10, %v2366_v9 }
0x175f   :  { %6803 = vmatmul.mubr.msk.bf16.gmra.mrb[32].mxu1 %vm376_vm13, %v2388_v62 }
0x1760   :  { %v2351_v11 = vpop.permute.xlu1 %2350  ;;  %2486 = vmatprep.mubr.bf16.mxu1 %v8104_v2  ;;  %v2369_v57 = vld [vmem:[#allocation2 + $0x18] sm:$0xff] }
0x1761   :  { %2353 = vst.msk [vmem:[#allocation2 + $0x38] sm:$0xff] %vm376_vm13, %v2351_v11  ;;  %v2375_v53 = vpack.c.bf16 %v2369_v57, %v2368_v43  ;;  %v2900_v11 = vpop.f32.mrb[28].mxu0 }
0x1764   :  { %v2371_v55 = vld [vmem:[#allocation2 + $0x28] sm:$0xff] }
0x1765   :  { %v2376_v61 = vpack.c.bf16 %v2371_v55, %v2370_v23 }
0x1767   :  { %6804 = vmatmul.mubr.msk.bf16.gmra.mrb[36].mxu1 %vm376_vm13, %v2389_v24  ;;  %v7317_v24 = vpop.f32.mrb[29].mxu0 }
0x1768   :  { %2562 = vmatprep.mubr.bf16.mxu1 %v8104_v2  ;;  %v2373_v39 = vld [vmem:[#allocation2 + $0x38] sm:$0xff] }
0x1769   :  { %v2377_v42 = vpack.c.bf16 %v2373_v39, %v2372_v27 }
0x176f   :  { %6810 = vmatmul.mubr.msk.bf16.vlgmr.msra.gmra.mrb[24].mxu1 %vm376_vm13, %v2374_v20 }
0x1770   :  { %2572 = vmatprep.mubr.bf16.mxu1 %v8104_v2  ;;  %7635 = vmatpush3.bf16.msra.mxu1 %v9084_v50 }
0x1771   :  { %7403 = vmatprep.subr.mxu1 %v8106_v22 }
0x1774   :  { %7404 = vmatpush3.msra.mxu1 %v9091_v38 }
0x1775   :  { %7639 = vmatprep.subr.bf16.mxu1 %v8105_v21 }
0x1777   :  { %6811 = vmatmul.mubr.msk.bf16.gmra.mrb[28].mxu1 %vm376_vm13, %v2375_v53 }
0x1778   :  { %2582 = vmatprep.mubr.bf16.mxu1 %v8104_v2 }
0x177f   :  { %6812 = vmatmul.mubr.msk.bf16.gmra.mrb[32].mxu1 %vm376_vm13, %v2376_v61 }
0x1780   :  { %2592 = vmatprep.mubr.bf16.mxu1 %v8104_v2 }
0x1787   :  { %6813 = vmatmul.mubr.msk.bf16.gmra.mrb[36].mxu1 %vm376_vm13, %v2377_v42 }
0x1788   :  { %7405 = vmatprep.mubr.msk.f32.mxu1 %vm8107_vm1, %v8106_v22 }
0x1842   :  { %v2564_v6 = vpop.f32.mrb[24].mxu1 }
0x1843   :  { %v9154_v44 = vadd.f32 %v2608_v54, %v2564_v6  ;;  %v2566_v45 = vpop.f32.mrb[25].mxu1 }
0x1844   :  { %v9156_v29 = vadd.f32 %v2612_v46, %v2566_v45  ;;  %v2568_v56 = vpop.f32.mrb[26].mxu1 }
0x1845   :  { %2631 = vst.msk [vmem:[#allocation4] sm:$0xff] %vm285_vm11, %v9154_v44  ;;  %v9160_v30 = vadd.f32 %v2608_v54, %v2568_v56  ;;  %v2570_v52 = vpop.f32.mrb[27].mxu1 }
0x1846   :  { %v9162_v41 = vadd.f32 %v2612_v46, %v2570_v52 }
0x1847   :  { %2632 = vst.msk [vmem:[#allocation4 + $0x8] sm:$0xff] %vm285_vm11, %v9160_v30 }
0x184a   :  { %v2574_v49 = vpop.f32.mrb[28].mxu1 }
0x184b   :  { %v9166_v12 = vadd.f32 %v2608_v54, %v2574_v49  ;;  %v2576_v60 = vpop.f32.mrb[29].mxu1 }
0x184c   :  { %v9168_v18 = vadd.f32 %v2612_v46, %v2576_v60  ;;  %v2578_v28 = vpop.f32.mrb[30].mxu1  ;;  %v2720_v48 = vld [vmem:[#allocation4] sm:$0xff] }
0x184d   :  { %2633 = vst.msk [vmem:[#allocation4 + $0x10] sm:$0xff] %vm285_vm11, %v9166_v12  ;;  %v9172_v3 = vadd.f32 %v2608_v54, %v2578_v28  ;;  %v2580_v59 = vpop.f32.mrb[31].mxu1  ;;  %v2791_v47 = vadd.f32 %v2787_v1, %v2720_v48 }
0x184e   :  { %v9174_v34 = vadd.f32 %v2612_v46, %v2580_v59 }
0x184f   :  { %2634 = vst.msk [vmem:[#allocation4 + $0x18] sm:$0xff] %vm285_vm11, %v9172_v3  ;;  %7912 = vtanh.f32 %v2791_v47  ;;  %v6820_v43 = vmul.f32 -1.442695, %v2791_v47 }
0x1851   :  { %7914 = vpow2.f32 %v6820_v43 }
0x1852   :  { %v2584_v13 = vpop.f32.mrb[32].mxu1 }
0x1853   :  { %v9178_v8 = vadd.f32 %v2608_v54, %v2584_v13  ;;  %v2586_v14 = vpop.f32.mrb[33].mxu1 }
0x1854   :  { %v9180_v4 = vadd.f32 %v2612_v46, %v2586_v14  ;;  %v2588_v15 = vpop.f32.mrb[34].mxu1 }
0x1855   :  { %2635 = vst.msk [vmem:[#allocation4 + $0x20] sm:$0xff] %vm285_vm11, %v9178_v8  ;;  %v9184_v7 = vadd.f32 %v2608_v54, %v2588_v15  ;;  %v2590_v36 = vpop.f32.mrb[35].mxu1 }
0x1856   :  { %v9186_v16 = vadd.f32 %v2612_v46, %v2590_v36 }
0x1857   :  { %2636 = vst.msk [vmem:[#allocation4 + $0x28] sm:$0xff] %vm285_vm11, %v9184_v7 }
0x1859   :  { %v7913_v57 = vpop.eup %7912 }
0x185a   :  { %v2594_v63 = vpop.f32.mrb[36].mxu1 }
0x185b   :  { %v9190_v33 = vadd.f32 %v2608_v54, %v2594_v63  ;;  %v2596_v62 = vpop.f32.mrb[37].mxu1  ;;  %v7915_v53 = vpop.eup %7914 }
0x185c   :  { %v9192_v32 = vadd.f32 %v2612_v46, %v2596_v62  ;;  %v2598_v31 = vpop.f32.mrb[38].mxu1  ;;  %v2795_v55 = vadd.f32 1.0, %v7915_v53 }
0x185d   :  { %2637 = vst.msk [vmem:[#allocation4 + $0x30] sm:$0xff] %vm285_vm11, %v9190_v33  ;;  %v2629_v10 = vadd.f32 %v2608_v54, %v2598_v31  ;;  %v2600_v9 = vpop.f32.mrb[39].mxu1 }
0x185e   :  { %v2630_v20 = vadd.f32 %v2612_v46, %v2600_v9  ;;  %7916 = vrcp.f32 %v2795_v55 }
0x185f   :  { %2638 = vst.msk [vmem:[#allocation4 + $0x38] sm:$0xff] %vm285_vm11, %v2629_v10  ;;  %2683 = vrot.lane.b32.xlu0 %v2629_v10, %s8108_s30 }
0x1860   :  { %2685 = vrot.lane.b32.xlu1 %v2630_v20, %s8108_s30 }
0x1863   :  { %2801 = vrot.lane.b32.xlu0 %v7913_v57, %s8109_s9 }
0x1868   :  { %v7917_v27 = vpop.eup %7916 }
0x1869   :  { %v2799_v6 = vmul.f32 0.0, %v7917_v27 }
0x18d1   :  { %v2684_v23 = vpop.permute.xlu0 %2683 }
0x18d2   :  { %v2686_v61 = vpop.permute.xlu1 %2685 }
0x18d3   :  { %v2694_v39 = vsel %vm342_vm12, %v2684_v23, %v2686_v61 }
0x18d4   :  { %2710 = vst.msk [vmem:[#allocation5 + $0x38] sm:$0xff] %vm285_vm11, %v2694_v39  ;;  %v2949_v39 = vld [vmem:[#allocation4 + $0x8] sm:$0xff] }
0x18d5   :  { %v2802_v42 = vpop.permute.xlu0 %2801 }
0x18d6   :  { %v2804_v1 = vmul.f32 %v7917_v27, %v2802_v42 }
0x18d8   :  { %2806 = vrot.lane.b32.xlu0 %v2804_v1, %s8110_s5 }
0x18db   :  { %v2833_v26 = vld [vmem:[#allocation5 + $0x38] sm:$0xff] }
0x18dc   :  { %v2904_v17 = vadd.f32 %v2900_v11, %v2833_v26  ;;  %2818 = vperm.xlu0 %7699, %v8960_v58  }
0x18de   :  { %7918 = vtanh.f32 %v2904_v17  ;;  %v6821_v46 = vmul.f32 -1.442695, %v2904_v17 }
0x18e0   :  { %7920 = vpow2.f32 %v6821_v46 }
0x18e8   :  { %v7919_v54 = vpop.eup %7918 }
0x18e9   :  { %2914 = vrot.lane.b32.xlu1 %v7919_v54, %s8109_s9 }
0x18ea   :  { %v7921_v45 = vpop.eup %7920 }
0x18eb   :  { %v2908_v49 = vadd.f32 1.0, %v7921_v45 }
0x194a   :  { %v2807_v56 = vpop.permute.xlu0 %2806 }
0x194b   :  { %v2809_v52 = vadd.f32 %v2807_v56, %v2799_v6 }
0x194d   :  { %7922 = vtanh.f32 %v2809_v52 }
0x194e   :  { %7924 = vrcp.f32 %v2908_v49 }
0x1957   :  { %v7923_v60 = vpop.eup %7922 }
0x1958   :  { %2812 = vrot.lane.b32.xlu0 %v7923_v60, %s8111_s1  ;;  %v7925_v28 = vpop.eup %7924 }
0x1959   :  { %v2912_v13 = vmul.f32 0.0, %v7925_v28 }
0x195b   :  { %v2915_v59 = vpop.permute.xlu1 %2914  ;;  %v9215_v15 = vpop.permute.xlu0 %2818 }
0x195c   :  { %v2917_v48 = vmul.f32 %v7925_v28, %v2915_v59  ;;  %2938 = vperm.xlu0 %7699, %v2224_v51   ;;  %v2830_v58 = vmul.f32 %v9215_v15, %v2809_v52 }
0x195e   :  { %2919 = vrot.lane.b32.xlu1 %v2917_v48, %s8110_s5  ;;  %v2948_v48 = vld [vmem:[%s10213_s29 + $0x8] sm:$0xff] }
0x1962   :  { %2825 = vperm.xlu1 %7700, %v2340_v37  }
0x1966   :  { %2931 = vperm.xlu1 %7700, %v8973_v0  }
0x19ca   :  { %v2813_v36 = vpop.permute.xlu0 %2812 }
0x19cb   :  { %v2815_v62 = vmul.f32 %v7917_v27, %v2813_v36 }
0x19cd   :  { %v2821_v37 = vmul.f32 %v9215_v15, %v2815_v62 }
0x19d0   :  { %v2920_v14 = vpop.permute.xlu1 %2919 }
0x19d1   :  { %v9212_v47 = vadd.f32 %v2920_v14, %v2912_v13 }
0x19d3   :  { %7926 = vtanh.f32 %v9212_v47 }
0x19db   :  { %v9233_v10 = vpop.permute.xlu0 %2938 }
0x19dc   :  { %v9236_v57 = vmul.f32 0.0, %v9233_v10 }
0x19dd   :  { %v7927_v63 = vpop.eup %7926 }
0x19de   :  { %2925 = vrot.lane.b32.xlu1 %v7927_v63, %s8111_s1 }
0x19e1   :  { %v9218_v51 = vpop.permute.xlu1 %2825 }
0x19e2   :  { %v2828_v0 = vmul.f32 0.0, %v9218_v51 }
0x19e4   :  { %v9223_v11 = vadd.f32 %v2828_v0, %v2821_v37  ;;  %v9225_v31 = vadd.f32 %v2830_v58, %v2828_v0  ;;  %v3056_v0 = vsub.f32 1.0, %v2948_v48 }
0x19e5   :  { %v9231_v24 = vpop.permute.xlu1 %2931 }
0x19e6   :  { %2951 = vrot.lane.b32.xlu0 %v9223_v11, %s8112_s11 }
0x19ea   :  { %2679 = vrot.lane.b32.xlu0 %v9190_v33, %s8108_s30 }
0x1a50   :  { %v2926_v9 = vpop.permute.xlu1 %2925 }
0x1a51   :  { %v2928_v20 = vmul.f32 %v7925_v28, %v2926_v9 }
0x1a53   :  { %v2934_v43 = vmul.f32 %v9231_v24, %v2928_v20 }
0x1a55   :  { %v9240_v53 = vadd.f32 %v9236_v57, %v2934_v43  ;;  %v9276_v43 = vld [vmem:[%s10213_s29 + $0x30] sm:$0xff] }
0x1a57   :  { %3070 = vrot.lane.b32.xlu1 %v9240_v53, %s8112_s11 }
0x1a58   :  { %v2952_v55 = vpop.permute.xlu0 %2951 }
0x1a59   :  { %7325 = vmatmul.mubr.msk.f32.vlgmr.msra.gmra.mrb[30].mxu0 %vm376_vm13, %v2952_v55 }
0x1a5a   :  { %7611 = vmatpush3.bf16.msra.mxu0 %v9084_v50  ;;  %7333 = vmatprep.mubr.msk.f32.mxu0 %vm8107_vm1, %v8106_v22 }
0x1a5b   :  { %2681 = vrot.lane.b32.xlu1 %v9192_v32, %s8108_s30  ;;  %7331 = vmatprep.subr.mxu0 %v8106_v22 }
0x1a5c   :  { %v2680_v23 = vpop.permute.xlu0 %2679 }
0x1a5e   :  { %7332 = vmatpush3.msra.mxu0 %v9091_v38 }
0x1a5f   :  { %7612 = vmatprep.subr.bf16.mxu0 %v8105_v21 }
0x1ac9   :  { %v3071_v33 = vpop.permute.xlu1 %3070 }
0x1aca   :  { %7334 = vmatmul.mubr.msk.f32.vlgmr.msra.gmra.mrb[32].mxu0 %vm376_vm13, %v3071_v33  ;;  %v3175_v33 = vsub.f32 1.0, %v9276_v43 }
0x1acb   :  { %7614 = vmatpush3.bf16.msra.mxu0 %v9061_v19  ;;  %7342 = vmatprep.mubr.msk.f32.mxu0 %vm8107_vm1, %v8106_v22 }
0x1acc   :  { %7340 = vmatprep.subr.mxu0 %v8106_v22 }
0x1acd   :  { %v2682_v61 = vpop.permute.xlu1 %2681 }
0x1ace   :  { %v2693_v32 = vsel %vm342_vm12, %v2680_v23, %v2682_v61  ;;  %v2943_v23 = vmul.f32 %v9231_v24, %v9212_v47 }
0x1acf   :  { %2709 = vst.msk [vmem:[#allocation5 + $0x30] sm:$0xff] %vm285_vm11, %v2693_v32  ;;  %7341 = vmatpush3.msra.mxu0 %v9070_v5 }
0x1ad0   :  { %7615 = vmatprep.subr.bf16.mxu0 %v8105_v21  ;;  %v9284_v61 = vadd.f32 %v2943_v23, %v9236_v57 }
0x1ad6   :  { %v3068_v46 = vld [vmem:[#allocation5 + $0x30] sm:$0xff] }
0x1b2c   :  { %v3021_v27 = vpop.f32.mrb[30].mxu0 }
0x1b2d   :  { %v3025_v42 = vadd.f32 %v3021_v27, %v2949_v39  ;;  %v7326_v1 = vpop.f32.mrb[31].mxu0 }
0x1b2f   :  { %7928 = vtanh.f32 %v3025_v42  ;;  %v6823_v17 = vmul.f32 -1.442695, %v3025_v42 }
0x1b31   :  { %7930 = vpow2.f32 %v6823_v17 }
0x1b39   :  { %v7929_v26 = vpop.eup %7928 }
0x1b3a   :  { %3035 = vrot.lane.b32.xlu0 %v7929_v26, %s8109_s9 }
0x1b3b   :  { %v7931_v54 = vpop.eup %7930 }
0x1b3c   :  { %v3029_v45 = vadd.f32 1.0, %v7931_v54 }
0x1b9d   :  { %v3140_v6 = vpop.f32.mrb[32].mxu0 }
0x1b9e   :  { %v3144_v56 = vadd.f32 %v3140_v6, %v3068_v46  ;;  %v7335_v52 = vpop.f32.mrb[33].mxu0 }
0x1ba0   :  { %7932 = vtanh.f32 %v3144_v56  ;;  %v6825_v13 = vmul.f32 -1.442695, %v3144_v56 }
0x1ba1   :  { %7934 = vrcp.f32 %v3029_v45 }
0x1ba2   :  { %7936 = vpow2.f32 %v6825_v13  ;;  %v3197_v13 = vld [vmem:[#allocation4 + $0x10] sm:$0xff] }
0x1baa   :  { %v7933_v49 = vpop.eup %7932 }
0x1bab   :  { %3154 = vrot.lane.b32.xlu1 %v7933_v49, %s8109_s9  ;;  %v7935_v60 = vpop.eup %7934 }
0x1bac   :  { %v3036_v28 = vpop.permute.xlu0 %3035  ;;  %v7937_v14 = vpop.eup %7936  ;;  %v3033_v37 = vmul.f32 %v7935_v60, %v9225_v31 }
0x1bad   :  { %v3038_v59 = vmul.f32 %v7935_v60, %v3036_v28  ;;  %v3148_v36 = vadd.f32 1.0, %v7937_v14 }
0x1baf   :  { %3040 = vrot.lane.b32.xlu0 %v3038_v59, %s8110_s5  ;;  %7938 = vrcp.f32 %v3148_v36 }
0x1bb3   :  { %3052 = vperm.xlu0 %7699, %v2948_v48  }
0x1bb9   :  { %v7939_v63 = vpop.eup %7938 }
0x1bba   :  { %v3152_v32 = vmul.f32 %v7939_v63, %v9284_v61 }
0x1c1d   :  { %v3155_v62 = vpop.permute.xlu1 %3154 }
0x1c1e   :  { %v3157_v58 = vmul.f32 %v7939_v63, %v3155_v62 }
0x1c20   :  { %3159 = vrot.lane.b32.xlu1 %v3157_v58, %s8110_s5 }
0x1c21   :  { %v3041_v9 = vpop.permute.xlu0 %3040 }
0x1c22   :  { %v9270_v20 = vadd.f32 %v3041_v9, %v3033_v37 }
0x1c24   :  { %7940 = vtanh.f32 %v9270_v20  ;;  %3059 = vperm.xlu1 %7700, %v3056_v0  }
0x1c28   :  { %3171 = vperm.xlu1 %7700, %v9276_v43  }
0x1c2e   :  { %v7941_v55 = vpop.eup %7940 }
0x1c2f   :  { %3046 = vrot.lane.b32.xlu0 %v7941_v55, %s8111_s1 }
0x1c32   :  { %v9290_v42 = vpop.permute.xlu0 %3052 }
0x1c33   :  { %3178 = vperm.xlu0 %7699, %v3175_v33  }
0x1c92   :  { %v3160_v39 = vpop.permute.xlu1 %3159 }
0x1c93   :  { %v9287_v27 = vadd.f32 %v3160_v39, %v3152_v32 }
0x1c95   :  { %7942 = vtanh.f32 %v9287_v27 }
0x1c9f   :  { %v7943_v1 = vpop.eup %7942 }
0x1ca0   :  { %3165 = vrot.lane.b32.xlu1 %v7943_v1, %s8111_s1 }
0x1ca1   :  { %v3047_v26 = vpop.permute.xlu0 %3046 }
0x1ca2   :  { %v3049_v17 = vmul.f32 %v7935_v60, %v3047_v26 }
0x1ca3   :  { %v9293_v54 = vpop.permute.xlu1 %3059 }
0x1ca4   :  { %v3055_v47 = vmul.f32 %v9290_v42, %v3049_v17  ;;  %v3062_v57 = vmul.f32 %v9293_v54, %v9223_v11  ;;  %v9339_v17 = vld [vmem:[%s10213_s29 + $0x10] sm:$0xff] }
0x1ca6   :  { %v9298_v46 = vadd.f32 %v3062_v57, %v3055_v47 }
0x1ca7   :  { %v9304_v6 = vpop.permute.xlu1 %3171 }
0x1ca8   :  { %3199 = vrot.lane.b32.xlu0 %v9298_v46, %s8112_s11 }
0x1cac   :  { %2675 = vrot.lane.b32.xlu0 %v9184_v7, %s8108_s30 }
0x1cb2   :  { %v9306_v45 = vpop.permute.xlu0 %3178 }
0x1cb3   :  { %v3181_v60 = vmul.f32 %v9306_v45, %v9240_v53 }
0x1d12   :  { %v3166_v56 = vpop.permute.xlu1 %3165 }
0x1d13   :  { %v3168_v52 = vmul.f32 %v7939_v63, %v3166_v56 }
0x1d15   :  { %v3174_v49 = vmul.f32 %v9304_v6, %v3168_v52  ;;  %v3065_v52 = vmul.f32 %v9293_v54, %v9225_v31  ;;  %v9357_v31 = vld [vmem:[%s10213_s29 + $0x28] sm:$0xff] }
0x1d17   :  { %v9311_v11 = vadd.f32 %v3181_v60, %v3174_v49  ;;  %v3064_v49 = vmul.f32 %v9290_v42, %v9270_v20 }
0x1d19   :  { %3318 = vrot.lane.b32.xlu1 %v9311_v11, %s8112_s11 }
0x1d1a   :  { %v3200_v28 = vpop.permute.xlu0 %3199 }
0x1d1b   :  { %7343 = vmatmul.mubr.msk.f32.vlgmr.msra.gmra.mrb[34].mxu0 %vm376_vm13, %v3200_v28 }
0x1d1c   :  { %7617 = vmatpush3.bf16.msra.mxu0 %v9084_v50  ;;  %7351 = vmatprep.mubr.msk.f32.mxu0 %vm8107_vm1, %v8106_v22 }
0x1d1d   :  { %2677 = vrot.lane.b32.xlu1 %v9186_v16, %s8108_s30  ;;  %7349 = vmatprep.subr.mxu0 %v8106_v22 }
0x1d1e   :  { %v2676_v59 = vpop.permute.xlu0 %2675 }
0x1d20   :  { %7350 = vmatpush3.msra.mxu0 %v9091_v38 }
0x1d21   :  { %7618 = vmatprep.subr.bf16.mxu0 %v8105_v21 }
0x1d8b   :  { %v3319_v7 = vpop.permute.xlu1 %3318 }
0x1d8c   :  { %7352 = vmatmul.mubr.msk.f32.vlgmr.msra.gmra.mrb[36].mxu0 %vm376_vm13, %v3319_v7 }
0x1d8d   :  { %7620 = vmatpush3.bf16.msra.mxu0 %v9061_v19  ;;  %7360 = vmatprep.mubr.msk.f32.mxu0 %vm8107_vm1, %v8106_v22 }
0x1d8e   :  { %7358 = vmatprep.subr.mxu0 %v8106_v22 }
0x1d8f   :  { %v2678_v48 = vpop.permute.xlu1 %2677 }
0x1d90   :  { %v2692_v16 = vsel %vm342_vm12, %v2676_v59, %v2678_v48  ;;  %v9346_v59 = vadd.f32 %v3065_v52, %v3064_v49 }
0x1d91   :  { %2708 = vst.msk [vmem:[#allocation5 + $0x28] sm:$0xff] %vm285_vm11, %v2692_v16  ;;  %7359 = vmatpush3.msra.mxu0 %v9070_v5  ;;  %v3304_v16 = vsub.f32 1.0, %v9339_v17 }
0x1d92   :  { %7621 = vmatprep.subr.bf16.mxu0 %v8105_v21 }
0x1d98   :  { %v3316_v0 = vld [vmem:[#allocation5 + $0x28] sm:$0xff] }
0x1dee   :  { %v3269_v14 = vpop.f32.mrb[34].mxu0 }
0x1def   :  { %v3273_v36 = vadd.f32 %v3269_v14, %v3197_v13  ;;  %v7344_v63 = vpop.f32.mrb[35].mxu0 }
0x1df0   :  { %v3184_v63 = vmul.f32 %v9306_v45, %v9284_v61 }
0x1df1   :  { %7944 = vtanh.f32 %v3273_v36  ;;  %v6827_v58 = vmul.f32 -1.442695, %v3273_v36  ;;  %v3423_v36 = vsub.f32 1.0, %v9357_v31 }
0x1df3   :  { %7946 = vpow2.f32 %v6827_v58 }
0x1dfb   :  { %v7945_v62 = vpop.eup %7944 }
0x1dfc   :  { %3283 = vrot.lane.b32.xlu0 %v7945_v62, %s8109_s9  ;;  %v3183_v62 = vmul.f32 %v9304_v6, %v9287_v27 }
0x1dfd   :  { %v7947_v37 = vpop.eup %7946 }
0x1dfe   :  { %v3277_v55 = vadd.f32 1.0, %v7947_v37  ;;  %v9366_v58 = vadd.f32 %v3184_v63, %v3183_v62 }
0x1e5f   :  { %v3388_v9 = vpop.f32.mrb[36].mxu0 }
0x1e60   :  { %v3392_v33 = vadd.f32 %v3388_v9, %v3316_v0  ;;  %v7353_v23 = vpop.f32.mrb[37].mxu0 }
0x1e62   :  { %7948 = vtanh.f32 %v3392_v33  ;;  %v6829_v47 = vmul.f32 -1.442695, %v3392_v33 }
0x1e63   :  { %7950 = vrcp.f32 %v3277_v55 }
0x1e64   :  { %7952 = vpow2.f32 %v6829_v47 }
0x1e6c   :  { %v7949_v32 = vpop.eup %7948 }
0x1e6d   :  { %3402 = vrot.lane.b32.xlu1 %v7949_v32, %s8109_s9  ;;  %v7951_v39 = vpop.eup %7950 }
0x1e6e   :  { %v3284_v1 = vpop.permute.xlu0 %3283  ;;  %v7953_v57 = vpop.eup %7952  ;;  %v3281_v48 = vmul.f32 %v7951_v39, %v9346_v59 }
0x1e6f   :  { %v3286_v26 = vmul.f32 %v7951_v39, %v3284_v1  ;;  %v3396_v56 = vadd.f32 1.0, %v7953_v57 }
0x1e71   :  { %3288 = vrot.lane.b32.xlu0 %v3286_v26, %s8110_s5  ;;  %7954 = vrcp.f32 %v3396_v56 }
0x1e75   :  { %3300 = vperm.xlu0 %7699, %v9339_v17  }
0x1e7b   :  { %v7955_v60 = vpop.eup %7954 }
0x1e7c   :  { %v3400_v37 = vmul.f32 %v7955_v60, %v9366_v58 }
0x1edf   :  { %v3403_v28 = vpop.permute.xlu1 %3402 }
0x1ee0   :  { %v3405_v7 = vmul.f32 %v7955_v60, %v3403_v28 }
0x1ee2   :  { %3407 = vrot.lane.b32.xlu1 %v3405_v7, %s8110_s5 }
0x1ee3   :  { %v3289_v13 = vpop.permute.xlu0 %3288 }
0x1ee4   :  { %v9351_v14 = vadd.f32 %v3289_v13, %v3281_v48  ;;  %v3445_v48 = vld [vmem:[#allocation4 + $0x18] sm:$0xff] }
0x1ee6   :  { %7956 = vtanh.f32 %v9351_v14  ;;  %3307 = vperm.xlu1 %7700, %v3304_v16  }
0x1eea   :  { %3419 = vperm.xlu1 %7700, %v9357_v31  }
0x1ef0   :  { %v7957_v20 = vpop.eup %7956 }
0x1ef1   :  { %3294 = vrot.lane.b32.xlu0 %v7957_v20, %s8111_s1 }
0x1ef4   :  { %v9372_v55 = vpop.permute.xlu0 %3300 }
0x1ef5   :  { %3426 = vperm.xlu0 %7699, %v3423_v36  }
0x1f54   :  { %v3408_v0 = vpop.permute.xlu1 %3407 }
0x1f55   :  { %v9369_v9 = vadd.f32 %v3408_v0, %v3400_v37 }
0x1f57   :  { %7958 = vtanh.f32 %v9369_v9 }
0x1f61   :  { %v7959_v33 = vpop.eup %7958 }
0x1f62   :  { %3413 = vrot.lane.b32.xlu1 %v7959_v33, %s8111_s1 }
0x1f63   :  { %v3295_v23 = vpop.permute.xlu0 %3294 }
0x1f64   :  { %v3297_v32 = vmul.f32 %v7951_v39, %v3295_v23 }
0x1f65   :  { %v9375_v61 = vpop.permute.xlu1 %3307 }
0x1f66   :  { %v3303_v27 = vmul.f32 %v9372_v55, %v3297_v32  ;;  %v3310_v1 = vmul.f32 %v9375_v61, %v9298_v46 }
0x1f68   :  { %v9380_v26 = vadd.f32 %v3310_v1, %v3303_v27 }
0x1f69   :  { %v9386_v47 = vpop.permute.xlu1 %3419 }
0x1f6a   :  { %3447 = vrot.lane.b32.xlu0 %v9380_v26, %s8112_s11 }
0x1f6e   :  { %2671 = vrot.lane.b32.xlu0 %v9178_v8, %s8108_s30 }
0x1f74   :  { %v9388_v57 = vpop.permute.xlu0 %3426 }
0x1f75   :  { %v3429_v49 = vmul.f32 %v9388_v57, %v9311_v11 }
0x1fd4   :  { %v3414_v39 = vpop.permute.xlu1 %3413 }
0x1fd5   :  { %v3416_v56 = vmul.f32 %v7955_v60, %v3414_v39 }
0x1fd7   :  { %v3422_v52 = vmul.f32 %v9386_v47, %v3416_v56 }
0x1fd9   :  { %v9393_v46 = vadd.f32 %v3429_v49, %v3422_v52  ;;  %v9421_v52 = vld [vmem:[%s10213_s29 + $0x18] sm:$0xff] }
0x1fdb   :  { %3566 = vrot.lane.b32.xlu1 %v9393_v46, %s8112_s11 }
0x1fdc   :  { %v3448_v28 = vpop.permute.xlu0 %3447 }
0x1fdd   :  { %7361 = vmatmul.mubr.msk.f32.vlgmr.msra.gmra.mrb[38].mxu0 %vm376_vm13, %v3448_v28 }
0x1fde   :  { %7623 = vmatpush3.bf16.msra.mxu0 %v9084_v50  ;;  %7369 = vmatprep.mubr.msk.f32.mxu0 %vm8107_vm1, %v8106_v22 }
0x1fdf   :  { %2673 = vrot.lane.b32.xlu1 %v9180_v4, %s8108_s30  ;;  %7367 = vmatprep.subr.mxu0 %v8106_v22 }
0x1fe0   :  { %v2672_v60 = vpop.permute.xlu0 %2671 }
0x1fe2   :  { %7368 = vmatpush3.msra.mxu0 %v9091_v38 }
0x1fe3   :  { %7624 = vmatprep.subr.bf16.mxu0 %v8105_v21 }
0x204d   :  { %v3567_v8 = vpop.permute.xlu1 %3566 }
0x204e   :  { %7370 = vmatmul.mubr.msk.f32.vlgmr.msra.gmra.mrb[40].mxu0 %vm376_vm13, %v3567_v8 }
0x204f   :  { %7626 = vmatpush3.bf16.msra.mxu0 %v9061_v19  ;;  %7378 = vmatprep.mubr.msk.f32.mxu0 %vm8107_vm1, %v8106_v22 }
0x2050   :  { %7376 = vmatprep.subr.mxu0 %v8106_v22 }
0x2051   :  { %v2674_v7 = vpop.permute.xlu1 %2673 }
0x2052   :  { %v2691_v4 = vsel %vm342_vm12, %v2672_v60, %v2674_v7  ;;  %v3313_v60 = vmul.f32 %v9375_v61, %v9346_v59  ;;  %v3312_v7 = vmul.f32 %v9372_v55, %v9351_v14  ;;  %v9439_v59 = vld [vmem:[%s10213_s29 + $0x20] sm:$0xff] }
0x2053   :  { %2707 = vst.msk [vmem:[#allocation5 + $0x20] sm:$0xff] %vm285_vm11, %v2691_v4  ;;  %7377 = vmatpush3.msra.mxu0 %v9070_v5 }
0x2054   :  { %7627 = vmatprep.subr.bf16.mxu0 %v8105_v21 }
0x205a   :  { %v3564_v37 = vld [vmem:[#allocation5 + $0x20] sm:$0xff] }
0x20b0   :  { %v3517_v16 = vpop.f32.mrb[38].mxu0 }
0x20b1   :  { %v3521_v13 = vadd.f32 %v3517_v16, %v3445_v48  ;;  %v7362_v20 = vpop.f32.mrb[39].mxu0 }
0x20b3   :  { %7960 = vtanh.f32 %v3521_v13  ;;  %v6831_v63 = vmul.f32 -1.442695, %v3521_v13  ;;  %v9428_v13 = vadd.f32 %v3313_v60, %v3312_v7 }
0x20b5   :  { %7962 = vpow2.f32 %v6831_v63 }
0x20bd   :  { %v7961_v36 = vpop.eup %7960 }
0x20be   :  { %3531 = vrot.lane.b32.xlu0 %v7961_v36, %s8109_s9  ;;  %v3552_v36 = vsub.f32 1.0, %v9421_v52 }
0x20bf   :  { %v7963_v62 = vpop.eup %7962 }
0x20c0   :  { %v3525_v33 = vadd.f32 1.0, %v7963_v62 }
0x2121   :  { %v3636_v0 = vpop.f32.mrb[40].mxu0 }
0x2122   :  { %v3640_v23 = vadd.f32 %v3636_v0, %v3564_v37  ;;  %v7371_v32 = vpop.f32.mrb[41].mxu0  ;;  %v3671_v37 = vsub.f32 1.0, %v9439_v59  ;;  %v3432_v0 = vmul.f32 %v9388_v57, %v9366_v58 }
0x2124   :  { %7964 = vtanh.f32 %v3640_v23  ;;  %v6833_v49 = vmul.f32 -1.442695, %v3640_v23 }
0x2125   :  { %7966 = vrcp.f32 %v3525_v33  ;;  %v3431_v33 = vmul.f32 %v9386_v47, %v9369_v9 }
0x2126   :  { %7968 = vpow2.f32 %v6833_v49 }
0x2127   :  { %v9448_v23 = vadd.f32 %v3432_v0, %v3431_v33 }
0x212e   :  { %v7965_v27 = vpop.eup %7964 }
0x212f   :  { %3650 = vrot.lane.b32.xlu1 %v7965_v27, %s8109_s9  ;;  %v7967_v1 = vpop.eup %7966 }
0x2130   :  { %v3532_v39 = vpop.permute.xlu0 %3531  ;;  %v7969_v28 = vpop.eup %7968  ;;  %v3529_v20 = vmul.f32 %v7967_v1, %v9428_v13 }
0x2131   :  { %v3534_v56 = vmul.f32 %v7967_v1, %v3532_v39  ;;  %v3644_v8 = vadd.f32 1.0, %v7969_v28 }
0x2133   :  { %3536 = vrot.lane.b32.xlu0 %v3534_v56, %s8110_s5  ;;  %7970 = vrcp.f32 %v3644_v8 }
0x2137   :  { %3548 = vperm.xlu0 %7699, %v9421_v52  }
0x213d   :  { %v7971_v4 = vpop.eup %7970 }
0x213e   :  { %v3648_v32 = vmul.f32 %v7971_v4, %v9448_v23 }
0x21a1   :  { %v3651_v48 = vpop.permute.xlu1 %3650 }
0x21a2   :  { %v3653_v16 = vmul.f32 %v7971_v4, %v3651_v48 }
0x21a4   :  { %3655 = vrot.lane.b32.xlu1 %v3653_v16, %s8110_s5 }
0x21a5   :  { %v3537_v63 = vpop.permute.xlu0 %3536 }
0x21a6   :  { %v9433_v62 = vadd.f32 %v3537_v63, %v3529_v20 }
0x21a8   :  { %7972 = vtanh.f32 %v9433_v62  ;;  %3555 = vperm.xlu1 %7700, %v3552_v36  }
0x21ac   :  { %3667 = vperm.xlu1 %7700, %v9439_v59  }
0x21b2   :  { %v7973_v14 = vpop.eup %7972 }
0x21b3   :  { %3542 = vrot.lane.b32.xlu0 %v7973_v14, %s8111_s1 }
0x21b6   :  { %v9454_v56 = vpop.permute.xlu0 %3548 }
0x21b7   :  { %3674 = vperm.xlu0 %7699, %v3671_v37  }
0x2216   :  { %v3656_v27 = vpop.permute.xlu1 %3655 }
0x2217   :  { %v9451_v39 = vadd.f32 %v3656_v27, %v3648_v32 }
0x2219   :  { %7974 = vtanh.f32 %v9451_v39 }
0x2223   :  { %v7975_v49 = vpop.eup %7974 }
0x2224   :  { %3661 = vrot.lane.b32.xlu1 %v7975_v49, %s8111_s1 }
0x2225   :  { %v3543_v28 = vpop.permute.xlu0 %3542 }
0x2226   :  { %v3545_v8 = vmul.f32 %v7967_v1, %v3543_v28 }
0x2227   :  { %v9457_v58 = vpop.permute.xlu1 %3555 }
0x2228   :  { %v3551_v9 = vmul.f32 %v9454_v56, %v3545_v8  ;;  %v3558_v60 = vmul.f32 %v9457_v58, %v9380_v26 }
0x222a   :  { %v9462_v7 = vadd.f32 %v3558_v60, %v3551_v9 }
0x222b   :  { %v9468_v48 = vpop.permute.xlu1 %3667 }
0x222c   :  { %3694 = vrot.lane.b32.xlu0 %v9462_v7, %s8112_s11 }
0x2230   :  { %2667 = vrot.lane.b32.xlu0 %v9172_v3, %s8108_s30 }
0x2236   :  { %v9470_v16 = vpop.permute.xlu0 %3674 }
0x2237   :  { %v3677_v36 = vmul.f32 %v9470_v16, %v9393_v46 }
0x2296   :  { %v3662_v1 = vpop.permute.xlu1 %3661 }
0x2297   :  { %v3664_v20 = vmul.f32 %v7971_v4, %v3662_v1 }
0x2299   :  { %v3670_v63 = vmul.f32 %v9468_v48, %v3664_v20 }
0x229b   :  { %v9475_v26 = vadd.f32 %v3677_v36, %v3670_v63 }
0x229d   :  { %3801 = vrot.lane.b32.xlu1 %v9475_v26, %s8112_s11 }
0x229e   :  { %v3695_v14 = vpop.permute.xlu0 %3694 }
0x229f   :  { %7379 = vmatmul.mubr.msk.f32.vlgmr.msra.gmra.mrb[42].mxu0 %vm376_vm13, %v3695_v14 }
0x22a0   :  { %7629 = vmatpush3.bf16.msra.mxu0 %v9084_v50  ;;  %7387 = vmatprep.mubr.msk.f32.mxu0 %vm8107_vm1, %v8106_v22 }
0x22a1   :  { %2669 = vrot.lane.b32.xlu1 %v9174_v34, %s8108_s30  ;;  %7385 = vmatprep.subr.mxu0 %v8106_v22 }
0x22a2   :  { %v2668_v4 = vpop.permute.xlu0 %2667 }
0x22a4   :  { %7386 = vmatpush3.msra.mxu0 %v9091_v38  ;;  %v3692_v38 = vld [vmem:[#allocation4 + $0x20] sm:$0xff] }
0x22a5   :  { %7630 = vmatprep.subr.bf16.mxu0 %v8105_v21 }
0x230f   :  { %v3802_v3 = vpop.permute.xlu1 %3801 }
0x2310   :  { %7388 = vmatmul.mubr.msk.f32.vlgmr.msra.gmra.mrb[44].mxu0 %vm376_vm13, %v3802_v3 }
0x2311   :  { %7632 = vmatpush3.bf16.msra.mxu0 %v9061_v19  ;;  %7396 = vmatprep.mubr.msk.f32.mxu0 %vm8107_vm1, %v8106_v22 }
0x2312   :  { %7394 = vmatprep.subr.mxu0 %v8106_v22 }
0x2313   :  { %v2670_v37 = vpop.permute.xlu1 %2669 }
0x2314   :  { %v2690_v34 = vsel %vm342_vm12, %v2668_v4, %v2670_v37 }
0x2315   :  { %2706 = vst.msk [vmem:[#allocation5 + $0x18] sm:$0xff] %vm285_vm11, %v2690_v34  ;;  %7395 = vmatpush3.msra.mxu0 %v9070_v5  ;;  %v3561_v34 = vmul.f32 %v9457_v58, %v9428_v13  ;;  %v3680_v13 = vmul.f32 %v9470_v16, %v9448_v23  ;;  %v3794_v23 = vmul.f32 %v9470_v16, %v9462_v7 }
0x2316   :  { %7636 = vmatprep.subr.bf16.mxu0 %v8105_v21 }
0x231c   :  { %v3799_v8 = vld [vmem:[#allocation5 + $0x18] sm:$0xff] }
0x2372   :  { %v3764_v0 = vpop.f32.mrb[42].mxu0 }
0x2373   :  { %v3768_v33 = vadd.f32 %v3764_v0, %v3692_v38  ;;  %v7380_v32 = vpop.f32.mrb[43].mxu0  ;;  %v3560_v38 = vmul.f32 %v9454_v56, %v9433_v62  ;;  %v3679_v62 = vmul.f32 %v9468_v48, %v9451_v39 }
0x2375   :  { %7976 = vtanh.f32 %v3768_v33  ;;  %v6835_v49 = vmul.f32 -1.442695, %v3768_v33 }
0x2377   :  { %7978 = vpow2.f32 %v6835_v49 }
0x237f   :  { %v7977_v27 = vpop.eup %7976 }
0x2380   :  { %3778 = vrot.lane.b32.xlu1 %v7977_v27, %s8109_s9  ;;  %v9504_v27 = vadd.f32 %v3561_v34, %v3560_v38 }
0x2381   :  { %v7979_v28 = vpop.eup %7978 }
0x2382   :  { %v3772_v60 = vadd.f32 1.0, %v7979_v28 }
0x23e3   :  { %v3871_v9 = vpop.f32.mrb[44].mxu0 }
0x23e4   :  { %v3875_v1 = vadd.f32 %v3871_v9, %v3799_v8  ;;  %v7389_v20 = vpop.f32.mrb[45].mxu0 }
0x23e6   :  { %7980 = vtanh.f32 %v3875_v1  ;;  %v6837_v3 = vmul.f32 -1.442695, %v3875_v1 }
0x23e7   :  { %7982 = vrcp.f32 %v3772_v60  ;;  %v9516_v60 = vadd.f32 %v3680_v13, %v3679_v62 }
0x23e8   :  { %7984 = vpow2.f32 %v6837_v3 }
0x23f0   :  { %v7981_v5 = vpop.eup %7980 }
0x23f1   :  { %3885 = vrot.lane.b32.xlu0 %v7981_v5, %s8109_s9  ;;  %v7983_v36 = vpop.eup %7982 }
0x23f2   :  { %v3779_v63 = vpop.permute.xlu1 %3778  ;;  %v7985_v4 = vpop.eup %7984  ;;  %v3776_v49 = vmul.f32 %v7983_v36, %v9504_v27 }
0x23f3   :  { %v3781_v14 = vmul.f32 %v7983_v36, %v3779_v63  ;;  %v3879_v37 = vadd.f32 1.0, %v7985_v4 }
0x23f5   :  { %3783 = vrot.lane.b32.xlu1 %v3781_v14, %s8110_s5  ;;  %7986 = vrcp.f32 %v3879_v37 }
0x23ff   :  { %v7987_v0 = vpop.eup %7986 }
0x2400   :  { %v3883_v1 = vmul.f32 %v7987_v0, %v9516_v60 }
0x2463   :  { %v3886_v33 = vpop.permute.xlu0 %3885 }
0x2464   :  { %v3888_v32 = vmul.f32 %v7987_v0, %v3886_v33 }
0x2466   :  { %3890 = vrot.lane.b32.xlu0 %v3888_v32, %s8110_s5 }
0x2467   :  { %v3784_v28 = vpop.permute.xlu1 %3783 }
0x2468   :  { %v9508_v8 = vadd.f32 %v3784_v28, %v3776_v49  ;;  %v9563_v28 = vld [vmem:[%s10212_s0 + $0x58] sm:$0xff] }
0x246a   :  { %7988 = vtanh.f32 %v9508_v8 }
0x2474   :  { %v7989_v9 = vpop.eup %7988 }
0x2475   :  { %3789 = vrot.lane.b32.xlu1 %v7989_v9, %s8111_s1  ;;  %v3916_v9 = vld [vmem:[#allocation4 + $0x28] sm:$0xff] }
0x24d8   :  { %v3891_v20 = vpop.permute.xlu0 %3890 }
0x24d9   :  { %v9519_v5 = vadd.f32 %v3891_v20, %v3883_v1 }
0x24db   :  { %7990 = vtanh.f32 %v9519_v5 }
0x24e5   :  { %v7991_v63 = vpop.eup %7990 }
0x24e6   :  { %3896 = vrot.lane.b32.xlu0 %v7991_v63, %s8111_s1 }
0x24e7   :  { %v3790_v14 = vpop.permute.xlu1 %3789 }
0x24e8   :  { %v3792_v3 = vmul.f32 %v7983_v36, %v3790_v14  ;;  %v3901_v36 = vmul.f32 %v9475_v26, %v9457_v58 }
0x24ea   :  { %v3793_v4 = vmul.f32 %v3792_v3, %v9468_v48 }
0x24ec   :  { %v9526_v39 = vadd.f32 %v3794_v23, %v3793_v4 }
0x24ee   :  { %3918 = vrot.lane.b32.xlu1 %v9526_v39, %s8112_s11 }
0x24f2   :  { %2665 = vrot.lane.b32.xlu1 %v9168_v18, %s8108_s30  ;;  %v9549_v18 = vld [vmem:[%s10212_s0 + $0x40] sm:$0xff] }
0x2558   :  { %v3897_v37 = vpop.permute.xlu0 %3896 }
0x2559   :  { %v3899_v34 = vmul.f32 %v7987_v0, %v3897_v37 }
0x255b   :  { %v3900_v38 = vmul.f32 %v3899_v34, %v9454_v56 }
0x255d   :  { %v9535_v33 = vadd.f32 %v3901_v36, %v3900_v38 }
0x255f   :  { %4025 = vrot.lane.b32.xlu0 %v9535_v33, %s8112_s11 }
0x2560   :  { %v3919_v7 = vpop.permute.xlu1 %3918 }
0x2561   :  { %7397 = vmatmul.mubr.msk.f32.vlgmr.msra.gmra.mrb[46].mxu0 %vm376_vm13, %v3919_v7 }
0x2562   :  { %7638 = vmatpush3.bf16.msra.mxu0 %v9061_v19  ;;  %7414 = vmatprep.mubr.msk.f32.mxu0 %vm8107_vm1, %v8106_v22 }
0x2563   :  { %2663 = vrot.lane.b32.xlu0 %v9166_v12, %s8108_s30  ;;  %7412 = vmatprep.subr.mxu0 %v8106_v22 }
0x2564   :  { %v2666_v12 = vpop.permute.xlu1 %2665 }
0x2566   :  { %7413 = vmatpush3.msra.mxu0 %v9549_v18 }
0x2567   :  { %7642 = vmatprep.subr.bf16.mxu0 %v8105_v21 }
0x25d1   :  { %v4026_v0 = vpop.permute.xlu0 %4025 }
0x25d2   :  { %7406 = vmatmul.mubr.msk.f32.vlgmr.msra.gmra.mrb[22].mxu1 %vm376_vm13, %v4026_v0 }
0x25d3   :  { %7641 = vmatpush3.bf16.msra.mxu1 %v9084_v50  ;;  %7423 = vmatprep.mubr.msk.f32.mxu1 %vm8107_vm1, %v8106_v22 }
0x25d4   :  { %7421 = vmatprep.subr.mxu1 %v8106_v22 }
0x25d5   :  { %v2664_v32 = vpop.permute.xlu0 %2663 }
0x25d6   :  { %v2689_v49 = vsel %vm342_vm12, %v2664_v32, %v2666_v12 }
0x25d7   :  { %2705 = vst.msk [vmem:[#allocation5 + $0x10] sm:$0xff] %vm285_vm11, %v2689_v49  ;;  %7422 = vmatpush3.msra.mxu1 %v9563_v28 }
0x25d8   :  { %7645 = vmatprep.subr.bf16.mxu1 %v8105_v21 }
0x25de   :  { %v4023_v3 = vld [vmem:[#allocation5 + $0x10] sm:$0xff] }
0x2634   :  { %v3988_v13 = vpop.f32.mrb[46].mxu0 }
0x2635   :  { %v3992_v62 = vadd.f32 %v3988_v13, %v3916_v9  ;;  %v7398_v1 = vpop.f32.mrb[47].mxu0  ;;  %v3796_v9 = vmul.f32 %v9508_v8, %v9468_v48  ;;  %v3797_v13 = vmul.f32 %v9470_v16, %v9504_v27  ;;  %v3903_v48 = vmul.f32 %v9519_v5, %v9454_v56 }
0x2636   :  { %v3904_v16 = vmul.f32 %v9516_v60, %v9457_v58  ;;  %v4018_v56 = vmul.f32 %v9526_v39, %v9388_v57 }
0x2637   :  { %7992 = vtanh.f32 %v3992_v62  ;;  %v6839_v63 = vmul.f32 -1.442695, %v3992_v62 }
0x2638   :  { %v9586_v27 = vadd.f32 %v3904_v16, %v3903_v48 }
0x2639   :  { %7994 = vpow2.f32 %v6839_v63  ;;  %v9574_v63 = vadd.f32 %v3797_v13, %v3796_v9 }
0x2641   :  { %v7993_v20 = vpop.eup %7992 }
0x2642   :  { %4002 = vrot.lane.b32.xlu1 %v7993_v20, %s8109_s9 }
0x2643   :  { %v7995_v14 = vpop.eup %7994 }
0x2644   :  { %v3996_v4 = vadd.f32 1.0, %v7995_v14 }
0x26a5   :  { %v4095_v23 = vpop.f32.mrb[22].mxu1 }
0x26a6   :  { %v4099_v37 = vadd.f32 %v4095_v23, %v4023_v3  ;;  %v7407_v34 = vpop.f32.mrb[23].mxu1 }
0x26a8   :  { %7996 = vtanh.f32 %v4099_v37  ;;  %v6841_v12 = vmul.f32 -1.442695, %v4099_v37 }
0x26a9   :  { %7998 = vrcp.f32 %v3996_v4 }
0x26aa   :  { %8000 = vpow2.f32 %v6841_v12 }
0x26b2   :  { %v7997_v38 = vpop.eup %7996 }
0x26b3   :  { %4109 = vrot.lane.b32.xlu0 %v7997_v38, %s8109_s9  ;;  %v7999_v36 = vpop.eup %7998 }
0x26b4   :  { %v4003_v7 = vpop.permute.xlu1 %4002  ;;  %v8001_v32 = vpop.eup %8000  ;;  %v4000_v14 = vmul.f32 %v7999_v36, %v9574_v63 }
0x26b5   :  { %v4005_v0 = vmul.f32 %v7999_v36, %v4003_v7  ;;  %v4103_v49 = vadd.f32 1.0, %v8001_v32 }
0x26b7   :  { %4007 = vrot.lane.b32.xlu1 %v4005_v0, %s8110_s5  ;;  %8002 = vrcp.f32 %v4103_v49 }
0x26c1   :  { %v8003_v62 = vpop.eup %8002 }
0x26c2   :  { %v4107_v8 = vmul.f32 %v8003_v62, %v9586_v27 }
0x2725   :  { %v4110_v1 = vpop.permute.xlu0 %4109 }
0x2726   :  { %v4112_v20 = vmul.f32 %v8003_v62, %v4110_v1 }
0x2728   :  { %4114 = vrot.lane.b32.xlu0 %v4112_v20, %s8110_s5 }
0x2729   :  { %v4008_v3 = vpop.permute.xlu1 %4007 }
0x272a   :  { %v9578_v23 = vadd.f32 %v4008_v3, %v4000_v14 }
0x272c   :  { %8004 = vtanh.f32 %v9578_v23 }
0x2736   :  { %v8005_v4 = vpop.eup %8004 }
0x2737   :  { %4013 = vrot.lane.b32.xlu1 %v8005_v4, %s8111_s1 }
0x279a   :  { %v4115_v37 = vpop.permute.xlu0 %4114 }
0x279b   :  { %v9589_v34 = vadd.f32 %v4115_v37, %v4107_v8 }
0x279d   :  { %8006 = vtanh.f32 %v9589_v34 }
0x27a7   :  { %v8007_v38 = vpop.eup %8006 }
0x27a8   :  { %4120 = vrot.lane.b32.xlu0 %v8007_v38, %s8111_s1 }
0x27a9   :  { %v4014_v7 = vpop.permute.xlu1 %4013 }
0x27aa   :  { %v4016_v0 = vmul.f32 %v7999_v36, %v4014_v7  ;;  %v4125_v36 = vmul.f32 %v9535_v33, %v9375_v61 }
0x27ac   :  { %v4017_v12 = vmul.f32 %v4016_v0, %v9386_v47 }
0x27ae   :  { %v9596_v58 = vadd.f32 %v4018_v56, %v4017_v12 }
0x27b0   :  { %4142 = vrot.lane.b32.xlu1 %v9596_v58, %s8112_s11 }
0x27b4   :  { %2661 = vrot.lane.b32.xlu1 %v9162_v41, %s8108_s30 }
0x281a   :  { %v4121_v60 = vpop.permute.xlu0 %4120 }
0x281b   :  { %v4123_v5 = vmul.f32 %v8003_v62, %v4121_v60  ;;  %v4020_v60 = vmul.f32 %v9578_v23, %v9386_v47  ;;  %v4127_v47 = vmul.f32 %v9589_v34, %v9372_v55 }
0x281d   :  { %v4124_v32 = vmul.f32 %v4123_v5, %v9372_v55  ;;  %v4021_v5 = vmul.f32 %v9574_v63, %v9388_v57  ;;  %v4128_v57 = vmul.f32 %v9586_v27, %v9375_v61  ;;  %v4242_v55 = vmul.f32 %v9596_v58, %v9306_v45 }
0x281f   :  { %v9605_v49 = vadd.f32 %v4125_v36, %v4124_v32  ;;  %v9646_v63 = vadd.f32 %v4128_v57, %v4127_v47 }
0x2821   :  { %4249 = vrot.lane.b32.xlu0 %v9605_v49, %s8112_s11 }
0x2822   :  { %v4143_v39 = vpop.permute.xlu1 %4142 }
0x2823   :  { %7415 = vmatmul.mubr.msk.f32.vlgmr.msra.gmra.mrb[48].mxu0 %vm376_vm13, %v4143_v39 }
0x2824   :  { %7644 = vmatpush3.bf16.msra.mxu0 %v9061_v19  ;;  %7432 = vmatprep.mubr.msk.f32.mxu0 %vm8107_vm1, %v8106_v22 }
0x2825   :  { %2659 = vrot.lane.b32.xlu0 %v9160_v30, %s8108_s30  ;;  %7430 = vmatprep.subr.mxu0 %v8106_v22 }
0x2826   :  { %v2662_v19 = vpop.permute.xlu1 %2661 }
0x2828   :  { %7431 = vmatpush3.msra.mxu0 %v9549_v18  ;;  %v4140_v18 = vld [vmem:[#allocation4 + $0x30] sm:$0xff] }
0x2829   :  { %7648 = vmatprep.subr.bf16.mxu0 %v8105_v21 }
0x2893   :  { %v4250_v41 = vpop.permute.xlu0 %4249 }
0x2894   :  { %7424 = vmatmul.mubr.msk.f32.vlgmr.msra.gmra.mrb[40].mxu1 %vm376_vm13, %v4250_v41  ;;  %v9634_v41 = vadd.f32 %v4021_v5, %v4020_v60  ;;  %v8076_v60 = vld [vmem:[%s10213_s29 + $0x38] sm:$0xff] }
0x2895   :  { %7647 = vmatpush3.bf16.msra.mxu1 %v9084_v50  ;;  %7441 = vmatprep.mubr.msk.f32.mxu1 %vm8107_vm1, %v8106_v22  ;;  %v2947_v5 = vmax.f32 %v8076_v60, 0.0 }
0x2896   :  { %7439 = vmatprep.subr.mxu1 %v8106_v22 }
0x2897   :  { %v2660_v9 = vpop.permute.xlu0 %2659 }
0x2898   :  { %v2688_v30 = vsel %vm342_vm12, %v2660_v9, %v2662_v19 }
0x2899   :  { %2704 = vst.msk [vmem:[#allocation5 + $0x8] sm:$0xff] %vm285_vm11, %v2688_v30  ;;  %7440 = vmatpush3.msra.mxu1 %v9563_v28 }
0x289a   :  { %7651 = vmatprep.subr.bf16.mxu1 %v8105_v21 }
0x28a0   :  { %v4247_v3 = vld [vmem:[#allocation5 + $0x8] sm:$0xff] }
0x28f6   :  { %v4212_v13 = vpop.f32.mrb[48].mxu0 }
0x28f7   :  { %v4216_v62 = vadd.f32 %v4212_v13, %v4140_v18  ;;  %v7416_v1 = vpop.f32.mrb[49].mxu0 }
0x28f9   :  { %8008 = vtanh.f32 %v4216_v62  ;;  %v6843_v20 = vmul.f32 -1.442695, %v4216_v62 }
0x28fb   :  { %8010 = vpow2.f32 %v6843_v20 }
0x2903   :  { %v8009_v50 = vpop.eup %8008 }
0x2904   :  { %4226 = vrot.lane.b32.xlu1 %v8009_v50, %s8109_s9 }
0x2905   :  { %v8011_v14 = vpop.eup %8010 }
0x2906   :  { %v4220_v48 = vadd.f32 1.0, %v8011_v14 }
0x2967   :  { %v4319_v4 = vpop.f32.mrb[40].mxu1 }
0x2968   :  { %v4323_v16 = vadd.f32 %v4319_v4, %v4247_v3  ;;  %v7425_v8 = vpop.f32.mrb[41].mxu1  ;;  %v4349_v4 = vmul.f32 %v9605_v49, %v9293_v54 }
0x296a   :  { %8012 = vtanh.f32 %v4323_v16  ;;  %v6845_v0 = vmul.f32 -1.442695, %v4323_v16 }
0x296b   :  { %8014 = vrcp.f32 %v4220_v48 }
0x296c   :  { %8016 = vpow2.f32 %v6845_v0 }
0x2974   :  { %v8013_v28 = vpop.eup %8012 }
0x2975   :  { %4333 = vrot.lane.b32.xlu0 %v8013_v28, %s8109_s9  ;;  %v8015_v37 = vpop.eup %8014 }
0x2976   :  { %v4227_v38 = vpop.permute.xlu1 %4226  ;;  %v8017_v12 = vpop.eup %8016  ;;  %v4224_v19 = vmul.f32 %v8015_v37, %v9634_v41 }
0x2977   :  { %v4229_v7 = vmul.f32 %v8015_v37, %v4227_v38  ;;  %v4327_v56 = vadd.f32 1.0, %v8017_v12 }
0x2979   :  { %4231 = vrot.lane.b32.xlu1 %v4229_v7, %s8110_s5  ;;  %8018 = vrcp.f32 %v4327_v56 }
0x2983   :  { %v8019_v32 = vpop.eup %8018 }
0x2984   :  { %v4331_v23 = vmul.f32 %v8019_v32, %v9646_v63 }
0x29e7   :  { %v4334_v36 = vpop.permute.xlu0 %4333 }
0x29e8   :  { %v4336_v39 = vmul.f32 %v8019_v32, %v4334_v36 }
0x29ea   :  { %4338 = vrot.lane.b32.xlu0 %v4336_v39, %s8110_s5 }
0x29eb   :  { %v4232_v9 = vpop.permute.xlu1 %4231 }
0x29ec   :  { %v9638_v30 = vadd.f32 %v4232_v9, %v4224_v19 }
0x29ee   :  { %8020 = vtanh.f32 %v9638_v30 }
0x29f8   :  { %v8021_v18 = vpop.eup %8020 }
0x29f9   :  { %4237 = vrot.lane.b32.xlu1 %v8021_v18, %s8111_s1  ;;  %v3195_v18 = vmax.f32 %v2947_v5, %v9276_v43 }
0x29fb   :  { %v3443_v47 = vmax.f32 %v3195_v18, %v9357_v31 }
0x29fd   :  { %v3691_v57 = vmax.f32 %v3443_v47, %v9439_v59 }
0x2a5c   :  { %v4339_v13 = vpop.permute.xlu0 %4338 }
0x2a5d   :  { %v9649_v62 = vadd.f32 %v4339_v13, %v4331_v23  ;;  %v3915_v13 = vmax.f32 %v3691_v57, %v9421_v52 }
0x2a5f   :  { %8022 = vtanh.f32 %v9649_v62 }
0x2a69   :  { %v8023_v1 = vpop.eup %8022 }
0x2a6a   :  { %4344 = vrot.lane.b32.xlu0 %v8023_v1, %s8111_s1  ;;  %v3434_v1 = vsub.f32 1.0, %v3195_v18  ;;  %v4352_v18 = vmul.f32 %v9646_v63, %v9293_v54 }
0x2a6b   :  { %v4238_v50 = vpop.permute.xlu1 %4237 }
0x2a6c   :  { %v4240_v20 = vmul.f32 %v8015_v37, %v4238_v50  ;;  %v4364_v37 = vld [vmem:[#allocation4 + $0x38] sm:$0xff]  ;;  %v3435_v43 = vmul.f32 %v3434_v1, %v9357_v31  ;;  %v3186_v31 = vsub.f32 1.0, %v2947_v5 }
0x2a6e   :  { %v4241_v14 = vmul.f32 %v4240_v20, %v9304_v6 }
0x2a70   :  { %v9656_v61 = vadd.f32 %v4242_v55, %v4241_v14  ;;  %v3906_v55 = vsub.f32 1.0, %v3691_v57 }
0x2a72   :  { %4366 = vrot.lane.b32.xlu1 %v9656_v61, %s8112_s11 }
0x2a76   :  { %2657 = vrot.lane.b32.xlu1 %v9156_v29, %s8108_s30 }
0x2adc   :  { %v4345_v27 = vpop.permute.xlu0 %4344 }
0x2add   :  { %v4347_v34 = vmul.f32 %v8019_v32, %v4345_v27  ;;  %v4139_v27 = vmax.f32 %v3915_v13, %v9339_v17 }
0x2adf   :  { %v4348_v3 = vmul.f32 %v4347_v34, %v9290_v42  ;;  %v3907_v34 = vmul.f32 %v3906_v55, %v9421_v52 }
0x2ae1   :  { %v9665_v48 = vadd.f32 %v4349_v4, %v4348_v3  ;;  %v4354_v3 = vsub.f32 1.0, %v4139_v27  ;;  %v8077_v4 = vld [vmem:[%s10213_s29 + $0x8] sm:$0xff] }
0x2ae3   :  { %4470 = vrot.lane.b32.xlu0 %v9665_v48, %s8112_s11 }
0x2ae4   :  { %v4367_v58 = vpop.permute.xlu1 %4366 }
0x2ae5   :  { %7433 = vmatmul.mubr.msk.f32.vlgmr.msra.gmra.mrb[50].mxu0 %vm376_vm13, %v4367_v58  ;;  %v4355_v58 = vmul.f32 %v8077_v4, %v4354_v3 }
0x2ae6   :  { %7450 = vmatprep.mubr.msk.f32.mxu0 %vm8107_vm1, %v8106_v22 }
0x2ae7   :  { %2655 = vrot.lane.b32.xlu0 %v9154_v44, %s8108_s30 }
0x2ae8   :  { %v2658_v16 = vpop.permute.xlu1 %2657 }
0x2b55   :  { %v4471_v29 = vpop.permute.xlu0 %4470 }
0x2b56   :  { %7442 = vmatmul.mubr.msk.f32.vlgmr.msra.gmra.mrb[42].mxu1 %vm376_vm13, %v4471_v29 }
0x2b57   :  { %7459 = vmatprep.mubr.msk.f32.mxu1 %vm8107_vm1, %v8106_v22 }
0x2b59   :  { %v2656_v8 = vpop.permute.xlu0 %2655 }
0x2b5a   :  { %v2687_v28 = vsel %vm342_vm12, %v2656_v8, %v2658_v16 }
0x2b5b   :  { %2703 = vst.msk [vmem:[#allocation5] sm:$0xff] %vm285_vm11, %v2687_v28 }
0x2b62   :  { %v4468_v32 = vld [vmem:[#allocation5] sm:$0xff] }
0x2bb8   :  { %v4436_v38 = vpop.f32.mrb[50].mxu0 }
0x2bb9   :  { %v4440_v7 = vadd.f32 %v4436_v38, %v4364_v37  ;;  %v7434_v0 = vpop.f32.mrb[51].mxu0  ;;  %v4244_v37 = vmul.f32 %v9638_v30, %v9304_v6  ;;  %v4130_v30 = vsub.f32 1.0, %v3915_v13 }
0x2bba   :  { %v8078_v0 = vld [vmem:[%s10213_s29 + $0x30] sm:$0xff] }
0x2bbb   :  { %8024 = vtanh.f32 %v4440_v7  ;;  %v6847_v44 = vmul.f32 -1.442695, %v4440_v7  ;;  %v4245_v7 = vmul.f32 %v9634_v41, %v9306_v45  ;;  %v4131_v45 = vmul.f32 %v4130_v30, %v9339_v17 }
0x2bbd   :  { %8026 = vpow2.f32 %v6847_v44  ;;  %v3682_v44 = vsub.f32 1.0, %v3443_v47 }
0x2bbf   :  { %v3683_v6 = vmul.f32 %v3682_v44, %v9439_v59  ;;  %v4351_v59 = vmul.f32 %v9649_v62, %v9290_v42  ;;  %v2945_v62 = vmul.f32 %v9240_v53, %v9231_v24 }
0x2bc1   :  { %v4353_v47 = vadd.f32 %v4352_v18, %v4351_v59 }
0x2bc5   :  { %v8025_v12 = vpop.eup %8024 }
0x2bc6   :  { %4450 = vrot.lane.b32.xlu1 %v8025_v12, %s8109_s9  ;;  %v3187_v12 = vmul.f32 %v8078_v0, %v3186_v31 }
0x2bc7   :  { %v8027_v56 = vpop.eup %8026 }
0x2bc8   :  { %v4444_v39 = vadd.f32 1.0, %v8027_v56  ;;  %v4246_v56 = vadd.f32 %v4245_v7, %v4244_v37  ;;  %v4466_v7 = vmul.f32 %v9656_v61, %v9233_v10 }
0x2c29   :  { %v4540_v36 = vpop.f32.mrb[42].mxu1 }
0x2c2a   :  { %v4544_v19 = vadd.f32 %v4540_v36, %v4468_v32  ;;  %v7443_v9 = vpop.f32.mrb[43].mxu1  ;;  %v4363_v32 = vmax.f32 %v4139_v27, %v8077_v4 }
0x2c2c   :  { %8028 = vtanh.f32 %v4544_v19  ;;  %v6849_v29 = vmul.f32 -1.442695, %v4544_v19  ;;  %v4572_v41 = vsub.f32 1.0, %v4363_v32 }
0x2c2d   :  { %8030 = vrcp.f32 %v4444_v39  ;;  %v8079_v39 = vld [vmem:[%s10213_s29] sm:$0xff]  ;;  %s10216_s29 = sld [smem:[#allocation15_spill]] }
0x2c2e   :  { %8032 = vpow2.f32 %v6849_v29  ;;  %v4573_v19 = vmul.f32 %v8079_v39, %v4572_v41 }
0x2c33   :  { %v4581_v13 = vld [vmem:[%s10216_s29] sm:$0xff]  ;;  %v4582_v1 = vld [vmem:[%s10216_s29 + $0x8] sm:$0xff]  ;;  %v4583_v54 = vld [vmem:[%s10216_s29 + $0x10] sm:$0xff] }
0x2c36   :  { %v8029_v23 = vpop.eup %8028 }
0x2c37   :  { %4554 = vrot.lane.b32.xlu0 %v8029_v23, %s8109_s9  ;;  %v9688_v50 = vpop.eup %8030 }
0x2c38   :  { %v4451_v20 = vpop.permute.xlu1 %4450  ;;  %v8033_v16 = vpop.eup %8032  ;;  %v4448_v5 = vmul.f32 %v9688_v50, %v4246_v56 }
0x2c39   :  { %v4453_v14 = vmul.f32 %v9688_v50, %v4451_v20  ;;  %v4548_v8 = vadd.f32 1.0, %v8033_v16  ;;  %v7652_v20 = vpack.c.bf16 %v4582_v1, %v4581_v13  ;;  %v7724_v1 = vld [vmem:[%s10177_s13 + $0x4] ss:$8 sps:$4 sm:$0xff]  }
0x2c3b   :  { %4455 = vrot.lane.b32.xlu1 %v4453_v14, %s8110_s5  ;;  %8034 = vrcp.f32 %v4548_v8  ;;  %7653 = vmatpush3.bf16.msra.mxu1 %v7652_v20  ;;  %v7722_v20 = vld [vmem:[%s10177_s13] ss:$8 sps:$4 sm:$0xff]  }
0x2c3c   :  { %7457 = vmatprep.subr.mxu1 %v8106_v22 }
0x2c3f   :  { %3438 = vperm.xlu1 %7700, %v3435_v43   ;;  %7458 = vmatpush3.msra.mxu1 %v4583_v54  ;;  %v7728_v54 = vld [vmem:[%s10177_s13 + $0x20] ss:$8 sps:$4 sm:$0xff]  }
0x2c40   :  { %7462 = vmatprep.subr.mxu1 %v8106_v22 }
0x2c43   :  { %3910 = vperm.xlu1 %7700, %v3907_v34  }
0x2c45   :  { %v9698_v28 = vpop.eup %8034 }
0x2c46   :  { %v4552_v17 = vmul.f32 %v9698_v28, %v4353_v47 }
0x2c47   :  { %4358 = vperm.xlu1 %7700, %v4355_v58  }
0x2ca9   :  { %v4555_v52 = vpop.permute.xlu0 %4554 }
0x2caa   :  { %v4557_v38 = vmul.f32 %v9698_v28, %v4555_v52 }
0x2cac   :  { %4559 = vrot.lane.b32.xlu0 %v4557_v38, %s8110_s5 }
0x2cad   :  { %v4456_v60 = vpop.permute.xlu1 %4455 }
0x2cae   :  { %v4458_v36 = vadd.f32 %v4456_v60, %v4448_v5 }
0x2cb0   :  { %3190 = vperm.xlu0 %7699, %v3187_v12   ;;  %8036 = vtanh.f32 %v4458_v36 }
0x2cb4   :  { %3686 = vperm.xlu0 %7699, %v3683_v6   ;;  %v4570_v6 = vmul.f32 %v9665_v48, %v9218_v51 }
0x2cb8   :  { %4134 = vperm.xlu0 %7699, %v4131_v45  }
0x2cba   :  { %v8037_v9 = vpop.eup %8036 }
0x2cbc   :  { %4576 = vperm.xlu0 %7699, %v4573_v19   ;;  %v4746_v19 = vld [vmem:[%s10218_s8] sm:$0xff]  ;;  %s8116_s8 = smov 104  }
0x2cbe   :  { %v3439_v42 = vpop.permute.xlu1 %3438 }
0x2cbf   :  { %v3441_v55 = vmul.f32 %v3439_v42, %v9393_v46  ;;  %v4585_v46 = vld [vmem:[%s10216_s29 + $0x20] sm:$0xff]  ;;  %v7725_v42 = vld [vmem:[%s10177_s13 + $0x10] ss:$8 sps:$4 sm:$0xff]  }
0x2cc0   :  { %4461 = vrot.lane.b32.xlu0 %v8037_v9, %s8111_s1 }
0x2cc2   :  { %v3911_v34 = vpop.permute.xlu1 %3910 }
0x2cc3   :  { %v3913_v29 = vmul.f32 %v3911_v34, %v9535_v33 }
0x2cc6   :  { %v4359_v44 = vpop.permute.xlu1 %4358 }
0x2d1e   :  { %v4560_v57 = vpop.permute.xlu0 %4559 }
0x2d1f   :  { %v4562_v23 = vadd.f32 %v4560_v57, %v4552_v17 }
0x2d21   :  { %8038 = vtanh.f32 %v4562_v23 }
0x2d2b   :  { %v8039_v14 = vpop.eup %8038 }
0x2d2c   :  { %4565 = vrot.lane.b32.xlu1 %v8039_v14, %s8111_s1  ;;  %v7727_v14 = vld [vmem:[%s10177_s13 + $0x14] ss:$8 sps:$4 sm:$0xff]  }
0x2d2f   :  { %v3191_v63 = vpop.permute.xlu0 %3190 }
0x2d30   :  { %v3193_v43 = vmul.f32 %v3191_v63, %v9311_v11  ;;  %v4584_v11 = vld [vmem:[%s10216_s29 + $0x18] sm:$0xff]  ;;  %v7730_v63 = vld [vmem:[%s10177_s13 + $0x24] ss:$8 sps:$4 sm:$0xff]   ;;  %s10221_s13 = sld [smem:[#allocation19_spill]] }
0x2d31   :  { %v7649_v52 = vpack.c.bf16 %v4585_v46, %v4584_v11 }
0x2d32   :  { %v3194_v27 = vadd.f32 %v3193_v43, %v2945_v62 }
0x2d33   :  { %v3687_v3 = vpop.permute.xlu0 %3686  ;;  %7650 = vmatpush3.bf16.msra.mxu0 %v7649_v52 }
0x2d34   :  { %v3442_v4 = vadd.f32 %v3441_v55, %v3194_v27  ;;  %v3689_v58 = vmul.f32 %v3687_v3, %v9475_v26  ;;  %7448 = vmatprep.subr.mxu0 %v8106_v22  ;;  %v4586_v26 = vld [vmem:[%s10216_s29 + $0x28] sm:$0xff]  ;;  %s10219_s29 = sld [smem:[#allocation20_spill]] }
0x2d36   :  { %v3690_v16 = vadd.f32 %v3689_v58, %v3442_v4  ;;  %v6854_v4 = vld [vmem:[%s10176_s12] ss:$0 sm:$0xff]  ;;  %s8113_s12 = smov 72  }
0x2d37   :  { %v4135_v8 = vpop.permute.xlu0 %4134  ;;  %7449 = vmatpush3.msra.mxu0 %v4586_v26  ;;  %v9835_v26 = vld [vmem:[%s10220_s7] sm:$0xff] }
0x2d38   :  { %v3914_v31 = vadd.f32 %v3913_v29, %v3690_v16  ;;  %v4137_v53 = vmul.f32 %v4135_v8, %v9605_v49  ;;  %4831 = vmatprep.subr.bf16.mxu0 %v7724_v1  ;;  %v9809_v8 = vld [vmem:[%s10178_s14] sm:$0x3]  ;;  %s8115_s14 = smov 112  }
0x2d3a   :  { %v4138_v37 = vadd.f32 %v4137_v53, %v3914_v31  ;;  %v6853_v34 = vld [vmem:[%s10219_s29] ss:$0 sm:$0xff]  ;;  %v4791_v31 = vrot.slane %v9809_v8, %v9144_v40  ;;  %s8119_s29 = smov 64  }
0x2d3b   :  { %v4577_v38 = vpop.permute.xlu0 %4576 }
0x2d3f   :  { %v4462_v33 = vpop.permute.xlu0 %4461 }
0x2d40   :  { %v4464_v49 = vmul.f32 %v9688_v50, %v4462_v33  ;;  %v4361_v50 = vmul.f32 %v4359_v44, %v9665_v48 }
0x2d42   :  { %v4465_v0 = vmul.f32 %v4464_v49, %v9231_v24  ;;  %v4362_v32 = vadd.f32 %v4361_v50, %v4138_v37 }
0x2d44   :  { %v4467_v12 = vadd.f32 %v4466_v7, %v4465_v0 }
0x2d46   :  { %4663 = vrot.lane.b32.xlu0 %v4467_v12, %s8112_s11 }
0x2d9e   :  { %v4566_v56 = vpop.permute.xlu1 %4565 }
0x2d9f   :  { %v4568_v60 = vmul.f32 %v9698_v28, %v4566_v56  ;;  %v6852_v28 = vld [vmem:[%s10217_s28] ss:$0 sm:$0xff] }
0x2da1   :  { %v4569_v5 = vmul.f32 %v4568_v60, %v9215_v15 }
0x2da3   :  { %v4571_v30 = vadd.f32 %v4570_v6, %v4569_v5 }
0x2da5   :  { %v4579_v36 = vmul.f32 %v4577_v38, %v4571_v30 }
0x2da7   :  { %v4580_v10 = vadd.f32 %v4579_v36, %v4362_v32 }
0x2da9   :  { %4588 = vrot.lane.b32.xlu1 %v4580_v10, %s8112_s11 }
0x2db8   :  { %v4664_v24 = vpop.permute.xlu0 %4663 }
0x2db9   :  { %7460 = vmatmul.mubr.msk.f32.vlgmr.msra.gmra.mrb[44].mxu1 %vm376_vm13, %v4664_v24 }
0x2dba   :  { %7464 = vmatprep.mubr.msk.f32.mxu1 %vm8107_vm1, %v8106_v22 }
0x2e1b   :  { %v4589_v61 = vpop.permute.xlu1 %4588 }
0x2e1c   :  { %7451 = vmatmul.mubr.msk.f32.vlgmr.msra.gmra.mrb[52].mxu0 %vm376_vm13, %v4589_v61 }
0x2e1d   :  { %4863 = vmatprep.mubr.bf16.mxu0 %v8104_v2  ;;  %4832 = vmatpush1.bf16.msra.mxu0 %v7722_v20 }
0x2e1e   :  { %4833 = vmatprep.subr.bf16.mxu0 %v7727_v14 }
0x2e21   :  { %4834 = vmatpush1.bf16.msra.mxu0 %v7725_v42 }
0x2e22   :  { %4835 = vmatprep.subr.bf16.mxu0 %v7730_v63 }
0x2e25   :  { %4836 = vmatpush1.bf16.msra.mxu0 %v7728_v54 }
0x2e26   :  { %7482 = vmatprep.subr.mxu0 %v8106_v22 }
0x2e8c   :  { %v4733_v15 = vpop.f32.mrb[44].mxu1 }
0x2e8d   :  { %v7461_v51 = vpop.f32.mrb[45].mxu1 }
0x2eef   :  { %v4658_v48 = vpop.f32.mrb[52].mxu0 }
0x2ef0   :  { %v4734_v45 = vadd.f32 %v4733_v15, %v4658_v48  ;;  %v7452_v41 = vpop.f32.mrb[53].mxu0 }
0x2ef2   :  { %v4744_v39 = vadd.f32 %v6852_v28, %v4734_v45 }
0x2ef4   :  { %8040 = vtanh.f32 %v4744_v39 }
0x2efe   :  { %v8041_v9 = vpop.eup %8040 }
0x2eff   :  { %v4747_v59 = vadd.f32 %v8041_v9, %v4746_v19 }
0x2f01   :  { %v4751_v18 = vsel %vm4750_vm15, %v4747_v59, 0.0 }
0x2f02   :  { %4752 = vadd.xlane.f32.xlu1 %v4751_v18 }
0x2f8f   :  { %v4753_v47 = vpop.xlane.xlu1 %4752 }
0x2f90   :  { %v4755_v17 = vmul.f32 0.020833334, %v4753_v47 }
0x2f92   :  { %v4756_v57 = vsub.f32 %v4747_v59, %v4755_v17 }
0x2f94   :  { %v4757_v23 = vmul.f32 %v4756_v57, %v4756_v57 }
0x2f96   :  { %v4758_v13 = vsel %vm4750_vm15, %v4757_v23, 0.0 }
0x2f97   :  { %4759 = vadd.xlane.f32.xlu0 %v4758_v13 }
0x3024   :  { %v4760_v62 = vpop.xlane.xlu0 %4759 }
0x3025   :  { %v4761_v43 = vmul.f32 0.020833334, %v4760_v62 }
0x3027   :  { %v4762_v55 = vadd.f32 1e-05, %v4761_v43 }
0x3029   :  { %8042 = vrsqrt.f32 %v4762_v55 }
0x3033   :  { %v8043_v27 = vpop.eup %8042 }
0x3034   :  { %v4764_v3 = vmul.f32 %v8043_v27, %v4756_v57 }
0x3036   :  { %v4771_v58 = vmul.f32 %v6853_v34, %v4764_v3 }
0x3038   :  { %v9799_v29 = vadd.f32 %v6854_v4, %v4771_v58 }
0x303a   :  { %v4779_v16 = vpack.c.bf16 %v9799_v29, %v9799_v29 }
0x303c   :  { %6861 = vmatmul.mubr.msk.bf16.vlgmr.msra.gmra.mrb[56].mxu0 %vm4750_vm15, %v4779_v16 }
0x303d   :  { %7484 = vmatprep.mubr.msk.f32.mxu0 %vm8107_vm1, %v8106_v22 }
0x310f   :  { %v4865_v53 = vpop.f32.mrb[56].mxu0 }
0x3110   :  { %v9813_v11 = vadd.f32 %v4865_v53, %v4791_v31  ;;  %v9815_v46 = vpop.f32.mrb[57].mxu0 }
0x3111   :  { %v4869_v37 = vpop.f32.mrb[58].mxu0 }
0x3112   :  { %v4870_v52 = vpop.f32.mrb[59].mxu0  ;;  %4874 = vrot.lane.b32.xlu0 %v9813_v11, %s8109_s9 }
0x3116   :  { %5042 = vrot.lane.b32.xlu0 %v9813_v11, %s8113_s12 }
0x311a   :  { %5040 = vrot.lane.b32.xlu0 %v9813_v11, %s8114_s6 }
0x311e   :  { %5207 = vrot.lane.b32.xlu0 %v9813_v11, %s8115_s14 }
0x3122   :  { %5374 = vrot.lane.b32.xlu0 %v9813_v11, %s8116_s8 }
0x3126   :  { %5541 = vrot.lane.b32.xlu0 %v9813_v11, %s8117_s2 }
0x312a   :  { %5705 = vrot.lane.b32.xlu0 %v9813_v11, %s8118_s3 }
0x3184   :  { %v4875_v38 = vpop.permute.xlu0 %4874 }
0x3185   :  { %7463 = vmatpush3.xpose.msk.msra.mxu1 %vm4876_vm0, %v4875_v38 }
0x3186   :  { %7467 = vmatprep.subr.mxu1 %v8106_v22 }
0x3188   :  { %7465 = vmatmul.mubr.msk.f32.vlgmr.msra.gmra.mrb[46].mxu1 %vm4876_vm0, %v9813_v11  ;;  %v5043_v44 = vpop.permute.xlu0 %5042 }
0x3189   :  { %7469 = vmatprep.mubr.msk.f32.mxu1 %vm8107_vm1, %v8106_v22 }
0x318c   :  { %v5041_v50 = vpop.permute.xlu0 %5040 }
0x3190   :  { %v5208_v32 = vpop.permute.xlu0 %5207 }
0x3194   :  { %v5375_v61 = vpop.permute.xlu0 %5374 }
0x3198   :  { %v5542_v48 = vpop.permute.xlu0 %5541 }
0x319c   :  { %v5706_v39 = vpop.permute.xlu0 %5705 }
0x325b   :  { %v4947_v33 = vpop.f32.mrb[46].mxu1 }
0x325c   :  { %v4951_v49 = vmul.f32 0.35355338, %v4947_v33  ;;  %v7466_v7 = vpop.f32.mrb[47].mxu1 }
0x325e   :  { %v4952_v0 = vadd.f32 %v4951_v49, %v9835_v26 }
0x3260   :  { %v4953_v12 = vsel %vm4876_vm0, %v4952_v0, -inf }
0x3261   :  { %4954 = vmax.xlane.f32.xlu1 %v4953_v12 }
0x3272   :  { %4964 = vrot.lane.b32.xlu1 %v9813_v11, %s8108_s30 }
0x3276   :  { %5209 = vrot.lane.b32.xlu1 %v9813_v11, %s8119_s29 }
0x32ee   :  { %v4955_v56 = vpop.xlane.xlu1 %4954 }
0x32ef   :  { %v4956_v60 = vsub.f32 %v4952_v0, %v4955_v56 }
0x32f1   :  { %v4957_v5 = vmul.f32 1.442695, %v4956_v60 }
0x32f2   :  { %v4965_v6 = vpop.permute.xlu1 %4964 }
0x32f3   :  { %8044 = vpow2.f32 %v4957_v5  ;;  %7468 = vmatpush3.msra.mxu1 %v4965_v6 }
0x32f4   :  { %7472 = vmatprep.subr.mxu1 %v8106_v22 }
0x32f6   :  { %v5210_v30 = vpop.permute.xlu1 %5209 }
0x32f7   :  { %7483 = vmatpush3.xpose.msk.msra.mxu0 %vm4876_vm0, %v5210_v30 }
0x32f8   :  { %7492 = vmatprep.subr.mxu0 %v8106_v22 }
0x32fa   :  { %7485 = vmatmul.mubr.msk.f32.vlgmr.msra.gmra.mrb[54].mxu0 %vm4876_vm0, %v5208_v32 }
0x32fb   :  { %7494 = vmatprep.mubr.msk.f32.mxu0 %vm8107_vm1, %v8106_v22 }
0x32fd   :  { %v8045_v36 = vpop.eup %8044 }
0x32fe   :  { %v4959_v10 = vsel %vm4876_vm0, %v8045_v36, 0.0 }
0x32ff   :  { %4960 = vadd.xlane.f32.xlu1 %v4959_v10 }
0x3310   :  { %5376 = vrot.lane.b32.xlu1 %v9813_v11, %s8112_s11  ;;  %s8122_s11 = smov 8  }
0x3314   :  { %5543 = vrot.lane.b32.xlu1 %v9813_v11, %s8111_s1  ;;  %s8121_s1 = smov 16  }
0x3318   :  { %5707 = vrot.lane.b32.xlu1 %v9813_v11, %s8120_s4 }
0x338c   :  { %v4961_v24 = vpop.xlane.xlu1 %4960 }
0x338d   :  { %8046 = vrcp.f32 %v4961_v24 }
0x3390   :  { %v5377_v15 = vpop.permute.xlu1 %5376 }
0x3391   :  { %7493 = vmatpush3.xpose.msk.msra.mxu0 %vm4876_vm0, %v5377_v15 }
0x3392   :  { %7502 = vmatprep.subr.mxu0 %v8106_v22 }
0x3394   :  { %v5544_v51 = vpop.permute.xlu1 %5543  ;;  %7495 = vmatmul.mubr.msk.f32.vlgmr.msra.gmra.mrb[60].mxu0 %vm4876_vm0, %v5375_v61 }
0x3395   :  { %7503 = vmatpush3.xpose.msk.msra.mxu0 %vm4876_vm0, %v5544_v51  ;;  %7504 = vmatprep.mubr.msk.f32.mxu0 %vm8107_vm1, %v8106_v22  ;;  %v4795_v51 = vrot.slane %v9809_v8, %v9150_v25 }
0x3396   :  { %7512 = vmatprep.subr.mxu0 %v8106_v22 }
0x3397   :  { %v8047_v28 = vpop.eup %8046 }
0x3398   :  { %v4963_v45 = vmul.f32 %v8047_v28, %v8045_v36  ;;  %v5708_v41 = vpop.permute.xlu1 %5707  ;;  %7505 = vmatmul.mubr.msk.f32.vlgmr.msra.gmra.mrb[62].mxu0 %vm4876_vm0, %v5542_v48  ;;  %v4868_v48 = vadd.f32 %v9815_v46, %v4795_v51 }
0x3399   :  { %7513 = vmatpush3.xpose.msk.msra.mxu0 %vm4876_vm0, %v5708_v41  ;;  %7514 = vmatprep.mubr.msk.f32.mxu0 %vm8107_vm1, %v8106_v22 }
0x339a   :  { %7470 = vmatmul.mubr.msk.f32.vlgmr.msra.gmra.mrb[48].mxu1 %vm4876_vm0, %v4963_v45  ;;  %7522 = vmatprep.subr.bf16.mxu0 %v8106_v22 }
0x339b   :  { %7473 = vmatpush3.xpose.msk.msra.mxu1 %vm4876_vm0, %v5043_v44  ;;  %7474 = vmatprep.mubr.msk.f32.mxu1 %vm8107_vm1, %v8106_v22 }
0x339c   :  { %7515 = vmatmul.mubr.msk.f32.vlgmr.msra.gmra.mrb[64].mxu0 %vm4876_vm0, %v5706_v39  ;;  %7477 = vmatprep.subr.mxu1 %v8106_v22 }
0x339d   :  { %7528 = vmatprep.mubr.msk.bf16.mxu0 %vm8107_vm1, %v8106_v22 }
0x339e   :  { %7475 = vmatmul.mubr.msk.f32.vlgmr.msra.gmra.mrb[50].mxu1 %vm4876_vm0, %v5041_v50 }
0x339f   :  { %7479 = vmatprep.mubr.msk.f32.mxu1 %vm8107_vm1, %v8106_v22 }
0x33cd   :  { %v5281_v19 = vpop.f32.mrb[54].mxu0 }
0x33ce   :  { %v5285_v9 = vmul.f32 0.35355338, %v5281_v19  ;;  %v7486_v59 = vpop.f32.mrb[55].mxu0 }
0x33d0   :  { %v5286_v18 = vadd.f32 %v5285_v9, %v9835_v26 }
0x33d2   :  { %v5287_v47 = vsel %vm4876_vm0, %v5286_v18, -inf }
0x33d3   :  { %5288 = vmax.xlane.f32.xlu0 %v5287_v47 }
0x3460   :  { %v5289_v17 = vpop.xlane.xlu0 %5288 }
0x3461   :  { %v5290_v57 = vsub.f32 %v5286_v18, %v5289_v17 }
0x3463   :  { %v5291_v23 = vmul.f32 1.442695, %v5290_v57 }
0x3465   :  { %8048 = vpow2.f32 %v5291_v23 }
0x3467   :  { %v5448_v13 = vpop.f32.mrb[60].mxu0 }
0x3468   :  { %v5452_v1 = vmul.f32 0.35355338, %v5448_v13  ;;  %v7496_v20 = vpop.f32.mrb[61].mxu0 }
0x346a   :  { %v5453_v14 = vadd.f32 %v5452_v1, %v9835_v26 }
0x346b   :  { %v5615_v42 = vpop.f32.mrb[62].mxu0 }
0x346c   :  { %v7506_v54 = vpop.f32.mrb[63].mxu0  ;;  %v5454_v63 = vsel %vm4876_vm0, %v5453_v14, -inf  ;;  %v5619_v4 = vmul.f32 0.35355338, %v5615_v42 }
0x346d   :  { %v9882_v62 = vpop.f32.mrb[48].mxu1  ;;  %5455 = vmax.xlane.f32.xlu0 %v5454_v63 }
0x346e   :  { %v7471_v43 = vpop.f32.mrb[49].mxu1  ;;  %v5620_v38 = vadd.f32 %v5619_v4, %v9835_v26  ;;  %v7733_v4 = vld [vmem:[%s10179_s15 + $0x10] sm:$0xff]  }
0x346f   :  { %v5779_v55 = vpop.f32.mrb[64].mxu0  ;;  %v9887_v52 = vpop.eup %8048 }
0x3470   :  { %v5783_v27 = vmul.f32 0.35355338, %v5779_v55  ;;  %v7516_v34 = vpop.f32.mrb[65].mxu0  ;;  %v5293_v49 = vsel %vm4876_vm0, %v9887_v52, 0.0  ;;  %v5621_v7 = vsel %vm4876_vm0, %v5620_v38, -inf  ;;  %v7731_v55 = vld [vmem:[%s10179_s15] sm:$0xff]  }
0x3471   :  { %v5114_v3 = vpop.f32.mrb[50].mxu1  ;;  %7523 = vmatpush3.bf16.msra.mxu0 %v7731_v55 }
0x3472   :  { %v5784_v58 = vadd.f32 %v5783_v27, %v9835_v26  ;;  %v5118_v16 = vmul.f32 0.35355338, %v5114_v3  ;;  %v7476_v31 = vpop.f32.mrb[51].mxu1  ;;  %7524 = vmatprep.subr.bf16.mxu0 %v8106_v22  ;;  %v7732_v27 = vld [vmem:[%s10179_s15 + $0x8] sm:$0xff]  }
0x3474   :  { %v5119_v53 = vadd.f32 %v5118_v16, %v9835_v26  ;;  %v5785_v37 = vsel %vm4876_vm0, %v5784_v58, -inf }
0x3475   :  { %5786 = vmax.xlane.f32.xlu0 %v5785_v37  ;;  %7525 = vmatpush3.bf16.msra.mxu0 %v7732_v27  ;;  %v7754_v27 = vld [vmem:[%s10185_s21] sm:$0xff]  }
0x3476   :  { %v5120_v33 = vsel %vm4876_vm0, %v5119_v53, -inf  ;;  %7526 = vmatprep.subr.bf16.mxu0 %v8106_v22 }
0x3477   :  { %5121 = vmax.xlane.f32.xlu1 %v5120_v33 }
0x3479   :  { %5294 = vadd.xlane.f32.xlu0 %v5293_v49  ;;  %7527 = vmatpush3.bf16.msra.mxu0 %v7733_v4  ;;  %v7756_v4 = vld [vmem:[%s10185_s21 + $0x48] sm:$0xff]  }
0x347b   :  { %5622 = vmax.xlane.f32.xlu1 %v5621_v7 }
0x34fa   :  { %v5456_v0 = vpop.xlane.xlu0 %5455 }
0x34fb   :  { %v5457_v12 = vsub.f32 %v5453_v14, %v5456_v0 }
0x34fd   :  { %v5458_v44 = vmul.f32 1.442695, %v5457_v12 }
0x34ff   :  { %8050 = vpow2.f32 %v5458_v44 }
0x3502   :  { %v5787_v56 = vpop.xlane.xlu0 %5786 }
0x3503   :  { %v5788_v60 = vsub.f32 %v5784_v58, %v5787_v56 }
0x3504   :  { %v5122_v5 = vpop.xlane.xlu1 %5121 }
0x3505   :  { %v5789_v6 = vmul.f32 1.442695, %v5788_v60  ;;  %v5123_v28 = vsub.f32 %v5119_v53, %v5122_v5 }
0x3506   :  { %v5295_v19 = vpop.xlane.xlu0 %5294 }
0x3507   :  { %8052 = vpow2.f32 %v5789_v6  ;;  %v5124_v45 = vmul.f32 1.442695, %v5123_v28 }
0x3508   :  { %v5623_v26 = vpop.xlane.xlu1 %5622 }
0x3509   :  { %v8051_v50 = vpop.eup %8050  ;;  %v5624_v30 = vsub.f32 %v5620_v38, %v5623_v26 }
0x350a   :  { %v5460_v32 = vsel %vm4876_vm0, %v8051_v50, 0.0 }
0x350b   :  { %v5625_v36 = vmul.f32 1.442695, %v5624_v30  ;;  %5461 = vadd.xlane.f32.xlu1 %v5460_v32  ;;  %v6880_v30 = vld [vmem:[%s10180_s16] ss:$0 sm:$0xff] }
0x350d   :  { %8054 = vpow2.f32 %v5625_v36 }
0x350e   :  { %8056 = vpow2.f32 %v5124_v45 }
0x3511   :  { %v8053_v10 = vpop.eup %8052 }
0x3512   :  { %v5791_v24 = vsel %vm4876_vm0, %v8053_v10, 0.0 }
0x3513   :  { %5792 = vadd.xlane.f32.xlu1 %v5791_v24 }
0x3517   :  { %v8055_v61 = vpop.eup %8054 }
0x3518   :  { %v5627_v15 = vsel %vm4876_vm0, %v8055_v61, 0.0  ;;  %v8057_v41 = vpop.eup %8056 }
0x3519   :  { %5628 = vadd.xlane.f32.xlu0 %v5627_v15  ;;  %v5126_v39 = vsel %vm4876_vm0, %v8057_v41, 0.0 }
0x3524   :  { %5298 = vrot.lane.b32.xlu1 %v9813_v11, %s8121_s1 }
0x352f   :  { %5131 = vrot.lane.b32.xlu0 %v9813_v11, %s8110_s5 }
0x3533   :  { %5797 = vrot.lane.b32.xlu0 %v4868_v48, %s8114_s6 }
0x3548   :  { %5127 = vadd.xlane.f32.xlu1 %v5126_v39  ;;  %v7739_v39 = vld [vmem:[%s10183_s19 + $0xc] ss:$16 sps:$4 sm:$0xff]  }
0x3549   :  { %6144 = vmatprep.subr.bf16.mxu0 %v7739_v39 }
0x3559   :  { %5465 = vrot.lane.b32.xlu1 %v9813_v11, %s8122_s11 }
0x3598   :  { %v5462_v46 = vpop.xlane.xlu1 %5461 }
0x35a0   :  { %v5793_v59 = vpop.xlane.xlu1 %5792 }
0x35a4   :  { %v5299_v18 = vpop.permute.xlu1 %5298 }
0x35a6   :  { %v5629_v8 = vpop.xlane.xlu0 %5628 }
0x35aa   :  { %v5132_v9 = vpop.permute.xlu0 %5131 }
0x35ab   :  { %7478 = vmatpush3.msra.mxu1 %v5132_v9  ;;  %v7745_v9 = vld [vmem:[%s10183_s19 + $0x2c] ss:$16 sps:$4 sm:$0xff]  }
0x35ac   :  { %7487 = vmatprep.subr.mxu1 %v8106_v22 }
0x35ae   :  { %v5798_v63 = vpop.permute.xlu0 %5797 }
0x35d5   :  { %v5128_v47 = vpop.xlane.xlu1 %5127 }
0x35d6   :  { %8058 = vrcp.f32 %v5128_v47  ;;  %v7748_v47 = vld [vmem:[%s10183_s19 + $0x44] ss:$16 sps:$4 sm:$0xff]  }
0x35d7   :  { %8060 = vrcp.f32 %v5295_v19  ;;  %v7737_v19 = vld [vmem:[%s10183_s19 + $0x8] ss:$16 sps:$4 sm:$0xff]  }
0x35d8   :  { %8062 = vrcp.f32 %v5462_v46  ;;  %v7740_v46 = vld [vmem:[%s10183_s19 + $0x20] ss:$16 sps:$4 sm:$0xff]  }
0x35d9   :  { %8064 = vrcp.f32 %v5629_v8  ;;  %v5466_v1 = vpop.permute.xlu1 %5465  ;;  %v7742_v8 = vld [vmem:[%s10183_s19 + $0x24] ss:$16 sps:$4 sm:$0xff]  }
0x35da   :  { %8066 = vrcp.f32 %v5793_v59  ;;  %v7743_v59 = vld [vmem:[%s10183_s19 + $0x28] ss:$16 sps:$4 sm:$0xff]  }
0x35e0   :  { %v8059_v17 = vpop.eup %8058 }
0x35e1   :  { %v5130_v57 = vmul.f32 %v8059_v17, %v8057_v41  ;;  %v8061_v23 = vpop.eup %8060  ;;  %v7736_v41 = vld [vmem:[%s10183_s19 + $0x4] ss:$16 sps:$4 sm:$0xff]   ;;  %v7749_v17 = vld [vmem:[%s10183_s19 + $0x48] ss:$16 sps:$4 sm:$0xff]  }
0x35e2   :  { %v5297_v11 = vmul.f32 %v8061_v23, %v9887_v52  ;;  %v8063_v13 = vpop.eup %8062  ;;  %v7752_v23 = vld [vmem:[%s10185_s21 + $0x40] sm:$0xff]  }
0x35e3   :  { %7480 = vmatmul.mubr.msk.f32.vlgmr.msra.gmra.mrb[52].mxu1 %vm4876_vm0, %v5130_v57  ;;  %v5464_v20 = vmul.f32 %v8063_v13, %v8051_v50  ;;  %v8065_v14 = vpop.eup %8064  ;;  %v7751_v57 = vld [vmem:[%s10183_s19 + $0x4c] ss:$16 sps:$4 sm:$0xff]  }
0x35e4   :  { %7488 = vmatpush3.msra.mxu1 %v5299_v18  ;;  %7489 = vmatprep.mubr.msk.f32.mxu1 %vm8107_vm1, %v8106_v22  ;;  %v5631_v42 = vmul.f32 %v8065_v14, %v8055_v61  ;;  %v8067_v54 = vpop.eup %8066  ;;  %v7746_v18 = vld [vmem:[%s10183_s19 + $0x40] ss:$16 sps:$4 sm:$0xff]  }
0x35e5   :  { %7497 = vmatprep.subr.mxu1 %v8106_v22  ;;  %v5795_v43 = vmul.f32 %v8067_v54, %v8053_v10 }
0x35e7   :  { %7490 = vmatmul.mubr.msk.f32.vlgmr.msra.gmra.mrb[54].mxu1 %vm4876_vm0, %v5297_v11  ;;  %v7753_v11 = vld [vmem:[%s10185_s21 + $0xc0] sm:$0xff]  }
0x35e8   :  { %7498 = vmatpush3.msra.mxu1 %v5466_v1  ;;  %7499 = vmatprep.mubr.msk.f32.mxu1 %vm8107_vm1, %v8106_v22 }
0x35e9   :  { %7507 = vmatprep.subr.mxu1 %v8106_v22 }
0x35eb   :  { %7500 = vmatmul.mubr.msk.f32.vlgmr.msra.gmra.mrb[56].mxu1 %vm4876_vm0, %v5464_v20 }
0x35ec   :  { %7508 = vmatpush3.msra.mxu1 %v4868_v48  ;;  %7509 = vmatprep.mubr.msk.f32.mxu1 %vm8107_vm1, %v8106_v22 }
0x35ed   :  { %7517 = vmatprep.subr.mxu1 %v8106_v22 }
0x35ef   :  { %7510 = vmatmul.mubr.msk.f32.vlgmr.msra.gmra.mrb[58].mxu1 %vm4876_vm0, %v5631_v42  ;;  %v6885_v42 = vld [vmem:[%s10181_s17] ss:$0 sm:$0xff] }
0x35f0   :  { %7518 = vmatpush3.msra.mxu1 %v5798_v63  ;;  %7519 = vmatprep.mubr.msk.f32.mxu1 %vm8107_vm1, %v8106_v22  ;;  %v6886_v63 = vld [vmem:[%s10182_s18] ss:$0 sm:$0xff] }
0x35f1   :  { %6103 = vmatprep.subr.bf16.mxu1 %v7736_v41 }
0x35f3   :  { %7520 = vmatmul.mubr.msk.f32.vlgmr.msra.gmra.mrb[60].mxu1 %vm4876_vm0, %v5795_v43 }
0x35f4   :  { %6135 = vmatprep.mubr.bf16.mxu1 %v8104_v2 }
0x36b6   :  { %v5203_v34 = vpop.f32.mrb[52].mxu1 }
0x36b7   :  { %5874 = vrot.lane.b32.xlu1 %v5203_v34, %s8122_s11  ;;  %v7481_v3 = vpop.f32.mrb[53].mxu1  ;;  %v7755_v34 = vld [vmem:[%s10185_s21 + $0x80] sm:$0xff]  }
0x36ba   :  { %v5370_v58 = vpop.f32.mrb[54].mxu1 }
0x36bb   :  { %5878 = vrot.lane.b32.xlu0 %v5370_v58, %s8121_s1  ;;  %v7491_v16 = vpop.f32.mrb[55].mxu1  ;;  %v7757_v58 = vld [vmem:[%s10185_s21 + $0xc8] sm:$0xff]  }
0x36bc   :  { %v7758_v16 = vld [vmem:[%s10185_s21 + $0x8] sm:$0xff]  }
0x36be   :  { %v5537_v31 = vpop.f32.mrb[56].mxu1 }
0x36bf   :  { %5882 = vrot.lane.b32.xlu1 %v5537_v31, %s8110_s5  ;;  %v7501_v53 = vpop.f32.mrb[57].mxu1  ;;  %v7759_v31 = vld [vmem:[%s10185_s21 + $0x88] sm:$0xff]   ;;  %s8123_s5 = smov [#allocation6]  }
0x36c0   :  { %v7760_v53 = vld [vmem:[%s10185_s21 + $0x50] sm:$0xff]   ;;  %s6734_s8 = sshll.u32 %s8123_s5, 4  ;;  %s6735_s8 = int_to_ptr.vmem [resolvable:$true] %s6734_s8 }
0x36c1   :  { %p8085_p1 = scmp.lt.s32.totalorder %s6735_s8, %s6735_s8 }
0x36c2   :  { %v5701_v37 = vpop.f32.mrb[58].mxu1 }
0x36c3   :  { %5886 = vrot.lane.b32.xlu0 %v5701_v37, %s8108_s30  ;;  %v7511_v52 = vpop.f32.mrb[59].mxu1  ;;  %v7761_v37 = vld [vmem:[%s10185_s21 + $0xd0] sm:$0xff]  }
0x36c4   :  { %v7762_v52 = vld [vmem:[%s10185_s21 + $0x10] sm:$0xff]  }
0x36c6   :  { %v5869_v38 = vpop.f32.mrb[60].mxu1 }
0x36c7   :  { %5890 = vrot.lane.b32.xlu1 %v5869_v38, %s8120_s4  ;;  %v7521_v33 = vpop.f32.mrb[61].mxu1  ;;  %v7763_v38 = vld [vmem:[%s10185_s21 + $0x90] sm:$0xff]  }
0x36c8   :  { %v7764_v33 = vld [vmem:[%s10185_s21 + $0x58] sm:$0xff]  }
0x3729   :  { %v5875_v49 = vpop.permute.xlu1 %5874 }
0x372a   :  { %v5893_v12 = vsel %vm4876_vm0, %v9882_v62, %v5875_v49  ;;  %v7765_v49 = vld [vmem:[%s10185_s21 + $0xd8] sm:$0xff]  }
0x372d   :  { %v5879_v7 = vpop.permute.xlu0 %5878 }
0x372e   :  { %v5895_v56 = vsel %vm5894_vm2, %v5893_v12, %v5879_v7  ;;  %v7766_v7 = vld [vmem:[%s10185_s21 + $0x18] sm:$0xff]   ;;  %v7768_v12 = vld [vmem:[%s10185_s21 + $0x60] sm:$0xff]  }
0x3731   :  { %v5883_v0 = vpop.permute.xlu1 %5882 }
0x3732   :  { %v5896_v60 = vsel %vm376_vm13, %v5895_v56, %v5883_v0  ;;  %v7767_v0 = vld [vmem:[%s10185_s21 + $0x98] sm:$0xff]   ;;  %v7770_v56 = vld [vmem:[%s10185_s21 + $0x20] sm:$0xff]  }
0x3735   :  { %v5887_v44 = vpop.permute.xlu0 %5886 }
0x3736   :  { %v5897_v5 = vsel %vm342_vm12, %v5896_v60, %v5887_v44  ;;  %v7769_v44 = vld [vmem:[%s10185_s21 + $0xe0] sm:$0xff]  }
0x3737   :  { %v7771_v60 = vld [vmem:[%s10185_s21 + $0xa0] sm:$0xff]  }
0x3739   :  { %v5891_v6 = vpop.permute.xlu1 %5890 }
0x373a   :  { %v5899_v26 = vsel %vm5898_vm3, %v5897_v5, %v5891_v6  ;;  %v7772_v5 = vld [vmem:[%s10185_s21 + $0x68] sm:$0xff]  }
0x373b   :  { %v5900_v50 = vpack.c.bf16 %v5899_v26, %v5899_v26  ;;  %v7773_v6 = vld [vmem:[%s10185_s21 + $0xe8] sm:$0xff]  }
0x373c   :  { %v7774_v26 = vld [vmem:[%s10185_s21 + $0x28] sm:$0xff]  }
0x373d   :  { %7529 = vmatmul.mubr.msk.bf16.vlgmr.msra.gmra.mrb[68].mxu0 %vm4750_vm15, %v5900_v50  ;;  %v7775_v50 = vld [vmem:[%s10185_s21 + $0xa8] sm:$0xff]  }
0x373e   :  { %6176 = vmatprep.mubr.bf16.mxu0 %v8104_v2  ;;  %6145 = vmatpush1.bf16.msra.mxu0 %v7737_v19 }
0x373f   :  { %6146 = vmatprep.subr.bf16.mxu0 %v7745_v9 }
0x3742   :  { %6147 = vmatpush1.bf16.msra.mxu0 %v7743_v59 }
0x3743   :  { %6148 = vmatprep.subr.bf16.mxu0 %v7751_v57 }
0x3746   :  { %6149 = vmatpush1.bf16.msra.mxu0 %v7749_v17 }
0x3747   :  { %7125 = vmatprep.subr.bf16.mxu0 %v7753_v11 }
0x3810   :  { %v5969_v32 = vpop.f32.mrb[68].mxu0 }
0x3811   :  { %v5970_v62 = vadd.f32 %v6880_v30, %v5969_v32  ;;  %v7530_v36 = vpop.f32.mrb[69].mxu0  ;;  %v7776_v30 = vld [vmem:[%s10185_s21 + $0x70] sm:$0xff]  }
0x3812   :  { %v5972_v10 = vpop.f32.mrb[70].mxu0  ;;  %v7777_v32 = vld [vmem:[%s10185_s21 + $0xf0] sm:$0xff]  }
0x3813   :  { %v5975_v24 = vadd.f32 %v5970_v62, %v9799_v29  ;;  %v7531_v61 = vpop.f32.mrb[71].mxu0  ;;  %v7734_v29 = vld [vmem:[%s10183_s19] ss:$16 sps:$4 sm:$0xff]   ;;  %v7780_v10 = vld [vmem:[%s10185_s21 + $0x78] sm:$0xff]  }
0x3814   :  { %6104 = vmatpush1.bf16.msra.mxu1 %v7734_v29  ;;  %v7778_v62 = vld [vmem:[%s10185_s21 + $0x30] sm:$0xff]   ;;  %v7782_v61 = vld [vmem:[%s10185_s21 + $0x38] sm:$0xff]  }
0x3815   :  { %v5978_v15 = vsel %vm4750_vm15, %v5975_v24, 0.0  ;;  %6105 = vmatprep.subr.bf16.mxu1 %v7742_v8  ;;  %v7779_v36 = vld [vmem:[%s10185_s21 + $0xb0] sm:$0xff]  }
0x3816   :  { %5979 = vadd.xlane.f32.xlu0 %v5978_v15  ;;  %v7783_v15 = vld [vmem:[%s10185_s21 + $0xb8] sm:$0xff]  }
0x3818   :  { %6106 = vmatpush1.bf16.msra.mxu1 %v7740_v46 }
0x3819   :  { %6107 = vmatprep.subr.bf16.mxu1 %v7748_v47 }
0x381c   :  { %6108 = vmatpush1.bf16.msra.mxu1 %v7746_v18 }
0x381d   :  { %7103 = vmatprep.subr.bf16.mxu1 %v7752_v23 }
0x38a3   :  { %v5980_v51 = vpop.xlane.xlu0 %5979 }
0x38a4   :  { %v5981_v48 = vmul.f32 0.020833334, %v5980_v51  ;;  %v6030_v51 = vsub.s32 2, %v9141_v35 }
0x38a6   :  { %v5982_v28 = vsub.f32 %v5975_v24, %v5981_v48  ;;  %v7781_v24 = vld [vmem:[%s10185_s21 + $0xf8] sm:$0xff]   ;;  %v6018_v48 = vld [vmem:[%s10184_s20] sm:$0xf] }
0x38a7   :  { %v6027_v41 = vrot.slane %v6018_v48, %v9150_v25 }
0x38a8   :  { %v5983_v45 = vmul.f32 %v5982_v28, %v5982_v28 }
0x38aa   :  { %v5984_v2 = vsel %vm4750_vm15, %v5983_v45, 0.0  ;;  %v6023_v45 = vrot.slane %v6018_v48, %v9144_v40 }
0x38ab   :  { %5985 = vadd.xlane.f32.xlu1 %v5984_v2  ;;  %v6031_v2 = vrot.slane %v6018_v48, %v6030_v51 }
0x3938   :  { %v5986_v13 = vpop.xlane.xlu1 %5985 }
0x3939   :  { %v5987_v1 = vmul.f32 0.020833334, %v5986_v13 }
0x393b   :  { %v5988_v20 = vadd.f32 1e-05, %v5987_v1 }
0x393d   :  { %8068 = vrsqrt.f32 %v5988_v20 }
0x3947   :  { %v8069_v14 = vpop.eup %8068 }
0x3948   :  { %v5990_v54 = vmul.f32 %v8069_v14, %v5982_v28  ;;  %v6034_v28 = vsub.s32 3, %v9141_v35 }
0x394a   :  { %v5997_v43 = vmul.f32 %v6885_v42, %v5990_v54  ;;  %v6035_v39 = vrot.slane %v6018_v48, %v6034_v28  ;;  %v6644_v48 = vld [vmem:[%s10189_s25 + $0x20] sm:$0xff]  ;;  %v6645_v28 = vld [vmem:[%s10189_s25 + $0x28] sm:$0xff] }
0x394c   :  { %v10003_v55 = vadd.f32 %v6886_v63, %v5997_v43  ;;  %v6901_v43 = vld [vmem:[%s10186_s22] ss:$0 sm:$0xff] }
0x394e   :  { %v6005_v3 = vpack.c.bf16 %v10003_v55, %v10003_v55 }
0x3950   :  { %6899 = vmatmul.mubr.msk.bf16.vlgmr.msra.gmra.mrb[64].mxu1 %vm4750_vm15, %v6005_v3  ;;  %6900 = vmatmul.mubr.msk.bf16.vlgmr.msra.gmra.mrb[72].mxu0 %vm4750_vm15, %v6005_v3 }
0x3951   :  { %7104 = vmatpush3.bf16.msra.mxu1 %v7754_v27  ;;  %7126 = vmatpush3.bf16.msra.mxu0 %v7755_v34 }
0x3952   :  { %7105 = vmatprep.subr.bf16.mxu1 %v7756_v4  ;;  %7127 = vmatprep.subr.bf16.mxu0 %v7757_v58 }
0x3955   :  { %7106 = vmatpush3.bf16.msra.mxu1 %v7758_v16  ;;  %7128 = vmatpush3.bf16.msra.mxu0 %v7759_v31 }
0x3956   :  { %7107 = vmatprep.subr.bf16.mxu1 %v7760_v53  ;;  %7129 = vmatprep.subr.bf16.mxu0 %v7761_v37 }
0x3959   :  { %7108 = vmatpush3.bf16.msra.mxu1 %v7762_v52  ;;  %7130 = vmatpush3.bf16.msra.mxu0 %v7763_v38 }
0x395a   :  { %7109 = vmatprep.subr.bf16.mxu1 %v7764_v33  ;;  %7131 = vmatprep.subr.bf16.mxu0 %v7765_v49 }
0x395d   :  { %7110 = vmatpush3.bf16.msra.mxu1 %v7766_v7  ;;  %7132 = vmatpush3.bf16.msra.mxu0 %v7767_v0 }
0x395e   :  { %7111 = vmatprep.subr.bf16.mxu1 %v7768_v12  ;;  %7133 = vmatprep.subr.bf16.mxu0 %v7769_v44 }
0x3961   :  { %7112 = vmatpush3.bf16.msra.mxu1 %v7770_v56  ;;  %7134 = vmatpush3.bf16.msra.mxu0 %v7771_v60 }
0x3962   :  { %7113 = vmatprep.subr.bf16.mxu1 %v7772_v5  ;;  %7135 = vmatprep.subr.bf16.mxu0 %v7773_v6 }
0x3965   :  { %7114 = vmatpush3.bf16.msra.mxu1 %v7774_v26  ;;  %7136 = vmatpush3.bf16.msra.mxu0 %v7775_v50  ;;  %v6934_v26 = vld [vmem:[%s10187_s23] ss:$0 sm:$0xff] }
0x3966   :  { %7115 = vmatprep.subr.bf16.mxu1 %v7776_v30  ;;  %7137 = vmatprep.subr.bf16.mxu0 %v7777_v32  ;;  %v6935_v50 = vld [vmem:[%s10188_s24] ss:$0 sm:$0xff]  ;;  %v6641_v32 = vld [vmem:[%s10189_s25 + $0x8] sm:$0xff] }
0x3967   :  { %v6640_v30 = vld [vmem:[%s10189_s25] sm:$0xff] }
0x3969   :  { %7116 = vmatpush3.bf16.msra.mxu1 %v7778_v62  ;;  %7138 = vmatpush3.bf16.msra.mxu0 %v7779_v36 }
0x396a   :  { %7117 = vmatprep.subr.bf16.mxu1 %v7780_v10  ;;  %7139 = vmatprep.subr.bf16.mxu0 %v7781_v24  ;;  %v6566_v10 = vld [vmem:[%s10221_s13] sm:$0x3]  ;;  %v7655_v24 = vpack.c.bf16 %v6641_v32, %v6640_v30 }
0x396d   :  { %7118 = vmatpush3.bf16.msra.mxu1 %v7782_v61  ;;  %7140 = vmatpush3.bf16.msra.mxu0 %v7783_v15  ;;  %v6642_v61 = vld [vmem:[%s10189_s25 + $0x10] sm:$0xff]  ;;  %v6643_v15 = vld [vmem:[%s10189_s25 + $0x18] sm:$0xff]  ;;  %s8080_s25 = scalar_lea.vmem %s6735_s8, 32 }
0x396e   :  { %7532 = vmatprep.subr.mxu1 %v8106_v22  ;;  %v7658_v51 = vpack.c.bf16 %v6643_v15, %v6642_v61  ;;  %p8081_p0 = scmp.ne.s32.totalorder %s6735_s8, %s8080_s25  ;;  %p8086_p2 = scmp.lt.s32.totalorder %s8080_s25, %s8080_s25 }
0x3970   :  { %p8087_p3 = por %p8086_p2, %p8085_p1 }
0x3972   :  { %p8088_p4 = pnand %p8087_p3, %p8081_p0 }
0x3a23   :  { %v6137_v29 = vpop.f32.mrb[64].mxu1  ;;  %v6178_v19 = vpop.f32.mrb[72].mxu0 }
0x3a24   :  { %v6138_v8 = vadd.f32 %v6137_v29, %v6023_v45  ;;  %v6179_v9 = vadd.f32 %v6178_v19, %v6031_v2  ;;  %v6139_v46 = vpop.f32.mrb[65].mxu1  ;;  %v6180_v59 = vpop.f32.mrb[73].mxu0  ;;  %v7661_v45 = vpack.c.bf16 %v6645_v28, %v6644_v48 }
0x3a25   :  { %v6140_v18 = vadd.f32 %v6139_v46, %v6027_v41  ;;  %v6181_v47 = vadd.f32 %v6180_v59, %v6035_v39  ;;  %v6141_v17 = vpop.f32.mrb[66].mxu1  ;;  %v6182_v57 = vpop.f32.mrb[74].mxu0 }
0x3a26   :  { %v6185_v23 = vmax.f32 %v6138_v8, 0.0  ;;  %v6187_v11 = vmax.f32 %v6179_v9, 0.0  ;;  %v6142_v13 = vpop.f32.mrb[67].mxu1  ;;  %v6183_v35 = vpop.f32.mrb[75].mxu0 }
0x3a27   :  { %v6186_v1 = vmax.f32 %v6140_v18, 0.0  ;;  %v6188_v40 = vmax.f32 %v6181_v47, 0.0 }
0x3a28   :  { %v6189_v25 = vpack.c.bf16 %v6185_v23, %v6185_v23  ;;  %v6191_v42 = vpack.c.bf16 %v6187_v11, %v6187_v11 }
0x3a29   :  { %v6190_v20 = vpack.c.bf16 %v6186_v1, %v6186_v1  ;;  %v6192_v14 = vpack.c.bf16 %v6188_v40, %v6188_v40 }
0x3a2b   :  { %6488 = vmatprep.mubr.bf16.mxu1 %v6190_v20  ;;  %6528 = vmatprep.mubr.bf16.mxu0 %v6192_v14 }
0x3a2c   :  { %6489 = vmatmul.mubr.bf16.vlgmr.msra.gmra.mrb[68].mxu1 %v6189_v25  ;;  %6529 = vmatmul.mubr.bf16.vlgmr.msra.gmra.mrb[76].mxu0 %v6191_v42 }
0x3a2d   :  { %7534 = vmatprep.mubr.msk.f32.mxu1 %vm8107_vm1, %v8106_v22 }
0x3aff   :  { %v7119_v54 = vpop.f32.mrb[68].mxu1  ;;  %v7141_v63 = vpop.f32.mrb[76].mxu0 }
0x3b00   :  { %v7120_v27 = vpop.f32.mrb[69].mxu1  ;;  %v7142_v34 = vpop.f32.mrb[77].mxu0 }
0x3b01   :  { %v7121_v3 = vadd.f32 %v7120_v27, %v7119_v54  ;;  %v7143_v4 = vadd.f32 %v7142_v34, %v7141_v63  ;;  %v7122_v58 = vpop.f32.mrb[70].mxu1  ;;  %v7144_v16 = vpop.f32.mrb[78].mxu0 }
0x3b02   :  { %v7123_v31 = vpop.f32.mrb[71].mxu1  ;;  %v7145_v53 = vpop.f32.mrb[79].mxu0 }
0x3b03   :  { %v6491_v37 = vadd.f32 %v7121_v3, %v6901_v43 }
0x3b05   :  { %v6531_v52 = vadd.f32 %v7143_v4, %v6491_v37 }
0x3b07   :  { %v6536_v38 = vadd.f32 %v6531_v52, %v10003_v55 }
0x3b09   :  { %v6539_v33 = vsel %vm4750_vm15, %v6536_v38, 0.0 }
0x3b0a   :  { %6540 = vadd.xlane.f32.xlu0 %v6539_v33 }
0x3b97   :  { %v6541_v49 = vpop.xlane.xlu0 %6540 }
0x3b98   :  { %v6542_v7 = vmul.f32 0.020833334, %v6541_v49 }
0x3b9a   :  { %v6543_v0 = vsub.f32 %v6536_v38, %v6542_v7 }
0x3b9c   :  { %v6544_v12 = vmul.f32 %v6543_v0, %v6543_v0 }
0x3b9e   :  { %v6545_v44 = vsel %vm4750_vm15, %v6544_v12, 0.0 }
0x3b9f   :  { %6546 = vadd.xlane.f32.xlu0 %v6545_v44 }
0x3c2c   :  { %v6547_v56 = vpop.xlane.xlu0 %6546 }
0x3c2d   :  { %v6548_v60 = vmul.f32 0.020833334, %v6547_v56 }
0x3c2f   :  { %v6549_v5 = vadd.f32 1e-05, %v6548_v60 }
0x3c31   :  { %8070 = vrsqrt.f32 %v6549_v5 }
0x3c3b   :  { %v8071_v6 = vpop.eup %8070 }
0x3c3c   :  { %v6551_v55 = vmul.f32 %v8071_v6, %v6543_v0 }
0x3c3e   :  { %v6558_v62 = vmul.f32 %v6934_v26, %v6551_v55 }
0x3c40   :  { %v6565_v36 = vadd.f32 %v6935_v50, %v6558_v62 }
0x3c42   :  { %7533 = vmatpush3.msra.mxu1 %v6565_v36 }
0x3c43   :  { %7535 = vmatmul.mubr.msk.f32.vlgmr.msra.gmra.mrb[62].mxu1 %vm4876_vm0, %v6566_v10  ;;  %7654 = vmatprep.subr.bf16.mxu1 %v8105_v21 }
0x3c44   :  { %7656 = vmatpush3.bf16.msra.mxu1 %v7655_v24  ;;  %7549 = vmatprep.mubr.msk.f32.mxu1 %vm8107_vm1, %v8106_v22  ;;  %v6937_v22 = vld [vmem:[%s10190_s26] ss:$0 sm:$0xff]  ;;  %vm6726_vm1 = vcmask 9216  }
0x3c45   :  { %7657 = vmatprep.subr.bf16.mxu1 %v8105_v21 }
0x3c48   :  { %7659 = vmatpush3.bf16.msra.mxu1 %v7658_v51 }
0x3c49   :  { %7660 = vmatprep.subr.bf16.mxu1 %v8105_v21 }
0x3c4c   :  { %7662 = vmatpush3.bf16.msra.mxu1 %v7661_v45 }
0x3d16   :  { %v6636_v2 = vpop.f32.mrb[62].mxu1 }
0x3d17   :  { %v7536_v41 = vpop.f32.mrb[63].mxu1  ;;  %7550 = vmatmul.mubr.msk.f32.vlgmr.msra.gmra.mrb[72].mxu1 %vm4750_vm15, %v6636_v2 }
0x3dea   :  { %v6722_v39 = vpop.f32.mrb[72].mxu1 }
0x3deb   :  { %v6723_v29 = vadd.f32 %v6937_v22, %v6722_v39  ;;  %v7551_v19 = vpop.f32.mrb[73].mxu1 }
0x3ded   :  { %6727 = vst.msk [vmem:[#allocation6] sm:$0x3] %vm6726_vm1, %v6723_v29 }
0x3dee   :  { %8091 = shalt.err (!%p8088_p4)
}
0x3def   :  { %s8092_s3 = scalar_lea.hbm %s10191_s27, 32 }
0x3df0   :  { %p8093_p5 = scmp.ne.s32.totalorder %s10191_s27, %s8092_s3  ;;  %p8096_p6 = scmp.lt.u32.totalorder %s8092_s3, %s10191_s27 }
0x3df2   :  { %p8098_p7 = pnand %p8096_p6, %p8093_p5 }
0x3df4   :  { %8101 = shalt.err (!%p8098_p7)
}
0x3df5   :  { %6737 = dma.vmem_to_hbm [thread:$0]  %s6735_s8, 32, %s10191_s27, [#allocation7]  }
0x3df6   :  { %8102 = dma.done.wait [#allocation7], 32  }
0x3df7   :  { %8103 = vsyncadd [#allocation7], 4294967264 }
0x3df8   :  { %6741 = vsyncpa [#allocation7], 1 }

</bundles_post_ra>
